<compile_context>
chip_gen: v7x
topology: tpu7x:2x2x1
jax: 0.10.0
libtpu: 0.0.40
codegen_flags: <defaults>
</compile_context>

<pallas_src>
import math

import jax
import jax.numpy as jnp
from jax import lax
from jax.experimental import pallas as pl
from jax.experimental.pallas import tpu as pltpu

# ------------------------- model hyper-parameters (from __init__ defaults) ----
R_MAX = 4.0
NUM_LAYERS = 3
NUM_BASIS = 8
CUTOFF_P = 6
CONV_OUT = 32           # irreps_conv_out = '32x0e'
EMBED_OUT = 16          # irreps_embedding_out = '16x0e'
INVARIANT_NEURONS = 64  # convolution_kwargs['invariant_neurons']
AVG_NUM_NEIGHBORS = 20.0
ELEMENT_NUMBER = 2
ATOMIC_SCALE = 1.0      # atomic_shift = 0 -> falsy in torch, so it is NOT applied

INV_SQRT_NN = 1.0 / math.sqrt(AVG_NUM_NEIGHBORS)


# ------------------------- small in-kernel helpers -----------------------------
def _sigmoid(z):
    return 1.0 / (1.0 + jnp.exp(-z))


def _dsilu(z, sg):
    # d/dz [z * sigmoid(z)] given sg = sigmoid(z)
    return sg * (1.0 + z * (1.0 - sg))


def _dot(a, w):
    return jnp.dot(a, w, precision=lax.Precision.HIGHEST,
                   preferred_element_type=jnp.float32)


def _dotT(a, w):
    # a @ w.T without materialising the transpose (MXU via dimension_numbers)
    return lax.dot_general(a, w, (((1,), (1,)), ((), ())),
                           precision=lax.Precision.HIGHEST,
                           preferred_element_type=jnp.float32)


# ------------------------- single fused forward + backward kernel --------------
def _forcenet_kernel(rad_ref, src_col_ref, src_row_ref, dst_col_ref, dst_row_ref,
                     atype_ref, wemb_ref, w1_ref, w2_ref, w3_ref, wlin_ref,
                     wsc_ref, wl1_ref, wl2_ref,
                     energy_ref, drad_ref):
    n_edges = rad_ref.shape[0]
    n_nodes = atype_ref.shape[0]
    n_layers = w1_ref.shape[0]

    rad = rad_ref[...]                                     # [E, 8]
    atype = atype_ref[...]                                 # [N, 1] int32
    is_t0 = (atype == 0).astype(jnp.float32)               # [N, 1]

    # layer-invariant one-hot gather/scatter masks, built ONCE in-register
    iota_en = lax.broadcasted_iota(jnp.int32, (n_edges, n_nodes), 1)
    iota_ne = lax.broadcasted_iota(jnp.int32, (n_nodes, n_edges), 0)
    gather_src = (iota_en == src_col_ref[...]).astype(jnp.float32)    # x[edge_src]
    gather_dst = (iota_en == dst_col_ref[...]).astype(jnp.float32)    # (backward)
    scatter_dst = (iota_ne == dst_row_ref[...]).astype(jnp.float32)   # segsum @ dst
    scatter_src = (iota_ne == src_row_ref[...]).astype(jnp.float32)   # (backward)

    wl1 = wl1_ref[...]                                     # [32, 16]
    wl2 = wl2_ref[...]                                     # [1, 16]

    # type embedding (lin_input applied to the one-hot node input)
    wemb = wemb_ref[...]                                   # [2, 32]
    nf = is_t0 * wemb[0:1, :] + (1.0 - is_t0) * wemb[1:2, :]   # [N, 32]

    # ---------------- forward: statically unrolled message passing ------------
    saved = []
    for l in range(n_layers):
        w1 = w1_ref[l]; w2 = w2_ref[l]; w3 = w3_ref[l]; wlin = wlin_ref[l]
        wsc0 = wsc_ref[l, 0]; wsc1 = wsc_ref[l, 1]

        # per-edge radial MLP (silu in-kernel, f32 accumulate)
        z1 = _dot(rad, w1); sg1 = _sigmoid(z1); h1 = z1 * sg1
        z2 = _dot(h1, w2);  sg2 = _sigmoid(z2); h2 = z2 * sg2
        edge_w = _dot(h2, w3)                              # [E, 32]

        # gather -> scalar tensor-product message -> scatter-add (MXU matmuls)
        feat_src = _dot(gather_src, nf)                    # [E, 32]
        messages = feat_src * edge_w                       # sh0 == 1 (dead work removed)
        agg = _dot(scatter_dst, messages) * INV_SQRT_NN    # [N, 32]

        conv = _dot(agg, wlin)
        # self-connection: per-atom-type weight select (node_attr is one-hot)
        sc = is_t0 * _dot(nf, wsc0) + (1.0 - is_t0) * _dot(nf, wsc1)

        z3 = conv + sc; sg3 = _sigmoid(z3)
        nf = nf + z3 * sg3                                 # resnet update
        saved.append((z1, sg1, z2, sg2, edge_w, feat_src, z3, sg3))

    # ---------------- readout: lin1 -> lin2 (lin2 stored as a [1,16] row) -----
    y = _dot(nf, wl1)                                      # [N, 16]
    energy_ref[...] = jnp.sum(y * wl2, axis=1, keepdims=True) * ATOMIC_SCALE

    # ---------------- backward: d(sum atomic_energy)/d(radial) ----------------
    # readout cotangent is the constant row ATOMIC_SCALE * (wl2 @ wl1^T)
    d_nf = jnp.broadcast_to(_dotT(wl2, wl1), (n_nodes, wl1.shape[0])) * ATOMIC_SCALE
    d_rad = jnp.zeros_like(rad)
    for l in reversed(range(n_layers)):
        z1, sg1, z2, sg2, edge_w, feat_src, z3, sg3 = saved[l]
        w1 = w1_ref[l]; w2 = w2_ref[l]; w3 = w3_ref[l]; wlin = wlin_ref[l]
        wsc0 = wsc_ref[l, 0]; wsc1 = wsc_ref[l, 1]

        s = _dsilu(z3, sg3) * d_nf                         # cotangent at z3

        # conv / message path
        d_agg = _dotT(s, wlin)
        d_msg = _dot(gather_dst, d_agg) * INV_SQRT_NN      # gather at edge_dst
        d_feat_src = d_msg * edge_w
        d_edge_w = d_msg * feat_src
        d_nf_gather = _dot(scatter_src, d_feat_src)        # scatter-add at edge_src

        # self-connection path
        d_nf_sc = is_t0 * _dotT(s, wsc0) + (1.0 - is_t0) * _dotT(s, wsc1)

        # radial MLP path (radial feeds every layer)
        d_h2 = _dotT(d_edge_w, w3)
        d_z2 = d_h2 * _dsilu(z2, sg2)
        d_h1 = _dotT(d_z2, w2)
        d_z1 = d_h1 * _dsilu(z1, sg1)
        d_rad = d_rad + _dotT(d_z1, w1)

        # carry to the previous layer: resnet + gather + self-connection
        d_nf = d_nf + d_nf_gather + d_nf_sc
        # TODO(synk): weight cotangents intentionally not materialised -- forces
        # only need d/d(positions).

    drad_ref[...] = d_rad


# ------------------------- pallas_call wrapper ----------------------------------
def _forcenet_pallas(params, radial, src_col, src_row, dst_col, dst_row, atype_col):
    n_nodes = atype_col.shape[0]
    n_edges = radial.shape[0]
    # Grid-less call: every operand is a single full-extent VMEM block
    # (all inputs together are ~120 KiB f32), so no BlockSpec tiling is needed.
    return pl.pallas_call(
        _forcenet_kernel,
        out_shape=(jax.ShapeDtypeStruct((n_nodes, 1), jnp.float32),           # energy
                   jax.ShapeDtypeStruct((n_edges, NUM_BASIS), jnp.float32)),  # d/d radial
        compiler_params=pltpu.CompilerParams(vmem_limit_bytes=32 * 1024 * 1024),
    )(radial, src_col, src_row, dst_col, dst_row, atype_col,
      params["w_embed"], params["w1"], params["w2"], params["w3"],
      params["w_lin"], params["w_sc"], params["w_lin1"], params["w_lin2"])


# ------------------------- parameter init (true, unpadded shapes) ---------------
def init_params(seed=42):
    key = jax.random.PRNGKey(seed)

    def dense(k, fan_in, fan_out):
        return jax.random.normal(k, (fan_in, fan_out), jnp.float32) / math.sqrt(fan_in)

    keys = iter(jax.random.split(key, 3 + 6 * NUM_LAYERS))

    w_embed = dense(next(keys), ELEMENT_NUMBER, CONV_OUT)                # [2, 32]
    w_lin1 = dense(next(keys), CONV_OUT, EMBED_OUT)                      # [32, 16]
    w_lin2 = dense(next(keys), EMBED_OUT, 1).reshape(1, EMBED_OUT)       # [1, 16] row

    w1, w2, w3, w_lin, w_sc = [], [], [], [], []
    for _ in range(NUM_LAYERS):
        w1.append(dense(next(keys), NUM_BASIS, INVARIANT_NEURONS))       # [8, 64]
        w2.append(dense(next(keys), INVARIANT_NEURONS, INVARIANT_NEURONS))
        w3.append(dense(next(keys), INVARIANT_NEURONS, CONV_OUT))        # [64, 32]
        w_lin.append(dense(next(keys), CONV_OUT, CONV_OUT))              # [32, 32]
        # self-connection FullyConnectedTensorProduct(feat, one-hot attr) on
        # scalars == one [CONV_OUT, CONV_OUT] weight per atom type.
        w_sc.append(jnp.stack([dense(next(keys), CONV_OUT, CONV_OUT)
                               for _ in range(ELEMENT_NUMBER)]))

    return {
        "w_embed": w_embed,
        "w_lin1": w_lin1, "w_lin2": w_lin2,
        "w1": jnp.stack(w1), "w2": jnp.stack(w2),
        "w3": jnp.stack(w3), "w_lin": jnp.stack(w_lin),                  # [L, ...]
        "w_sc": jnp.stack(w_sc),                                         # [L, 2, 32, 32]
    }


# ------------------------- position-dependent radial embedding (JAX, tiny) -----
def _radial_from_pos(atom_pos, edge_src, edge_dst, edge_cell_shift, cell, image_index):
    cell3 = cell.reshape(-1, 3, 3)
    edge_vec = atom_pos[edge_dst] - atom_pos[edge_src]
    edge_vec = edge_vec + jnp.einsum("ni,nij->nj", edge_cell_shift,
                                     cell3[image_index[edge_src]])
    # TODO(synk): zero-length edges give NaN here; the torch reference has the
    # same behaviour (no guard), so semantics are kept.
    edge_len = jnp.linalg.norm(edge_vec, axis=1)
    x = edge_len / R_MAX
    n = jnp.arange(1, NUM_BASIS + 1, dtype=jnp.float32)
    bessel = (2.0 / R_MAX) * jnp.sin(n[None, :] * jnp.pi * x[:, None]) / edge_len[:, None]
    p = float(CUTOFF_P)
    cut = (1.0
           - ((p + 1.0) * (p + 2.0) / 2.0) * x ** p
           + p * (p + 2.0) * x ** (p + 1.0)
           - (p * (p + 1.0) / 2.0) * x ** (p + 2.0))
    cut = jnp.where(x < 1.0, cut, 0.0)
    return bessel * cut[:, None]                           # [E, NUM_BASIS], unpadded


# ------------------------- ForceNet forward ------------------------------------
@jax.jit
def forcenet_forward(params, atom_type, atom_pos, edge_src, edge_dst,
                     edge_cell_shift, cell, image_index):
    n_nodes = atom_pos.shape[0]
    n_edges = edge_src.shape[0]

    radial_fn = lambda pos: _radial_from_pos(pos, edge_src, edge_dst,
                                             edge_cell_shift, cell, image_index)
    radial, radial_vjp = jax.vjp(radial_fn, atom_pos)      # [E, 8]

    src_col = edge_src.reshape(n_edges, 1).astype(jnp.int32)
    src_row = edge_src.reshape(1, n_edges).astype(jnp.int32)
    dst_col = edge_dst.reshape(n_edges, 1).astype(jnp.int32)
    dst_row = edge_dst.reshape(1, n_edges).astype(jnp.int32)
    atype_col = atom_type.reshape(n_nodes, 1).astype(jnp.int32)

    # ONE fused pallas_call: embedding + 3 MP layers + readout + hand backward.
    # ATOMIC_SCALE is applied in-kernel; atomic_shift = 0 is falsy -> not applied.
    atomic_energy, d_radial = _forcenet_pallas(
        params, radial, src_col, src_row, dst_col, dst_row, atype_col)

    # forces = -d(sum atomic_energy)/d(atom_pos): the kernel gives d/d(radial);
    # the jax.vjp of the radial embedding chains it to positions
    # (mirrors torch.autograd.grad in ForceNet.forward).
    (d_pos,) = radial_vjp(d_radial)
    forces = -d_pos
    return atomic_energy, forces


# ------------------------- pure-JAX reference (correctness check only) ---------
def _reference_forward(params, atom_type, atom_pos, edge_src, edge_dst,
                       edge_cell_shift, cell, image_index):
    hp = lax.Precision.HIGHEST
    num_layers = params["w1"].shape[0]

    def atomic_energies(pos):
        radial = _radial_from_pos(pos, edge_src, edge_dst, edge_cell_shift,
                                  cell, image_index)
        nf = params["w_embed"][atom_type]
        for l in range(num_layers):
            h = jax.nn.silu(jnp.matmul(radial, params["w1"][l], precision=hp))
            h = jax.nn.silu(jnp.matmul(h, params["w2"][l], precision=hp))
            edge_w = jnp.matmul(h, params["w3"][l], precision=hp)
            messages = nf[edge_src] * edge_w
            agg = jax.ops.segment_sum(messages, edge_dst,
                                      num_segments=nf.shape[0]) * INV_SQRT_NN
            conv = jnp.matmul(agg, params["w_lin"][l], precision=hp)
            sc = jnp.einsum("nc,ncd->nd", nf, params["w_sc"][l][atom_type],
                            precision=hp)
            nf = nf + jax.nn.silu(conv + sc)
        y = jnp.matmul(nf, params["w_lin1"], precision=hp)
        e = jnp.sum(y * params["w_lin2"], axis=1, keepdims=True)
        return e * ATOMIC_SCALE

    energies = atomic_energies(atom_pos)
    forces = -jax.grad(lambda pos: atomic_energies(pos).sum())(atom_pos)
    return energies, forces


# ------------------------- driver ---------------------------------------------
if __name__ == "__main__":
    N_ATOMS = 8
    params = init_params(seed=42)

    key = jax.random.PRNGKey(0)
    k_pos, k_type, k_shift = jax.random.split(key, 3)

    atom_type = jax.random.randint(k_type, (N_ATOMS,), 0, ELEMENT_NUMBER)
    atom_pos = jax.random.uniform(k_pos, (N_ATOMS, 3), jnp.float32, 0.0, 3.0)

    # ring-style edge list (src != dst so edge lengths are strictly positive)
    edge_src = jnp.concatenate([jnp.arange(N_ATOMS), jnp.arange(N_ATOMS)]).astype(jnp.int32)
    edge_dst = jnp.concatenate([(jnp.arange(N_ATOMS) + 1) % N_ATOMS,
                                (jnp.arange(N_ATOMS) + 2) % N_ATOMS]).astype(jnp.int32)
    E = edge_src.shape[0]

    edge_cell_shift = jax.random.randint(k_shift, (E, 3), -1, 2).astype(jnp.float32)
    cell = (5.0 * jnp.eye(3, dtype=jnp.float32)).reshape(1, 3, 3)
    image_index = jnp.zeros((N_ATOMS,), jnp.int32)

    atomic_energy, forces = forcenet_forward(
        params, atom_type, atom_pos, edge_src, edge_dst,
        edge_cell_shift, cell, image_index)
    jax.block_until_ready((atomic_energy, forces))

    assert atomic_energy.shape == (N_ATOMS, 1)
    assert forces.shape == (N_ATOMS, 3)
    assert bool(jnp.all(jnp.isfinite(atomic_energy))) and bool(jnp.all(jnp.isfinite(forces)))

    # structural correctness check against a pure-JAX reference of the same model
    ref_energy, ref_forces = _reference_forward(
        params, atom_type, atom_pos, edge_src, edge_dst,
        edge_cell_shift, cell, image_index)
    assert bool(jnp.allclose(atomic_energy, ref_energy, rtol=2e-2, atol=2e-3)), "energy mismatch"
    assert bool(jnp.allclose(forces, ref_forces, rtol=2e-2, atol=2e-3)), "force mismatch"

    print("KERNEL_OK")
</pallas_src>

<mosaic_0001>
module attributes {stable_mosaic.version = 11 : i64} {
  func.func @_forcenet_kernel(%arg0: memref<16x8xf32, #tpu.memory_space<vmem>>, %arg1: memref<16x1xi32, #tpu.memory_space<vmem>>, %arg2: memref<1x16xi32, #tpu.memory_space<vmem>>, %arg3: memref<16x1xi32, #tpu.memory_space<vmem>>, %arg4: memref<1x16xi32, #tpu.memory_space<vmem>>, %arg5: memref<8x1xi32, #tpu.memory_space<vmem>>, %arg6: memref<2x32xf32, #tpu.memory_space<vmem>>, %arg7: memref<3x8x64xf32, #tpu.memory_space<vmem>>, %arg8: memref<3x64x64xf32, #tpu.memory_space<vmem>>, %arg9: memref<3x64x32xf32, #tpu.memory_space<vmem>>, %arg10: memref<3x32x32xf32, #tpu.memory_space<vmem>>, %arg11: memref<3x2x32x32xf32, #tpu.memory_space<vmem>>, %arg12: memref<32x16xf32, #tpu.memory_space<vmem>>, %arg13: memref<1x16xf32, #tpu.memory_space<vmem>>, %arg14: memref<8x1xf32, #tpu.memory_space<vmem>>, %arg15: memref<16x8xf32, #tpu.memory_space<vmem>>) attributes {dimension_semantics = [], scalar_prefetch = 0 : i64, scratch_operands = 0 : i64, tpu.core_type = #tpu.core_type<tc>} {
    %c0 = arith.constant 0 : index
    %c0_0 = arith.constant 0 : index
    %0 = vector.load %arg0[%c0, %c0_0] : memref<16x8xf32, #tpu.memory_space<vmem>>, vector<16x8xf32>
    %c0_1 = arith.constant 0 : index
    %c0_2 = arith.constant 0 : index
    %1 = vector.load %arg5[%c0_1, %c0_2] : memref<8x1xi32, #tpu.memory_space<vmem>>, vector<8x1xi32>
    %c0_i32 = arith.constant 0 : i32
    %2 = vector.broadcast %c0_i32 : i32 to vector<8x1xi32>
    %3 = arith.cmpi eq, %1, %2 : vector<8x1xi32>
    %4 = arith.extui %3 : vector<8x1xi1> to vector<8x1xi32>
    %5 = arith.sitofp %4 : vector<8x1xi32> to vector<8x1xf32>
    %6 = tpu.iota {dimensions = array<i32: 1>} : vector<16x8xi32>
    %7 = tpu.iota {dimensions = array<i32: 0>} : vector<8x16xi32>
    %c0_3 = arith.constant 0 : index
    %c0_4 = arith.constant 0 : index
    %8 = vector.load %arg1[%c0_3, %c0_4] : memref<16x1xi32, #tpu.memory_space<vmem>>, vector<16x1xi32>
    %9 = vector.broadcast %8 : vector<16x1xi32> to vector<16x8xi32>
    %10 = arith.cmpi eq, %6, %9 : vector<16x8xi32>
    %11 = arith.extui %10 : vector<16x8xi1> to vector<16x8xi32>
    %12 = arith.sitofp %11 : vector<16x8xi32> to vector<16x8xf32>
    %c0_5 = arith.constant 0 : index
    %c0_6 = arith.constant 0 : index
    %13 = vector.load %arg3[%c0_5, %c0_6] : memref<16x1xi32, #tpu.memory_space<vmem>>, vector<16x1xi32>
    %14 = vector.broadcast %13 : vector<16x1xi32> to vector<16x8xi32>
    %15 = arith.cmpi eq, %6, %14 : vector<16x8xi32>
    %16 = arith.extui %15 : vector<16x8xi1> to vector<16x8xi32>
    %17 = arith.sitofp %16 : vector<16x8xi32> to vector<16x8xf32>
    %c0_7 = arith.constant 0 : index
    %c0_8 = arith.constant 0 : index
    %18 = vector.load %arg4[%c0_7, %c0_8] : memref<1x16xi32, #tpu.memory_space<vmem>>, vector<1x16xi32>
    %19 = vector.broadcast %18 : vector<1x16xi32> to vector<8x16xi32>
    %20 = arith.cmpi eq, %7, %19 : vector<8x16xi32>
    %21 = arith.extui %20 : vector<8x16xi1> to vector<8x16xi32>
    %22 = arith.sitofp %21 : vector<8x16xi32> to vector<8x16xf32>
    %c0_9 = arith.constant 0 : index
    %c0_10 = arith.constant 0 : index
    %23 = vector.load %arg2[%c0_9, %c0_10] : memref<1x16xi32, #tpu.memory_space<vmem>>, vector<1x16xi32>
    %24 = vector.broadcast %23 : vector<1x16xi32> to vector<8x16xi32>
    %25 = arith.cmpi eq, %7, %24 : vector<8x16xi32>
    %26 = arith.extui %25 : vector<8x16xi1> to vector<8x16xi32>
    %27 = arith.sitofp %26 : vector<8x16xi32> to vector<8x16xf32>
    %c0_11 = arith.constant 0 : index
    %c0_12 = arith.constant 0 : index
    %28 = vector.load %arg12[%c0_11, %c0_12] : memref<32x16xf32, #tpu.memory_space<vmem>>, vector<32x16xf32>
    %c0_13 = arith.constant 0 : index
    %c0_14 = arith.constant 0 : index
    %29 = vector.load %arg13[%c0_13, %c0_14] : memref<1x16xf32, #tpu.memory_space<vmem>>, vector<1x16xf32>
    %c0_15 = arith.constant 0 : index
    %c0_16 = arith.constant 0 : index
    %30 = vector.load %arg6[%c0_15, %c0_16] : memref<2x32xf32, #tpu.memory_space<vmem>>, vector<2x32xf32>
    %31 = vector.extract_strided_slice %30 {offsets = [0, 0], sizes = [1, 32], strides = [1, 1]} : vector<2x32xf32> to vector<1x32xf32>
    %32 = vector.broadcast %5 : vector<8x1xf32> to vector<8x32xf32>
    %33 = vector.broadcast %31 : vector<1x32xf32> to vector<8x32xf32>
    %34 = arith.mulf %32, %33 : vector<8x32xf32>
    %cst = arith.constant 1.000000e+00 : f32
    %35 = vector.broadcast %cst : f32 to vector<8x1xf32>
    %36 = arith.subf %35, %5 : vector<8x1xf32>
    %37 = vector.extract_strided_slice %30 {offsets = [1, 0], sizes = [1, 32], strides = [1, 1]} : vector<2x32xf32> to vector<1x32xf32>
    %38 = vector.broadcast %36 : vector<8x1xf32> to vector<8x32xf32>
    %39 = vector.broadcast %37 : vector<1x32xf32> to vector<8x32xf32>
    %40 = arith.mulf %38, %39 : vector<8x32xf32>
    %41 = arith.addf %34, %40 : vector<8x32xf32>
    %c0_17 = arith.constant 0 : index
    %c0_18 = arith.constant 0 : index
    %c0_19 = arith.constant 0 : index
    %42 = vector.load %arg7[%c0_17, %c0_18, %c0_19] : memref<3x8x64xf32, #tpu.memory_space<vmem>>, vector<1x8x64xf32>
    %43 = vector.shape_cast %42 : vector<1x8x64xf32> to vector<8x64xf32>
    %c0_20 = arith.constant 0 : index
    %c0_21 = arith.constant 0 : index
    %c0_22 = arith.constant 0 : index
    %44 = vector.load %arg8[%c0_20, %c0_21, %c0_22] : memref<3x64x64xf32, #tpu.memory_space<vmem>>, vector<1x64x64xf32>
    %45 = vector.shape_cast %44 : vector<1x64x64xf32> to vector<64x64xf32>
    %c0_23 = arith.constant 0 : index
    %c0_24 = arith.constant 0 : index
    %c0_25 = arith.constant 0 : index
    %46 = vector.load %arg9[%c0_23, %c0_24, %c0_25] : memref<3x64x32xf32, #tpu.memory_space<vmem>>, vector<1x64x32xf32>
    %47 = vector.shape_cast %46 : vector<1x64x32xf32> to vector<64x32xf32>
    %c0_26 = arith.constant 0 : index
    %c0_27 = arith.constant 0 : index
    %c0_28 = arith.constant 0 : index
    %48 = vector.load %arg10[%c0_26, %c0_27, %c0_28] : memref<3x32x32xf32, #tpu.memory_space<vmem>>, vector<1x32x32xf32>
    %49 = vector.shape_cast %48 : vector<1x32x32xf32> to vector<32x32xf32>
    %c0_29 = arith.constant 0 : index
    %c0_30 = arith.constant 0 : index
    %c0_31 = arith.constant 0 : index
    %c0_32 = arith.constant 0 : index
    %50 = vector.load %arg11[%c0_29, %c0_30, %c0_31, %c0_32] : memref<3x2x32x32xf32, #tpu.memory_space<vmem>>, vector<1x1x32x32xf32>
    %51 = vector.shape_cast %50 : vector<1x1x32x32xf32> to vector<32x32xf32>
    %c0_33 = arith.constant 0 : index
    %c1 = arith.constant 1 : index
    %c0_34 = arith.constant 0 : index
    %c0_35 = arith.constant 0 : index
    %52 = vector.load %arg11[%c0_33, %c1, %c0_34, %c0_35] : memref<3x2x32x32xf32, #tpu.memory_space<vmem>>, vector<1x1x32x32xf32>
    %53 = vector.shape_cast %52 : vector<1x1x32x32xf32> to vector<32x32xf32>
    %cst_36 = arith.constant dense<0.000000e+00> : vector<16x64xf32>
    %54 = tpu.matmul %0, %43, %cst_36 {dimension_numbers = #tpu.dot_dimension_numbers<[1], [0], [0], [1], [0, 0, 1, 1], [], []>, precision = #tpu.contract_precision<fp32>} : vector<16x8xf32>, vector<8x64xf32>, vector<16x64xf32> -> vector<16x64xf32>
    %cst_37 = arith.constant 0.000000e+00 : f32
    %55 = vector.broadcast %cst_37 : f32 to vector<16x64xf32>
    %56 = arith.subf %55, %54 : vector<16x64xf32>
    %57 = math.exp %56 : vector<16x64xf32>
    %cst_38 = arith.constant 1.000000e+00 : f32
    %58 = vector.broadcast %cst_38 : f32 to vector<16x64xf32>
    %59 = arith.addf %58, %57 : vector<16x64xf32>
    %cst_39 = arith.constant 1.000000e+00 : f32
    %60 = vector.broadcast %cst_39 : f32 to vector<16x64xf32>
    %61 = arith.divf %60, %59 : vector<16x64xf32>
    %62 = arith.mulf %54, %61 : vector<16x64xf32>
    %cst_40 = arith.constant dense<0.000000e+00> : vector<16x64xf32>
    %63 = tpu.matmul %62, %45, %cst_40 {dimension_numbers = #tpu.dot_dimension_numbers<[1], [0], [0], [1], [0, 0, 1, 1], [], []>, precision = #tpu.contract_precision<fp32>} : vector<16x64xf32>, vector<64x64xf32>, vector<16x64xf32> -> vector<16x64xf32>
    %cst_41 = arith.constant 0.000000e+00 : f32
    %64 = vector.broadcast %cst_41 : f32 to vector<16x64xf32>
    %65 = arith.subf %64, %63 : vector<16x64xf32>
    %66 = math.exp %65 : vector<16x64xf32>
    %cst_42 = arith.constant 1.000000e+00 : f32
    %67 = vector.broadcast %cst_42 : f32 to vector<16x64xf32>
    %68 = arith.addf %67, %66 : vector<16x64xf32>
    %cst_43 = arith.constant 1.000000e+00 : f32
    %69 = vector.broadcast %cst_43 : f32 to vector<16x64xf32>
    %70 = arith.divf %69, %68 : vector<16x64xf32>
    %71 = arith.mulf %63, %70 : vector<16x64xf32>
    %cst_44 = arith.constant dense<0.000000e+00> : vector<16x32xf32>
    %72 = tpu.matmul %71, %47, %cst_44 {dimension_numbers = #tpu.dot_dimension_numbers<[1], [0], [0], [1], [0, 0, 1, 1], [], []>, precision = #tpu.contract_precision<fp32>} : vector<16x64xf32>, vector<64x32xf32>, vector<16x32xf32> -> vector<16x32xf32>
    %cst_45 = arith.constant dense<0.000000e+00> : vector<16x32xf32>
    %73 = tpu.matmul %12, %41, %cst_45 {dimension_numbers = #tpu.dot_dimension_numbers<[1], [0], [0], [1], [0, 0, 1, 1], [], []>, precision = #tpu.contract_precision<fp32>} : vector<16x8xf32>, vector<8x32xf32>, vector<16x32xf32> -> vector<16x32xf32>
    %74 = arith.mulf %73, %72 : vector<16x32xf32>
    %cst_46 = arith.constant dense<0.000000e+00> : vector<8x32xf32>
    %75 = tpu.matmul %22, %74, %cst_46 {dimension_numbers = #tpu.dot_dimension_numbers<[1], [0], [0], [1], [0, 0, 1, 1], [], []>, precision = #tpu.contract_precision<fp32>} : vector<8x16xf32>, vector<16x32xf32>, vector<8x32xf32> -> vector<8x32xf32>
    %cst_47 = arith.constant 0.223606795 : f32
    %76 = vector.broadcast %cst_47 : f32 to vector<8x32xf32>
    %77 = arith.mulf %75, %76 : vector<8x32xf32>
    %cst_48 = arith.constant dense<0.000000e+00> : vector<8x32xf32>
    %78 = tpu.matmul %77, %49, %cst_48 {dimension_numbers = #tpu.dot_dimension_numbers<[1], [0], [0], [1], [0, 0, 1, 1], [], []>, precision = #tpu.contract_precision<fp32>} : vector<8x32xf32>, vector<32x32xf32>, vector<8x32xf32> -> vector<8x32xf32>
    %cst_49 = arith.constant dense<0.000000e+00> : vector<8x32xf32>
    %79 = tpu.matmul %41, %51, %cst_49 {dimension_numbers = #tpu.dot_dimension_numbers<[1], [0], [0], [1], [0, 0, 1, 1], [], []>, precision = #tpu.contract_precision<fp32>} : vector<8x32xf32>, vector<32x32xf32>, vector<8x32xf32> -> vector<8x32xf32>
    %80 = vector.broadcast %5 : vector<8x1xf32> to vector<8x32xf32>
    %81 = arith.mulf %80, %79 : vector<8x32xf32>
    %cst_50 = arith.constant 1.000000e+00 : f32
    %82 = vector.broadcast %cst_50 : f32 to vector<8x1xf32>
    %83 = arith.subf %82, %5 : vector<8x1xf32>
    %cst_51 = arith.constant dense<0.000000e+00> : vector<8x32xf32>
    %84 = tpu.matmul %41, %53, %cst_51 {dimension_numbers = #tpu.dot_dimension_numbers<[1], [0], [0], [1], [0, 0, 1, 1], [], []>, precision = #tpu.contract_precision<fp32>} : vector<8x32xf32>, vector<32x32xf32>, vector<8x32xf32> -> vector<8x32xf32>
    %85 = vector.broadcast %83 : vector<8x1xf32> to vector<8x32xf32>
    %86 = arith.mulf %85, %84 : vector<8x32xf32>
    %87 = arith.addf %81, %86 : vector<8x32xf32>
    %88 = arith.addf %78, %87 : vector<8x32xf32>
    %cst_52 = arith.constant 0.000000e+00 : f32
    %89 = vector.broadcast %cst_52 : f32 to vector<8x32xf32>
    %90 = arith.subf %89, %88 : vector<8x32xf32>
    %91 = math.exp %90 : vector<8x32xf32>
    %cst_53 = arith.constant 1.000000e+00 : f32
    %92 = vector.broadcast %cst_53 : f32 to vector<8x32xf32>
    %93 = arith.addf %92, %91 : vector<8x32xf32>
    %cst_54 = arith.constant 1.000000e+00 : f32
    %94 = vector.broadcast %cst_54 : f32 to vector<8x32xf32>
    %95 = arith.divf %94, %93 : vector<8x32xf32>
    %96 = arith.mulf %88, %95 : vector<8x32xf32>
    %97 = arith.addf %41, %96 : vector<8x32xf32>
    %c1_55 = arith.constant 1 : index
    %c0_56 = arith.constant 0 : index
    %c0_57 = arith.constant 0 : index
    %98 = vector.load %arg7[%c1_55, %c0_56, %c0_57] : memref<3x8x64xf32, #tpu.memory_space<vmem>>, vector<1x8x64xf32>
    %99 = vector.shape_cast %98 : vector<1x8x64xf32> to vector<8x64xf32>
    %c1_58 = arith.constant 1 : index
    %c0_59 = arith.constant 0 : index
    %c0_60 = arith.constant 0 : index
    %100 = vector.load %arg8[%c1_58, %c0_59, %c0_60] : memref<3x64x64xf32, #tpu.memory_space<vmem>>, vector<1x64x64xf32>
    %101 = vector.shape_cast %100 : vector<1x64x64xf32> to vector<64x64xf32>
    %c1_61 = arith.constant 1 : index
    %c0_62 = arith.constant 0 : index
    %c0_63 = arith.constant 0 : index
    %102 = vector.load %arg9[%c1_61, %c0_62, %c0_63] : memref<3x64x32xf32, #tpu.memory_space<vmem>>, vector<1x64x32xf32>
    %103 = vector.shape_cast %102 : vector<1x64x32xf32> to vector<64x32xf32>
    %c1_64 = arith.constant 1 : index
    %c0_65 = arith.constant 0 : index
    %c0_66 = arith.constant 0 : index
    %104 = vector.load %arg10[%c1_64, %c0_65, %c0_66] : memref<3x32x32xf32, #tpu.memory_space<vmem>>, vector<1x32x32xf32>
    %105 = vector.shape_cast %104 : vector<1x32x32xf32> to vector<32x32xf32>
    %c1_67 = arith.constant 1 : index
    %c0_68 = arith.constant 0 : index
    %c0_69 = arith.constant 0 : index
    %c0_70 = arith.constant 0 : index
    %106 = vector.load %arg11[%c1_67, %c0_68, %c0_69, %c0_70] : memref<3x2x32x32xf32, #tpu.memory_space<vmem>>, vector<1x1x32x32xf32>
    %107 = vector.shape_cast %106 : vector<1x1x32x32xf32> to vector<32x32xf32>
    %c1_71 = arith.constant 1 : index
    %c1_72 = arith.constant 1 : index
    %c0_73 = arith.constant 0 : index
    %c0_74 = arith.constant 0 : index
    %108 = vector.load %arg11[%c1_71, %c1_72, %c0_73, %c0_74] : memref<3x2x32x32xf32, #tpu.memory_space<vmem>>, vector<1x1x32x32xf32>
    %109 = vector.shape_cast %108 : vector<1x1x32x32xf32> to vector<32x32xf32>
    %cst_75 = arith.constant dense<0.000000e+00> : vector<16x64xf32>
    %110 = tpu.matmul %0, %99, %cst_75 {dimension_numbers = #tpu.dot_dimension_numbers<[1], [0], [0], [1], [0, 0, 1, 1], [], []>, precision = #tpu.contract_precision<fp32>} : vector<16x8xf32>, vector<8x64xf32>, vector<16x64xf32> -> vector<16x64xf32>
    %cst_76 = arith.constant 0.000000e+00 : f32
    %111 = vector.broadcast %cst_76 : f32 to vector<16x64xf32>
    %112 = arith.subf %111, %110 : vector<16x64xf32>
    %113 = math.exp %112 : vector<16x64xf32>
    %cst_77 = arith.constant 1.000000e+00 : f32
    %114 = vector.broadcast %cst_77 : f32 to vector<16x64xf32>
    %115 = arith.addf %114, %113 : vector<16x64xf32>
    %cst_78 = arith.constant 1.000000e+00 : f32
    %116 = vector.broadcast %cst_78 : f32 to vector<16x64xf32>
    %117 = arith.divf %116, %115 : vector<16x64xf32>
    %118 = arith.mulf %110, %117 : vector<16x64xf32>
    %cst_79 = arith.constant dense<0.000000e+00> : vector<16x64xf32>
    %119 = tpu.matmul %118, %101, %cst_79 {dimension_numbers = #tpu.dot_dimension_numbers<[1], [0], [0], [1], [0, 0, 1, 1], [], []>, precision = #tpu.contract_precision<fp32>} : vector<16x64xf32>, vector<64x64xf32>, vector<16x64xf32> -> vector<16x64xf32>
    %cst_80 = arith.constant 0.000000e+00 : f32
    %120 = vector.broadcast %cst_80 : f32 to vector<16x64xf32>
    %121 = arith.subf %120, %119 : vector<16x64xf32>
    %122 = math.exp %121 : vector<16x64xf32>
    %cst_81 = arith.constant 1.000000e+00 : f32
    %123 = vector.broadcast %cst_81 : f32 to vector<16x64xf32>
    %124 = arith.addf %123, %122 : vector<16x64xf32>
    %cst_82 = arith.constant 1.000000e+00 : f32
    %125 = vector.broadcast %cst_82 : f32 to vector<16x64xf32>
    %126 = arith.divf %125, %124 : vector<16x64xf32>
    %127 = arith.mulf %119, %126 : vector<16x64xf32>
    %cst_83 = arith.constant dense<0.000000e+00> : vector<16x32xf32>
    %128 = tpu.matmul %127, %103, %cst_83 {dimension_numbers = #tpu.dot_dimension_numbers<[1], [0], [0], [1], [0, 0, 1, 1], [], []>, precision = #tpu.contract_precision<fp32>} : vector<16x64xf32>, vector<64x32xf32>, vector<16x32xf32> -> vector<16x32xf32>
    %cst_84 = arith.constant dense<0.000000e+00> : vector<16x32xf32>
    %129 = tpu.matmul %12, %97, %cst_84 {dimension_numbers = #tpu.dot_dimension_numbers<[1], [0], [0], [1], [0, 0, 1, 1], [], []>, precision = #tpu.contract_precision<fp32>} : vector<16x8xf32>, vector<8x32xf32>, vector<16x32xf32> -> vector<16x32xf32>
    %130 = arith.mulf %129, %128 : vector<16x32xf32>
    %cst_85 = arith.constant dense<0.000000e+00> : vector<8x32xf32>
    %131 = tpu.matmul %22, %130, %cst_85 {dimension_numbers = #tpu.dot_dimension_numbers<[1], [0], [0], [1], [0, 0, 1, 1], [], []>, precision = #tpu.contract_precision<fp32>} : vector<8x16xf32>, vector<16x32xf32>, vector<8x32xf32> -> vector<8x32xf32>
    %cst_86 = arith.constant 0.223606795 : f32
    %132 = vector.broadcast %cst_86 : f32 to vector<8x32xf32>
    %133 = arith.mulf %131, %132 : vector<8x32xf32>
    %cst_87 = arith.constant dense<0.000000e+00> : vector<8x32xf32>
    %134 = tpu.matmul %133, %105, %cst_87 {dimension_numbers = #tpu.dot_dimension_numbers<[1], [0], [0], [1], [0, 0, 1, 1], [], []>, precision = #tpu.contract_precision<fp32>} : vector<8x32xf32>, vector<32x32xf32>, vector<8x32xf32> -> vector<8x32xf32>
    %cst_88 = arith.constant dense<0.000000e+00> : vector<8x32xf32>
    %135 = tpu.matmul %97, %107, %cst_88 {dimension_numbers = #tpu.dot_dimension_numbers<[1], [0], [0], [1], [0, 0, 1, 1], [], []>, precision = #tpu.contract_precision<fp32>} : vector<8x32xf32>, vector<32x32xf32>, vector<8x32xf32> -> vector<8x32xf32>
    %136 = vector.broadcast %5 : vector<8x1xf32> to vector<8x32xf32>
    %137 = arith.mulf %136, %135 : vector<8x32xf32>
    %cst_89 = arith.constant 1.000000e+00 : f32
    %138 = vector.broadcast %cst_89 : f32 to vector<8x1xf32>
    %139 = arith.subf %138, %5 : vector<8x1xf32>
    %cst_90 = arith.constant dense<0.000000e+00> : vector<8x32xf32>
    %140 = tpu.matmul %97, %109, %cst_90 {dimension_numbers = #tpu.dot_dimension_numbers<[1], [0], [0], [1], [0, 0, 1, 1], [], []>, precision = #tpu.contract_precision<fp32>} : vector<8x32xf32>, vector<32x32xf32>, vector<8x32xf32> -> vector<8x32xf32>
    %141 = vector.broadcast %139 : vector<8x1xf32> to vector<8x32xf32>
    %142 = arith.mulf %141, %140 : vector<8x32xf32>
    %143 = arith.addf %137, %142 : vector<8x32xf32>
    %144 = arith.addf %134, %143 : vector<8x32xf32>
    %cst_91 = arith.constant 0.000000e+00 : f32
    %145 = vector.broadcast %cst_91 : f32 to vector<8x32xf32>
    %146 = arith.subf %145, %144 : vector<8x32xf32>
    %147 = math.exp %146 : vector<8x32xf32>
    %cst_92 = arith.constant 1.000000e+00 : f32
    %148 = vector.broadcast %cst_92 : f32 to vector<8x32xf32>
    %149 = arith.addf %148, %147 : vector<8x32xf32>
    %cst_93 = arith.constant 1.000000e+00 : f32
    %150 = vector.broadcast %cst_93 : f32 to vector<8x32xf32>
    %151 = arith.divf %150, %149 : vector<8x32xf32>
    %152 = arith.mulf %144, %151 : vector<8x32xf32>
    %153 = arith.addf %97, %152 : vector<8x32xf32>
    %c2 = arith.constant 2 : index
    %c0_94 = arith.constant 0 : index
    %c0_95 = arith.constant 0 : index
    %154 = vector.load %arg7[%c2, %c0_94, %c0_95] : memref<3x8x64xf32, #tpu.memory_space<vmem>>, vector<1x8x64xf32>
    %155 = vector.shape_cast %154 : vector<1x8x64xf32> to vector<8x64xf32>
    %c2_96 = arith.constant 2 : index
    %c0_97 = arith.constant 0 : index
    %c0_98 = arith.constant 0 : index
    %156 = vector.load %arg8[%c2_96, %c0_97, %c0_98] : memref<3x64x64xf32, #tpu.memory_space<vmem>>, vector<1x64x64xf32>
    %157 = vector.shape_cast %156 : vector<1x64x64xf32> to vector<64x64xf32>
    %c2_99 = arith.constant 2 : index
    %c0_100 = arith.constant 0 : index
    %c0_101 = arith.constant 0 : index
    %158 = vector.load %arg9[%c2_99, %c0_100, %c0_101] : memref<3x64x32xf32, #tpu.memory_space<vmem>>, vector<1x64x32xf32>
    %159 = vector.shape_cast %158 : vector<1x64x32xf32> to vector<64x32xf32>
    %c2_102 = arith.constant 2 : index
    %c0_103 = arith.constant 0 : index
    %c0_104 = arith.constant 0 : index
    %160 = vector.load %arg10[%c2_102, %c0_103, %c0_104] : memref<3x32x32xf32, #tpu.memory_space<vmem>>, vector<1x32x32xf32>
    %161 = vector.shape_cast %160 : vector<1x32x32xf32> to vector<32x32xf32>
    %c2_105 = arith.constant 2 : index
    %c0_106 = arith.constant 0 : index
    %c0_107 = arith.constant 0 : index
    %c0_108 = arith.constant 0 : index
    %162 = vector.load %arg11[%c2_105, %c0_106, %c0_107, %c0_108] : memref<3x2x32x32xf32, #tpu.memory_space<vmem>>, vector<1x1x32x32xf32>
    %163 = vector.shape_cast %162 : vector<1x1x32x32xf32> to vector<32x32xf32>
    %c2_109 = arith.constant 2 : index
    %c1_110 = arith.constant 1 : index
    %c0_111 = arith.constant 0 : index
    %c0_112 = arith.constant 0 : index
    %164 = vector.load %arg11[%c2_109, %c1_110, %c0_111, %c0_112] : memref<3x2x32x32xf32, #tpu.memory_space<vmem>>, vector<1x1x32x32xf32>
    %165 = vector.shape_cast %164 : vector<1x1x32x32xf32> to vector<32x32xf32>
    %cst_113 = arith.constant dense<0.000000e+00> : vector<16x64xf32>
    %166 = tpu.matmul %0, %155, %cst_113 {dimension_numbers = #tpu.dot_dimension_numbers<[1], [0], [0], [1], [0, 0, 1, 1], [], []>, precision = #tpu.contract_precision<fp32>} : vector<16x8xf32>, vector<8x64xf32>, vector<16x64xf32> -> vector<16x64xf32>
    %cst_114 = arith.constant 0.000000e+00 : f32
    %167 = vector.broadcast %cst_114 : f32 to vector<16x64xf32>
    %168 = arith.subf %167, %166 : vector<16x64xf32>
    %169 = math.exp %168 : vector<16x64xf32>
    %cst_115 = arith.constant 1.000000e+00 : f32
    %170 = vector.broadcast %cst_115 : f32 to vector<16x64xf32>
    %171 = arith.addf %170, %169 : vector<16x64xf32>
    %cst_116 = arith.constant 1.000000e+00 : f32
    %172 = vector.broadcast %cst_116 : f32 to vector<16x64xf32>
    %173 = arith.divf %172, %171 : vector<16x64xf32>
    %174 = arith.mulf %166, %173 : vector<16x64xf32>
    %cst_117 = arith.constant dense<0.000000e+00> : vector<16x64xf32>
    %175 = tpu.matmul %174, %157, %cst_117 {dimension_numbers = #tpu.dot_dimension_numbers<[1], [0], [0], [1], [0, 0, 1, 1], [], []>, precision = #tpu.contract_precision<fp32>} : vector<16x64xf32>, vector<64x64xf32>, vector<16x64xf32> -> vector<16x64xf32>
    %cst_118 = arith.constant 0.000000e+00 : f32
    %176 = vector.broadcast %cst_118 : f32 to vector<16x64xf32>
    %177 = arith.subf %176, %175 : vector<16x64xf32>
    %178 = math.exp %177 : vector<16x64xf32>
    %cst_119 = arith.constant 1.000000e+00 : f32
    %179 = vector.broadcast %cst_119 : f32 to vector<16x64xf32>
    %180 = arith.addf %179, %178 : vector<16x64xf32>
    %cst_120 = arith.constant 1.000000e+00 : f32
    %181 = vector.broadcast %cst_120 : f32 to vector<16x64xf32>
    %182 = arith.divf %181, %180 : vector<16x64xf32>
    %183 = arith.mulf %175, %182 : vector<16x64xf32>
    %cst_121 = arith.constant dense<0.000000e+00> : vector<16x32xf32>
    %184 = tpu.matmul %183, %159, %cst_121 {dimension_numbers = #tpu.dot_dimension_numbers<[1], [0], [0], [1], [0, 0, 1, 1], [], []>, precision = #tpu.contract_precision<fp32>} : vector<16x64xf32>, vector<64x32xf32>, vector<16x32xf32> -> vector<16x32xf32>
    %cst_122 = arith.constant dense<0.000000e+00> : vector<16x32xf32>
    %185 = tpu.matmul %12, %153, %cst_122 {dimension_numbers = #tpu.dot_dimension_numbers<[1], [0], [0], [1], [0, 0, 1, 1], [], []>, precision = #tpu.contract_precision<fp32>} : vector<16x8xf32>, vector<8x32xf32>, vector<16x32xf32> -> vector<16x32xf32>
    %186 = arith.mulf %185, %184 : vector<16x32xf32>
    %cst_123 = arith.constant dense<0.000000e+00> : vector<8x32xf32>
    %187 = tpu.matmul %22, %186, %cst_123 {dimension_numbers = #tpu.dot_dimension_numbers<[1], [0], [0], [1], [0, 0, 1, 1], [], []>, precision = #tpu.contract_precision<fp32>} : vector<8x16xf32>, vector<16x32xf32>, vector<8x32xf32> -> vector<8x32xf32>
    %cst_124 = arith.constant 0.223606795 : f32
    %188 = vector.broadcast %cst_124 : f32 to vector<8x32xf32>
    %189 = arith.mulf %187, %188 : vector<8x32xf32>
    %cst_125 = arith.constant dense<0.000000e+00> : vector<8x32xf32>
    %190 = tpu.matmul %189, %161, %cst_125 {dimension_numbers = #tpu.dot_dimension_numbers<[1], [0], [0], [1], [0, 0, 1, 1], [], []>, precision = #tpu.contract_precision<fp32>} : vector<8x32xf32>, vector<32x32xf32>, vector<8x32xf32> -> vector<8x32xf32>
    %cst_126 = arith.constant dense<0.000000e+00> : vector<8x32xf32>
    %191 = tpu.matmul %153, %163, %cst_126 {dimension_numbers = #tpu.dot_dimension_numbers<[1], [0], [0], [1], [0, 0, 1, 1], [], []>, precision = #tpu.contract_precision<fp32>} : vector<8x32xf32>, vector<32x32xf32>, vector<8x32xf32> -> vector<8x32xf32>
    %192 = vector.broadcast %5 : vector<8x1xf32> to vector<8x32xf32>
    %193 = arith.mulf %192, %191 : vector<8x32xf32>
    %cst_127 = arith.constant 1.000000e+00 : f32
    %194 = vector.broadcast %cst_127 : f32 to vector<8x1xf32>
    %195 = arith.subf %194, %5 : vector<8x1xf32>
    %cst_128 = arith.constant dense<0.000000e+00> : vector<8x32xf32>
    %196 = tpu.matmul %153, %165, %cst_128 {dimension_numbers = #tpu.dot_dimension_numbers<[1], [0], [0], [1], [0, 0, 1, 1], [], []>, precision = #tpu.contract_precision<fp32>} : vector<8x32xf32>, vector<32x32xf32>, vector<8x32xf32> -> vector<8x32xf32>
    %197 = vector.broadcast %195 : vector<8x1xf32> to vector<8x32xf32>
    %198 = arith.mulf %197, %196 : vector<8x32xf32>
    %199 = arith.addf %193, %198 : vector<8x32xf32>
    %200 = arith.addf %190, %199 : vector<8x32xf32>
    %cst_129 = arith.constant 0.000000e+00 : f32
    %201 = vector.broadcast %cst_129 : f32 to vector<8x32xf32>
    %202 = arith.subf %201, %200 : vector<8x32xf32>
    %203 = math.exp %202 : vector<8x32xf32>
    %cst_130 = arith.constant 1.000000e+00 : f32
    %204 = vector.broadcast %cst_130 : f32 to vector<8x32xf32>
    %205 = arith.addf %204, %203 : vector<8x32xf32>
    %cst_131 = arith.constant 1.000000e+00 : f32
    %206 = vector.broadcast %cst_131 : f32 to vector<8x32xf32>
    %207 = arith.divf %206, %205 : vector<8x32xf32>
    %208 = arith.mulf %200, %207 : vector<8x32xf32>
    %209 = arith.addf %153, %208 : vector<8x32xf32>
    %cst_132 = arith.constant dense<0.000000e+00> : vector<8x16xf32>
    %210 = tpu.matmul %209, %28, %cst_132 {dimension_numbers = #tpu.dot_dimension_numbers<[1], [0], [0], [1], [0, 0, 1, 1], [], []>, precision = #tpu.contract_precision<fp32>} : vector<8x32xf32>, vector<32x16xf32>, vector<8x16xf32> -> vector<8x16xf32>
    %211 = vector.broadcast %29 : vector<1x16xf32> to vector<8x16xf32>
    %212 = arith.mulf %210, %211 : vector<8x16xf32>
    %cst_133 = arith.constant dense<0.000000e+00> : vector<8xf32>
    %213 = vector.multi_reduction <add>, %212, %cst_133 [1] : vector<8x16xf32> to vector<8xf32>
    %214 = vector.shape_cast %213 : vector<8xf32> to vector<8x1xf32>
    %cst_134 = arith.constant 1.000000e+00 : f32
    %215 = vector.broadcast %cst_134 : f32 to vector<8x1xf32>
    %216 = arith.mulf %214, %215 : vector<8x1xf32>
    %c0_135 = arith.constant 0 : index
    %c0_136 = arith.constant 0 : index
    %217 = vector.load %arg14[%c0_135, %c0_136] : memref<8x1xf32, #tpu.memory_space<vmem>>, vector<8x1xf32>
    tpu.vector_store %arg14[%c0_135, %c0_136], %216 {strides = array<i32>} : memref<8x1xf32, #tpu.memory_space<vmem>>, vector<8x1xf32>,
    %cst_137 = arith.constant dense<0.000000e+00> : vector<1x32xf32>
    %218 = tpu.matmul %29, %28, %cst_137 {dimension_numbers = #tpu.dot_dimension_numbers<[1], [1], [0], [0], [0, 0, 1, 0], [], []>, precision = #tpu.contract_precision<fp32>} : vector<1x16xf32>, vector<32x16xf32>, vector<1x32xf32> -> vector<1x32xf32>
    %219 = vector.shape_cast %218 : vector<1x32xf32> to vector<1x32xf32>
    %220 = vector.broadcast %219 : vector<1x32xf32> to vector<8x32xf32>
    %cst_138 = arith.constant 1.000000e+00 : f32
    %221 = vector.broadcast %cst_138 : f32 to vector<8x32xf32>
    %222 = arith.mulf %220, %221 : vector<8x32xf32>
    %cst_139 = arith.constant 0.000000e+00 : f32
    %223 = vector.broadcast %cst_139 : f32 to vector<16x8xf32>
    %c2_140 = arith.constant 2 : index
    %c0_141 = arith.constant 0 : index
    %c0_142 = arith.constant 0 : index
    %224 = vector.load %arg7[%c2_140, %c0_141, %c0_142] : memref<3x8x64xf32, #tpu.memory_space<vmem>>, vector<1x8x64xf32>
    %225 = vector.shape_cast %224 : vector<1x8x64xf32> to vector<8x64xf32>
    %c2_143 = arith.constant 2 : index
    %c0_144 = arith.constant 0 : index
    %c0_145 = arith.constant 0 : index
    %226 = vector.load %arg8[%c2_143, %c0_144, %c0_145] : memref<3x64x64xf32, #tpu.memory_space<vmem>>, vector<1x64x64xf32>
    %227 = vector.shape_cast %226 : vector<1x64x64xf32> to vector<64x64xf32>
    %c2_146 = arith.constant 2 : index
    %c0_147 = arith.constant 0 : index
    %c0_148 = arith.constant 0 : index
    %228 = vector.load %arg9[%c2_146, %c0_147, %c0_148] : memref<3x64x32xf32, #tpu.memory_space<vmem>>, vector<1x64x32xf32>
    %229 = vector.shape_cast %228 : vector<1x64x32xf32> to vector<64x32xf32>
    %c2_149 = arith.constant 2 : index
    %c0_150 = arith.constant 0 : index
    %c0_151 = arith.constant 0 : index
    %230 = vector.load %arg10[%c2_149, %c0_150, %c0_151] : memref<3x32x32xf32, #tpu.memory_space<vmem>>, vector<1x32x32xf32>
    %231 = vector.shape_cast %230 : vector<1x32x32xf32> to vector<32x32xf32>
    %c2_152 = arith.constant 2 : index
    %c0_153 = arith.constant 0 : index
    %c0_154 = arith.constant 0 : index
    %c0_155 = arith.constant 0 : index
    %232 = vector.load %arg11[%c2_152, %c0_153, %c0_154, %c0_155] : memref<3x2x32x32xf32, #tpu.memory_space<vmem>>, vector<1x1x32x32xf32>
    %233 = vector.shape_cast %232 : vector<1x1x32x32xf32> to vector<32x32xf32>
    %c2_156 = arith.constant 2 : index
    %c1_157 = arith.constant 1 : index
    %c0_158 = arith.constant 0 : index
    %c0_159 = arith.constant 0 : index
    %234 = vector.load %arg11[%c2_156, %c1_157, %c0_158, %c0_159] : memref<3x2x32x32xf32, #tpu.memory_space<vmem>>, vector<1x1x32x32xf32>
    %235 = vector.shape_cast %234 : vector<1x1x32x32xf32> to vector<32x32xf32>
    %cst_160 = arith.constant 1.000000e+00 : f32
    %236 = vector.broadcast %cst_160 : f32 to vector<8x32xf32>
    %237 = arith.subf %236, %207 : vector<8x32xf32>
    %238 = arith.mulf %200, %237 : vector<8x32xf32>
    %cst_161 = arith.constant 1.000000e+00 : f32
    %239 = vector.broadcast %cst_161 : f32 to vector<8x32xf32>
    %240 = arith.addf %239, %238 : vector<8x32xf32>
    %241 = arith.mulf %207, %240 : vector<8x32xf32>
    %242 = arith.mulf %241, %222 : vector<8x32xf32>
    %cst_162 = arith.constant dense<0.000000e+00> : vector<8x32xf32>
    %243 = tpu.matmul %242, %231, %cst_162 {dimension_numbers = #tpu.dot_dimension_numbers<[1], [1], [0], [0], [0, 0, 1, 0], [], []>, precision = #tpu.contract_precision<fp32>} : vector<8x32xf32>, vector<32x32xf32>, vector<8x32xf32> -> vector<8x32xf32>
    %cst_163 = arith.constant dense<0.000000e+00> : vector<16x32xf32>
    %244 = tpu.matmul %17, %243, %cst_163 {dimension_numbers = #tpu.dot_dimension_numbers<[1], [0], [0], [1], [0, 0, 1, 1], [], []>, precision = #tpu.contract_precision<fp32>} : vector<16x8xf32>, vector<8x32xf32>, vector<16x32xf32> -> vector<16x32xf32>
    %cst_164 = arith.constant 0.223606795 : f32
    %245 = vector.broadcast %cst_164 : f32 to vector<16x32xf32>
    %246 = arith.mulf %244, %245 : vector<16x32xf32>
    %247 = arith.mulf %246, %184 : vector<16x32xf32>
    %248 = arith.mulf %246, %185 : vector<16x32xf32>
    %cst_165 = arith.constant dense<0.000000e+00> : vector<8x32xf32>
    %249 = tpu.matmul %27, %247, %cst_165 {dimension_numbers = #tpu.dot_dimension_numbers<[1], [0], [0], [1], [0, 0, 1, 1], [], []>, precision = #tpu.contract_precision<fp32>} : vector<8x16xf32>, vector<16x32xf32>, vector<8x32xf32> -> vector<8x32xf32>
    %cst_166 = arith.constant dense<0.000000e+00> : vector<8x32xf32>
    %250 = tpu.matmul %242, %233, %cst_166 {dimension_numbers = #tpu.dot_dimension_numbers<[1], [1], [0], [0], [0, 0, 1, 0], [], []>, precision = #tpu.contract_precision<fp32>} : vector<8x32xf32>, vector<32x32xf32>, vector<8x32xf32> -> vector<8x32xf32>
    %251 = vector.broadcast %5 : vector<8x1xf32> to vector<8x32xf32>
    %252 = arith.mulf %251, %250 : vector<8x32xf32>
    %cst_167 = arith.constant 1.000000e+00 : f32
    %253 = vector.broadcast %cst_167 : f32 to vector<8x1xf32>
    %254 = arith.subf %253, %5 : vector<8x1xf32>
    %cst_168 = arith.constant dense<0.000000e+00> : vector<8x32xf32>
    %255 = tpu.matmul %242, %235, %cst_168 {dimension_numbers = #tpu.dot_dimension_numbers<[1], [1], [0], [0], [0, 0, 1, 0], [], []>, precision = #tpu.contract_precision<fp32>} : vector<8x32xf32>, vector<32x32xf32>, vector<8x32xf32> -> vector<8x32xf32>
    %256 = vector.broadcast %254 : vector<8x1xf32> to vector<8x32xf32>
    %257 = arith.mulf %256, %255 : vector<8x32xf32>
    %258 = arith.addf %252, %257 : vector<8x32xf32>
    %cst_169 = arith.constant dense<0.000000e+00> : vector<16x64xf32>
    %259 = tpu.matmul %248, %229, %cst_169 {dimension_numbers = #tpu.dot_dimension_numbers<[1], [1], [0], [0], [0, 0, 1, 0], [], []>, precision = #tpu.contract_precision<fp32>} : vector<16x32xf32>, vector<64x32xf32>, vector<16x64xf32> -> vector<16x64xf32>
    %cst_170 = arith.constant 1.000000e+00 : f32
    %260 = vector.broadcast %cst_170 : f32 to vector<16x64xf32>
    %261 = arith.subf %260, %182 : vector<16x64xf32>
    %262 = arith.mulf %175, %261 : vector<16x64xf32>
    %cst_171 = arith.constant 1.000000e+00 : f32
    %263 = vector.broadcast %cst_171 : f32 to vector<16x64xf32>
    %264 = arith.addf %263, %262 : vector<16x64xf32>
    %265 = arith.mulf %182, %264 : vector<16x64xf32>
    %266 = arith.mulf %259, %265 : vector<16x64xf32>
    %cst_172 = arith.constant dense<0.000000e+00> : vector<16x64xf32>
    %267 = tpu.matmul %266, %227, %cst_172 {dimension_numbers = #tpu.dot_dimension_numbers<[1], [1], [0], [0], [0, 0, 1, 0], [], []>, precision = #tpu.contract_precision<fp32>} : vector<16x64xf32>, vector<64x64xf32>, vector<16x64xf32> -> vector<16x64xf32>
    %cst_173 = arith.constant 1.000000e+00 : f32
    %268 = vector.broadcast %cst_173 : f32 to vector<16x64xf32>
    %269 = arith.subf %268, %173 : vector<16x64xf32>
    %270 = arith.mulf %166, %269 : vector<16x64xf32>
    %cst_174 = arith.constant 1.000000e+00 : f32
    %271 = vector.broadcast %cst_174 : f32 to vector<16x64xf32>
    %272 = arith.addf %271, %270 : vector<16x64xf32>
    %273 = arith.mulf %173, %272 : vector<16x64xf32>
    %274 = arith.mulf %267, %273 : vector<16x64xf32>
    %cst_175 = arith.constant dense<0.000000e+00> : vector<16x8xf32>
    %275 = tpu.matmul %274, %225, %cst_175 {dimension_numbers = #tpu.dot_dimension_numbers<[1], [1], [0], [0], [0, 0, 1, 0], [], []>, precision = #tpu.contract_precision<fp32>} : vector<16x64xf32>, vector<8x64xf32>, vector<16x8xf32> -> vector<16x8xf32>
    %276 = arith.addf %223, %275 : vector<16x8xf32>
    %277 = arith.addf %222, %249 : vector<8x32xf32>
    %278 = arith.addf %277, %258 : vector<8x32xf32>
    %c1_176 = arith.constant 1 : index
    %c0_177 = arith.constant 0 : index
    %c0_178 = arith.constant 0 : index
    %279 = vector.load %arg7[%c1_176, %c0_177, %c0_178] : memref<3x8x64xf32, #tpu.memory_space<vmem>>, vector<1x8x64xf32>
    %280 = vector.shape_cast %279 : vector<1x8x64xf32> to vector<8x64xf32>
    %c1_179 = arith.constant 1 : index
    %c0_180 = arith.constant 0 : index
    %c0_181 = arith.constant 0 : index
    %281 = vector.load %arg8[%c1_179, %c0_180, %c0_181] : memref<3x64x64xf32, #tpu.memory_space<vmem>>, vector<1x64x64xf32>
    %282 = vector.shape_cast %281 : vector<1x64x64xf32> to vector<64x64xf32>
    %c1_182 = arith.constant 1 : index
    %c0_183 = arith.constant 0 : index
    %c0_184 = arith.constant 0 : index
    %283 = vector.load %arg9[%c1_182, %c0_183, %c0_184] : memref<3x64x32xf32, #tpu.memory_space<vmem>>, vector<1x64x32xf32>
    %284 = vector.shape_cast %283 : vector<1x64x32xf32> to vector<64x32xf32>
    %c1_185 = arith.constant 1 : index
    %c0_186 = arith.constant 0 : index
    %c0_187 = arith.constant 0 : index
    %285 = vector.load %arg10[%c1_185, %c0_186, %c0_187] : memref<3x32x32xf32, #tpu.memory_space<vmem>>, vector<1x32x32xf32>
    %286 = vector.shape_cast %285 : vector<1x32x32xf32> to vector<32x32xf32>
    %c1_188 = arith.constant 1 : index
    %c0_189 = arith.constant 0 : index
    %c0_190 = arith.constant 0 : index
    %c0_191 = arith.constant 0 : index
    %287 = vector.load %arg11[%c1_188, %c0_189, %c0_190, %c0_191] : memref<3x2x32x32xf32, #tpu.memory_space<vmem>>, vector<1x1x32x32xf32>
    %288 = vector.shape_cast %287 : vector<1x1x32x32xf32> to vector<32x32xf32>
    %c1_192 = arith.constant 1 : index
    %c1_193 = arith.constant 1 : index
    %c0_194 = arith.constant 0 : index
    %c0_195 = arith.constant 0 : index
    %289 = vector.load %arg11[%c1_192, %c1_193, %c0_194, %c0_195] : memref<3x2x32x32xf32, #tpu.memory_space<vmem>>, vector<1x1x32x32xf32>
    %290 = vector.shape_cast %289 : vector<1x1x32x32xf32> to vector<32x32xf32>
    %cst_196 = arith.constant 1.000000e+00 : f32
    %291 = vector.broadcast %cst_196 : f32 to vector<8x32xf32>
    %292 = arith.subf %291, %151 : vector<8x32xf32>
    %293 = arith.mulf %144, %292 : vector<8x32xf32>
    %cst_197 = arith.constant 1.000000e+00 : f32
    %294 = vector.broadcast %cst_197 : f32 to vector<8x32xf32>
    %295 = arith.addf %294, %293 : vector<8x32xf32>
    %296 = arith.mulf %151, %295 : vector<8x32xf32>
    %297 = arith.mulf %296, %278 : vector<8x32xf32>
    %cst_198 = arith.constant dense<0.000000e+00> : vector<8x32xf32>
    %298 = tpu.matmul %297, %286, %cst_198 {dimension_numbers = #tpu.dot_dimension_numbers<[1], [1], [0], [0], [0, 0, 1, 0], [], []>, precision = #tpu.contract_precision<fp32>} : vector<8x32xf32>, vector<32x32xf32>, vector<8x32xf32> -> vector<8x32xf32>
    %cst_199 = arith.constant dense<0.000000e+00> : vector<16x32xf32>
    %299 = tpu.matmul %17, %298, %cst_199 {dimension_numbers = #tpu.dot_dimension_numbers<[1], [0], [0], [1], [0, 0, 1, 1], [], []>, precision = #tpu.contract_precision<fp32>} : vector<16x8xf32>, vector<8x32xf32>, vector<16x32xf32> -> vector<16x32xf32>
    %cst_200 = arith.constant 0.223606795 : f32
    %300 = vector.broadcast %cst_200 : f32 to vector<16x32xf32>
    %301 = arith.mulf %299, %300 : vector<16x32xf32>
    %302 = arith.mulf %301, %128 : vector<16x32xf32>
    %303 = arith.mulf %301, %129 : vector<16x32xf32>
    %cst_201 = arith.constant dense<0.000000e+00> : vector<8x32xf32>
    %304 = tpu.matmul %27, %302, %cst_201 {dimension_numbers = #tpu.dot_dimension_numbers<[1], [0], [0], [1], [0, 0, 1, 1], [], []>, precision = #tpu.contract_precision<fp32>} : vector<8x16xf32>, vector<16x32xf32>, vector<8x32xf32> -> vector<8x32xf32>
    %cst_202 = arith.constant dense<0.000000e+00> : vector<8x32xf32>
    %305 = tpu.matmul %297, %288, %cst_202 {dimension_numbers = #tpu.dot_dimension_numbers<[1], [1], [0], [0], [0, 0, 1, 0], [], []>, precision = #tpu.contract_precision<fp32>} : vector<8x32xf32>, vector<32x32xf32>, vector<8x32xf32> -> vector<8x32xf32>
    %306 = vector.broadcast %5 : vector<8x1xf32> to vector<8x32xf32>
    %307 = arith.mulf %306, %305 : vector<8x32xf32>
    %cst_203 = arith.constant 1.000000e+00 : f32
    %308 = vector.broadcast %cst_203 : f32 to vector<8x1xf32>
    %309 = arith.subf %308, %5 : vector<8x1xf32>
    %cst_204 = arith.constant dense<0.000000e+00> : vector<8x32xf32>
    %310 = tpu.matmul %297, %290, %cst_204 {dimension_numbers = #tpu.dot_dimension_numbers<[1], [1], [0], [0], [0, 0, 1, 0], [], []>, precision = #tpu.contract_precision<fp32>} : vector<8x32xf32>, vector<32x32xf32>, vector<8x32xf32> -> vector<8x32xf32>
    %311 = vector.broadcast %309 : vector<8x1xf32> to vector<8x32xf32>
    %312 = arith.mulf %311, %310 : vector<8x32xf32>
    %313 = arith.addf %307, %312 : vector<8x32xf32>
    %cst_205 = arith.constant dense<0.000000e+00> : vector<16x64xf32>
    %314 = tpu.matmul %303, %284, %cst_205 {dimension_numbers = #tpu.dot_dimension_numbers<[1], [1], [0], [0], [0, 0, 1, 0], [], []>, precision = #tpu.contract_precision<fp32>} : vector<16x32xf32>, vector<64x32xf32>, vector<16x64xf32> -> vector<16x64xf32>
    %cst_206 = arith.constant 1.000000e+00 : f32
    %315 = vector.broadcast %cst_206 : f32 to vector<16x64xf32>
    %316 = arith.subf %315, %126 : vector<16x64xf32>
    %317 = arith.mulf %119, %316 : vector<16x64xf32>
    %cst_207 = arith.constant 1.000000e+00 : f32
    %318 = vector.broadcast %cst_207 : f32 to vector<16x64xf32>
    %319 = arith.addf %318, %317 : vector<16x64xf32>
    %320 = arith.mulf %126, %319 : vector<16x64xf32>
    %321 = arith.mulf %314, %320 : vector<16x64xf32>
    %cst_208 = arith.constant dense<0.000000e+00> : vector<16x64xf32>
    %322 = tpu.matmul %321, %282, %cst_208 {dimension_numbers = #tpu.dot_dimension_numbers<[1], [1], [0], [0], [0, 0, 1, 0], [], []>, precision = #tpu.contract_precision<fp32>} : vector<16x64xf32>, vector<64x64xf32>, vector<16x64xf32> -> vector<16x64xf32>
    %cst_209 = arith.constant 1.000000e+00 : f32
    %323 = vector.broadcast %cst_209 : f32 to vector<16x64xf32>
    %324 = arith.subf %323, %117 : vector<16x64xf32>
    %325 = arith.mulf %110, %324 : vector<16x64xf32>
    %cst_210 = arith.constant 1.000000e+00 : f32
    %326 = vector.broadcast %cst_210 : f32 to vector<16x64xf32>
    %327 = arith.addf %326, %325 : vector<16x64xf32>
    %328 = arith.mulf %117, %327 : vector<16x64xf32>
    %329 = arith.mulf %322, %328 : vector<16x64xf32>
    %cst_211 = arith.constant dense<0.000000e+00> : vector<16x8xf32>
    %330 = tpu.matmul %329, %280, %cst_211 {dimension_numbers = #tpu.dot_dimension_numbers<[1], [1], [0], [0], [0, 0, 1, 0], [], []>, precision = #tpu.contract_precision<fp32>} : vector<16x64xf32>, vector<8x64xf32>, vector<16x8xf32> -> vector<16x8xf32>
    %331 = arith.addf %276, %330 : vector<16x8xf32>
    %332 = arith.addf %278, %304 : vector<8x32xf32>
    %333 = arith.addf %332, %313 : vector<8x32xf32>
    %c0_212 = arith.constant 0 : index
    %c0_213 = arith.constant 0 : index
    %c0_214 = arith.constant 0 : index
    %334 = vector.load %arg7[%c0_212, %c0_213, %c0_214] : memref<3x8x64xf32, #tpu.memory_space<vmem>>, vector<1x8x64xf32>
    %335 = vector.shape_cast %334 : vector<1x8x64xf32> to vector<8x64xf32>
    %c0_215 = arith.constant 0 : index
    %c0_216 = arith.constant 0 : index
    %c0_217 = arith.constant 0 : index
    %336 = vector.load %arg8[%c0_215, %c0_216, %c0_217] : memref<3x64x64xf32, #tpu.memory_space<vmem>>, vector<1x64x64xf32>
    %337 = vector.shape_cast %336 : vector<1x64x64xf32> to vector<64x64xf32>
    %c0_218 = arith.constant 0 : index
    %c0_219 = arith.constant 0 : index
    %c0_220 = arith.constant 0 : index
    %338 = vector.load %arg9[%c0_218, %c0_219, %c0_220] : memref<3x64x32xf32, #tpu.memory_space<vmem>>, vector<1x64x32xf32>
    %339 = vector.shape_cast %338 : vector<1x64x32xf32> to vector<64x32xf32>
    %c0_221 = arith.constant 0 : index
    %c0_222 = arith.constant 0 : index
    %c0_223 = arith.constant 0 : index
    %340 = vector.load %arg10[%c0_221, %c0_222, %c0_223] : memref<3x32x32xf32, #tpu.memory_space<vmem>>, vector<1x32x32xf32>
    %341 = vector.shape_cast %340 : vector<1x32x32xf32> to vector<32x32xf32>
    %cst_224 = arith.constant 1.000000e+00 : f32
    %342 = vector.broadcast %cst_224 : f32 to vector<8x32xf32>
    %343 = arith.subf %342, %95 : vector<8x32xf32>
    %344 = arith.mulf %88, %343 : vector<8x32xf32>
    %cst_225 = arith.constant 1.000000e+00 : f32
    %345 = vector.broadcast %cst_225 : f32 to vector<8x32xf32>
    %346 = arith.addf %345, %344 : vector<8x32xf32>
    %347 = arith.mulf %95, %346 : vector<8x32xf32>
    %348 = arith.mulf %347, %333 : vector<8x32xf32>
    %cst_226 = arith.constant dense<0.000000e+00> : vector<8x32xf32>
    %349 = tpu.matmul %348, %341, %cst_226 {dimension_numbers = #tpu.dot_dimension_numbers<[1], [1], [0], [0], [0, 0, 1, 0], [], []>, precision = #tpu.contract_precision<fp32>} : vector<8x32xf32>, vector<32x32xf32>, vector<8x32xf32> -> vector<8x32xf32>
    %cst_227 = arith.constant dense<0.000000e+00> : vector<16x32xf32>
    %350 = tpu.matmul %17, %349, %cst_227 {dimension_numbers = #tpu.dot_dimension_numbers<[1], [0], [0], [1], [0, 0, 1, 1], [], []>, precision = #tpu.contract_precision<fp32>} : vector<16x8xf32>, vector<8x32xf32>, vector<16x32xf32> -> vector<16x32xf32>
    %cst_228 = arith.constant 0.223606795 : f32
    %351 = vector.broadcast %cst_228 : f32 to vector<16x32xf32>
    %352 = arith.mulf %350, %351 : vector<16x32xf32>
    %353 = arith.mulf %352, %73 : vector<16x32xf32>
    %cst_229 = arith.constant dense<0.000000e+00> : vector<16x64xf32>
    %354 = tpu.matmul %353, %339, %cst_229 {dimension_numbers = #tpu.dot_dimension_numbers<[1], [1], [0], [0], [0, 0, 1, 0], [], []>, precision = #tpu.contract_precision<fp32>} : vector<16x32xf32>, vector<64x32xf32>, vector<16x64xf32> -> vector<16x64xf32>
    %cst_230 = arith.constant 1.000000e+00 : f32
    %355 = vector.broadcast %cst_230 : f32 to vector<16x64xf32>
    %356 = arith.subf %355, %70 : vector<16x64xf32>
    %357 = arith.mulf %63, %356 : vector<16x64xf32>
    %cst_231 = arith.constant 1.000000e+00 : f32
    %358 = vector.broadcast %cst_231 : f32 to vector<16x64xf32>
    %359 = arith.addf %358, %357 : vector<16x64xf32>
    %360 = arith.mulf %70, %359 : vector<16x64xf32>
    %361 = arith.mulf %354, %360 : vector<16x64xf32>
    %cst_232 = arith.constant dense<0.000000e+00> : vector<16x64xf32>
    %362 = tpu.matmul %361, %337, %cst_232 {dimension_numbers = #tpu.dot_dimension_numbers<[1], [1], [0], [0], [0, 0, 1, 0], [], []>, precision = #tpu.contract_precision<fp32>} : vector<16x64xf32>, vector<64x64xf32>, vector<16x64xf32> -> vector<16x64xf32>
    %cst_233 = arith.constant 1.000000e+00 : f32
    %363 = vector.broadcast %cst_233 : f32 to vector<16x64xf32>
    %364 = arith.subf %363, %61 : vector<16x64xf32>
    %365 = arith.mulf %54, %364 : vector<16x64xf32>
    %cst_234 = arith.constant 1.000000e+00 : f32
    %366 = vector.broadcast %cst_234 : f32 to vector<16x64xf32>
    %367 = arith.addf %366, %365 : vector<16x64xf32>
    %368 = arith.mulf %61, %367 : vector<16x64xf32>
    %369 = arith.mulf %362, %368 : vector<16x64xf32>
    %cst_235 = arith.constant dense<0.000000e+00> : vector<16x8xf32>
    %370 = tpu.matmul %369, %335, %cst_235 {dimension_numbers = #tpu.dot_dimension_numbers<[1], [1], [0], [0], [0, 0, 1, 0], [], []>, precision = #tpu.contract_precision<fp32>} : vector<16x64xf32>, vector<8x64xf32>, vector<16x8xf32> -> vector<16x8xf32>
    %371 = arith.addf %331, %370 : vector<16x8xf32>
    %c0_236 = arith.constant 0 : index
    %c0_237 = arith.constant 0 : index
    %372 = vector.load %arg15[%c0_236, %c0_237] : memref<16x8xf32, #tpu.memory_space<vmem>>, vector<16x8xf32>
    tpu.vector_store %arg15[%c0_236, %c0_237], %371 {strides = array<i32>} : memref<16x8xf32, #tpu.memory_space<vmem>>, vector<16x8xf32>,
    return
  }
}

</mosaic_0001>

<bundles_post_ra>
// kernel: forcenet_forward.1
= control target key start
LH: loop header
LB: loop body
LE: loop exit
PB: predicated region body
PF: predicated region fallthrough
CT: control target
= control target key end

     0   :  { %vm161_vm0 = vcmask 64512   ;;  %vm671_vm2 = vcmask 523264   ;;  %vm2819_vm5 = vcmask 261120   ;;  %vm32104_vm6 = vmmov 0   ;;  %s36170_s7 = inlined_call_operand.vmem [shape: f32[3,8,64], index: 7, kind: input, shape index: {}]   ;;  %s36171_s0 = inlined_call_operand.vmem [shape: f32[16,8], index: 0, kind: input, shape index: {}]   ;;  %s36172_s8 = inlined_call_operand.vmem [shape: f32[3,64,64], index: 8, kind: input, shape index: {}]   ;;  %s36173_s1 = inlined_call_operand.vmem [shape: s32[16,1], index: 1, kind: input, shape index: {}]   ;;  %s36174_s5 = inlined_call_operand.vmem [shape: s32[8,1], index: 5, kind: input, shape index: {}]   ;;  %s36175_s3 = inlined_call_operand.vmem [shape: s32[16,1], index: 3, kind: input, shape index: {}]   ;;  %s36176_s9 = inlined_call_operand.vmem [shape: f32[3,64,32], index: 9, kind: input, shape index: {}]   ;;  %s36177_s6 = inlined_call_operand.vmem [shape: f32[2,32], index: 6, kind: input, shape index: {}]   ;;  %s36178_s11 = inlined_call_operand.vmem [shape: f32[3,2,32,32], index: 11, kind: input, shape index: {}]   ;;  %s36179_s4 = inlined_call_operand.vmem [shape: s32[1,16], index: 4, kind: input, shape index: {}]   ;;  %s36180_s10 = inlined_call_operand.vmem [shape: f32[3,32,32], index: 10, kind: input, shape index: {}]   ;;  %s36181_s12 = inlined_call_operand.vmem [shape: f32[32,16], index: 12, kind: input, shape index: {}]   ;;  %s36182_s13 = inlined_call_operand.vmem [shape: f32[1,16], index: 13, kind: input, shape index: {}]   ;;  %s36183_s14 = inlined_call_operand.vmem [shape: f32[8,1], index: 14, kind: output, shape index: {0}]   ;;  %s36184_s2 = inlined_call_operand.vmem [shape: s32[1,16], index: 2, kind: input, shape index: {}]   ;;  %s36185_s15 = inlined_call_operand.vmem [shape: f32[16,8], index: 15, kind: output, shape index: {1}]  }
   0x1   :  { %v131_v0 = vld [vmem:[%s36170_s7] sm:$0xff]  ;;  %v50_v2 = vld [vmem:[%s36171_s0 + $0x8] sm:$0xff]  ;;  %v134_v25 = vld [vmem:[%s36172_s8 + $0x10] sm:$0xff]  ;;  %vm2355_vm8 = vcmask 130048   ;;  %vm13084_vm11 = vcmask 7168  }
   0x2   :  { %v49_v1 = vld [vmem:[%s36171_s0] sm:$0xff]  ;;  %v169_v3 = vand.u32 4294901760, %v131_v0  ;;  %v166_v5 = vsel %vm161_vm0, %v50_v2, 0  ;;  %v133_v21 = vld [vmem:[%s36172_s8 + $0x8] sm:$0xff]  ;;  %v135_v26 = vld [vmem:[%s36172_s8 + $0x18] sm:$0xff]  ;;  %v685_v27 = vand.u32 4294901760, %v134_v25 }
   0x3   :  { %v163_v4 = vsel %vm161_vm0, %v49_v1, 0  ;;  %v32198_v7 = vand.u32 4294901760, %v166_v5  ;;  %v132_v20 = vld [vmem:[%s36172_s8] sm:$0xff]  ;;  %v682_v23 = vand.u32 4294901760, %v133_v21  ;;  %v688_v28 = vand.u32 4294901760, %v135_v26  ;;  %v137_v31 = vld [vmem:[%s36172_s8 + $0x28] sm:$0xff] }
   0x4   :  { %v32196_v6 = vand.u32 4294901760, %v163_v4  ;;  %26563 = vmatprep.subr.mxu0 %v169_v3  ;;  %v256_v8 = vsub.f32 %v131_v0, %v169_v3  ;;  %v679_v22 = vand.u32 4294901760, %v132_v20  ;;  %v136_v30 = vld [vmem:[%s36172_s8 + $0x20] sm:$0xff]  ;;  %v694_v33 = vand.u32 4294901760, %v137_v31  ;;  %v138_v37 = vld [vmem:[%s36172_s8 + $0x30] sm:$0xff]  ;;  %v139_v38 = vld [vmem:[%s36172_s8 + $0x38] sm:$0xff] }
   0x5   :  { %36240 = vst [vmem:[#allocation3_spill] sm:$0xff] %v32198_v7  ;;  %26564 = vmatpush3.msra.mxu0 %v169_v3  ;;  %v32204_v10 = vsub.f32 %v166_v5, %v32198_v7  ;;  %v32248_v29 = vpack.c.bf16 %v688_v28, %v685_v27  ;;  %v691_v32 = vand.u32 4294901760, %v136_v30  ;;  %v780_v36 = vsub.f32 %v133_v21, %v682_v23 }
   0x6   :  { %36239 = vst [vmem:[#allocation2_spill] sm:$0xff] %v32196_v6  ;;  %v32201_v9 = vsub.f32 %v163_v4, %v32196_v6  ;;  %v257_v11 = vand.u32 4294901760, %v256_v8  ;;  %v32238_v24 = vpack.c.bf16 %v682_v23, %v679_v22  ;;  %v773_v35 = vsub.f32 %v132_v20, %v679_v22 }
   0x7   :  { %36242 = vst [vmem:[#allocation5_spill] sm:$0xff] %v32204_v10  ;;  %v32210_v13 = vand.u32 4294901760, %v32204_v10  ;;  %v32258_v34 = vpack.c.bf16 %v694_v33, %v691_v32  ;;  %v697_v39 = vand.u32 4294901760, %v138_v37  ;;  %v700_v40 = vand.u32 4294901760, %v139_v38 }
   0x8   :  { %36241 = vst [vmem:[#allocation4_spill] sm:$0xff] %v32201_v9  ;;  %v32207_v12 = vand.u32 4294901760, %v32201_v9  ;;  %v258_v14 = vsub.f32 %v256_v8, %v257_v11  ;;  %29690 = vmatprep.subr.bf16.mxu1 %v32238_v24  ;;  %v774_v41 = vand.u32 4294901760, %v773_v35  ;;  %v781_v42 = vand.u32 4294901760, %v780_v36 }
   0x9   :  { %36244 = vst [vmem:[#allocation7_spill] sm:$0xff] %v32210_v13  ;;  %v247_v16 = vsub.f32 %v32204_v10, %v32210_v13  ;;  %29692 = vmatpush3.bf16.msra.mxu1 %v32238_v24  ;;  %v32268_v43 = vpack.c.bf16 %v700_v40, %v697_v39  ;;  %v787_v46 = vsub.f32 %v134_v25, %v685_v27 }
   0xa   :  { %36243 = vst [vmem:[#allocation6_spill] sm:$0xff] %v32207_v12  ;;  %v237_v15 = vsub.f32 %v32201_v9, %v32207_v12  ;;  %v259_v17 = vand.u32 4294901760, %v258_v14  ;;  %29694 = vmatprep.subr.bf16.mxu1 %v32248_v29  ;;  %v775_v44 = vsub.f32 %v773_v35, %v774_v41  ;;  %v782_v45 = vsub.f32 %v780_v36, %v781_v42 }
   0xb   :  { %v32218_v19 = vand.u32 4294901760, %v247_v16  ;;  %v794_v47 = vsub.f32 %v135_v26, %v688_v28  ;;  %v788_v50 = vand.u32 4294901760, %v787_v46  ;;  %v801_v55 = vsub.f32 %v136_v30, %v691_v32  ;;  %v51_v32 = vld [vmem:[%s36174_s5] sm:$0xff] }
   0xc   :  { %v32216_v18 = vand.u32 4294901760, %v237_v15  ;;  %26568 = vmatprep.subr.mxu0 %v259_v17  ;;  %v776_v48 = vand.u32 4294901760, %v775_v44  ;;  %v783_v49 = vand.u32 4294901760, %v782_v45  ;;  %v808_v56 = vsub.f32 %v137_v31, %v694_v33  ;;  %v59_v31 = vld [vmem:[%s36173_s1] sm:$0xff] }
   0xd   :  { %36246 = vst [vmem:[#allocation9_spill] sm:$0xff] %v32218_v19  ;;  %29696 = vmatpush3.bf16.msra.mxu1 %v32248_v29  ;;  %v795_v51 = vand.u32 4294901760, %v794_v47  ;;  %v789_v53 = vsub.f32 %v787_v46, %v788_v50  ;;  %v802_v59 = vand.u32 4294901760, %v801_v55  ;;  %v815_v0 = vsub.f32 %v138_v37, %v697_v39  ;;  %v73_v44 = vld [vmem:[%s36175_s3] sm:$0xff] }
   0xe   :  { %36245 = vst [vmem:[#allocation8_spill] sm:$0xff] %v32216_v18  ;;  %26565 = vmatprep.mubr.f32.mxu0 %v32216_v18  ;;  %29698 = vmatprep.subr.bf16.mxu1 %v32258_v34  ;;  %v32272_v52 = vpack.c.bf16 %v783_v49, %v776_v48  ;;  %v809_v60 = vand.u32 4294901760, %v808_v56  ;;  %v822_v1 = vsub.f32 %v139_v38, %v700_v40  ;;  %v32101_v30 = vmov 0  }
   0xf   :  { %26566 = vmatmul.mubr.f32.vlgmr.msra.gmra.mrb[0].mxu0 %v32218_v19  ;;  %v796_v54 = vsub.f32 %v794_v47, %v795_v51  ;;  %v790_v57 = vand.u32 4294901760, %v789_v53  ;;  %v803_v62 = vsub.f32 %v801_v55, %v802_v59  ;;  %v816_v4 = vand.u32 4294901760, %v815_v0  ;;  %32039 = vset.pattern.permute.xlu0 %v32101_v30 }
  0x10   :  { %26569 = vmatpush3.msra.mxu0 %v259_v17  ;;  %26570 = vmatprep.mubr.f32.mxu0 %v32196_v6  ;;  %v810_v63 = vsub.f32 %v808_v56, %v809_v60  ;;  %v823_v5 = vand.u32 4294901760, %v822_v1  ;;  %v32281_v20 = vpack.c.bf16 %v780_v36, %v773_v35  ;;  %v32283_v21 = vpack.c.bf16 %v794_v47, %v787_v46  ;;  %v60_v36 = vld [vmem:[%s36173_s1 + $0x8] sm:$0xff] }
  0x11   :  { %26573 = vmatprep.subr.mxu0 %v256_v8  ;;  %29700 = vmatpush3.bf16.msra.mxu1 %v32258_v34  ;;  %v797_v58 = vand.u32 4294901760, %v796_v54  ;;  %v804_v2 = vand.u32 4294901760, %v803_v62  ;;  %v32285_v22 = vpack.c.bf16 %v808_v56, %v801_v55  ;;  %v32287_v23 = vpack.c.bf16 %v822_v1, %v815_v0  ;;  %v74_v46 = vld [vmem:[%s36175_s3 + $0x8] sm:$0xff] }
  0x12   :  { %29702 = vmatprep.subr.bf16.mxu1 %v32268_v43  ;;  %v824_v14 = vsub.f32 %v822_v1, %v823_v5  ;;  %v32289_v25 = vpack.c.bf16 %v781_v42, %v774_v41  ;;  %v32291_v26 = vpack.c.bf16 %v795_v51, %v788_v50  ;;  %v32293_v27 = vpack.c.bf16 %v809_v60, %v802_v59 }
  0x13   :  { %v32275_v61 = vpack.c.bf16 %v797_v58, %v790_v57  ;;  %v32295_v28 = vpack.c.bf16 %v823_v5, %v816_v4  ;;  %32040 = vset.pattern.permute.xlu1 %v32101_v30  ;;  %62 = vperm.xlu0 %32039, %v59_v31   ;;  %vm52_vm1 = vcmp.eq.s32.totalorder %v51_v32, 0  ;;  %v36191_v33 = vmov 0.0  }
  0x14   :  { %v825_v16 = vand.u32 4294901760, %v824_v14  ;;  %v24817_v35 = vsel %vm52_vm1, 1.0, %v36191_v33 }
  0x15   :  { %29704 = vmatpush3.bf16.msra.mxu1 %v32268_v43  ;;  %111 = vperm.xlu1 %32040, %v24817_v35   ;;  %v119_v38 = vsub.f32 1.0, %v24817_v35  ;;  %v144_v35 = vld [vmem:[%s36176_s9 + $0x20] sm:$0xff] }
  0x16   :  { %29706 = vmatprep.subr.bf16.mxu1 %v32272_v52 }
  0x17   :  { %26571 = vmatmul.mubr.f32.vlgmr.msra.gmra.mrb[0].mxu0 %v32198_v7  ;;  %65 = vperm.xlu0 %32039, %v60_v36   ;;  %v145_v36 = vld [vmem:[%s36176_s9 + $0x28] sm:$0xff] }
  0x18   :  { %26574 = vmatpush3.msra.mxu0 %v256_v8  ;;  %26575 = vmatprep.mubr.f32.mxu0 %v32201_v9 }
  0x19   :  { %26578 = vmatprep.subr.mxu0 %v169_v3  ;;  %122 = vperm.xlu1 %32040, %v119_v38  }
  0x1b   :  { %76 = vperm.xlu0 %32039, %v73_v44  }
  0x1d   :  { %79 = vperm.xlu1 %32040, %v74_v46  }
  0x1f   :  { %26576 = vmatmul.mubr.f32.vlgmr.msra.gmra.mrb[0].mxu0 %v32204_v10 }
  0x20   :  { %26579 = vmatpush3.msra.mxu0 %v169_v3  ;;  %26580 = vmatprep.mubr.f32.mxu0 %v32207_v12 }
  0x21   :  { %26583 = vmatprep.subr.mxu0 %v257_v11 }
  0x27   :  { %26581 = vmatmul.mubr.f32.vlgmr.msra.gmra.mrb[0].mxu0 %v32210_v13 }
  0x28   :  { %26584 = vmatpush3.msra.mxu0 %v257_v11  ;;  %26585 = vmatprep.mubr.f32.mxu0 %v32196_v6  ;;  %v817_v11 = vsub.f32 %v815_v0, %v816_v4 }
  0x29   :  { %26588 = vmatprep.subr.mxu0 %v169_v3 }
  0x2a   :  { %v818_v15 = vand.u32 4294901760, %v817_v11 }
  0x2c   :  { %v32279_v17 = vpack.c.bf16 %v825_v16, %v818_v15 }
  0x2f   :  { %26586 = vmatmul.mubr.f32.vlgmr.msra.gmra.mrb[0].mxu0 %v32198_v7 }
  0x30   :  { %26589 = vmatpush3.msra.mxu0 %v169_v3  ;;  %26590 = vmatprep.mubr.f32.mxu0 %v32196_v6  ;;  %v811_v3 = vand.u32 4294901760, %v810_v63 }
  0x32   :  { %v32277_v8 = vpack.c.bf16 %v811_v3, %v804_v2 }
  0x37   :  { %26591 = vmatmul.mubr.f32.vlgmr.msra.gmra.mrb[0].mxu0 %v32198_v7 }
 0x10a   :  { %v26592_v37 = vpop.f32.mrb[0].mxu0 }
 0x10b   :  { %v658_v39 = vsub.f32 0.0, %v26592_v37  ;;  %v647_v40 = vpop.f32.mrb[1].mxu0 }
 0x10c   :  { %v657_v41 = vsub.f32 0.0, %v647_v40 }
 0x10d   :  { %v661_v42 = vmul.f32 1.442695, %v658_v39 }
 0x10e   :  { %v659_v45 = vmul.f32 1.442695, %v657_v41  ;;  %v1291_v41 = vand.u32 4294901760, %v144_v35 }
 0x10f   :  { %32041 = vpow2.f32 %v661_v42  ;;  %v1294_v42 = vand.u32 4294901760, %v145_v36 }
 0x110   :  { %32043 = vpow2.f32 %v659_v45 }
 0x119   :  { %v32042_v47 = vpop.eup %32041 }
 0x11a   :  { %v32044_v48 = vpop.eup %32043  ;;  %v664_v49 = vadd.f32 1.0, %v32042_v47  ;;  %v32406_v47 = vsub.f32 %v144_v35, %v1291_v41 }
 0x11b   :  { %v663_v50 = vadd.f32 1.0, %v32044_v48  ;;  %v32408_v48 = vsub.f32 %v145_v36, %v1294_v42 }
 0x11c   :  { %32045 = vrcp.f32 %v664_v49  ;;  %v146_v49 = vld [vmem:[%s36176_s9 + $0x30] sm:$0xff] }
 0x11d   :  { %32047 = vrcp.f32 %v663_v50  ;;  %v147_v50 = vld [vmem:[%s36176_s9 + $0x38] sm:$0xff] }
 0x126   :  { %v32046_v51 = vpop.eup %32045 }
 0x127   :  { %v32048_v53 = vpop.eup %32047  ;;  %v670_v54 = vmul.f32 %v32046_v51, %v26592_v37  ;;  %v24298_v55 = vsub.f32 1.0, %v32046_v51 }
 0x128   :  { %v669_v56 = vmul.f32 %v32048_v53, %v647_v40  ;;  %v24297_v57 = vsub.f32 1.0, %v32048_v53 }
 0x129   :  { %v676_v58 = vsel %vm671_vm2, %v670_v54, 0  ;;  %v24300_v59 = vmul.f32 %v26592_v37, %v24298_v55  ;;  %v1297_v54 = vand.u32 4294901760, %v146_v49  ;;  %v1300_v55 = vand.u32 4294901760, %v147_v50 }
 0x12a   :  { %v32314_v60 = vand.u32 4294901760, %v676_v58  ;;  %v673_v62 = vsel %vm671_vm2, %v669_v56, 0  ;;  %v24299_v63 = vmul.f32 %v24297_v57, %v647_v40  ;;  %v1402_v56 = vand.u32 4294901760, %v32406_v47 }
 0x12b   :  { %v24302_v0 = vadd.f32 1.0, %v24300_v59  ;;  %v751_v1 = vand.u32 4294901760, %v673_v62  ;;  %v1409_v57 = vand.u32 4294901760, %v32408_v48  ;;  %v1415_v59 = vsub.f32 %v146_v49, %v1297_v54 }
 0x12c   :  { %v762_v2 = vsub.f32 %v676_v58, %v32314_v60  ;;  %v24301_v3 = vadd.f32 1.0, %v24299_v63 }
 0x12d   :  { %v752_v4 = vsub.f32 %v673_v62, %v751_v1  ;;  %v32318_v5 = vmul.f32 %v32046_v51, %v24302_v0  ;;  %v1403_v62 = vsub.f32 %v32406_v47, %v1402_v56  ;;  %v1410_v63 = vsub.f32 %v32408_v48, %v1409_v57 }
 0x12e   :  { %v763_v11 = vand.u32 4294901760, %v762_v2  ;;  %v32320_v14 = vmul.f32 %v32048_v53, %v24301_v3  ;;  %v1416_v0 = vand.u32 4294901760, %v1415_v59 }
 0x12f   :  { %36247 = vst [vmem:[#allocation10_spill] sm:$0xff] %v32318_v5  ;;  %v753_v15 = vand.u32 4294901760, %v752_v4  ;;  %v1411_v3 = vand.u32 4294901760, %v1410_v63 }
 0x130   :  { %36248 = vst [vmem:[#allocation11_spill] sm:$0xff] %v32320_v14  ;;  %v764_v16 = vsub.f32 %v762_v2, %v763_v11 }
 0x131   :  { %v754_v30 = vsub.f32 %v752_v4, %v753_v15 }
 0x132   :  { %v765_v32 = vand.u32 4294901760, %v764_v16 }
 0x133   :  { %v755_v31 = vand.u32 4294901760, %v754_v30 }
 0x135   :  { %26609 = vmatprep.mubr.f32.mxu1 %v755_v31 }
 0x136   :  { %26610 = vmatmul.mubr.f32.vlgmr.msra.gmra.mrb[0].mxu1 %v765_v32 }
 0x137   :  { %29708 = vmatpush3.bf16.msra.mxu1 %v32272_v52  ;;  %26628 = vmatprep.mubr.f32.mxu1 %v751_v1  ;;  %v140_v52 = vld [vmem:[%s36176_s9] sm:$0xff] }
 0x138   :  { %29710 = vmatprep.subr.bf16.mxu1 %v32275_v61 }
 0x13b   :  { %29712 = vmatpush3.bf16.msra.mxu1 %v32275_v61  ;;  %v1279_v61 = vand.u32 4294901760, %v140_v52 }
 0x13c   :  { %29714 = vmatprep.subr.bf16.mxu1 %v32277_v8 }
 0x13f   :  { %29716 = vmatpush3.bf16.msra.mxu1 %v32277_v8  ;;  %v32370_v8 = vsub.f32 %v140_v52, %v1279_v61 }
 0x140   :  { %29718 = vmatprep.subr.bf16.mxu1 %v32279_v17 }
 0x143   :  { %29720 = vmatpush3.bf16.msra.mxu1 %v32279_v17 }
 0x144   :  { %29722 = vmatprep.subr.bf16.mxu1 %v32281_v20 }
 0x146   :  { %26629 = vmatmul.mubr.f32.vlgmr.msra.gmra.mrb[0].mxu1 %v32314_v60 }
 0x147   :  { %29724 = vmatpush3.bf16.msra.mxu1 %v32281_v20  ;;  %26647 = vmatprep.mubr.f32.mxu1 %v752_v4  ;;  %v1374_v20 = vand.u32 4294901760, %v32370_v8  ;;  %v1417_v4 = vsub.f32 %v1415_v59, %v1416_v0 }
 0x148   :  { %29726 = vmatprep.subr.bf16.mxu1 %v32283_v21 }
 0x149   :  { %v1418_v30 = vand.u32 4294901760, %v1417_v4 }
 0x14b   :  { %29728 = vmatpush3.bf16.msra.mxu1 %v32283_v21 }
 0x14c   :  { %29730 = vmatprep.subr.bf16.mxu1 %v32285_v22 }
 0x14f   :  { %29732 = vmatpush3.bf16.msra.mxu1 %v32285_v22 }
 0x150   :  { %29734 = vmatprep.subr.bf16.mxu1 %v32287_v23 }
 0x153   :  { %29736 = vmatpush3.bf16.msra.mxu1 %v32287_v23 }
 0x154   :  { %29738 = vmatprep.subr.bf16.mxu1 %v32238_v24 }
 0x156   :  { %26648 = vmatmul.mubr.f32.vlgmr.msra.gmra.mrb[0].mxu1 %v762_v2  ;;  %v1404_v2 = vand.u32 4294901760, %v1403_v62 }
 0x157   :  { %29740 = vmatpush3.bf16.msra.mxu1 %v32238_v24  ;;  %26666 = vmatprep.mubr.f32.mxu1 %v753_v15 }
 0x158   :  { %29742 = vmatprep.subr.bf16.mxu1 %v32248_v29  ;;  %v29809_v16 = vpack.c.bf16 %v1411_v3, %v1404_v2 }
 0x15b   :  { %29744 = vmatpush3.bf16.msra.mxu1 %v32248_v29 }
 0x15c   :  { %29746 = vmatprep.subr.bf16.mxu1 %v32258_v34 }
 0x15f   :  { %29748 = vmatpush3.bf16.msra.mxu1 %v32258_v34 }
 0x160   :  { %29750 = vmatprep.subr.bf16.mxu1 %v32268_v43 }
 0x163   :  { %29752 = vmatpush3.bf16.msra.mxu1 %v32268_v43 }
 0x164   :  { %29754 = vmatprep.subr.bf16.mxu1 %v32289_v25 }
 0x166   :  { %26667 = vmatmul.mubr.f32.vlgmr.msra.gmra.mrb[0].mxu1 %v763_v11 }
 0x167   :  { %29756 = vmatpush3.bf16.msra.mxu1 %v32289_v25  ;;  %26685 = vmatprep.mubr.f32.mxu1 %v751_v1  ;;  %v1375_v25 = vsub.f32 %v32370_v8, %v1374_v20 }
 0x168   :  { %29758 = vmatprep.subr.bf16.mxu1 %v32291_v26 }
 0x169   :  { %v1376_v37 = vand.u32 4294901760, %v1375_v25  ;;  %v32438_v25 = vpop.permute.xlu1 %111 }
 0x16b   :  { %29760 = vmatpush3.bf16.msra.mxu1 %v32291_v26 }
 0x16c   :  { %29762 = vmatprep.subr.bf16.mxu1 %v32293_v27 }
 0x16f   :  { %29764 = vmatpush3.bf16.msra.mxu1 %v32293_v27 }
 0x170   :  { %29766 = vmatprep.subr.bf16.mxu1 %v32295_v28 }
 0x173   :  { %29768 = vmatpush3.bf16.msra.mxu1 %v32295_v28 }
 0x174   :  { %29770 = vmatprep.subr.bf16.mxu1 %v32238_v24 }
 0x176   :  { %26686 = vmatmul.mubr.f32.vlgmr.msra.gmra.mrb[0].mxu1 %v32314_v60 }
 0x177   :  { %29772 = vmatpush3.bf16.msra.mxu1 %v32238_v24  ;;  %26704 = vmatprep.mubr.f32.mxu1 %v751_v1  ;;  %v141_v24 = vld [vmem:[%s36176_s9 + $0x8] sm:$0xff] }
 0x178   :  { %29774 = vmatprep.subr.bf16.mxu1 %v32248_v29 }
 0x17b   :  { %29776 = vmatpush3.bf16.msra.mxu1 %v32248_v29  ;;  %v1282_v29 = vand.u32 4294901760, %v141_v24 }
 0x17c   :  { %29778 = vmatprep.subr.bf16.mxu1 %v32258_v34 }
 0x17d   :  { %v32372_v17 = vsub.f32 %v141_v24, %v1282_v29  ;;  %v32420_v15 = vpack.c.bf16 %v1282_v29, %v1279_v61  ;;  %v55_v24 = vlaneseq  ;;  %v32434_v29 = vpack.c.bf16 %v1294_v42, %v1291_v41 }
 0x17f   :  { %29780 = vmatpush3.bf16.msra.mxu1 %v32258_v34  ;;  %v142_v34 = vld [vmem:[%s36176_s9 + $0x10] sm:$0xff]  ;;  %v1381_v21 = vand.u32 4294901760, %v32372_v17  ;;  %v32432_v61 = vpack.c.bf16 %v32372_v17, %v32370_v8 }
 0x180   :  { %29782 = vmatprep.subr.bf16.mxu1 %v32268_v43  ;;  %v1285_v22 = vand.u32 4294901760, %v142_v34 }
 0x181   :  { %v1382_v26 = vsub.f32 %v32372_v17, %v1381_v21  ;;  %v32492_v17 = vld [vmem:[%s36178_s11 + $0x20] sm:$0xff] }
 0x182   :  { %v32388_v27 = vsub.f32 %v142_v34, %v1285_v22  ;;  %v32427_v34 = vshrl.u32 %v55_v24, 7 }
 0x183   :  { %29784 = vmatpush3.bf16.msra.mxu1 %v32268_v43  ;;  %v143_v43 = vld [vmem:[%s36176_s9 + $0x18] sm:$0xff]  ;;  %v1383_v38 = vand.u32 4294901760, %v1382_v26 }
 0x184   :  { %v1288_v23 = vand.u32 4294901760, %v143_v43  ;;  %v1388_v39 = vand.u32 4294901760, %v32388_v27  ;;  %29786 = vmatprep.subr.bf16.mxu1 %v32420_v15  ;;  %36249 = vst [vmem:[#allocation12_spill] sm:$0xff] %v32427_v34  ;;  %v127_v35 = vsub.s32 1, %v32427_v34 }
 0x185   :  { %v29801_v44 = vpack.c.bf16 %v1383_v38, %v1376_v37  ;;  %v32456_v37 = vpop.permute.xlu1 %122 }
 0x186   :  { %26705 = vmatmul.mubr.f32.vlgmr.msra.gmra.mrb[0].mxu1 %v32314_v60  ;;  %v32390_v28 = vsub.f32 %v143_v43, %v1288_v23  ;;  %v1389_v45 = vsub.f32 %v32388_v27, %v1388_v39  ;;  %v1422_v60 = vsub.f32 %v147_v50, %v1300_v55  ;;  %v32424_v52 = vpack.c.bf16 %v1288_v23, %v1285_v22  ;;  %v108_v22 = vld [vmem:[%s36177_s6] sm:$0x3] }
 0x187   :  { %29802 = vmatprep.subr.bf16.mxu0 %v29801_v44  ;;  %29788 = vmatpush3.bf16.msra.mxu1 %v32420_v15  ;;  %v32436_v43 = vpack.c.bf16 %v1300_v55, %v1297_v54  ;;  %v32445_v23 = vsub.s32 0, %v32427_v34  ;;  %v128_v41 = vrot.slane %v108_v22, %v127_v35  ;;  %v32477_v50 = vpack.c.bf16 %v1381_v21, %v1374_v20  ;;  %v32497_v20 = vld [vmem:[%s36178_s11 + $0x28] sm:$0xff] }
 0x188   :  { %v1395_v40 = vand.u32 4294901760, %v32390_v28  ;;  %v1390_v51 = vand.u32 4294901760, %v1389_v45  ;;  %29804 = vmatpush3.bf16.msra.mxu0 %v29801_v44  ;;  %v1423_v1 = vand.u32 4294901760, %v1422_v60  ;;  %29790 = vmatprep.subr.bf16.mxu1 %v32424_v52  ;;  %v32453_v36 = vpack.c.bf16 %v32390_v28, %v32388_v27 }
 0x189   :  { %36250 = vst [vmem:[#allocation13_spill] sm:$0xff] %v32445_v23  ;;  %v117_v26 = vrot.slane %v108_v22, %v32445_v23  ;;  %v129_v42 = vmul.f32 %v128_v41, %v32456_v37  ;;  %v32463_v44 = vpack.c.bf16 %v32408_v48, %v32406_v47  ;;  %v32485_v48 = vpack.c.bf16 %v1409_v57, %v1402_v56 }
 0x18a   :  { %v1396_v46 = vsub.f32 %v32390_v28, %v1395_v40  ;;  %v1424_v11 = vsub.f32 %v1422_v60, %v1423_v1  ;;  %v32483_v47 = vpack.c.bf16 %v1395_v40, %v1388_v39  ;;  %v3310_v21 = vand.u32 4294901760, %v32492_v17  ;;  %v32504_v28 = vld [vmem:[%s36178_s11 + $0x30] sm:$0xff]  ;;  %v32509_v39 = vld [vmem:[%s36178_s11 + $0x38] sm:$0xff] }
 0x18b   :  { %29792 = vmatpush3.bf16.msra.mxu1 %v32424_v52  ;;  %v118_v38 = vmul.f32 %v117_v26, %v32438_v25  ;;  %v36188_v27 = vand.u32 4294901760, %v32497_v20  ;;  %v36187_v57 = vand.u32 4294901760, %v32504_v28 }
 0x18c   :  { %v1397_v53 = vand.u32 4294901760, %v1396_v46  ;;  %v1425_v31 = vand.u32 4294901760, %v1424_v11  ;;  %29794 = vmatprep.subr.bf16.mxu1 %v32434_v29  ;;  %v32467_v46 = vpack.c.bf16 %v1422_v60, %v1415_v59  ;;  %v32514_v40 = vsub.f32 %v32492_v17, %v3310_v21 }
 0x18d   :  { %v32465_v45 = vadd.f32 %v129_v42, %v118_v38  ;;  %v32519_v56 = vsub.f32 %v32497_v20, %v36188_v27  ;;  %v36186_v60 = vand.u32 4294901760, %v32509_v39  ;;  %v32526_v62 = vsub.f32 %v32504_v28, %v36187_v57 }
 0x18e   :  { %v29805_v58 = vpack.c.bf16 %v1397_v53, %v1390_v51  ;;  %v29813_v32 = vpack.c.bf16 %v1425_v31, %v1418_v30  ;;  %v32487_v51 = vpack.c.bf16 %v1423_v1, %v1416_v0  ;;  %v63_v0 = vpop.permute.xlu0 %62  ;;  %v32533_v11 = vand.u32 127, %v55_v24 }
 0x18f   :  { %29796 = vmatpush3.bf16.msra.mxu1 %v32434_v29  ;;  %v32470_v49 = vand.u32 4294901760, %v32465_v45  ;;  %v32531_v63 = vsub.f32 %v32509_v39, %v36186_v60  ;;  %v3391_v17 = vand.u32 4294901760, %v32514_v40 }
 0x190   :  { %29806 = vmatprep.subr.bf16.mxu0 %v29805_v58  ;;  %29798 = vmatprep.subr.bf16.mxu1 %v32436_v43  ;;  %36251 = vst [vmem:[#allocation14_spill] sm:$0xff] %v32533_v11  ;;  %vm67_vm3 = vcmp.eq.s32.totalorder %v32533_v11, %v63_v0 }
 0x191   :  { %29808 = vmatpush3.bf16.msra.mxu0 %v29805_v58  ;;  %v32538_v30 = vsel %vm67_vm3, 1.0, %v36191_v33 }
 0x192   :  { %29810 = vmatprep.subr.bf16.mxu0 %v29809_v16 }
 0x193   :  { %29800 = vmatpush3.bf16.msra.mxu1 %v32436_v43 }
 0x194   :  { %26821 = vmatprep.subr.mxu1 %v32470_v49 }
 0x195   :  { %29812 = vmatpush3.bf16.msra.mxu0 %v29809_v16  ;;  %v66_v16 = vpop.permute.xlu0 %65 }
 0x196   :  { %29814 = vmatprep.subr.bf16.mxu0 %v29813_v32  ;;  %vm68_vm4 = vcmp.eq.s32.totalorder %v32533_v11, %v66_v16 }
 0x197   :  { %v32541_v31 = vsel %vm68_vm4, 1.0, %v36191_v33 }
 0x198   :  { %v1862_v38 = vsel %vm161_vm0, %v32541_v31, 0 }
 0x199   :  { %29816 = vmatpush3.bf16.msra.mxu0 %v29813_v32  ;;  %v1859_v32 = vsel %vm161_vm0, %v32538_v30, 0 }
 0x19a   :  { %29818 = vmatprep.subr.bf16.mxu0 %v32432_v61 }
 0x259   :  { %v26706_v53 = vpop.f32.mrb[0].mxu1 }
 0x25a   :  { %v1259_v54 = vsub.f32 0.0, %v26706_v53  ;;  %v1248_v55 = vpop.f32.mrb[1].mxu1 }
 0x25b   :  { %v1258_v58 = vsub.f32 0.0, %v1248_v55 }
 0x25c   :  { %v1262_v59 = vmul.f32 1.442695, %v1259_v54  ;;  %v32547_v54 = vsub.f32 %v1859_v32, %v1859_v32 }
 0x25d   :  { %v1260_v8 = vmul.f32 1.442695, %v1258_v58 }
 0x25e   :  { %32049 = vpow2.f32 %v1262_v59  ;;  %v32561_v57 = vand.u32 4294901760, %v32547_v54 }
 0x25f   :  { %32051 = vpow2.f32 %v1260_v8  ;;  %v1952_v8 = vsub.f32 %v32465_v45, %v32470_v49 }
 0x268   :  { %v32050_v1 = vpop.eup %32049 }
 0x269   :  { %v32052_v2 = vpop.eup %32051  ;;  %v1265_v3 = vadd.f32 1.0, %v32050_v1 }
 0x26a   :  { %v1264_v4 = vadd.f32 1.0, %v32052_v2 }
 0x26b   :  { %32053 = vrcp.f32 %v1265_v3  ;;  %v32555_v3 = vsub.f32 %v1862_v38, %v1862_v38 }
 0x26c   :  { %32055 = vrcp.f32 %v1264_v4 }
 0x26d   :  { %v32569_v38 = vand.u32 4294901760, %v32555_v3 }
 0x275   :  { %v32054_v22 = vpop.eup %32053 }
 0x276   :  { %v32056_v26 = vpop.eup %32055  ;;  %v1271_v24 = vmul.f32 %v32054_v22, %v26706_v53  ;;  %v23678_v35 = vsub.f32 1.0, %v32054_v22 }
 0x277   :  { %v1270_v41 = vmul.f32 %v32056_v26, %v1248_v55  ;;  %v23677_v42 = vsub.f32 1.0, %v32056_v26 }
 0x278   :  { %v1276_v58 = vsel %vm671_vm2, %v1271_v24, 0  ;;  %v23680_v59 = vmul.f32 %v26706_v53, %v23678_v35  ;;  %v1953_v24 = vand.u32 4294901760, %v1952_v8 }
 0x279   :  { %v32552_v0 = vand.u32 4294901760, %v1276_v58  ;;  %v1273_v1 = vsel %vm671_vm2, %v1270_v41, 0  ;;  %v23679_v2 = vmul.f32 %v23677_v42, %v1248_v55 }
 0x27a   :  { %v23682_v4 = vadd.f32 1.0, %v23680_v59  ;;  %v32557_v16 = vand.u32 4294901760, %v1273_v1  ;;  %v1933_v59 = vsub.f32 %v32547_v54, %v32561_v57 }
 0x27b   :  { %v1362_v60 = vsub.f32 %v1276_v58, %v32552_v0  ;;  %v23681_v32 = vadd.f32 1.0, %v23679_v2  ;;  %v1943_v2 = vsub.f32 %v32555_v3, %v32569_v38 }
 0x27c   :  { %26742 = vmatprep.mubr.f32.mxu0 %v32557_v16  ;;  %v1352_v53 = vsub.f32 %v1273_v1, %v32557_v16  ;;  %v32565_v35 = vmul.f32 %v32054_v22, %v23682_v4  ;;  %v1954_v1 = vsub.f32 %v1952_v8, %v1953_v24 }
 0x27d   :  { %26743 = vmatmul.mubr.f32.vlgmr.msra.gmra.mrb[2].mxu0 %v32552_v0  ;;  %v1363_v55 = vand.u32 4294901760, %v1362_v60  ;;  %v32571_v41 = vmul.f32 %v32056_v26, %v23681_v32  ;;  %v32583_v27 = vand.u32 4294901760, %v1943_v2 }
 0x27e   :  { %36252 = vst [vmem:[#allocation15_spill] sm:$0xff] %v32565_v35  ;;  %29820 = vmatpush3.bf16.msra.mxu0 %v32432_v61  ;;  %26761 = vmatprep.mubr.f32.mxu0 %v1352_v53  ;;  %v1353_v42 = vand.u32 4294901760, %v1352_v53  ;;  %v32581_v61 = vand.u32 4294901760, %v1933_v59  ;;  %v1955_v32 = vand.u32 4294901760, %v1954_v1 }
 0x27f   :  { %36253 = vst [vmem:[#allocation16_spill] sm:$0xff] %v32571_v41  ;;  %29822 = vmatprep.subr.bf16.mxu0 %v32453_v36  ;;  %v1364_v58 = vsub.f32 %v1362_v60, %v1363_v55 }
 0x280   :  { %v1354_v22 = vsub.f32 %v1352_v53, %v1353_v42 }
 0x281   :  { %v1365_v26 = vand.u32 4294901760, %v1364_v58 }
 0x282   :  { %29824 = vmatpush3.bf16.msra.mxu0 %v32453_v36  ;;  %v1355_v4 = vand.u32 4294901760, %v1354_v22  ;;  %v152_v36 = vld [vmem:[%s36178_s11] sm:$0xff] }
 0x283   :  { %29826 = vmatprep.subr.bf16.mxu0 %v32463_v44 }
 0x284   :  { %26723 = vmatprep.mubr.f32.mxu1 %v1355_v4  ;;  %v36189_v4 = vmov 0.0|0.0  }
 0x285   :  { %26724 = vmatmul.mubr.f32.vlgmr.msra.gmra.mrb[2].mxu1 %v1365_v26 }
 0x286   :  { %29828 = vmatpush3.bf16.msra.mxu0 %v32463_v44  ;;  %26822 = vmatpush3.msra.mxu1 %v32470_v49  ;;  %v153_v44 = vld [vmem:[%s36178_s11 + $0x8] sm:$0xff] }
 0x287   :  { %29830 = vmatprep.subr.bf16.mxu0 %v32467_v46  ;;  %26823 = vmatprep.mubr.f32.mxu1 %v32581_v61 }
 0x288   :  { %26826 = vmatprep.subr.mxu1 %v1955_v32 }
 0x289   :  { %26824 = vmatmul.mubr.f32.vlgmr.msra.gmra.mrb[4].mxu1 %v32583_v27 }
 0x28a   :  { %29832 = vmatpush3.bf16.msra.mxu0 %v32467_v46  ;;  %26828 = vmatprep.mubr.msk.f32.mxu1 %vm161_vm0, %v32538_v30  ;;  %v2824_v46 = vand.u32 4294901760, %v152_v36 }
 0x28b   :  { %29834 = vmatprep.subr.bf16.mxu0 %v32420_v15  ;;  %26827 = vmatpush3.msra.mxu1 %v1955_v32 }
 0x28c   :  { %26831 = vmatprep.subr.mxu1 %v1952_v8  ;;  %v32633_v53 = vsub.f32 %v152_v36, %v2824_v46 }
 0x28d   :  { %26762 = vmatmul.mubr.f32.vlgmr.msra.gmra.mrb[2].mxu0 %v1362_v60  ;;  %v154_v60 = vld [vmem:[%s36178_s11 + $0x10] sm:$0xff] }
 0x28e   :  { %29836 = vmatpush3.bf16.msra.mxu0 %v32420_v15  ;;  %26780 = vmatprep.mubr.f32.mxu0 %v1353_v42  ;;  %v2905_v22 = vand.u32 4294901760, %v32633_v53 }
 0x28f   :  { %29838 = vmatprep.subr.bf16.mxu0 %v32424_v52 }
 0x291   :  { %26829 = vmatmul.mubr.msk.f32.vlgmr.msra.gmra.mrb[4].mxu1 %vm161_vm0, %v32541_v31 }
 0x292   :  { %29840 = vmatpush3.bf16.msra.mxu0 %v32424_v52  ;;  %26832 = vmatpush3.msra.mxu1 %v1952_v8  ;;  %v155_v8 = vld [vmem:[%s36178_s11 + $0x18] sm:$0xff] }
 0x293   :  { %26833 = vmatprep.mubr.f32.mxu1 %v32547_v54  ;;  %26836 = vmatprep.subr.mxu1 %v32470_v49  ;;  %v2833_v42 = vand.u32 4294901760, %v155_v8 }
 0x294   :  { %29842 = vmatprep.subr.bf16.mxu0 %v32434_v29 }
 0x296   :  { %29844 = vmatpush3.bf16.msra.mxu0 %v32434_v29 }
 0x297   :  { %29846 = vmatprep.subr.bf16.mxu0 %v32436_v43 }
 0x299   :  { %26834 = vmatmul.mubr.f32.vlgmr.msra.gmra.mrb[4].mxu1 %v32555_v3 }
 0x29a   :  { %29848 = vmatpush3.bf16.msra.mxu0 %v32436_v43  ;;  %26837 = vmatpush3.msra.mxu1 %v32470_v49 }
 0x29b   :  { %26838 = vmatprep.mubr.f32.mxu1 %v32561_v57  ;;  %26841 = vmatprep.subr.mxu1 %v1953_v24 }
 0x29c   :  { %29850 = vmatprep.subr.bf16.mxu0 %v32477_v50 }
 0x29d   :  { %26781 = vmatmul.mubr.f32.vlgmr.msra.gmra.mrb[2].mxu0 %v1363_v55  ;;  %v2830_v55 = vand.u32 4294901760, %v154_v60 }
 0x29e   :  { %29852 = vmatpush3.bf16.msra.mxu0 %v32477_v50  ;;  %26799 = vmatprep.mubr.f32.mxu0 %v32557_v16  ;;  %v2827_v50 = vand.u32 4294901760, %v153_v44 }
 0x29f   :  { %29854 = vmatprep.subr.bf16.mxu0 %v32483_v47  ;;  %v32644_v59 = vsub.f32 %v154_v60, %v2830_v55 }
 0x2a1   :  { %26839 = vmatmul.mubr.f32.vlgmr.msra.gmra.mrb[4].mxu1 %v32569_v38  ;;  %v2919_v32 = vand.u32 4294901760, %v32644_v59 }
 0x2a2   :  { %29856 = vmatpush3.bf16.msra.mxu0 %v32483_v47  ;;  %26842 = vmatpush3.msra.mxu1 %v1953_v24  ;;  %v2821_v47 = vsel %vm2819_vm5, %v32465_v45, 0  ;;  %v32635_v24 = vsub.f32 %v153_v44, %v2827_v50 }
 0x2a3   :  { %26843 = vmatprep.mubr.msk.f32.mxu1 %vm161_vm0, %v32538_v30  ;;  %26846 = vmatprep.subr.mxu1 %v32470_v49  ;;  %v32638_v58 = vand.u32 4294901760, %v2821_v47 }
 0x2a4   :  { %29858 = vmatprep.subr.bf16.mxu0 %v32485_v48  ;;  %v2912_v1 = vand.u32 4294901760, %v32635_v24 }
 0x2a5   :  { %v32654_v2 = vsub.f32 %v2821_v47, %v32638_v58 }
 0x2a6   :  { %29860 = vmatpush3.bf16.msra.mxu0 %v32485_v48  ;;  %v32646_v48 = vsub.f32 %v155_v8, %v2833_v42  ;;  %v2913_v26 = vsub.f32 %v32635_v24, %v2912_v1 }
 0x2a7   :  { %29862 = vmatprep.subr.bf16.mxu0 %v32487_v51  ;;  %v32668_v44 = vand.u32 4294901760, %v32654_v2 }
 0x2a8   :  { %v2926_v36 = vand.u32 4294901760, %v32646_v48 }
 0x2a9   :  { %26844 = vmatmul.mubr.msk.f32.vlgmr.msra.gmra.mrb[4].mxu1 %vm161_vm0, %v32541_v31  ;;  %v2895_v8 = vsub.f32 %v32654_v2, %v32668_v44 }
 0x2aa   :  { %29864 = vmatpush3.bf16.msra.mxu0 %v32487_v51  ;;  %26847 = vmatpush3.msra.mxu1 %v32470_v49  ;;  %v32658_v49 = vpack.c.bf16 %v2827_v50, %v2824_v46  ;;  %v2906_v51 = vsub.f32 %v32633_v53, %v2905_v22  ;;  %v29903_v46 = vpack.c.bf16 %v2833_v42, %v2830_v55 }
 0x2ab   :  { %26848 = vmatprep.mubr.msk.f32.mxu1 %vm161_vm0, %v32538_v30  ;;  %29866 = vmatprep.subr.bf16.mxu0 %v32420_v15  ;;  %v2920_v50 = vsub.f32 %v32644_v59, %v2919_v32  ;;  %v2927_v60 = vsub.f32 %v32646_v48, %v2926_v36  ;;  %v2896_v42 = vand.u32 4294901760, %v2895_v8  ;;  %v29948_v8 = vpack.c.bf16 %v32519_v56, %v32514_v40 }
 0x2ac   :  { %29899 = vmatprep.subr.bf16.mxu1 %v36189_v4 }
 0x2ad   :  { %26800 = vmatmul.mubr.f32.vlgmr.msra.gmra.mrb[2].mxu0 %v32552_v0  ;;  %v2921_v47 = vand.u32 4294901760, %v2920_v50  ;;  %v2928_v55 = vand.u32 4294901760, %v2927_v60 }
 0x2ae   :  { %29868 = vmatpush3.bf16.msra.mxu0 %v32420_v15  ;;  %26818 = vmatprep.mubr.f32.mxu0 %v32557_v16  ;;  %v2907_v15 = vand.u32 4294901760, %v2906_v51  ;;  %v2914_v16 = vand.u32 4294901760, %v2913_v26  ;;  %v3405_v26 = vand.u32 4294901760, %v32526_v62 }
 0x2af   :  { %29870 = vmatprep.subr.bf16.mxu0 %v32424_v52  ;;  %v29909_v51 = vpack.c.bf16 %v2928_v55, %v2921_v47 }
 0x2b1   :  { %26849 = vmatmul.mubr.msk.f32.vlgmr.msra.gmra.mrb[4].mxu1 %vm161_vm0, %v32541_v31 }
 0x2b2   :  { %29872 = vmatpush3.bf16.msra.mxu0 %v32424_v52  ;;  %29901 = vmatpush3.bf16.msra.mxu1 %v32658_v49  ;;  %v29906_v52 = vpack.c.bf16 %v2914_v16, %v2907_v15 }
 0x2b3   :  { %29874 = vmatprep.subr.bf16.mxu0 %v32434_v29  ;;  %29902 = vmatprep.subr.bf16.mxu1 %v36189_v4 }
 0x2b4   :  { %26901 = vmatprep.mubr.msk.f32.mxu1 %vm32104_vm6, %v36191_v33 }
 0x2b6   :  { %29876 = vmatpush3.bf16.msra.mxu0 %v32434_v29  ;;  %29904 = vmatpush3.bf16.msra.mxu1 %v29903_v46  ;;  %v29912_v29 = vpack.c.bf16 %v32635_v24, %v32633_v53  ;;  %v29927_v53 = vpack.c.bf16 %v2926_v36, %v2919_v32  ;;  %v36254_v24 = vand.u32 4294901760, %v32497_v20  ;;  %v3398_v20 = vand.u32 4294901760, %v32519_v56 }
 0x2b7   :  { %29878 = vmatprep.subr.bf16.mxu0 %v32436_v43  ;;  %29905 = vmatprep.subr.bf16.mxu1 %v36189_v4  ;;  %v3412_v32 = vand.u32 4294901760, %v32531_v63 }
 0x2b9   :  { %26902 = vmatmul.mubr.f32.vlgmr.msra.gmra.mrb[6].mxu1 %v2896_v42  ;;  %v3413_v15 = vsub.f32 %v32531_v63, %v3412_v32 }
 0x2ba   :  { %29880 = vmatpush3.bf16.msra.mxu0 %v32436_v43  ;;  %29907 = vmatpush3.bf16.msra.mxu1 %v29906_v52  ;;  %v29915_v43 = vpack.c.bf16 %v32646_v48, %v32644_v59  ;;  %v32723_v59 = vpack.c.bf16 %v36254_v24, %v3310_v21  ;;  %v36255_v48 = vand.u32 4294901760, %v32504_v28  ;;  %v3392_v21 = vsub.f32 %v32514_v40, %v3391_v17  ;;  %v24839_v40 = vld [vmem:[%s36170_s7 + $0x8] sm:$0xff] }
 0x2bb   :  { %29908 = vmatprep.subr.bf16.mxu1 %v36189_v4  ;;  %26912 = vmatprep.mubr.msk.f32.mxu1 %vm32104_vm6, %v36191_v33  ;;  %v3399_v28 = vsub.f32 %v32519_v56, %v3398_v20  ;;  %v3414_v50 = vand.u32 4294901760, %v3413_v15  ;;  %v4328_v56 = vand.u32 4294901760, %v24839_v40 }
 0x2bc   :  { %29881 = vmatprep.subr.bf16.mxu0 %v36189_v4 }
 0x2bd   :  { %26819 = vmatmul.mubr.f32.vlgmr.msra.gmra.mrb[2].mxu0 %v32552_v0  ;;  %v29924_v0 = vpack.c.bf16 %v2912_v1, %v2905_v22  ;;  %v36256_v22 = vand.u32 4294901760, %v32509_v39  ;;  %v3393_v39 = vand.u32 4294901760, %v3392_v21 }
 0x2be   :  { %29910 = vmatpush3.bf16.msra.mxu1 %v29909_v51  ;;  %26855 = vmatprep.mubr.msk.f32.mxu0 %vm32104_vm6, %v36191_v33  ;;  %v32759_v51 = vpack.c.bf16 %v3412_v32, %v3405_v26 }
 0x2bf   :  { %29911 = vmatprep.subr.bf16.mxu1 %v36189_v4  ;;  %v32732_v1 = vpack.c.bf16 %v36256_v22, %v36255_v48 }
 0x2c1   :  { %26913 = vmatmul.mubr.f32.vlgmr.msra.gmra.mrb[6].mxu1 %v32638_v58 }
 0x2c2   :  { %29913 = vmatpush3.bf16.msra.mxu1 %v29912_v29  ;;  %26923 = vmatprep.mubr.msk.f32.mxu1 %vm32104_vm6, %v36191_v33  ;;  %v24822_v29 = vld [vmem:[%s36179_s4] ss:$0 sm:$0xff] }
 0x2c3   :  { %29914 = vmatprep.subr.bf16.mxu1 %v36189_v4  ;;  %vm92_vm7 = vcmp.eq.s32.totalorder %v32427_v34, %v24822_v29 }
 0x2c6   :  { %29916 = vmatpush3.bf16.msra.mxu1 %v29915_v43 }
 0x2c7   :  { %29917 = vmatprep.subr.bf16.mxu1 %v36189_v4 }
 0x2c9   :  { %26924 = vmatmul.mubr.f32.vlgmr.msra.gmra.mrb[6].mxu1 %v32654_v2 }
 0x2ca   :  { %29919 = vmatpush3.bf16.msra.mxu1 %v32658_v49  ;;  %26934 = vmatprep.mubr.msk.f32.mxu1 %vm32104_vm6, %v36191_v33 }
 0x2cb   :  { %29920 = vmatprep.subr.bf16.mxu1 %v36189_v4 }
 0x2ce   :  { %29922 = vmatpush3.bf16.msra.mxu1 %v29903_v46 }
 0x2cf   :  { %29923 = vmatprep.subr.bf16.mxu1 %v36189_v4 }
 0x2d1   :  { %26935 = vmatmul.mubr.f32.vlgmr.msra.gmra.mrb[6].mxu1 %v32668_v44 }
 0x2d2   :  { %29925 = vmatpush3.bf16.msra.mxu1 %v29924_v0  ;;  %26945 = vmatprep.mubr.msk.f32.mxu1 %vm32104_vm6, %v36191_v33 }
 0x2d3   :  { %29926 = vmatprep.subr.bf16.mxu1 %v36189_v4 }
 0x2d6   :  { %29928 = vmatpush3.bf16.msra.mxu1 %v29927_v53  ;;  %v32770_v53 = vsel %vm92_vm7, 1.0, %v36191_v33 }
 0x2d7   :  { %29929 = vmatprep.subr.bf16.mxu1 %v36189_v4  ;;  %v2357_v24 = vsel %vm2355_vm8, %v32770_v53, 0 }
 0x2d8   :  { %v32774_v48 = vsub.f32 %v2357_v24, %v2357_v24 }
 0x2d9   :  { %26946 = vmatmul.mubr.f32.vlgmr.msra.gmra.mrb[6].mxu1 %v32638_v58 }
 0x2da   :  { %29931 = vmatpush3.bf16.msra.mxu1 %v32658_v49  ;;  %26956 = vmatprep.mubr.msk.f32.mxu1 %vm32104_vm6, %v36191_v33  ;;  %v3400_v49 = vand.u32 4294901760, %v3399_v28  ;;  %v32777_v21 = vand.u32 4294901760, %v32774_v48 }
 0x2db   :  { %29932 = vmatprep.subr.bf16.mxu1 %v36189_v4 }
 0x2dc   :  { %v32747_v36 = vpack.c.bf16 %v3400_v49, %v3393_v39  ;;  %v2429_v32 = vsub.f32 %v32774_v48, %v32777_v21 }
 0x2de   :  { %29934 = vmatpush3.bf16.msra.mxu1 %v29903_v46  ;;  %v3406_v46 = vsub.f32 %v32526_v62, %v3405_v26  ;;  %v32783_v24 = vand.u32 4294901760, %v2429_v32 }
 0x2df   :  { %29935 = vmatprep.subr.bf16.mxu1 %v36189_v4 }
 0x2e0   :  { %v3407_v16 = vand.u32 4294901760, %v3406_v46 }
 0x2e1   :  { %26957 = vmatmul.mubr.f32.vlgmr.msra.gmra.mrb[6].mxu1 %v32638_v58 }
 0x2e2   :  { %29937 = vmatpush3.bf16.msra.mxu1 %v32723_v59  ;;  %26967 = vmatprep.mubr.msk.f32.mxu1 %vm32104_vm6, %v36191_v33  ;;  %v32751_v60 = vpack.c.bf16 %v3414_v50, %v3407_v16 }
 0x2e3   :  { %29938 = vmatprep.subr.bf16.mxu1 %v36189_v4 }
 0x2e6   :  { %29940 = vmatpush3.bf16.msra.mxu1 %v32732_v1 }
 0x2e7   :  { %29971 = vmatprep.subr.bf16.mxu1 %v36189_v4 }
 0x2e9   :  { %26968 = vmatmul.mubr.f32.vlgmr.msra.gmra.mrb[8].mxu1 %v2896_v42  ;;  %v32757_v42 = vpack.c.bf16 %v3398_v20, %v3391_v17 }
 0x2ea   :  { %27033 = vmatprep.mubr.msk.f32.mxu1 %vm32104_vm6, %v36191_v33 }
 0x358   :  { %v26725_v47 = vpop.f32.mrb[2].mxu1 }
 0x359   :  { %v1357_v55 = vpop.f32.mrb[3].mxu1 }
 0x384   :  { %v32765_v43 = vpop.f32.mrb[4].mxu1 }
 0x385   :  { %36257 = vst [vmem:[#allocation17_spill] sm:$0xff] %v32765_v43  ;;  %v32767_v0 = vpop.f32.mrb[5].mxu1 }
 0x386   :  { %36258 = vst [vmem:[#allocation18_spill] sm:$0xff] %v32767_v0 }
 0x390   :  { %v26820_v22 = vpop.f32.mrb[2].mxu0 }
 0x391   :  { %v31579_v17 = vadd.f32 %v26820_v22, %v26725_v47  ;;  %v1848_v20 = vpop.f32.mrb[3].mxu0 }
 0x392   :  { %v31580_v28 = vadd.f32 %v1848_v20, %v1357_v55 }
 0x393   :  { %v2354_v39 = vmul.f32 %v31579_v17, %v32765_v43 }
 0x394   :  { %v2353_v49 = vmul.f32 %v31580_v28, %v32767_v0 }
 0x395   :  { %v2363_v26 = vand.u32 4294901760, %v2354_v39 }
 0x396   :  { %v2360_v46 = vand.u32 4294901760, %v2353_v49 }
 0x397   :  { %v2445_v15 = vsub.f32 %v2354_v39, %v2363_v26 }
 0x398   :  { %v29882_v16 = vpack.c.bf16 %v2363_v26, %v2360_v46  ;;  %v2438_v50 = vsub.f32 %v2353_v49, %v2360_v46  ;;  %v150_v46 = vld [vmem:[%s36180_s10 + $0x10] sm:$0xff] }
 0x399   :  { %v2446_v29 = vand.u32 4294901760, %v2445_v15 }
 0x39a   :  { %v2439_v47 = vand.u32 4294901760, %v2438_v50  ;;  %29883 = vmatpush3.bf16.msra.mxu0 %v29882_v16  ;;  %v29888_v22 = vpack.c.bf16 %v2445_v15, %v2438_v50 }
 0x39b   :  { %v2447_v52 = vsub.f32 %v2445_v15, %v2446_v29  ;;  %29884 = vmatprep.subr.bf16.mxu0 %v36189_v4  ;;  %v151_v15 = vld [vmem:[%s36180_s10 + $0x18] sm:$0xff] }
 0x39c   :  { %v2440_v55 = vsub.f32 %v2438_v50, %v2439_v47  ;;  %v29894_v17 = vpack.c.bf16 %v2446_v29, %v2439_v47  ;;  %v3809_v50 = vand.u32 4294901760, %v151_v15 }
 0x39d   :  { %26856 = vmatmul.mubr.f32.vlgmr.msra.gmra.mrb[4].mxu0 %v32783_v24  ;;  %v2448_v20 = vand.u32 4294901760, %v2447_v52 }
 0x39e   :  { %v2441_v28 = vand.u32 4294901760, %v2440_v55  ;;  %26862 = vmatprep.mubr.msk.f32.mxu0 %vm32104_vm6, %v36191_v33 }
 0x3a0   :  { %v29885_v39 = vpack.c.bf16 %v2448_v20, %v2441_v28 }
 0x3a2   :  { %29886 = vmatpush3.bf16.msra.mxu0 %v29885_v39 }
 0x3a3   :  { %29887 = vmatprep.subr.bf16.mxu0 %v36189_v4 }
 0x3a5   :  { %26863 = vmatmul.mubr.msk.f32.vlgmr.msra.gmra.mrb[4].mxu0 %vm2355_vm8, %v32770_v53 }
 0x3a6   :  { %29889 = vmatpush3.bf16.msra.mxu0 %v29888_v22  ;;  %26869 = vmatprep.mubr.msk.f32.mxu0 %vm32104_vm6, %v36191_v33 }
 0x3a7   :  { %29890 = vmatprep.subr.bf16.mxu0 %v36189_v4 }
 0x3ad   :  { %26870 = vmatmul.mubr.f32.vlgmr.msra.gmra.mrb[4].mxu0 %v32774_v48 }
 0x3ae   :  { %29892 = vmatpush3.bf16.msra.mxu0 %v29882_v16  ;;  %26876 = vmatprep.mubr.msk.f32.mxu0 %vm32104_vm6, %v36191_v33 }
 0x3af   :  { %29893 = vmatprep.subr.bf16.mxu0 %v36189_v4 }
 0x3b4   :  { %v32799_v52 = vpop.f32.mrb[6].mxu1 }
 0x3b5   :  { %26877 = vmatmul.mubr.f32.vlgmr.msra.gmra.mrb[4].mxu0 %v32777_v21  ;;  %v26958_v49 = vpop.f32.mrb[7].mxu1 }
 0x3b6   :  { %29895 = vmatpush3.bf16.msra.mxu0 %v29894_v17  ;;  %26883 = vmatprep.mubr.msk.f32.mxu0 %vm32104_vm6, %v36191_v33  ;;  %v32893_v17 = vsub.f32 %v151_v15, %v3809_v50  ;;  %v24841_v15 = vld [vmem:[%s36172_s8 + $0x48] sm:$0xff] }
 0x3b7   :  { %29896 = vmatprep.subr.bf16.mxu0 %v36189_v4 }
 0x3bc   :  { %v32805_v26 = vpop.f32.mrb[8].mxu1 }
 0x3bd   :  { %26884 = vmatmul.mubr.msk.f32.vlgmr.msra.gmra.mrb[4].mxu0 %vm2355_vm8, %v32770_v53  ;;  %v26969_v32 = vpop.f32.mrb[9].mxu1 }
 0x3be   :  { %29898 = vmatpush3.bf16.msra.mxu0 %v29882_v16  ;;  %26890 = vmatprep.mubr.msk.f32.mxu0 %vm32104_vm6, %v36191_v33  ;;  %v3806_v16 = vand.u32 4294901760, %v150_v46  ;;  %v3902_v32 = vand.u32 4294901760, %v32893_v17 }
 0x3bf   :  { %29941 = vmatprep.subr.bf16.mxu0 %v36189_v4 }
 0x3c0   :  { %v32889_v22 = vpack.c.bf16 %v3809_v50, %v3806_v16  ;;  %v32891_v55 = vsub.f32 %v150_v46, %v3806_v16  ;;  %v24840_v46 = vld [vmem:[%s36172_s8 + $0x40] sm:$0xff]  ;;  %v4840_v50 = vand.u32 4294901760, %v24841_v15 }
 0x3c1   :  { %v4837_v16 = vand.u32 4294901760, %v24840_v46 }
 0x3c2   :  { %v3895_v49 = vand.u32 4294901760, %v32891_v55 }
 0x3c5   :  { %26891 = vmatmul.mubr.msk.f32.vlgmr.msra.gmra.mrb[4].mxu0 %vm2355_vm8, %v32770_v53 }
 0x3c6   :  { %29943 = vmatpush3.bf16.msra.mxu0 %v32747_v36  ;;  %26978 = vmatprep.mubr.msk.f32.mxu0 %vm32104_vm6, %v36191_v33  ;;  %v36259_v36 = vpack.c.bf16 %v32531_v63, %v32526_v62  ;;  %v4415_v62 = vsub.f32 %v24839_v40, %v4328_v56  ;;  %v3896_v40 = vsub.f32 %v32891_v55, %v3895_v49 }
 0x3c7   :  { %29944 = vmatprep.subr.bf16.mxu0 %v36189_v4 }
 0x3c8   :  { %v4416_v63 = vand.u32 4294901760, %v4415_v62 }
 0x3ca   :  { %29946 = vmatpush3.bf16.msra.mxu0 %v32751_v60 }
 0x3cb   :  { %29947 = vmatprep.subr.bf16.mxu0 %v36189_v4 }
 0x3cd   :  { %26979 = vmatmul.mubr.f32.vlgmr.msra.gmra.mrb[6].mxu0 %v32638_v58 }
 0x3ce   :  { %29949 = vmatpush3.bf16.msra.mxu0 %v29948_v8  ;;  %26989 = vmatprep.mubr.msk.f32.mxu0 %vm32104_vm6, %v36191_v33 }
 0x3cf   :  { %29950 = vmatprep.subr.bf16.mxu0 %v36189_v4 }
 0x3d2   :  { %29952 = vmatpush3.bf16.msra.mxu0 %v36259_v36 }
 0x3d3   :  { %29953 = vmatprep.subr.bf16.mxu0 %v36189_v4 }
 0x3d5   :  { %26990 = vmatmul.mubr.f32.vlgmr.msra.gmra.mrb[6].mxu0 %v32654_v2  ;;  %v4417_v2 = vsub.f32 %v4415_v62, %v4416_v63 }
 0x3d6   :  { %29955 = vmatpush3.bf16.msra.mxu0 %v32723_v59  ;;  %27000 = vmatprep.mubr.msk.f32.mxu0 %vm32104_vm6, %v36191_v33 }
 0x3d7   :  { %29956 = vmatprep.subr.bf16.mxu0 %v36189_v4 }
 0x3da   :  { %29958 = vmatpush3.bf16.msra.mxu0 %v32732_v1 }
 0x3db   :  { %29959 = vmatprep.subr.bf16.mxu0 %v36189_v4 }
 0x3dd   :  { %27001 = vmatmul.mubr.f32.vlgmr.msra.gmra.mrb[6].mxu0 %v32668_v44  ;;  %v4418_v44 = vand.u32 4294901760, %v4417_v2 }
 0x3de   :  { %29961 = vmatpush3.bf16.msra.mxu0 %v32757_v42  ;;  %27011 = vmatprep.mubr.msk.f32.mxu0 %vm32104_vm6, %v36191_v33 }
 0x3df   :  { %29962 = vmatprep.subr.bf16.mxu0 %v36189_v4 }
 0x3e2   :  { %29964 = vmatpush3.bf16.msra.mxu0 %v32759_v51 }
 0x3e3   :  { %29965 = vmatprep.subr.bf16.mxu0 %v36189_v4 }
 0x3e5   :  { %27012 = vmatmul.mubr.f32.vlgmr.msra.gmra.mrb[6].mxu0 %v32638_v58 }
 0x3e6   :  { %29967 = vmatpush3.bf16.msra.mxu0 %v32723_v59  ;;  %27022 = vmatprep.mubr.msk.f32.mxu0 %vm32104_vm6, %v36191_v33  ;;  %v149_v59 = vld [vmem:[%s36180_s10 + $0x8] sm:$0xff] }
 0x3e7   :  { %29968 = vmatprep.subr.bf16.mxu0 %v36189_v4  ;;  %v3803_v60 = vand.u32 4294901760, %v149_v59 }
 0x3e9   :  { %v32877_v51 = vsub.f32 %v149_v59, %v3803_v60  ;;  %v32945_v59 = vsub.f32 %v24841_v15, %v4840_v50 }
 0x3ea   :  { %29970 = vmatpush3.bf16.msra.mxu0 %v32732_v1 }
 0x3eb   :  { %27091 = vmatprep.subr.mxu0 %v4328_v56  ;;  %v3888_v47 = vand.u32 4294901760, %v32877_v51  ;;  %v36200_v41 = vand.u32 4294901760, %v32945_v59 }
 0x3ed   :  { %27023 = vmatmul.mubr.f32.vlgmr.msra.gmra.mrb[6].mxu0 %v32638_v58  ;;  %v148_v58 = vld [vmem:[%s36180_s10] sm:$0xff]  ;;  %v3889_v28 = vsub.f32 %v32877_v51, %v3888_v47 }
 0x3ee   :  { %27092 = vmatpush3.msra.mxu0 %v4328_v56  ;;  %27093 = vmatprep.mubr.f32.mxu0 %v32216_v18  ;;  %v3800_v1 = vand.u32 4294901760, %v148_v58 }
 0x3ef   :  { %27096 = vmatprep.subr.mxu0 %v4418_v44  ;;  %v3890_v36 = vand.u32 4294901760, %v3889_v28  ;;  %v24842_v28 = vld [vmem:[%s36172_s8 + $0x50] sm:$0xff] }
 0x3f0   :  { %v32873_v8 = vpack.c.bf16 %v3803_v60, %v3800_v1  ;;  %v32875_v42 = vsub.f32 %v148_v58, %v3800_v1  ;;  %v32913_v60 = vpack.c.bf16 %v3902_v32, %v3895_v49  ;;  %v24846_v58 = vld [vmem:[%s36172_s8 + $0x70] sm:$0xff] }
 0x3f1   :  { %27094 = vmatmul.mubr.f32.vlgmr.msra.gmra.mrb[8].mxu0 %v32218_v19  ;;  %v4855_v33 = vand.u32 4294901760, %v24846_v58 }
 0x3f2   :  { %27097 = vmatpush3.msra.mxu0 %v4418_v44  ;;  %27098 = vmatprep.mubr.f32.mxu0 %v32196_v6  ;;  %v3881_v29 = vand.u32 4294901760, %v32875_v42 }
 0x3f3   :  { %27101 = vmatprep.subr.mxu0 %v4415_v62  ;;  %29973 = vmatpush3.bf16.msra.mxu1 %v32873_v8 }
 0x3f4   :  { %29974 = vmatprep.subr.bf16.mxu1 %v36189_v4  ;;  %v3882_v20 = vsub.f32 %v32875_v42, %v3881_v29  ;;  %v32911_v1 = vpack.c.bf16 %v3888_v47, %v3881_v29  ;;  %v24843_v29 = vld [vmem:[%s36172_s8 + $0x58] sm:$0xff]  ;;  %v4843_v47 = vand.u32 4294901760, %v24842_v28 }
 0x3f6   :  { %v3883_v39 = vand.u32 4294901760, %v3882_v20  ;;  %v32921_v20 = vpack.c.bf16 %v4840_v50, %v4837_v16  ;;  %v32965_v50 = vsub.f32 %v24842_v28, %v4843_v47 }
 0x3f7   :  { %29976 = vmatpush3.bf16.msra.mxu1 %v32889_v22 }
 0x3f8   :  { %29977 = vmatprep.subr.bf16.mxu1 %v36189_v4  ;;  %v24847_v4 = vld [vmem:[%s36172_s8 + $0x78] sm:$0xff]  ;;  %v36203_v34 = vand.u32 4294901760, %v32965_v50 }
 0x3f9   :  { %27099 = vmatmul.mubr.f32.vlgmr.msra.gmra.mrb[8].mxu0 %v32198_v7  ;;  %v4858_v14 = vand.u32 4294901760, %v24847_v4 }
 0x3fa   :  { %27102 = vmatpush3.msra.mxu0 %v4415_v62  ;;  %27103 = vmatprep.mubr.f32.mxu0 %v32201_v9  ;;  %v32903_v62 = vpack.c.bf16 %v3890_v36, %v3883_v39  ;;  %v4846_v39 = vand.u32 4294901760, %v24843_v29  ;;  %v24845_v36 = vld [vmem:[%s36172_s8 + $0x68] sm:$0xff] }
 0x3fb   :  { %27106 = vmatprep.subr.mxu0 %v4328_v56 }
 0x3fc   :  { %v32931_v49 = vpack.c.bf16 %v4846_v39, %v4843_v47  ;;  %v32967_v35 = vsub.f32 %v24843_v29, %v4846_v39 }
 0x3fe   :  { %v36204_v23 = vand.u32 4294901760, %v32967_v35 }
 0x400   :  { %v4954_v28 = vsub.f32 %v32967_v35, %v36204_v23 }
 0x401   :  { %27104 = vmatmul.mubr.f32.vlgmr.msra.gmra.mrb[8].mxu0 %v32204_v10 }
 0x402   :  { %27107 = vmatpush3.msra.mxu0 %v4328_v56  ;;  %27108 = vmatprep.mubr.f32.mxu0 %v32207_v12 }
 0x403   :  { %27111 = vmatprep.subr.mxu0 %v4416_v63 }
 0x409   :  { %27109 = vmatmul.mubr.f32.vlgmr.msra.gmra.mrb[8].mxu0 %v32210_v13 }
 0x40a   :  { %27112 = vmatpush3.msra.mxu0 %v4416_v63  ;;  %27113 = vmatprep.mubr.f32.mxu0 %v32196_v6  ;;  %v3897_v63 = vand.u32 4294901760, %v3896_v40 }
 0x40b   :  { %27116 = vmatprep.subr.mxu0 %v4328_v56 }
 0x411   :  { %27114 = vmatmul.mubr.f32.vlgmr.msra.gmra.mrb[8].mxu0 %v32198_v7 }
 0x412   :  { %27117 = vmatpush3.msra.mxu0 %v4328_v56  ;;  %27118 = vmatprep.mubr.f32.mxu0 %v32196_v6  ;;  %v3903_v56 = vsub.f32 %v32893_v17, %v3902_v32  ;;  %v24844_v32 = vld [vmem:[%s36172_s8 + $0x60] sm:$0xff] }
 0x413   :  { %30008 = vmatprep.subr.bf16.mxu0 %v32921_v20  ;;  %v4849_v40 = vand.u32 4294901760, %v24844_v32 }
 0x414   :  { %v3904_v2 = vand.u32 4294901760, %v3903_v56  ;;  %v4852_v56 = vand.u32 4294901760, %v24845_v36 }
 0x415   :  { %v32981_v29 = vsub.f32 %v24844_v32, %v4849_v40 }
 0x416   :  { %v32905_v44 = vpack.c.bf16 %v3904_v2, %v3897_v63  ;;  %v32941_v63 = vpack.c.bf16 %v4852_v56, %v4849_v40  ;;  %v32943_v2 = vsub.f32 %v24840_v46, %v4837_v16  ;;  %v32957_v46 = vpack.c.bf16 %v4858_v14, %v4855_v33 }
 0x417   :  { %v4940_v16 = vsub.f32 %v32945_v59, %v36200_v41  ;;  %v4947_v41 = vsub.f32 %v32965_v50, %v36203_v34  ;;  %v32983_v47 = vsub.f32 %v24845_v36, %v4852_v56  ;;  %v4973_v40 = vsub.f32 %v24846_v58, %v4855_v33 }
 0x418   :  { %v36201_v5 = vand.u32 4294901760, %v32943_v2  ;;  %v4980_v56 = vsub.f32 %v24847_v4, %v4858_v14  ;;  %v36260_v14 = vmov 0.0   ;;  %v36263_v4 = vpack.c.bf16 %v32893_v17, %v32891_v55 }
 0x419   :  { %27119 = vmatmul.mubr.f32.vlgmr.msra.gmra.mrb[8].mxu0 %v32198_v7  ;;  %v4941_v43 = vand.u32 4294901760, %v4940_v16  ;;  %v4955_v16 = vand.u32 4294901760, %v4954_v28  ;;  %v4974_v10 = vand.u32 4294901760, %v4973_v40  ;;  %v3308_v17 = vmul.f32 %v32799_v52, %v32438_v25 }
 0x41a   :  { %30010 = vmatpush3.bf16.msra.mxu0 %v32921_v20  ;;  %v4933_v15 = vsub.f32 %v32943_v2, %v36201_v5  ;;  %v36265_v58 = vand.u32 4294901760, %v32945_v59  ;;  %v36266_v52 = vand.u32 4294901760, %v32965_v50 }
 0x41b   :  { %30012 = vmatprep.subr.bf16.mxu0 %v32931_v49 }
 0x41c   :  { %v4934_v0 = vand.u32 4294901760, %v4933_v15  ;;  %v4948_v15 = vand.u32 4294901760, %v4947_v41 }
 0x41e   :  { %30014 = vmatpush3.bf16.msra.mxu0 %v32931_v49  ;;  %v32973_v11 = vpack.c.bf16 %v4941_v43, %v4934_v0  ;;  %v36210_v43 = vand.u32 4294901760, %v32981_v29  ;;  %v4967_v0 = vand.u32 4294901760, %v32983_v47  ;;  %v32988_v34 = vpack.c.bf16 %v4955_v16, %v4948_v15 }
 0x41f   :  { %30016 = vmatprep.subr.bf16.mxu0 %v32941_v63  ;;  %v4975_v16 = vsub.f32 %v4973_v40, %v4974_v10 }
 0x420   :  { %v4961_v32 = vsub.f32 %v32981_v29, %v36210_v43  ;;  %v4968_v36 = vsub.f32 %v32983_v47, %v4967_v0 }
 0x421   :  { %v4976_v43 = vand.u32 4294901760, %v4975_v16 }
 0x422   :  { %30018 = vmatpush3.bf16.msra.mxu0 %v32941_v63  ;;  %v4962_v23 = vand.u32 4294901760, %v4961_v32  ;;  %v4969_v12 = vand.u32 4294901760, %v4968_v36 }
 0x423   :  { %30020 = vmatprep.subr.bf16.mxu0 %v32957_v46 }
 0x424   :  { %v32997_v15 = vpack.c.bf16 %v4969_v12, %v4962_v23  ;;  %v36261_v12 = vmov 0.0|0.0   ;;  %v33011_v23 = vpack.c.bf16 %v32967_v35, %v32965_v50 }
 0x426   :  { %30022 = vmatpush3.bf16.msra.mxu0 %v32957_v46 }
 0x427   :  { %30024 = vmatprep.subr.bf16.mxu0 %v32973_v11 }
 0x498   :  { %v2814_v39 = vpop.f32.mrb[4].mxu0 }
 0x499   :  { %v2818_v5 = vmul.f32 0.2236068, %v2814_v39  ;;  %v26892_v13 = vpop.f32.mrb[5].mxu0  ;;  %v4981_v39 = vand.u32 4294901760, %v4980_v56 }
 0x49b   :  { %v3797_v41 = vsel %vm2819_vm5, %v2818_v5, 0  ;;  %v4982_v9 = vsub.f32 %v4980_v56, %v4981_v39  ;;  %v33003_v5 = vpack.c.bf16 %v32945_v59, %v32943_v2 }
 0x49c   :  { %v3868_v28 = vand.u32 4294901760, %v3797_v41 }
 0x49d   :  { %v4983_v6 = vand.u32 4294901760, %v4982_v9  ;;  %v36262_v9 = vpack.c.bf16 %v32877_v51, %v32875_v42 }
 0x49e   :  { %v3869_v13 = vsub.f32 %v3797_v41, %v3868_v28 }
 0x49f   :  { %v32999_v18 = vpack.c.bf16 %v4983_v6, %v4976_v43  ;;  %v33017_v6 = vpack.c.bf16 %v32983_v47, %v32981_v29 }
 0x4a0   :  { %v3870_v7 = vand.u32 4294901760, %v3869_v13 }
 0x4a2   :  { %v3871_v19 = vsub.f32 %v3869_v13, %v3870_v7 }
 0x4a4   :  { %v3872_v33 = vand.u32 4294901760, %v3871_v19  ;;  %v33025_v19 = vpack.c.bf16 %v4980_v56, %v4973_v40 }
 0x4a6   :  { %27034 = vmatmul.mubr.f32.vlgmr.msra.gmra.mrb[10].mxu1 %v3872_v33 }
 0x4a7   :  { %29979 = vmatpush3.bf16.msra.mxu1 %v32903_v62  ;;  %27044 = vmatprep.mubr.msk.f32.mxu1 %vm32104_vm6, %v36260_v14 }
 0x4a8   :  { %29980 = vmatprep.subr.bf16.mxu1 %v36261_v12 }
 0x4ab   :  { %29982 = vmatpush3.bf16.msra.mxu1 %v32905_v44  ;;  %v36264_v44 = vand.u32 4294901760, %v32943_v2  ;;  %v36268_v2 = vand.u32 4294901760, %v32981_v29 }
 0x4ac   :  { %29983 = vmatprep.subr.bf16.mxu1 %v36261_v12 }
 0x4ad   :  { %v33070_v59 = vpack.c.bf16 %v4967_v0, %v36268_v2 }
 0x4ae   :  { %27045 = vmatmul.mubr.f32.vlgmr.msra.gmra.mrb[10].mxu1 %v3868_v28 }
 0x4af   :  { %29985 = vmatpush3.bf16.msra.mxu1 %v36262_v9  ;;  %27055 = vmatprep.mubr.msk.f32.mxu1 %vm32104_vm6, %v36260_v14 }
 0x4b0   :  { %29986 = vmatprep.subr.bf16.mxu1 %v36261_v12 }
 0x4b3   :  { %29988 = vmatpush3.bf16.msra.mxu1 %v36263_v4 }
 0x4b4   :  { %29989 = vmatprep.subr.bf16.mxu1 %v36261_v12 }
 0x4b6   :  { %27056 = vmatmul.mubr.f32.vlgmr.msra.gmra.mrb[10].mxu1 %v3869_v13 }
 0x4b7   :  { %29991 = vmatpush3.bf16.msra.mxu1 %v32873_v8  ;;  %27066 = vmatprep.mubr.msk.f32.mxu1 %vm32104_vm6, %v36260_v14 }
 0x4b8   :  { %29992 = vmatprep.subr.bf16.mxu1 %v36261_v12 }
 0x4bb   :  { %29994 = vmatpush3.bf16.msra.mxu1 %v32889_v22 }
 0x4bc   :  { %29995 = vmatprep.subr.bf16.mxu1 %v36261_v12 }
 0x4be   :  { %27067 = vmatmul.mubr.f32.vlgmr.msra.gmra.mrb[10].mxu1 %v3870_v7 }
 0x4bf   :  { %29997 = vmatpush3.bf16.msra.mxu1 %v32911_v1  ;;  %27077 = vmatprep.mubr.msk.f32.mxu1 %vm32104_vm6, %v36260_v14  ;;  %v33053_v1 = vpack.c.bf16 %v36265_v58, %v36264_v44 }
 0x4c0   :  { %v3790_v42 = vpop.f32.mrb[6].mxu0  ;;  %29998 = vmatprep.subr.bf16.mxu1 %v36261_v12 }
 0x4c1   :  { %v31581_v51 = vadd.f32 %v3790_v42, %v32805_v26  ;;  %v27024_v55 = vpop.f32.mrb[7].mxu0  ;;  %v36267_v26 = vand.u32 4294901760, %v32967_v35 }
 0x4c3   :  { %v3794_v62 = vmul.f32 %v31581_v51, %v32456_v37  ;;  %30000 = vmatpush3.bf16.msra.mxu1 %v32913_v60  ;;  %v33063_v60 = vpack.c.bf16 %v36267_v26, %v36266_v52 }
 0x4c4   :  { %30001 = vmatprep.subr.bf16.mxu1 %v36261_v12 }
 0x4c5   :  { %v33047_v7 = vadd.f32 %v3794_v62, %v3308_v17 }
 0x4c6   :  { %27078 = vmatmul.mubr.f32.vlgmr.msra.gmra.mrb[10].mxu1 %v3868_v28 }
 0x4c7   :  { %30003 = vmatpush3.bf16.msra.mxu1 %v32873_v8  ;;  %27088 = vmatprep.mubr.msk.f32.mxu1 %vm32104_vm6, %v36260_v14  ;;  %v33072_v8 = vpack.c.bf16 %v4981_v39, %v4974_v10 }
 0x4c8   :  { %30004 = vmatprep.subr.bf16.mxu1 %v36261_v12 }
 0x4cb   :  { %30006 = vmatpush3.bf16.msra.mxu1 %v32889_v22 }
 0x4ce   :  { %27089 = vmatmul.mubr.f32.vlgmr.msra.gmra.mrb[10].mxu1 %v3868_v28 }
 0x4ec   :  { %v27120_v43 = vpop.f32.mrb[8].mxu0 }
 0x4ed   :  { %v4817_v32 = vsub.f32 0.0, %v27120_v43  ;;  %v4806_v36 = vpop.f32.mrb[9].mxu0 }
 0x4ee   :  { %v4816_v40 = vsub.f32 0.0, %v4806_v36 }
 0x4ef   :  { %v4820_v50 = vmul.f32 1.442695, %v4817_v32 }
 0x4f0   :  { %v4818_v41 = vmul.f32 1.442695, %v4816_v40 }
 0x4f1   :  { %32057 = vpow2.f32 %v4820_v50 }
 0x4f2   :  { %32059 = vpow2.f32 %v4818_v41  ;;  %v24848_v41 = vld [vmem:[%s36176_s9 + $0x40] sm:$0xff] }
 0x4fb   :  { %v32058_v35 = vpop.eup %32057 }
 0x4fc   :  { %v32060_v56 = vpop.eup %32059  ;;  %v4823_v22 = vadd.f32 1.0, %v32058_v35  ;;  %v24849_v35 = vld [vmem:[%s36176_s9 + $0x48] sm:$0xff] }
 0x4fd   :  { %v4822_v13 = vadd.f32 1.0, %v32060_v56  ;;  %v5437_v56 = vand.u32 4294901760, %v24848_v41 }
 0x4fe   :  { %32061 = vrcp.f32 %v4823_v22  ;;  %v5440_v22 = vand.u32 4294901760, %v24849_v35 }
 0x4ff   :  { %32063 = vrcp.f32 %v4822_v13 }
 0x500   :  { %v33152_v13 = vpack.c.bf16 %v5440_v22, %v5437_v56 }
 0x502   :  { %30104 = vmatprep.subr.bf16.mxu1 %v33152_v13 }
 0x503   :  { %30106 = vmatpush3.bf16.msra.mxu1 %v33152_v13 }
 0x508   :  { %v32062_v29 = vpop.eup %32061 }
 0x509   :  { %v32064_v47 = vpop.eup %32063  ;;  %v4829_v0 = vmul.f32 %v32062_v29, %v27120_v43  ;;  %v21041_v28 = vsub.f32 1.0, %v32062_v29 }
 0x50a   :  { %v4828_v10 = vmul.f32 %v32064_v47, %v4806_v36  ;;  %v21040_v39 = vsub.f32 1.0, %v32064_v47 }
 0x50b   :  { %v4834_v16 = vsel %vm671_vm2, %v4829_v0, 0  ;;  %v21043_v33 = vmul.f32 %v27120_v43, %v21041_v28 }
 0x50c   :  { %v33075_v9 = vand.u32 4294901760, %v4834_v16  ;;  %v4831_v4 = vsel %vm671_vm2, %v4828_v10, 0  ;;  %v21042_v42 = vmul.f32 %v21040_v39, %v4806_v36  ;;  %v24852_v39 = vld [vmem:[%s36176_s9 + $0x60] sm:$0xff] }
 0x50d   :  { %v21045_v51 = vadd.f32 1.0, %v21043_v33  ;;  %v4909_v55 = vand.u32 4294901760, %v4831_v4  ;;  %v5449_v33 = vand.u32 4294901760, %v24852_v39 }
 0x50e   :  { %v4920_v17 = vsub.f32 %v4834_v16, %v33075_v9  ;;  %v21044_v62 = vadd.f32 1.0, %v21042_v42  ;;  %v24853_v16 = vld [vmem:[%s36176_s9 + $0x68] sm:$0xff] }
 0x50f   :  { %v4910_v44 = vsub.f32 %v4831_v4, %v4909_v55  ;;  %v33079_v58 = vmul.f32 %v32062_v29, %v21045_v51  ;;  %v24850_v29 = vld [vmem:[%s36176_s9 + $0x50] sm:$0xff]  ;;  %v33178_v4 = vld [vmem:[%s36178_s11 + $0x40] sm:$0xff]  ;;  %v33182_v51 = vsub.f32 %v24848_v41, %v5437_v56 }
 0x510   :  { %v4921_v52 = vand.u32 4294901760, %v4920_v17  ;;  %v33081_v26 = vmul.f32 %v32064_v47, %v21044_v62  ;;  %v24851_v47 = vld [vmem:[%s36176_s9 + $0x58] sm:$0xff]  ;;  %v5443_v0 = vand.u32 4294901760, %v24850_v29  ;;  %v24854_v62 = vld [vmem:[%s36176_s9 + $0x70] sm:$0xff] }
 0x511   :  { %36269 = vst [vmem:[#allocation19_spill] sm:$0xff] %v33079_v58  ;;  %v4911_v2 = vand.u32 4294901760, %v4910_v44  ;;  %v5446_v28 = vand.u32 4294901760, %v24851_v47 }
 0x512   :  { %36270 = vst [vmem:[#allocation20_spill] sm:$0xff] %v33081_v26  ;;  %v4922_v32 = vsub.f32 %v4920_v17, %v4921_v52 }
 0x513   :  { %v4912_v40 = vsub.f32 %v4910_v44, %v4911_v2  ;;  %v33163_v10 = vpack.c.bf16 %v5446_v28, %v5443_v0 }
 0x514   :  { %v4923_v50 = vand.u32 4294901760, %v4922_v32  ;;  %v5532_v32 = vand.u32 4294901760, %v33182_v51 }
 0x515   :  { %v4913_v43 = vand.u32 4294901760, %v4912_v40  ;;  %30108 = vmatprep.subr.bf16.mxu1 %v33163_v10 }
 0x516   :  { %30110 = vmatpush3.bf16.msra.mxu1 %v33163_v10 }
 0x517   :  { %27137 = vmatprep.mubr.f32.mxu0 %v4913_v43  ;;  %v6971_v43 = vand.u32 4294901760, %v33178_v4 }
 0x518   :  { %27138 = vmatmul.mubr.f32.vlgmr.msra.gmra.mrb[10].mxu0 %v4923_v50 }
 0x519   :  { %30026 = vmatpush3.bf16.msra.mxu0 %v32973_v11  ;;  %27156 = vmatprep.mubr.f32.mxu0 %v4909_v55 }
 0x51a   :  { %30028 = vmatprep.subr.bf16.mxu0 %v32988_v34 }
 0x51d   :  { %30030 = vmatpush3.bf16.msra.mxu0 %v32988_v34 }
 0x51e   :  { %30032 = vmatprep.subr.bf16.mxu0 %v32997_v15 }
 0x521   :  { %30034 = vmatpush3.bf16.msra.mxu0 %v32997_v15 }
 0x522   :  { %30036 = vmatprep.subr.bf16.mxu0 %v32999_v18 }
 0x525   :  { %30038 = vmatpush3.bf16.msra.mxu0 %v32999_v18 }
 0x526   :  { %30040 = vmatprep.subr.bf16.mxu0 %v33003_v5 }
 0x528   :  { %27157 = vmatmul.mubr.f32.vlgmr.msra.gmra.mrb[10].mxu0 %v33075_v9 }
 0x529   :  { %30042 = vmatpush3.bf16.msra.mxu0 %v33003_v5  ;;  %27175 = vmatprep.mubr.f32.mxu0 %v4910_v44  ;;  %v24855_v44 = vld [vmem:[%s36176_s9 + $0x78] sm:$0xff] }
 0x52a   :  { %30044 = vmatprep.subr.bf16.mxu0 %v33011_v23 }
 0x52d   :  { %30046 = vmatpush3.bf16.msra.mxu0 %v33011_v23 }
 0x52e   :  { %30048 = vmatprep.subr.bf16.mxu0 %v33017_v6 }
 0x531   :  { %30050 = vmatpush3.bf16.msra.mxu0 %v33017_v6 }
 0x532   :  { %30052 = vmatprep.subr.bf16.mxu0 %v33025_v19 }
 0x535   :  { %30054 = vmatpush3.bf16.msra.mxu0 %v33025_v19 }
 0x536   :  { %30056 = vmatprep.subr.bf16.mxu0 %v32921_v20 }
 0x538   :  { %27176 = vmatmul.mubr.f32.vlgmr.msra.gmra.mrb[10].mxu0 %v4920_v17  ;;  %v24861_v17 = vld [vmem:[%s36178_s11 + $0x48] sm:$0xff] }
 0x539   :  { %30058 = vmatpush3.bf16.msra.mxu0 %v32921_v20  ;;  %27194 = vmatprep.mubr.f32.mxu0 %v4911_v2  ;;  %v5458_v2 = vand.u32 4294901760, %v24855_v44  ;;  %v6974_v50 = vand.u32 4294901760, %v24861_v17 }
 0x53a   :  { %30060 = vmatprep.subr.bf16.mxu0 %v32931_v49 }
 0x53d   :  { %30062 = vmatpush3.bf16.msra.mxu0 %v32931_v49 }
 0x53e   :  { %30064 = vmatprep.subr.bf16.mxu0 %v32941_v63 }
 0x541   :  { %30066 = vmatpush3.bf16.msra.mxu0 %v32941_v63 }
 0x542   :  { %30068 = vmatprep.subr.bf16.mxu0 %v32957_v46 }
 0x545   :  { %30070 = vmatpush3.bf16.msra.mxu0 %v32957_v46 }
 0x546   :  { %30072 = vmatprep.subr.bf16.mxu0 %v33053_v1 }
 0x548   :  { %27195 = vmatmul.mubr.f32.vlgmr.msra.gmra.mrb[10].mxu0 %v4921_v52  ;;  %v5455_v52 = vand.u32 4294901760, %v24854_v62 }
 0x549   :  { %30074 = vmatpush3.bf16.msra.mxu0 %v33053_v1  ;;  %27213 = vmatprep.mubr.f32.mxu0 %v4909_v55 }
 0x54a   :  { %30076 = vmatprep.subr.bf16.mxu0 %v33063_v60 }
 0x54d   :  { %30078 = vmatpush3.bf16.msra.mxu0 %v33063_v60 }
 0x54e   :  { %30080 = vmatprep.subr.bf16.mxu0 %v33070_v59 }
 0x551   :  { %30082 = vmatpush3.bf16.msra.mxu0 %v33070_v59 }
 0x552   :  { %30084 = vmatprep.subr.bf16.mxu0 %v33072_v8 }
 0x555   :  { %30086 = vmatpush3.bf16.msra.mxu0 %v33072_v8 }
 0x556   :  { %30088 = vmatprep.subr.bf16.mxu0 %v32921_v20 }
 0x558   :  { %27214 = vmatmul.mubr.f32.vlgmr.msra.gmra.mrb[10].mxu0 %v33075_v9 }
 0x559   :  { %30090 = vmatpush3.bf16.msra.mxu0 %v32921_v20  ;;  %27232 = vmatprep.mubr.f32.mxu0 %v4909_v55  ;;  %v33184_v55 = vsub.f32 %v24849_v35, %v5440_v22  ;;  %v33241_v22 = vsub.f32 %v24852_v39, %v5449_v33 }
 0x55a   :  { %30092 = vmatprep.subr.bf16.mxu0 %v32931_v49 }
 0x55b   :  { %v5539_v40 = vand.u32 4294901760, %v33184_v55 }
 0x55d   :  { %30094 = vmatpush3.bf16.msra.mxu0 %v32931_v49 }
 0x55e   :  { %30096 = vmatprep.subr.bf16.mxu0 %v32941_v63 }
 0x561   :  { %30098 = vmatpush3.bf16.msra.mxu0 %v32941_v63 }
 0x562   :  { %30100 = vmatprep.subr.bf16.mxu0 %v32957_v46 }
 0x565   :  { %30102 = vmatpush3.bf16.msra.mxu0 %v32957_v46 }
 0x568   :  { %27233 = vmatmul.mubr.f32.vlgmr.msra.gmra.mrb[10].mxu0 %v33075_v9  ;;  %v5452_v9 = vand.u32 4294901760, %v24853_v16 }
 0x569   :  { %27351 = vmatprep.mubr.f32.mxu0 %v32581_v61 }
 0x56a   :  { %v33180_v42 = vpack.c.bf16 %v5452_v9, %v5449_v33 }
 0x56c   :  { %30112 = vmatprep.subr.bf16.mxu1 %v33180_v42 }
 0x56d   :  { %30114 = vmatpush3.bf16.msra.mxu1 %v33180_v42 }
 0x5a1   :  { %v4280_v18 = vpop.f32.mrb[10].mxu1 }
 0x5a2   :  { %v31582_v34 = vadd.f32 %v4280_v18, %v33047_v7  ;;  %v27090_v11 = vpop.f32.mrb[11].mxu1  ;;  %v33201_v18 = vpack.c.bf16 %v5458_v2, %v5455_v52 }
 0x5a3   :  { %v5540_v11 = vsub.f32 %v33184_v55, %v5539_v40 }
 0x5a4   :  { %v4284_v20 = vsub.f32 0.0, %v31582_v34  ;;  %30116 = vmatprep.subr.bf16.mxu1 %v33201_v18 }
 0x5a5   :  { %30118 = vmatpush3.bf16.msra.mxu1 %v33201_v18 }
 0x5a6   :  { %v4285_v15 = vmul.f32 1.442695, %v4284_v20  ;;  %v24862_v20 = vld [vmem:[%s36178_s11 + $0x50] sm:$0xff] }
 0x5a8   :  { %32065 = vpow2.f32 %v4285_v15  ;;  %v24863_v15 = vld [vmem:[%s36178_s11 + $0x58] sm:$0xff] }
 0x5b2   :  { %v32066_v49 = vpop.eup %32065 }
 0x5b3   :  { %v4287_v5 = vadd.f32 1.0, %v32066_v49  ;;  %v33217_v49 = vsub.f32 %v24850_v29, %v5443_v0  ;;  %v33243_v29 = vsub.f32 %v24853_v16, %v5452_v9 }
 0x5b5   :  { %32067 = vrcp.f32 %v4287_v5  ;;  %v33219_v5 = vsub.f32 %v24851_v47, %v5446_v28 }
 0x5bf   :  { %v32068_v23 = vpop.eup %32067 }
 0x5c0   :  { %v4290_v63 = vmul.f32 %v32068_v23, %v31582_v34  ;;  %v22069_v6 = vsub.f32 1.0, %v32068_v23 }
 0x5c2   :  { %v33128_v19 = vadd.f32 %v4290_v63, %v32465_v45  ;;  %v22070_v46 = vmul.f32 %v31582_v34, %v22069_v6  ;;  %v5533_v34 = vsub.f32 %v33182_v51, %v5532_v32  ;;  %v5541_v63 = vand.u32 4294901760, %v5540_v11 }
 0x5c4   :  { %v33131_v1 = vand.u32 4294901760, %v33128_v19  ;;  %v22071_v60 = vadd.f32 1.0, %v22070_v46  ;;  %v6968_v6 = vsel %vm2819_vm5, %v33128_v19, 0  ;;  %v33226_v46 = vsub.f32 %v33178_v4, %v6971_v43 }
 0x5c5   :  { %v33245_v47 = vand.u32 4294901760, %v6968_v6  ;;  %v36216_v4 = vand.u32 4294901760, %v33241_v22 }
 0x5c6   :  { %v33133_v59 = vmul.f32 %v32068_v23, %v22071_v60  ;;  %27349 = vmatprep.subr.mxu0 %v33131_v1  ;;  %v6104_v7 = vsub.f32 %v33128_v19, %v33131_v1  ;;  %v5534_v23 = vand.u32 4294901760, %v5533_v34  ;;  %v36220_v60 = vand.u32 4294901760, %v33217_v49 }
 0x5c7   :  { %27350 = vmatpush3.msra.mxu0 %v33131_v1  ;;  %v7052_v39 = vand.u32 4294901760, %v33226_v46  ;;  %v5561_v9 = vsub.f32 %v33241_v22, %v36216_v4 }
 0x5c8   :  { %36271 = vst [vmem:[#allocation21_spill] sm:$0xff] %v33133_v59  ;;  %27352 = vmatmul.mubr.f32.vlgmr.msra.gmra.mrb[12].mxu0 %v32583_v27  ;;  %v6105_v8 = vand.u32 4294901760, %v6104_v7  ;;  %v33233_v41 = vpack.c.bf16 %v5541_v63, %v5534_v23  ;;  %v5547_v35 = vsub.f32 %v33217_v49, %v36220_v60  ;;  %v33275_v23 = vsub.f32 %v24855_v44, %v5458_v2 }
 0x5c9   :  { %27356 = vmatprep.mubr.msk.f32.mxu0 %vm161_vm0, %v32538_v30  ;;  %v5562_v63 = vand.u32 4294901760, %v5561_v9 }
 0x5ca   :  { %v6106_v45 = vsub.f32 %v6104_v7, %v6105_v8  ;;  %30120 = vmatprep.subr.bf16.mxu1 %v33233_v41  ;;  %v5548_v0 = vand.u32 4294901760, %v5547_v35 }
 0x5cc   :  { %v6107_v36 = vand.u32 4294901760, %v6106_v45  ;;  %v6977_v45 = vand.u32 4294901760, %v24862_v20 }
 0x5ce   :  { %27354 = vmatprep.subr.mxu0 %v6107_v36  ;;  %v33252_v34 = vsub.f32 %v24862_v20, %v6977_v45 }
 0x5cf   :  { %27355 = vmatpush3.msra.mxu0 %v6107_v36  ;;  %v6980_v36 = vand.u32 4294901760, %v24863_v15 }
 0x5d0   :  { %27357 = vmatmul.mubr.msk.f32.vlgmr.msra.gmra.mrb[12].mxu0 %vm161_vm0, %v32541_v31  ;;  %27359 = vmatprep.subr.mxu0 %v6104_v7 }
 0x5d1   :  { %27360 = vmatpush3.msra.mxu0 %v6104_v7  ;;  %27361 = vmatprep.mubr.f32.mxu0 %v32547_v54  ;;  %v36217_v7 = vand.u32 4294901760, %v33219_v5  ;;  %v33254_v11 = vsub.f32 %v24863_v15, %v6980_v36  ;;  %v33271_v15 = vsub.f32 %v6968_v6, %v33245_v47  ;;  %v30221_v9 = vpack.c.bf16 %v6980_v36, %v6977_v45 }
 0x5d2   :  { %27364 = vmatprep.subr.mxu0 %v33131_v1 }
 0x5d3   :  { %v5554_v56 = vsub.f32 %v33219_v5, %v36217_v7  ;;  %v7073_v44 = vand.u32 4294901760, %v33254_v11  ;;  %v33292_v2 = vand.u32 4294901760, %v33271_v15 }
 0x5d5   :  { %v5555_v28 = vand.u32 4294901760, %v5554_v56  ;;  %v33277_v56 = vpack.c.bf16 %v6974_v50, %v6971_v43 }
 0x5d7   :  { %v33261_v33 = vpack.c.bf16 %v5555_v28, %v5548_v0  ;;  %v7053_v0 = vsub.f32 %v33226_v46, %v7052_v39 }
 0x5d8   :  { %27362 = vmatmul.mubr.f32.vlgmr.msra.gmra.mrb[12].mxu0 %v32555_v3 }
 0x5d9   :  { %27365 = vmatpush3.msra.mxu0 %v33131_v1  ;;  %27366 = vmatprep.mubr.f32.mxu0 %v32561_v57 }
 0x5da   :  { %27369 = vmatprep.subr.mxu0 %v6105_v8 }
 0x5e0   :  { %27367 = vmatmul.mubr.f32.vlgmr.msra.gmra.mrb[12].mxu0 %v32569_v38 }
 0x5e1   :  { %27370 = vmatpush3.msra.mxu0 %v6105_v8  ;;  %27371 = vmatprep.mubr.msk.f32.mxu0 %vm161_vm0, %v32538_v30  ;;  %v33231_v8 = vsub.f32 %v24861_v17, %v6974_v50  ;;  %v36215_v17 = vand.u32 4294901760, %v33243_v29 }
 0x5e2   :  { %27374 = vmatprep.subr.mxu0 %v33131_v1 }
 0x5e3   :  { %v7059_v16 = vand.u32 4294901760, %v33231_v8  ;;  %v5568_v20 = vsub.f32 %v33243_v29, %v36215_v17  ;;  %v36219_v17 = vand.u32 4294901760, %v33275_v23 }
 0x5e5   :  { %v5569_v35 = vand.u32 4294901760, %v5568_v20  ;;  %v7060_v6 = vsub.f32 %v33231_v8, %v7059_v16  ;;  %v5582_v50 = vsub.f32 %v33275_v23, %v36219_v17  ;;  %v7042_v17 = vsub.f32 %v33271_v15, %v33292_v2 }
 0x5e7   :  { %v5583_v4 = vand.u32 4294901760, %v5582_v50  ;;  %v33314_v50 = vpack.c.bf16 %v33184_v55, %v33182_v51  ;;  %v36274_v51 = vand.u32 4294901760, %v33241_v22  ;;  %v36275_v55 = vand.u32 4294901760, %v33243_v29 }
 0x5e8   :  { %27372 = vmatmul.mubr.msk.f32.vlgmr.msra.gmra.mrb[12].mxu0 %vm161_vm0, %v32541_v31 }
 0x5e9   :  { %27375 = vmatpush3.msra.mxu0 %v33131_v1  ;;  %27376 = vmatprep.mubr.msk.f32.mxu0 %vm161_vm0, %v32538_v30  ;;  %v33273_v1 = vsub.f32 %v24854_v62, %v5455_v52  ;;  %v7066_v62 = vand.u32 4294901760, %v33252_v34  ;;  %v33289_v52 = vpack.c.bf16 %v5569_v35, %v5562_v63  ;;  %v7054_v63 = vand.u32 4294901760, %v7053_v0 }
 0x5ea   :  { %30217 = vmatprep.subr.bf16.mxu0 %v36261_v12  ;;  %v7061_v35 = vand.u32 4294901760, %v7060_v6  ;;  %v33316_v0 = vand.u32 4294901760, %v7042_v17  ;;  %v33322_v6 = vpack.c.bf16 %v33219_v5, %v33217_v49  ;;  %v30230_v17 = vpack.c.bf16 %v33231_v8, %v33226_v46 }
 0x5eb   :  { %v36218_v28 = vand.u32 4294901760, %v33273_v1  ;;  %v7067_v7 = vsub.f32 %v33252_v34, %v7066_v62  ;;  %v33363_v46 = vpack.c.bf16 %v5539_v40, %v5532_v32  ;;  %v36272_v8 = vand.u32 4294901760, %v33217_v49 }
 0x5ec   :  { %v30224_v45 = vpack.c.bf16 %v7061_v35, %v7054_v63  ;;  %v33381_v32 = vpack.c.bf16 %v36275_v55, %v36274_v51  ;;  %v36276_v40 = vand.u32 4294901760, %v33273_v1  ;;  %v36277_v49 = vand.u32 4294901760, %v33275_v23 }
 0x5ed   :  { %v5575_v43 = vsub.f32 %v33273_v1, %v36218_v28  ;;  %v7074_v28 = vsub.f32 %v33254_v11, %v7073_v44  ;;  %v7068_v36 = vand.u32 4294901760, %v7067_v7  ;;  %v33329_v7 = vpack.c.bf16 %v33243_v29, %v33241_v22 }
 0x5ef   :  { %v5576_v20 = vand.u32 4294901760, %v5575_v43  ;;  %v7075_v43 = vand.u32 4294901760, %v7074_v28  ;;  %v33337_v28 = vpack.c.bf16 %v33275_v23, %v33273_v1 }
 0x5f0   :  { %27377 = vmatmul.mubr.msk.f32.vlgmr.msra.gmra.mrb[12].mxu0 %vm161_vm0, %v32541_v31 }
 0x5f1   :  { %30219 = vmatpush3.bf16.msra.mxu0 %v33277_v56  ;;  %27429 = vmatprep.mubr.msk.f32.mxu0 %vm32104_vm6, %v36260_v14  ;;  %v33310_v60 = vpack.c.bf16 %v5583_v4, %v5576_v20  ;;  %v30227_v4 = vpack.c.bf16 %v7075_v43, %v7068_v36  ;;  %v30233_v20 = vpack.c.bf16 %v33254_v11, %v33252_v34 }
 0x5f2   :  { %30220 = vmatprep.subr.bf16.mxu0 %v36261_v12  ;;  %v30242_v34 = vpack.c.bf16 %v7059_v16, %v7052_v39  ;;  %v30245_v11 = vpack.c.bf16 %v7073_v44, %v7066_v62  ;;  %v36273_v39 = vand.u32 4294901760, %v33219_v5  ;;  %v33389_v5 = vpack.c.bf16 %v36277_v49, %v36276_v40 }
 0x5f4   :  { %v33371_v16 = vpack.c.bf16 %v36273_v39, %v36272_v8 }
 0x5f5   :  { %30222 = vmatpush3.bf16.msra.mxu0 %v30221_v9 }
 0x5f6   :  { %30223 = vmatprep.subr.bf16.mxu0 %v36261_v12 }
 0x5f8   :  { %27430 = vmatmul.mubr.f32.vlgmr.msra.gmra.mrb[14].mxu0 %v33316_v0 }
 0x5f9   :  { %30225 = vmatpush3.bf16.msra.mxu0 %v30224_v45  ;;  %27440 = vmatprep.mubr.msk.f32.mxu0 %vm32104_vm6, %v36260_v14 }
 0x5fa   :  { %30226 = vmatprep.subr.bf16.mxu0 %v36261_v12 }
 0x5fd   :  { %30228 = vmatpush3.bf16.msra.mxu0 %v30227_v4 }
 0x5fe   :  { %30229 = vmatprep.subr.bf16.mxu0 %v36261_v12 }
 0x600   :  { %27441 = vmatmul.mubr.f32.vlgmr.msra.gmra.mrb[14].mxu0 %v33245_v47 }
 0x601   :  { %30231 = vmatpush3.bf16.msra.mxu0 %v30230_v17  ;;  %27451 = vmatprep.mubr.msk.f32.mxu0 %vm32104_vm6, %v36260_v14 }
 0x602   :  { %30232 = vmatprep.subr.bf16.mxu0 %v36261_v12 }
 0x605   :  { %30234 = vmatpush3.bf16.msra.mxu0 %v30233_v20 }
 0x606   :  { %30235 = vmatprep.subr.bf16.mxu0 %v36261_v12 }
 0x608   :  { %27452 = vmatmul.mubr.f32.vlgmr.msra.gmra.mrb[14].mxu0 %v33271_v15 }
 0x609   :  { %30237 = vmatpush3.bf16.msra.mxu0 %v33277_v56  ;;  %27462 = vmatprep.mubr.msk.f32.mxu0 %vm32104_vm6, %v36260_v14 }
 0x60a   :  { %30238 = vmatprep.subr.bf16.mxu0 %v36261_v12 }
 0x60d   :  { %30240 = vmatpush3.bf16.msra.mxu0 %v30221_v9 }
 0x60e   :  { %30241 = vmatprep.subr.bf16.mxu0 %v36261_v12 }
 0x610   :  { %27463 = vmatmul.mubr.f32.vlgmr.msra.gmra.mrb[14].mxu0 %v33292_v2 }
 0x611   :  { %30243 = vmatpush3.bf16.msra.mxu0 %v30242_v34  ;;  %27473 = vmatprep.mubr.msk.f32.mxu0 %vm32104_vm6, %v36260_v14 }
 0x612   :  { %30244 = vmatprep.subr.bf16.mxu0 %v36261_v12 }
 0x615   :  { %30246 = vmatpush3.bf16.msra.mxu0 %v30245_v11 }
 0x616   :  { %30247 = vmatprep.subr.bf16.mxu0 %v36261_v12 }
 0x618   :  { %27474 = vmatmul.mubr.f32.vlgmr.msra.gmra.mrb[14].mxu0 %v33245_v47 }
 0x619   :  { %30249 = vmatpush3.bf16.msra.mxu0 %v33277_v56  ;;  %27484 = vmatprep.mubr.msk.f32.mxu0 %vm32104_vm6, %v36260_v14 }
 0x61a   :  { %30250 = vmatprep.subr.bf16.mxu0 %v36261_v12 }
 0x61d   :  { %30252 = vmatpush3.bf16.msra.mxu0 %v30221_v9 }
 0x61e   :  { %30289 = vmatprep.subr.bf16.mxu0 %v36261_v12 }
 0x620   :  { %27485 = vmatmul.mubr.f32.vlgmr.msra.gmra.mrb[14].mxu0 %v33245_v47 }
 0x621   :  { %27561 = vmatprep.mubr.msk.f32.mxu0 %vm32104_vm6, %v36260_v14 }
 0x63b   :  { %v27234_v56 = vpop.f32.mrb[10].mxu0 }
 0x63c   :  { %v5417_v22 = vsub.f32 0.0, %v27234_v56  ;;  %v5406_v62 = vpop.f32.mrb[11].mxu0 }
 0x63d   :  { %v5416_v29 = vsub.f32 0.0, %v5406_v62 }
 0x63e   :  { %v5420_v44 = vmul.f32 1.442695, %v5417_v22 }
 0x63f   :  { %v5418_v63 = vmul.f32 1.442695, %v5416_v29 }
 0x640   :  { %32069 = vpow2.f32 %v5420_v44 }
 0x641   :  { %32071 = vpow2.f32 %v5418_v63 }
 0x64a   :  { %v32070_v9 = vpop.eup %32069 }
 0x64b   :  { %v32072_v35 = vpop.eup %32071  ;;  %v5423_v45 = vadd.f32 1.0, %v32070_v9 }
 0x64c   :  { %v5422_v36 = vadd.f32 1.0, %v32072_v35 }
 0x64d   :  { %32073 = vrcp.f32 %v5423_v45 }
 0x64e   :  { %32075 = vrcp.f32 %v5422_v36 }
 0x657   :  { %v32074_v1 = vpop.eup %32073 }
 0x658   :  { %v32076_v23 = vpop.eup %32075  ;;  %v5429_v43 = vmul.f32 %v32074_v1, %v27234_v56  ;;  %v20421_v4 = vsub.f32 1.0, %v32074_v1 }
 0x659   :  { %v5428_v17 = vmul.f32 %v32076_v23, %v5406_v62  ;;  %v20420_v20 = vsub.f32 1.0, %v32076_v23 }
 0x65a   :  { %v5434_v34 = vsel %vm671_vm2, %v5429_v43, 0  ;;  %v20423_v11 = vmul.f32 %v27234_v56, %v20421_v4 }
 0x65b   :  { %v33394_v8 = vand.u32 4294901760, %v5434_v34  ;;  %v5431_v39 = vsel %vm671_vm2, %v5428_v17, 0  ;;  %v20422_v51 = vmul.f32 %v20420_v20, %v5406_v62 }
 0x65c   :  { %v20425_v55 = vadd.f32 1.0, %v20423_v11  ;;  %v5509_v40 = vand.u32 4294901760, %v5431_v39  ;;  %v24865_v11 = vld [vmem:[%s36178_s11 + $0x68] sm:$0xff] }
 0x65d   :  { %v5520_v49 = vsub.f32 %v5434_v34, %v33394_v8  ;;  %v20424_v22 = vadd.f32 1.0, %v20422_v51  ;;  %v24864_v34 = vld [vmem:[%s36178_s11 + $0x60] sm:$0xff]  ;;  %v24866_v51 = vld [vmem:[%s36178_s11 + $0x70] sm:$0xff] }
 0x65e   :  { %v5510_v29 = vsub.f32 %v5431_v39, %v5509_v40  ;;  %v33398_v44 = vmul.f32 %v32074_v1, %v20425_v55  ;;  %v7460_v39 = vand.u32 4294901760, %v24865_v11  ;;  %v24867_v55 = vld [vmem:[%s36178_s11 + $0x78] sm:$0xff] }
 0x65f   :  { %v5521_v63 = vand.u32 4294901760, %v5520_v49  ;;  %v33400_v9 = vmul.f32 %v32076_v23, %v20424_v22  ;;  %v7463_v22 = vand.u32 4294901760, %v24866_v51 }
 0x660   :  { %36278 = vst [vmem:[#allocation22_spill] sm:$0xff] %v33398_v44  ;;  %v5511_v35 = vand.u32 4294901760, %v5510_v29 }
 0x661   :  { %36279 = vst [vmem:[#allocation23_spill] sm:$0xff] %v33400_v9  ;;  %v5522_v45 = vsub.f32 %v5520_v49, %v5521_v63 }
 0x662   :  { %v5512_v36 = vsub.f32 %v5510_v29, %v5511_v35 }
 0x663   :  { %v5523_v43 = vand.u32 4294901760, %v5522_v45 }
 0x664   :  { %v5513_v56 = vand.u32 4294901760, %v5512_v36 }
 0x666   :  { %27251 = vmatprep.mubr.f32.mxu1 %v5513_v56 }
 0x667   :  { %27252 = vmatmul.mubr.f32.vlgmr.msra.gmra.mrb[12].mxu1 %v5523_v43 }
 0x668   :  { %30122 = vmatpush3.bf16.msra.mxu1 %v33233_v41  ;;  %27270 = vmatprep.mubr.f32.mxu1 %v5509_v40 }
 0x669   :  { %30124 = vmatprep.subr.bf16.mxu1 %v33261_v33 }
 0x66c   :  { %30126 = vmatpush3.bf16.msra.mxu1 %v33261_v33 }
 0x66d   :  { %30128 = vmatprep.subr.bf16.mxu1 %v33289_v52 }
 0x670   :  { %30130 = vmatpush3.bf16.msra.mxu1 %v33289_v52 }
 0x671   :  { %30132 = vmatprep.subr.bf16.mxu1 %v33310_v60 }
 0x674   :  { %30134 = vmatpush3.bf16.msra.mxu1 %v33310_v60 }
 0x675   :  { %30136 = vmatprep.subr.bf16.mxu1 %v33314_v50 }
 0x677   :  { %27271 = vmatmul.mubr.f32.vlgmr.msra.gmra.mrb[12].mxu1 %v33394_v8 }
 0x678   :  { %30138 = vmatpush3.bf16.msra.mxu1 %v33314_v50  ;;  %27289 = vmatprep.mubr.f32.mxu1 %v5510_v29  ;;  %v7466_v29 = vand.u32 4294901760, %v24867_v55 }
 0x679   :  { %30140 = vmatprep.subr.bf16.mxu1 %v33322_v6 }
 0x67c   :  { %30142 = vmatpush3.bf16.msra.mxu1 %v33322_v6 }
 0x67d   :  { %30144 = vmatprep.subr.bf16.mxu1 %v33329_v7 }
 0x680   :  { %30146 = vmatpush3.bf16.msra.mxu1 %v33329_v7 }
 0x681   :  { %30148 = vmatprep.subr.bf16.mxu1 %v33337_v28 }
 0x684   :  { %30150 = vmatpush3.bf16.msra.mxu1 %v33337_v28 }
 0x685   :  { %30152 = vmatprep.subr.bf16.mxu1 %v33152_v13 }
 0x687   :  { %27290 = vmatmul.mubr.f32.vlgmr.msra.gmra.mrb[12].mxu1 %v5520_v49  ;;  %v7544_v49 = vsub.f32 %v24865_v11, %v7460_v39 }
 0x688   :  { %30154 = vmatpush3.bf16.msra.mxu1 %v33152_v13  ;;  %27308 = vmatprep.mubr.f32.mxu1 %v5511_v35  ;;  %v7558_v35 = vsub.f32 %v24867_v55, %v7466_v29  ;;  %v36286_v55 = vld [vmem:[#allocation3_spill] sm:$0xff] }
 0x689   :  { %30156 = vmatprep.subr.bf16.mxu1 %v33163_v10  ;;  %v7545_v36 = vand.u32 4294901760, %v7544_v49 }
 0x68c   :  { %30158 = vmatpush3.bf16.msra.mxu1 %v33163_v10 }
 0x68d   :  { %30160 = vmatprep.subr.bf16.mxu1 %v33180_v42 }
 0x690   :  { %30162 = vmatpush3.bf16.msra.mxu1 %v33180_v42 }
 0x691   :  { %30164 = vmatprep.subr.bf16.mxu1 %v33201_v18 }
 0x694   :  { %30166 = vmatpush3.bf16.msra.mxu1 %v33201_v18 }
 0x695   :  { %30168 = vmatprep.subr.bf16.mxu1 %v33363_v46 }
 0x697   :  { %27309 = vmatmul.mubr.f32.vlgmr.msra.gmra.mrb[12].mxu1 %v5521_v63  ;;  %v7551_v63 = vsub.f32 %v24866_v51, %v7463_v22  ;;  %v36285_v51 = vld [vmem:[#allocation2_spill] sm:$0xff] }
 0x698   :  { %30170 = vmatpush3.bf16.msra.mxu1 %v33363_v46  ;;  %27327 = vmatprep.mubr.f32.mxu1 %v5509_v40 }
 0x699   :  { %30172 = vmatprep.subr.bf16.mxu1 %v33371_v16 }
 0x69c   :  { %30174 = vmatpush3.bf16.msra.mxu1 %v33371_v16 }
 0x69d   :  { %30176 = vmatprep.subr.bf16.mxu1 %v33381_v32 }
 0x6a0   :  { %30178 = vmatpush3.bf16.msra.mxu1 %v33381_v32 }
 0x6a1   :  { %30180 = vmatprep.subr.bf16.mxu1 %v33389_v5 }
 0x6a4   :  { %30182 = vmatpush3.bf16.msra.mxu1 %v33389_v5 }
 0x6a5   :  { %30184 = vmatprep.subr.bf16.mxu1 %v33152_v13 }
 0x6a7   :  { %27328 = vmatmul.mubr.f32.vlgmr.msra.gmra.mrb[12].mxu1 %v33394_v8 }
 0x6a8   :  { %30186 = vmatpush3.bf16.msra.mxu1 %v33152_v13  ;;  %27346 = vmatprep.mubr.f32.mxu1 %v5509_v40 }
 0x6a9   :  { %30188 = vmatprep.subr.bf16.mxu1 %v33163_v10 }
 0x6ac   :  { %30190 = vmatpush3.bf16.msra.mxu1 %v33163_v10 }
 0x6ad   :  { %30192 = vmatprep.subr.bf16.mxu1 %v33180_v42 }
 0x6b0   :  { %30194 = vmatpush3.bf16.msra.mxu1 %v33180_v42 }
 0x6b1   :  { %30196 = vmatprep.subr.bf16.mxu1 %v33201_v18 }
 0x6b4   :  { %30198 = vmatpush3.bf16.msra.mxu1 %v33201_v18 }
 0x6b5   :  { %30199 = vmatprep.subr.bf16.mxu1 %v36261_v12 }
 0x6b7   :  { %27347 = vmatmul.mubr.f32.vlgmr.msra.gmra.mrb[12].mxu1 %v33394_v8  ;;  %v7457_v8 = vand.u32 4294901760, %v24864_v34 }
 0x6b8   :  { %27383 = vmatprep.mubr.msk.f32.mxu1 %vm32104_vm6, %v36260_v14 }
 0x6b9   :  { %v7537_v40 = vsub.f32 %v24864_v34, %v7457_v8  ;;  %v30254_v56 = vpack.c.bf16 %v7460_v39, %v7457_v8  ;;  %v36283_v8 = vld [vmem:[#allocation8_spill] sm:$0xff]  ;;  %v36284_v39 = vld [vmem:[#allocation9_spill] sm:$0xff] }
 0x6bb   :  { %v7538_v45 = vand.u32 4294901760, %v7537_v40 }
 0x6bd   :  { %v7539_v43 = vsub.f32 %v7537_v40, %v7538_v45 }
 0x6c3   :  { %v33447_v13 = vpop.f32.mrb[12].mxu0 }
 0x6c4   :  { %36280 = vst [vmem:[#allocation24_spill] sm:$0xff] %v33447_v13  ;;  %v33449_v60 = vpop.f32.mrb[13].mxu0 }
 0x6c5   :  { %36281 = vst [vmem:[#allocation25_spill] sm:$0xff] %v33449_v60 }
 0x6f3   :  { %v33451_v10 = vpop.f32.mrb[14].mxu0 }
 0x6f4   :  { %v27486_v41 = vpop.f32.mrb[15].mxu0 }
 0x6f5   :  { %v7546_v41 = vsub.f32 %v7544_v49, %v7545_v36 }
 0x78a   :  { %v33453_v33 = vpop.f32.mrb[12].mxu1 }
 0x78b   :  { %v6506_v42 = vmul.f32 %v33447_v13, %v33453_v33  ;;  %v33457_v18 = vpop.f32.mrb[13].mxu1 }
 0x78c   :  { %36282 = vst [vmem:[#allocation26_spill] sm:$0xff] %v33457_v18  ;;  %v6505_v52 = vmul.f32 %v33449_v60, %v33457_v18 }
 0x78d   :  { %v6511_v50 = vand.u32 4294901760, %v6506_v42 }
 0x78e   :  { %v6508_v6 = vand.u32 4294901760, %v6505_v52 }
 0x78f   :  { %v6593_v7 = vsub.f32 %v6506_v42, %v6511_v50  ;;  %v7552_v42 = vand.u32 4294901760, %v7551_v63 }
 0x790   :  { %v30200_v28 = vpack.c.bf16 %v6511_v50, %v6508_v6  ;;  %v6586_v46 = vsub.f32 %v6505_v52, %v6508_v6  ;;  %v7559_v52 = vand.u32 4294901760, %v7558_v35  ;;  %v30257_v50 = vpack.c.bf16 %v7466_v29, %v7463_v22  ;;  %v36290_v22 = vld [vmem:[#allocation7_spill] sm:$0xff]  ;;  %v24856_v29 = vld [vmem:[%s36180_s10 + $0x20] sm:$0xff] }
 0x791   :  { %v6594_v16 = vand.u32 4294901760, %v6593_v7  ;;  %v7540_v6 = vand.u32 4294901760, %v7539_v43 }
 0x792   :  { %v6587_v32 = vand.u32 4294901760, %v6586_v46  ;;  %30201 = vmatpush3.bf16.msra.mxu1 %v30200_v28  ;;  %v30206_v5 = vpack.c.bf16 %v6593_v7, %v6586_v46 }
 0x793   :  { %v6595_v62 = vsub.f32 %v6593_v7, %v6594_v16  ;;  %30202 = vmatprep.subr.bf16.mxu1 %v36261_v12  ;;  %v7547_v7 = vand.u32 4294901760, %v7546_v41  ;;  %v24858_v41 = vld [vmem:[%s36180_s10 + $0x30] sm:$0xff] }
 0x794   :  { %v6588_v1 = vsub.f32 %v6586_v46, %v6587_v32  ;;  %v30212_v23 = vpack.c.bf16 %v6594_v16, %v6587_v32  ;;  %v7560_v46 = vsub.f32 %v7558_v35, %v7559_v52 }
 0x795   :  { %v6596_v4 = vand.u32 4294901760, %v6595_v62  ;;  %27384 = vmatmul.mubr.f32.vlgmr.msra.gmra.mrb[14].mxu1 %v32783_v24  ;;  %v30260_v16 = vpack.c.bf16 %v7547_v7, %v7540_v6 }
 0x796   :  { %v6589_v17 = vand.u32 4294901760, %v6588_v1  ;;  %27390 = vmatprep.mubr.msk.f32.mxu1 %vm32104_vm6, %v36260_v14  ;;  %v30266_v1 = vpack.c.bf16 %v7544_v49, %v7537_v40  ;;  %v36287_v40 = vld [vmem:[#allocation4_spill] sm:$0xff]  ;;  %v36288_v49 = vld [vmem:[#allocation5_spill] sm:$0xff] }
 0x798   :  { %v30203_v20 = vpack.c.bf16 %v6596_v4, %v6589_v17  ;;  %v30278_v4 = vpack.c.bf16 %v7545_v36, %v7538_v45 }
 0x79a   :  { %30204 = vmatpush3.bf16.msra.mxu1 %v30203_v20  ;;  %v30281_v20 = vpack.c.bf16 %v7559_v52, %v7552_v42  ;;  %v7953_v52 = vand.u32 4294901760, %v24858_v41 }
 0x79b   :  { %30205 = vmatprep.subr.bf16.mxu1 %v36261_v12 }
 0x79d   :  { %27391 = vmatmul.mubr.msk.f32.vlgmr.msra.gmra.mrb[14].mxu1 %vm2355_vm8, %v32770_v53 }
 0x79e   :  { %30207 = vmatpush3.bf16.msra.mxu1 %v30206_v5  ;;  %27397 = vmatprep.mubr.msk.f32.mxu1 %vm32104_vm6, %v36260_v14  ;;  %v7561_v5 = vand.u32 4294901760, %v7560_v46  ;;  %v33566_v46 = vsub.f32 %v24858_v41, %v7953_v52 }
 0x79f   :  { %30208 = vmatprep.subr.bf16.mxu1 %v36261_v12 }
 0x7a5   :  { %27398 = vmatmul.mubr.f32.vlgmr.msra.gmra.mrb[14].mxu1 %v32774_v48 }
 0x7a6   :  { %30210 = vmatpush3.bf16.msra.mxu1 %v30200_v28  ;;  %27404 = vmatprep.mubr.msk.f32.mxu1 %vm32104_vm6, %v36260_v14 }
 0x7a7   :  { %30211 = vmatprep.subr.bf16.mxu1 %v36261_v12 }
 0x7ad   :  { %27405 = vmatmul.mubr.f32.vlgmr.msra.gmra.mrb[14].mxu1 %v32777_v21 }
 0x7ae   :  { %30213 = vmatpush3.bf16.msra.mxu1 %v30212_v23  ;;  %27411 = vmatprep.mubr.msk.f32.mxu1 %vm32104_vm6, %v36260_v14  ;;  %v30269_v23 = vpack.c.bf16 %v7558_v35, %v7551_v63  ;;  %v7947_v35 = vand.u32 4294901760, %v24856_v29 }
 0x7af   :  { %30214 = vmatprep.subr.bf16.mxu1 %v36261_v12 }
 0x7b5   :  { %27412 = vmatmul.mubr.msk.f32.vlgmr.msra.gmra.mrb[14].mxu1 %vm2355_vm8, %v32770_v53 }
 0x7b6   :  { %30216 = vmatpush3.bf16.msra.mxu1 %v30200_v28  ;;  %27418 = vmatprep.mubr.msk.f32.mxu1 %vm32104_vm6, %v36260_v14  ;;  %v7553_v28 = vsub.f32 %v7551_v63, %v7552_v42  ;;  %v24857_v63 = vld [vmem:[%s36180_s10 + $0x28] sm:$0xff]  ;;  %v24859_v42 = vld [vmem:[%s36180_s10 + $0x38] sm:$0xff] }
 0x7b7   :  { %30253 = vmatprep.subr.bf16.mxu1 %v36261_v12  ;;  %v7950_v45 = vand.u32 4294901760, %v24857_v63 }
 0x7b8   :  { %v7554_v32 = vand.u32 4294901760, %v7553_v28 }
 0x7b9   :  { %v33547_v36 = vpack.c.bf16 %v7950_v45, %v7947_v35  ;;  %v33551_v43 = vsub.f32 %v24857_v63, %v7950_v45  ;;  %v24881_v63 = vld [vmem:[%s36172_s8 + $0x98] sm:$0xff] }
 0x7ba   :  { %v30263_v62 = vpack.c.bf16 %v7561_v5, %v7554_v32  ;;  %v8993_v45 = vand.u32 4294901760, %v24881_v63 }
 0x7bb   :  { %30291 = vmatpush3.bf16.msra.mxu0 %v33547_v36  ;;  %v8035_v7 = vand.u32 4294901760, %v33551_v43 }
 0x7bc   :  { %30292 = vmatprep.subr.bf16.mxu0 %v36261_v12 }
 0x7bd   :  { %27419 = vmatmul.mubr.msk.f32.vlgmr.msra.gmra.mrb[14].mxu1 %vm2355_vm8, %v32770_v53  ;;  %v8036_v5 = vsub.f32 %v33551_v43, %v8035_v7 }
 0x7be   :  { %30255 = vmatpush3.bf16.msra.mxu1 %v30254_v56  ;;  %27495 = vmatprep.mubr.msk.f32.mxu1 %vm32104_vm6, %v36260_v14 }
 0x7bf   :  { %30256 = vmatprep.subr.bf16.mxu1 %v36261_v12 }
 0x7c2   :  { %30258 = vmatpush3.bf16.msra.mxu1 %v30257_v50 }
 0x7c3   :  { %30259 = vmatprep.subr.bf16.mxu1 %v36261_v12 }
 0x7c5   :  { %27496 = vmatmul.mubr.f32.vlgmr.msra.gmra.mrb[16].mxu1 %v33316_v0  ;;  %v24877_v0 = vld [vmem:[%s36170_s7 + $0x10] sm:$0xff] }
 0x7c6   :  { %30261 = vmatpush3.bf16.msra.mxu1 %v30260_v16  ;;  %27506 = vmatprep.mubr.msk.f32.mxu1 %vm32104_vm6, %v36260_v14  ;;  %v8475_v17 = vand.u32 4294901760, %v24877_v0 }
 0x7c7   :  { %30262 = vmatprep.subr.bf16.mxu1 %v36261_v12 }
 0x7ca   :  { %30264 = vmatpush3.bf16.msra.mxu1 %v30263_v62 }
 0x7cb   :  { %30265 = vmatprep.subr.bf16.mxu1 %v36261_v12 }
 0x7cd   :  { %27507 = vmatmul.mubr.f32.vlgmr.msra.gmra.mrb[16].mxu1 %v33245_v47 }
 0x7ce   :  { %30267 = vmatpush3.bf16.msra.mxu1 %v30266_v1  ;;  %27517 = vmatprep.mubr.msk.f32.mxu1 %vm32104_vm6, %v36260_v14  ;;  %v8042_v1 = vand.u32 4294901760, %v33566_v46 }
 0x7cf   :  { %30268 = vmatprep.subr.bf16.mxu1 %v36261_v12 }
 0x7d2   :  { %30270 = vmatpush3.bf16.msra.mxu1 %v30269_v23 }
 0x7d3   :  { %30271 = vmatprep.subr.bf16.mxu1 %v36261_v12 }
 0x7d5   :  { %27518 = vmatmul.mubr.f32.vlgmr.msra.gmra.mrb[16].mxu1 %v33271_v15  ;;  %v8562_v15 = vsub.f32 %v24877_v0, %v8475_v17  ;;  %v8037_v0 = vand.u32 4294901760, %v8036_v5 }
 0x7d6   :  { %30273 = vmatpush3.bf16.msra.mxu1 %v30254_v56  ;;  %27528 = vmatprep.mubr.msk.f32.mxu1 %vm32104_vm6, %v36260_v14 }
 0x7d7   :  { %30274 = vmatprep.subr.bf16.mxu1 %v36261_v12  ;;  %v8563_v34 = vand.u32 4294901760, %v8562_v15 }
 0x7da   :  { %30276 = vmatpush3.bf16.msra.mxu1 %v30257_v50 }
 0x7db   :  { %30277 = vmatprep.subr.bf16.mxu1 %v36261_v12 }
 0x7dd   :  { %27529 = vmatmul.mubr.f32.vlgmr.msra.gmra.mrb[16].mxu1 %v33292_v2  ;;  %v8564_v2 = vsub.f32 %v8562_v15, %v8563_v34 }
 0x7de   :  { %30279 = vmatpush3.bf16.msra.mxu1 %v30278_v4  ;;  %27539 = vmatprep.mubr.msk.f32.mxu1 %vm32104_vm6, %v36260_v14  ;;  %v8043_v4 = vsub.f32 %v33566_v46, %v8042_v1 }
 0x7df   :  { %30280 = vmatprep.subr.bf16.mxu1 %v36261_v12  ;;  %v8565_v11 = vand.u32 4294901760, %v8564_v2 }
 0x7e2   :  { %30282 = vmatpush3.bf16.msra.mxu1 %v30281_v20 }
 0x7e3   :  { %30283 = vmatprep.subr.bf16.mxu1 %v36261_v12 }
 0x7e5   :  { %27540 = vmatmul.mubr.f32.vlgmr.msra.gmra.mrb[16].mxu1 %v33245_v47 }
 0x7e6   :  { %30285 = vmatpush3.bf16.msra.mxu1 %v30254_v56  ;;  %27550 = vmatprep.mubr.msk.f32.mxu1 %vm32104_vm6, %v36260_v14  ;;  %v33549_v56 = vsub.f32 %v24856_v29, %v7947_v35  ;;  %v24880_v29 = vld [vmem:[%s36172_s8 + $0x90] sm:$0xff] }
 0x7e7   :  { %30286 = vmatprep.subr.bf16.mxu1 %v36261_v12  ;;  %v8990_v35 = vand.u32 4294901760, %v24880_v29 }
 0x7e8   :  { %v8028_v6 = vand.u32 4294901760, %v33549_v56 }
 0x7e9   :  { %v33606_v41 = vpack.c.bf16 %v8993_v45, %v8990_v35 }
 0x7ea   :  { %30288 = vmatpush3.bf16.msra.mxu1 %v30257_v50  ;;  %v7956_v50 = vand.u32 4294901760, %v24859_v42  ;;  %v8029_v32 = vsub.f32 %v33549_v56, %v8028_v6 }
 0x7eb   :  { %27619 = vmatprep.subr.mxu1 %v8475_v17 }
 0x7ec   :  { %v33564_v28 = vpack.c.bf16 %v7956_v50, %v7953_v52  ;;  %v33568_v16 = vsub.f32 %v24859_v42, %v7956_v50  ;;  %v8030_v62 = vand.u32 4294901760, %v8029_v32  ;;  %v24882_v42 = vld [vmem:[%s36172_s8 + $0xa0] sm:$0xff]  ;;  %v24883_v52 = vld [vmem:[%s36172_s8 + $0xa8] sm:$0xff] }
 0x7ed   :  { %27551 = vmatmul.mubr.f32.vlgmr.msra.gmra.mrb[16].mxu1 %v33245_v47  ;;  %v36289_v47 = vld [vmem:[#allocation6_spill] sm:$0xff]  ;;  %v8996_v50 = vand.u32 4294901760, %v24882_v42 }
 0x7ee   :  { %27620 = vmatpush3.msra.mxu1 %v8475_v17  ;;  %27621 = vmatprep.mubr.f32.mxu1 %v36283_v8  ;;  %v8049_v23 = vand.u32 4294901760, %v33568_v16  ;;  %v33578_v20 = vpack.c.bf16 %v8037_v0, %v8030_v62  ;;  %v24884_v62 = vld [vmem:[%s36172_s8 + $0xb0] sm:$0xff]  ;;  %v33640_v8 = vsub.f32 %v24880_v29, %v8990_v35 }
 0x7ef   :  { %27624 = vmatprep.subr.mxu1 %v8565_v11  ;;  %30294 = vmatpush3.bf16.msra.mxu0 %v33564_v28 }
 0x7f0   :  { %30295 = vmatprep.subr.bf16.mxu0 %v36261_v12 }
 0x7f1   :  { %27622 = vmatmul.mubr.f32.vlgmr.msra.gmra.mrb[18].mxu1 %v36284_v39  ;;  %v33586_v39 = vpack.c.bf16 %v8035_v7, %v8028_v6  ;;  %v8999_v6 = vand.u32 4294901760, %v24883_v52 }
 0x7f2   :  { %27625 = vmatpush3.msra.mxu1 %v8565_v11  ;;  %27626 = vmatprep.mubr.f32.mxu1 %v36285_v51  ;;  %v33642_v11 = vsub.f32 %v24881_v63, %v8993_v45  ;;  %v33660_v45 = vsub.f32 %v24882_v42, %v8996_v50 }
 0x7f3   :  { %27629 = vmatprep.subr.mxu1 %v8562_v15  ;;  %v33616_v7 = vpack.c.bf16 %v8999_v6, %v8996_v50 }
 0x7f4   :  { %v36225_v9 = vand.u32 4294901760, %v33642_v11 }
 0x7f6   :  { %v9101_v35 = vsub.f32 %v33642_v11, %v36225_v9 }
 0x7f9   :  { %27627 = vmatmul.mubr.f32.vlgmr.msra.gmra.mrb[18].mxu1 %v36286_v55 }
 0x7fa   :  { %27630 = vmatpush3.msra.mxu1 %v8562_v15  ;;  %27631 = vmatprep.mubr.f32.mxu1 %v36287_v40  ;;  %v8044_v15 = vand.u32 4294901760, %v8043_v4  ;;  %v24879_v40 = vld [vmem:[%s36172_s8 + $0x88] sm:$0xff] }
 0x7fb   :  { %27634 = vmatprep.subr.mxu1 %v8475_v17 }
 0x801   :  { %27632 = vmatmul.mubr.f32.vlgmr.msra.gmra.mrb[18].mxu1 %v36288_v49 }
 0x802   :  { %27635 = vmatpush3.msra.mxu1 %v8475_v17  ;;  %27636 = vmatprep.mubr.f32.mxu1 %v36289_v47  ;;  %v8987_v47 = vand.u32 4294901760, %v24879_v40 }
 0x803   :  { %27639 = vmatprep.subr.mxu1 %v8563_v34 }
 0x804   :  { %v33620_v5 = vsub.f32 %v24879_v40, %v8987_v47 }
 0x809   :  { %27637 = vmatmul.mubr.f32.vlgmr.msra.gmra.mrb[18].mxu1 %v36290_v22 }
 0x80a   :  { %27640 = vmatpush3.msra.mxu1 %v8563_v34  ;;  %27641 = vmatprep.mubr.f32.mxu1 %v36285_v51 }
 0x80b   :  { %27644 = vmatprep.subr.mxu1 %v8475_v17 }
 0x811   :  { %27642 = vmatmul.mubr.f32.vlgmr.msra.gmra.mrb[18].mxu1 %v36286_v55 }
 0x812   :  { %27645 = vmatpush3.msra.mxu1 %v8475_v17  ;;  %27646 = vmatprep.mubr.f32.mxu1 %v36285_v51  ;;  %v8050_v17 = vsub.f32 %v33568_v16, %v8049_v23  ;;  %v33588_v51 = vpack.c.bf16 %v8049_v23, %v8042_v1  ;;  %v24885_v1 = vld [vmem:[%s36172_s8 + $0xb8] sm:$0xff]  ;;  %v9002_v23 = vand.u32 4294901760, %v24884_v62 }
 0x813   :  { %v9005_v0 = vand.u32 4294901760, %v24885_v1 }
 0x814   :  { %v8051_v34 = vand.u32 4294901760, %v8050_v17  ;;  %v36222_v17 = vand.u32 4294901760, %v33620_v5  ;;  %v9120_v60 = vsub.f32 %v24884_v62, %v9002_v23 }
 0x815   :  { %v33632_v40 = vpack.c.bf16 %v9005_v0, %v9002_v23  ;;  %v9127_v50 = vsub.f32 %v24885_v1, %v9005_v0 }
 0x816   :  { %v33580_v2 = vpack.c.bf16 %v8051_v34, %v8044_v15 }
 0x817   :  { %v9128_v13 = vand.u32 4294901760, %v9127_v50 }
 0x819   :  { %27647 = vmatmul.mubr.f32.vlgmr.msra.gmra.mrb[18].mxu1 %v36286_v55  ;;  %v24878_v55 = vld [vmem:[%s36172_s8 + $0x80] sm:$0xff] }
 0x81a   :  { %v8984_v49 = vand.u32 4294901760, %v24878_v55 }
 0x81c   :  { %v33596_v22 = vpack.c.bf16 %v8987_v47, %v8984_v49  ;;  %v33618_v32 = vsub.f32 %v24878_v55, %v8984_v49  ;;  %v9087_v47 = vsub.f32 %v33620_v5, %v36222_v17 }
 0x81e   :  { %30326 = vmatprep.subr.bf16.mxu1 %v33596_v22  ;;  %v36221_v4 = vand.u32 4294901760, %v33618_v32 }
 0x81f   :  { %30328 = vmatpush3.bf16.msra.mxu1 %v33596_v22 }
 0x820   :  { %30330 = vmatprep.subr.bf16.mxu1 %v33606_v41  ;;  %v9080_v49 = vsub.f32 %v33618_v32, %v36221_v4  ;;  %v36223_v4 = vand.u32 4294901760, %v33640_v8 }
 0x822   :  { %v9094_v63 = vsub.f32 %v33640_v8, %v36223_v4 }
 0x823   :  { %30332 = vmatpush3.bf16.msra.mxu1 %v33606_v41 }
 0x824   :  { %30334 = vmatprep.subr.bf16.mxu1 %v33616_v7 }
 0x827   :  { %30336 = vmatpush3.bf16.msra.mxu1 %v33616_v7 }
 0x828   :  { %30338 = vmatprep.subr.bf16.mxu1 %v33632_v40 }
 0x82b   :  { %30340 = vmatpush3.bf16.msra.mxu1 %v33632_v40 }
 0x890   :  { %v6962_v15 = vpop.f32.mrb[14].mxu1 }
 0x891   :  { %v6966_v34 = vmul.f32 0.2236068, %v6962_v15  ;;  %v27420_v55 = vpop.f32.mrb[15].mxu1  ;;  %v9081_v15 = vand.u32 4294901760, %v9080_v49 }
 0x892   :  { %v9088_v55 = vand.u32 4294901760, %v9087_v47  ;;  %v9095_v47 = vand.u32 4294901760, %v9094_v63 }
 0x893   :  { %v7944_v26 = vsel %vm2819_vm5, %v6966_v34, 0  ;;  %v33663_v34 = vsub.f32 %v24883_v52, %v8999_v6  ;;  %v9121_v52 = vand.u32 4294901760, %v9120_v60 }
 0x894   :  { %v33646_v58 = vand.u32 4294901760, %v7944_v26  ;;  %v33651_v44 = vpack.c.bf16 %v9088_v55, %v9081_v15  ;;  %v9102_v15 = vand.u32 4294901760, %v9101_v35  ;;  %v9107_v55 = vand.u32 4294901760, %v33660_v45 }
 0x895   :  { %v9122_v63 = vsub.f32 %v9120_v60, %v9121_v52  ;;  %v33702_v0 = vpack.c.bf16 %v33663_v34, %v33660_v45 }
 0x896   :  { %v8016_v29 = vsub.f32 %v7944_v26, %v33646_v58  ;;  %30342 = vmatprep.subr.bf16.mxu1 %v33651_v44  ;;  %v9114_v26 = vand.u32 4294901760, %v33663_v34  ;;  %v33667_v59 = vpack.c.bf16 %v9102_v15, %v9095_v47  ;;  %v9108_v4 = vsub.f32 %v33660_v45, %v9107_v55 }
 0x897   :  { %v9129_v47 = vsub.f32 %v9127_v50, %v9128_v13  ;;  %v9123_v62 = vand.u32 4294901760, %v9122_v63 }
 0x898   :  { %v8017_v49 = vand.u32 4294901760, %v8016_v29  ;;  %v9115_v42 = vsub.f32 %v33663_v34, %v9114_v26  ;;  %v9109_v18 = vand.u32 4294901760, %v9108_v4  ;;  %v33742_v45 = vpack.c.bf16 %v9114_v26, %v9107_v55 }
 0x899   :  { %v9130_v23 = vand.u32 4294901760, %v9129_v47  ;;  %v33744_v34 = vpack.c.bf16 %v9128_v13, %v9121_v52 }
 0x89a   :  { %v8018_v17 = vsub.f32 %v8016_v29, %v8017_v49  ;;  %v9116_v6 = vand.u32 4294901760, %v9115_v42 }
 0x89b   :  { %v33678_v1 = vpack.c.bf16 %v9130_v23, %v9123_v62 }
 0x89c   :  { %v8019_v9 = vand.u32 4294901760, %v8018_v17  ;;  %v33674_v35 = vpack.c.bf16 %v9116_v6, %v9109_v18  ;;  %v36291_v18 = vpack.c.bf16 %v33551_v43, %v33549_v56  ;;  %v33708_v56 = vpack.c.bf16 %v9127_v50, %v9120_v60 }
 0x89d   :  { %v7455_v43 = vmul.f32 %v33451_v10, %v32438_v25  ;;  %v36295_v17 = vand.u32 4294901760, %v33640_v8 }
 0x89e   :  { %27562 = vmatmul.mubr.f32.vlgmr.msra.gmra.mrb[16].mxu0 %v8019_v9  ;;  %v33684_v9 = vpack.c.bf16 %v33620_v5, %v33618_v32 }
 0x89f   :  { %30297 = vmatpush3.bf16.msra.mxu0 %v33578_v20  ;;  %27572 = vmatprep.mubr.msk.f32.mxu0 %vm32104_vm6, %v36260_v14  ;;  %v33694_v20 = vpack.c.bf16 %v33642_v11, %v33640_v8 }
 0x8a0   :  { %30298 = vmatprep.subr.bf16.mxu0 %v36261_v12 }
 0x8a3   :  { %30300 = vmatpush3.bf16.msra.mxu0 %v33580_v2  ;;  %v36292_v2 = vpack.c.bf16 %v33568_v16, %v33566_v46 }
 0x8a4   :  { %30301 = vmatprep.subr.bf16.mxu0 %v36261_v12 }
 0x8a6   :  { %27573 = vmatmul.mubr.f32.vlgmr.msra.gmra.mrb[16].mxu0 %v33646_v58 }
 0x8a7   :  { %30303 = vmatpush3.bf16.msra.mxu0 %v36291_v18  ;;  %27583 = vmatprep.mubr.msk.f32.mxu0 %vm32104_vm6, %v36260_v14 }
 0x8a8   :  { %30304 = vmatprep.subr.bf16.mxu0 %v36261_v12 }
 0x8ab   :  { %30306 = vmatpush3.bf16.msra.mxu0 %v36292_v2 }
 0x8ac   :  { %30307 = vmatprep.subr.bf16.mxu0 %v36261_v12 }
 0x8ae   :  { %27584 = vmatmul.mubr.f32.vlgmr.msra.gmra.mrb[16].mxu0 %v8016_v29  ;;  %v36296_v29 = vand.u32 4294901760, %v33642_v11 }
 0x8af   :  { %30309 = vmatpush3.bf16.msra.mxu0 %v33547_v36  ;;  %27594 = vmatprep.mubr.msk.f32.mxu0 %vm32104_vm6, %v36260_v14 }
 0x8b0   :  { %30310 = vmatprep.subr.bf16.mxu0 %v36261_v12  ;;  %v33740_v10 = vpack.c.bf16 %v36296_v29, %v36295_v17 }
 0x8b3   :  { %30312 = vmatpush3.bf16.msra.mxu0 %v33564_v28 }
 0x8b4   :  { %30313 = vmatprep.subr.bf16.mxu0 %v36261_v12 }
 0x8b6   :  { %27595 = vmatmul.mubr.f32.vlgmr.msra.gmra.mrb[16].mxu0 %v8017_v49 }
 0x8b7   :  { %30315 = vmatpush3.bf16.msra.mxu0 %v33586_v39  ;;  %27605 = vmatprep.mubr.msk.f32.mxu0 %vm32104_vm6, %v36260_v14 }
 0x8b8   :  { %30316 = vmatprep.subr.bf16.mxu0 %v36261_v12 }
 0x8bb   :  { %30318 = vmatpush3.bf16.msra.mxu0 %v33588_v51  ;;  %v36294_v51 = vand.u32 4294901760, %v33620_v5 }
 0x8bc   :  { %30319 = vmatprep.subr.bf16.mxu0 %v36261_v12 }
 0x8be   :  { %27606 = vmatmul.mubr.f32.vlgmr.msra.gmra.mrb[16].mxu0 %v33646_v58 }
 0x8bf   :  { %30321 = vmatpush3.bf16.msra.mxu0 %v33547_v36  ;;  %27616 = vmatprep.mubr.msk.f32.mxu0 %vm32104_vm6, %v36260_v14  ;;  %v36293_v36 = vand.u32 4294901760, %v33618_v32 }
 0x8c0   :  { %v7937_v60 = vpop.f32.mrb[16].mxu1  ;;  %30322 = vmatprep.subr.bf16.mxu0 %v36261_v12 }
 0x8c1   :  { %v7941_v46 = vmul.f32 %v7937_v60, %v32456_v37  ;;  %v27552_v16 = vpop.f32.mrb[17].mxu1  ;;  %v33734_v4 = vpack.c.bf16 %v36294_v51, %v36293_v36 }
 0x8c3   :  { %30324 = vmatpush3.bf16.msra.mxu0 %v33564_v28  ;;  %v33727_v39 = vadd.f32 %v7941_v46, %v7455_v43 }
 0x8c6   :  { %27617 = vmatmul.mubr.f32.vlgmr.msra.gmra.mrb[16].mxu0 %v33646_v58 }
 0x8ec   :  { %v27648_v28 = vpop.f32.mrb[18].mxu1 }
 0x8ed   :  { %v8964_v49 = vsub.f32 0.0, %v27648_v28  ;;  %v8953_v15 = vpop.f32.mrb[19].mxu1 }
 0x8ee   :  { %v8963_v58 = vsub.f32 0.0, %v8953_v15 }
 0x8ef   :  { %v8967_v42 = vmul.f32 1.442695, %v8964_v49 }
 0x8f0   :  { %v8965_v32 = vmul.f32 1.442695, %v8963_v58 }
 0x8f1   :  { %32077 = vpow2.f32 %v8967_v42 }
 0x8f2   :  { %32079 = vpow2.f32 %v8965_v32 }
 0x8fb   :  { %v32078_v5 = vpop.eup %32077 }
 0x8fc   :  { %v32080_v50 = vpop.eup %32079  ;;  %v8970_v6 = vadd.f32 1.0, %v32078_v5 }
 0x8fd   :  { %v8969_v8 = vadd.f32 1.0, %v32080_v50 }
 0x8fe   :  { %32081 = vrcp.f32 %v8970_v6  ;;  %v24888_v6 = vld [vmem:[%s36176_s9 + $0x90] sm:$0xff] }
 0x8ff   :  { %32083 = vrcp.f32 %v8969_v8  ;;  %v24889_v8 = vld [vmem:[%s36176_s9 + $0x98] sm:$0xff] }
 0x908   :  { %v32082_v11 = vpop.eup %32081 }
 0x909   :  { %v32084_v63 = vpop.eup %32083  ;;  %v8976_v55 = vmul.f32 %v32082_v11, %v27648_v28  ;;  %v17314_v26 = vsub.f32 1.0, %v32082_v11 }
 0x90a   :  { %v8975_v13 = vmul.f32 %v32084_v63, %v8953_v15  ;;  %v17313_v52 = vsub.f32 1.0, %v32084_v63 }
 0x90b   :  { %v8981_v47 = vsel %vm671_vm2, %v8976_v55, 0  ;;  %v17316_v62 = vmul.f32 %v27648_v28, %v17314_v26 }
 0x90c   :  { %v33747_v23 = vand.u32 4294901760, %v8981_v47  ;;  %v8978_v18 = vsel %vm671_vm2, %v8975_v13, 0  ;;  %v17315_v2 = vmul.f32 %v17313_v52, %v8953_v15  ;;  %v24887_v15 = vld [vmem:[%s36176_s9 + $0x88] sm:$0xff]  ;;  %v33847_v13 = vld [vmem:[%s36178_s11 + $0x90] sm:$0xff] }
 0x90d   :  { %v17318_v60 = vadd.f32 1.0, %v17316_v62  ;;  %v9056_v43 = vand.u32 4294901760, %v8978_v18  ;;  %v9587_v50 = vand.u32 4294901760, %v24887_v15  ;;  %v24891_v62 = vld [vmem:[%s36176_s9 + $0xa8] sm:$0xff] }
 0x90e   :  { %v9067_v46 = vsub.f32 %v8981_v47, %v33747_v23  ;;  %v17317_v16 = vadd.f32 1.0, %v17315_v2  ;;  %v33856_v47 = vld [vmem:[%s36178_s11 + $0x98] sm:$0xff]  ;;  %v9599_v2 = vand.u32 4294901760, %v24891_v62 }
 0x90f   :  { %v9057_v36 = vsub.f32 %v8978_v18, %v9056_v43  ;;  %v33751_v51 = vmul.f32 %v32082_v11, %v17318_v60  ;;  %v9590_v11 = vand.u32 4294901760, %v24888_v6 }
 0x910   :  { %v9068_v17 = vand.u32 4294901760, %v9067_v46  ;;  %v33753_v29 = vmul.f32 %v32084_v63, %v17317_v16  ;;  %v9593_v63 = vand.u32 4294901760, %v24889_v8  ;;  %v11127_v16 = vand.u32 4294901760, %v33856_v47 }
 0x911   :  { %v9058_v49 = vand.u32 4294901760, %v9057_v36 }
 0x912   :  { %v9069_v58 = vsub.f32 %v9067_v46, %v9068_v17  ;;  %v33849_v52 = vpack.c.bf16 %v9593_v63, %v9590_v11 }
 0x913   :  { %v9059_v42 = vsub.f32 %v9057_v36, %v9058_v49 }
 0x914   :  { %v9070_v32 = vand.u32 4294901760, %v9069_v58 }
 0x915   :  { %v9060_v28 = vand.u32 4294901760, %v9059_v42  ;;  %v24892_v42 = vld [vmem:[%s36176_s9 + $0xb0] sm:$0xff] }
 0x917   :  { %27665 = vmatprep.mubr.f32.mxu1 %v9060_v28  ;;  %v24893_v28 = vld [vmem:[%s36176_s9 + $0xb8] sm:$0xff] }
 0x918   :  { %27666 = vmatmul.mubr.f32.vlgmr.msra.gmra.mrb[20].mxu1 %v9070_v32  ;;  %v9602_v32 = vand.u32 4294901760, %v24892_v42 }
 0x919   :  { %30344 = vmatpush3.bf16.msra.mxu1 %v33651_v44  ;;  %27684 = vmatprep.mubr.f32.mxu1 %v9056_v43 }
 0x91a   :  { %30346 = vmatprep.subr.bf16.mxu1 %v33667_v59 }
 0x91d   :  { %30348 = vmatpush3.bf16.msra.mxu1 %v33667_v59 }
 0x91e   :  { %30350 = vmatprep.subr.bf16.mxu1 %v33674_v35 }
 0x921   :  { %30352 = vmatpush3.bf16.msra.mxu1 %v33674_v35 }
 0x922   :  { %30354 = vmatprep.subr.bf16.mxu1 %v33678_v1 }
 0x925   :  { %30356 = vmatpush3.bf16.msra.mxu1 %v33678_v1 }
 0x926   :  { %30358 = vmatprep.subr.bf16.mxu1 %v33684_v9 }
 0x928   :  { %27685 = vmatmul.mubr.f32.vlgmr.msra.gmra.mrb[20].mxu1 %v33747_v23 }
 0x929   :  { %30360 = vmatpush3.bf16.msra.mxu1 %v33684_v9  ;;  %27703 = vmatprep.mubr.f32.mxu1 %v9057_v36 }
 0x92a   :  { %30362 = vmatprep.subr.bf16.mxu1 %v33694_v20 }
 0x92d   :  { %30364 = vmatpush3.bf16.msra.mxu1 %v33694_v20 }
 0x92e   :  { %30366 = vmatprep.subr.bf16.mxu1 %v33702_v0 }
 0x931   :  { %30368 = vmatpush3.bf16.msra.mxu1 %v33702_v0 }
 0x932   :  { %30370 = vmatprep.subr.bf16.mxu1 %v33708_v56 }
 0x935   :  { %30372 = vmatpush3.bf16.msra.mxu1 %v33708_v56 }
 0x936   :  { %30374 = vmatprep.subr.bf16.mxu1 %v33596_v22 }
 0x938   :  { %27704 = vmatmul.mubr.f32.vlgmr.msra.gmra.mrb[20].mxu1 %v9067_v46  ;;  %v11124_v46 = vand.u32 4294901760, %v33847_v13 }
 0x939   :  { %30376 = vmatpush3.bf16.msra.mxu1 %v33596_v22  ;;  %27722 = vmatprep.mubr.f32.mxu1 %v9058_v49  ;;  %v33879_v49 = vsub.f32 %v24887_v15, %v9587_v50 }
 0x93a   :  { %30378 = vmatprep.subr.bf16.mxu1 %v33606_v41 }
 0x93d   :  { %30380 = vmatpush3.bf16.msra.mxu1 %v33606_v41 }
 0x93e   :  { %30382 = vmatprep.subr.bf16.mxu1 %v33616_v7 }
 0x941   :  { %30384 = vmatpush3.bf16.msra.mxu1 %v33616_v7 }
 0x942   :  { %30386 = vmatprep.subr.bf16.mxu1 %v33632_v40 }
 0x945   :  { %30388 = vmatpush3.bf16.msra.mxu1 %v33632_v40 }
 0x946   :  { %30390 = vmatprep.subr.bf16.mxu1 %v33734_v4 }
 0x948   :  { %27723 = vmatmul.mubr.f32.vlgmr.msra.gmra.mrb[20].mxu1 %v9068_v17 }
 0x949   :  { %30392 = vmatpush3.bf16.msra.mxu1 %v33734_v4  ;;  %27741 = vmatprep.mubr.f32.mxu1 %v9056_v43 }
 0x94a   :  { %30394 = vmatprep.subr.bf16.mxu1 %v33740_v10 }
 0x94d   :  { %30396 = vmatpush3.bf16.msra.mxu1 %v33740_v10 }
 0x94e   :  { %30398 = vmatprep.subr.bf16.mxu1 %v33742_v45 }
 0x951   :  { %30400 = vmatpush3.bf16.msra.mxu1 %v33742_v45 }
 0x952   :  { %30402 = vmatprep.subr.bf16.mxu1 %v33744_v34 }
 0x955   :  { %30404 = vmatpush3.bf16.msra.mxu1 %v33744_v34 }
 0x956   :  { %30406 = vmatprep.subr.bf16.mxu1 %v33596_v22 }
 0x958   :  { %27742 = vmatmul.mubr.f32.vlgmr.msra.gmra.mrb[20].mxu1 %v33747_v23 }
 0x959   :  { %30408 = vmatpush3.bf16.msra.mxu1 %v33596_v22  ;;  %27760 = vmatprep.mubr.f32.mxu1 %v9056_v43 }
 0x95a   :  { %30410 = vmatprep.subr.bf16.mxu1 %v33606_v41 }
 0x95d   :  { %30412 = vmatpush3.bf16.msra.mxu1 %v33606_v41 }
 0x95e   :  { %30414 = vmatprep.subr.bf16.mxu1 %v33616_v7 }
 0x961   :  { %30416 = vmatpush3.bf16.msra.mxu1 %v33616_v7 }
 0x962   :  { %30418 = vmatprep.subr.bf16.mxu1 %v33632_v40 }
 0x965   :  { %30420 = vmatpush3.bf16.msra.mxu1 %v33632_v40 }
 0x968   :  { %27761 = vmatmul.mubr.f32.vlgmr.msra.gmra.mrb[20].mxu1 %v33747_v23 }
 0x969   :  { %27879 = vmatprep.mubr.f32.mxu1 %v32581_v61 }
 0x999   :  { %v8427_v59 = vpop.f32.mrb[16].mxu0 }
 0x99a   :  { %v31583_v44 = vadd.f32 %v8427_v59, %v33727_v39  ;;  %v27618_v22 = vpop.f32.mrb[17].mxu0  ;;  %v9605_v59 = vand.u32 4294901760, %v24893_v28 }
 0x99b   :  { %v9686_v22 = vand.u32 4294901760, %v33879_v49 }
 0x99c   :  { %v8431_v35 = vsub.f32 0.0, %v31583_v44 }
 0x99e   :  { %v8432_v1 = vmul.f32 1.442695, %v8431_v35  ;;  %v33893_v35 = vsub.f32 %v33847_v13, %v11124_v46 }
 0x9a0   :  { %32085 = vpow2.f32 %v8432_v1 }
 0x9aa   :  { %v32086_v41 = vpop.eup %32085 }
 0x9ab   :  { %v8434_v9 = vadd.f32 1.0, %v32086_v41 }
 0x9ad   :  { %32087 = vrcp.f32 %v8434_v9  ;;  %v33901_v9 = vsub.f32 %v33856_v47, %v11127_v16 }
 0x9b7   :  { %v32088_v20 = vpop.eup %32087 }
 0x9b8   :  { %v8437_v7 = vmul.f32 %v32088_v20, %v31583_v44  ;;  %v17354_v0 = vsub.f32 1.0, %v32088_v20 }
 0x9ba   :  { %v33800_v56 = vadd.f32 %v8437_v7, %v33128_v19  ;;  %v17355_v40 = vmul.f32 %v31583_v44, %v17354_v0  ;;  %v9687_v0 = vsub.f32 %v33879_v49, %v9686_v22 }
 0x9bc   :  { %v33803_v4 = vand.u32 4294901760, %v33800_v56  ;;  %v17356_v61 = vadd.f32 1.0, %v17355_v40  ;;  %v11115_v23 = vsel %vm2819_vm5, %v33800_v56, 0  ;;  %v33914_v40 = vsub.f32 %v24888_v6, %v9590_v11 }
 0x9bd   :  { %v33881_v58 = vand.u32 4294901760, %v11115_v23  ;;  %v33946_v11 = vsub.f32 %v24891_v62, %v9599_v2 }
 0x9be   :  { %v33805_v10 = vmul.f32 %v32088_v20, %v17356_v61  ;;  %27877 = vmatprep.subr.mxu1 %v33803_v4  ;;  %v10251_v39 = vsub.f32 %v33800_v56, %v33803_v4  ;;  %v33903_v20 = vpack.c.bf16 %v9605_v59, %v9602_v32  ;;  %v33916_v61 = vsub.f32 %v24889_v8, %v9593_v63 }
 0x9bf   :  { %27878 = vmatpush3.msra.mxu1 %v33803_v4  ;;  %v36229_v47 = vand.u32 4294901760, %v33946_v11 }
 0x9c0   :  { %27880 = vmatmul.mubr.f32.vlgmr.msra.gmra.mrb[22].mxu1 %v32583_v27  ;;  %v10252_v45 = vand.u32 4294901760, %v10251_v39  ;;  %v24886_v27 = vld [vmem:[%s36176_s9 + $0x80] sm:$0xff] }
 0x9c1   :  { %27884 = vmatprep.mubr.msk.f32.mxu1 %vm161_vm0, %v32538_v30  ;;  %v9584_v5 = vand.u32 4294901760, %v24886_v27 }
 0x9c2   :  { %v10253_v19 = vsub.f32 %v10251_v39, %v10252_v45 }
 0x9c3   :  { %v33877_v17 = vsub.f32 %v24886_v27, %v9584_v5  ;;  %v9700_v27 = vand.u32 4294901760, %v33916_v61 }
 0x9c4   :  { %v10254_v34 = vand.u32 4294901760, %v10253_v19  ;;  %v9688_v19 = vand.u32 4294901760, %v9687_v0  ;;  %v33978_v0 = vsub.f32 %v24892_v42, %v9602_v32 }
 0x9c5   :  { %v9679_v44 = vand.u32 4294901760, %v33877_v17  ;;  %v9701_v6 = vsub.f32 %v33916_v61, %v9700_v27 }
 0x9c6   :  { %27882 = vmatprep.subr.mxu1 %v10254_v34 }
 0x9c7   :  { %27883 = vmatpush3.msra.mxu1 %v10254_v34  ;;  %v9680_v7 = vsub.f32 %v33877_v17, %v9679_v44 }
 0x9c8   :  { %27885 = vmatmul.mubr.msk.f32.vlgmr.msra.gmra.mrb[22].mxu1 %vm161_vm0, %v32541_v31  ;;  %27887 = vmatprep.subr.mxu1 %v10251_v39 }
 0x9c9   :  { %27888 = vmatpush3.msra.mxu1 %v10251_v39  ;;  %27889 = vmatprep.mubr.f32.mxu1 %v32547_v54  ;;  %v24898_v54 = vld [vmem:[%s36178_s11 + $0x80] sm:$0xff]  ;;  %v33920_v39 = vsub.f32 %v11115_v23, %v33881_v58  ;;  %v33956_v23 = vpack.c.bf16 %v11127_v16, %v11124_v46  ;;  %v9715_v46 = vsub.f32 %v33946_v11, %v36229_v47 }
 0x9ca   :  { %27892 = vmatprep.subr.mxu1 %v33803_v4  ;;  %v11118_v55 = vand.u32 4294901760, %v24898_v54 }
 0x9cb   :  { %v33949_v63 = vand.u32 4294901760, %v33920_v39 }
 0x9cc   :  { %v33868_v60 = vsub.f32 %v24898_v54, %v11118_v55 }
 0x9cd   :  { %v11189_v16 = vsub.f32 %v33920_v39, %v33949_v63 }
 0x9ce   :  { %v11199_v1 = vand.u32 4294901760, %v33868_v60 }
 0x9cf   :  { %v33984_v47 = vand.u32 4294901760, %v11189_v16 }
 0x9d0   :  { %27890 = vmatmul.mubr.f32.vlgmr.msra.gmra.mrb[22].mxu1 %v32555_v3  ;;  %v24899_v3 = vld [vmem:[%s36178_s11 + $0x88] sm:$0xff] }
 0x9d1   :  { %27893 = vmatpush3.msra.mxu1 %v33803_v4  ;;  %27894 = vmatprep.mubr.f32.mxu1 %v32561_v57  ;;  %v33833_v57 = vpack.c.bf16 %v9587_v50, %v9584_v5  ;;  %v11121_v26 = vand.u32 4294901760, %v24899_v3  ;;  %v11213_v5 = vand.u32 4294901760, %v33893_v35  ;;  %v11220_v50 = vand.u32 4294901760, %v33901_v9 }
 0x9d2   :  { %27897 = vmatprep.subr.mxu1 %v10252_v45 }
 0x9d3   :  { %30422 = vmatprep.subr.bf16.mxu0 %v33833_v57  ;;  %v33870_v43 = vsub.f32 %v24899_v3, %v11121_v26  ;;  %v33923_v34 = vpack.c.bf16 %v11121_v26, %v11118_v55  ;;  %v9702_v26 = vand.u32 4294901760, %v9701_v6  ;;  %v11214_v62 = vsub.f32 %v33893_v35, %v11213_v5 }
 0x9d4   :  { %30424 = vmatpush3.bf16.msra.mxu0 %v33833_v57 }
 0x9d5   :  { %30426 = vmatprep.subr.bf16.mxu0 %v33849_v52  ;;  %v11206_v41 = vand.u32 4294901760, %v33870_v43 }
 0x9d7   :  { %v11207_v15 = vsub.f32 %v33870_v43, %v11206_v41 }
 0x9d8   :  { %27895 = vmatmul.mubr.f32.vlgmr.msra.gmra.mrb[22].mxu1 %v32569_v38  ;;  %v24890_v38 = vld [vmem:[%s36176_s9 + $0xa0] sm:$0xff]  ;;  %30428 = vmatpush3.bf16.msra.mxu0 %v33849_v52 }
 0x9d9   :  { %27898 = vmatpush3.msra.mxu1 %v10252_v45  ;;  %27899 = vmatprep.mubr.msk.f32.mxu1 %vm161_vm0, %v32538_v30  ;;  %v9596_v18 = vand.u32 4294901760, %v24890_v38  ;;  %v9681_v45 = vand.u32 4294901760, %v9680_v7 }
 0x9da   :  { %27902 = vmatprep.subr.mxu1 %v33803_v4 }
 0x9db   :  { %v33875_v36 = vpack.c.bf16 %v9599_v2, %v9596_v18  ;;  %v33936_v54 = vpack.c.bf16 %v9688_v19, %v9681_v45  ;;  %v33944_v8 = vsub.f32 %v24890_v38, %v9596_v18  ;;  %v11221_v18 = vsub.f32 %v33901_v9, %v11220_v50 }
 0x9dc   :  { %v11208_v2 = vand.u32 4294901760, %v11207_v15  ;;  %v9727_v45 = vsub.f32 %v24893_v28, %v9605_v59  ;;  %v9721_v15 = vand.u32 4294901760, %v33978_v0 }
 0x9dd   :  { %30430 = vmatprep.subr.bf16.mxu0 %v33875_v36  ;;  %v36228_v13 = vand.u32 4294901760, %v33944_v8  ;;  %v34013_v16 = vpack.c.bf16 %v33946_v11, %v33944_v8 }
 0x9de   :  { %30432 = vmatpush3.bf16.msra.mxu0 %v33875_v36  ;;  %v9722_v42 = vsub.f32 %v33978_v0, %v9721_v15 }
 0x9df   :  { %30434 = vmatprep.subr.bf16.mxu0 %v33903_v20 }
 0x9e0   :  { %27900 = vmatmul.mubr.msk.f32.vlgmr.msra.gmra.mrb[22].mxu1 %vm161_vm0, %v32541_v31  ;;  %v9723_v28 = vand.u32 4294901760, %v9722_v42 }
 0x9e1   :  { %27903 = vmatpush3.msra.mxu1 %v33803_v4  ;;  %27904 = vmatprep.mubr.msk.f32.mxu1 %vm161_vm0, %v32538_v30  ;;  %v11200_v4 = vsub.f32 %v33868_v60, %v11199_v1  ;;  %v9693_v30 = vand.u32 4294901760, %v33914_v40 }
 0x9e2   :  { %30535 = vmatprep.subr.bf16.mxu1 %v36261_v12  ;;  %30436 = vmatpush3.bf16.msra.mxu0 %v33903_v20 }
 0x9e3   :  { %v9694_v3 = vsub.f32 %v33914_v40, %v9693_v30  ;;  %30438 = vmatprep.subr.bf16.mxu0 %v33936_v54  ;;  %v11201_v38 = vand.u32 4294901760, %v11200_v4  ;;  %v9716_v4 = vand.u32 4294901760, %v9715_v46  ;;  %v30551_v46 = vpack.c.bf16 %v33901_v9, %v33893_v35 }
 0x9e4   :  { %v36297_v35 = vand.u32 4294901760, %v33944_v8 }
 0x9e5   :  { %v9695_v55 = vand.u32 4294901760, %v9694_v3  ;;  %v9728_v3 = vand.u32 4294901760, %v9727_v45  ;;  %v30542_v6 = vpack.c.bf16 %v11208_v2, %v11201_v38  ;;  %v34004_v2 = vpack.c.bf16 %v33916_v61, %v33914_v40 }
 0x9e7   :  { %v33967_v7 = vpack.c.bf16 %v9702_v26, %v9695_v55  ;;  %v11215_v55 = vand.u32 4294901760, %v11214_v62  ;;  %v11222_v26 = vand.u32 4294901760, %v11221_v18  ;;  %v9729_v32 = vsub.f32 %v9727_v45, %v9728_v3 }
 0x9e8   :  { %27905 = vmatmul.mubr.msk.f32.vlgmr.msra.gmra.mrb[22].mxu1 %vm161_vm0, %v32541_v31  ;;  %v9708_v31 = vsub.f32 %v33944_v8, %v36228_v13  ;;  %v30548_v62 = vpack.c.bf16 %v33870_v43, %v33868_v60  ;;  %v33998_v18 = vpack.c.bf16 %v33879_v49, %v33877_v17  ;;  %v34049_v60 = vpack.c.bf16 %v9686_v22, %v9679_v44 }
 0x9e9   :  { %30537 = vmatpush3.bf16.msra.mxu1 %v33923_v34  ;;  %27957 = vmatprep.mubr.msk.f32.mxu1 %vm32104_vm6, %v36260_v14  ;;  %v9730_v59 = vand.u32 4294901760, %v9729_v32  ;;  %v34057_v43 = vpack.c.bf16 %v9700_v27, %v9693_v30  ;;  %v36298_v17 = vand.u32 4294901760, %v33946_v11  ;;  %v34067_v44 = vpack.c.bf16 %v9728_v3, %v9721_v15 }
 0x9ea   :  { %30538 = vmatprep.subr.bf16.mxu1 %v36261_v12  ;;  %v9709_v19 = vand.u32 4294901760, %v9708_v31  ;;  %v30545_v31 = vpack.c.bf16 %v11222_v26, %v11215_v55 }
 0x9eb   :  { %v33992_v38 = vpack.c.bf16 %v9730_v59, %v9723_v28  ;;  %v34065_v49 = vpack.c.bf16 %v36298_v17, %v36297_v35 }
 0x9ec   :  { %v33982_v13 = vpack.c.bf16 %v9716_v4, %v9709_v19  ;;  %v34018_v19 = vpack.c.bf16 %v9727_v45, %v33978_v0  ;;  %v30560_v4 = vpack.c.bf16 %v11206_v41, %v11199_v1  ;;  %v30563_v0 = vpack.c.bf16 %v11220_v50, %v11213_v5 }
 0x9ed   :  { %30540 = vmatpush3.bf16.msra.mxu1 %v33956_v23 }
 0x9ee   :  { %30541 = vmatprep.subr.bf16.mxu1 %v36261_v12 }
 0x9f0   :  { %27958 = vmatmul.mubr.f32.vlgmr.msra.gmra.mrb[24].mxu1 %v33984_v47 }
 0x9f1   :  { %30543 = vmatpush3.bf16.msra.mxu1 %v30542_v6  ;;  %27968 = vmatprep.mubr.msk.f32.mxu1 %vm32104_vm6, %v36260_v14 }
 0x9f2   :  { %30544 = vmatprep.subr.bf16.mxu1 %v36261_v12 }
 0x9f5   :  { %30546 = vmatpush3.bf16.msra.mxu1 %v30545_v31 }
 0x9f6   :  { %30547 = vmatprep.subr.bf16.mxu1 %v36261_v12 }
 0x9f8   :  { %27969 = vmatmul.mubr.f32.vlgmr.msra.gmra.mrb[24].mxu1 %v33881_v58 }
 0x9f9   :  { %30549 = vmatpush3.bf16.msra.mxu1 %v30548_v62  ;;  %27979 = vmatprep.mubr.msk.f32.mxu1 %vm32104_vm6, %v36260_v14 }
 0x9fa   :  { %30550 = vmatprep.subr.bf16.mxu1 %v36261_v12 }
 0x9fd   :  { %30552 = vmatpush3.bf16.msra.mxu1 %v30551_v46 }
 0x9fe   :  { %30553 = vmatprep.subr.bf16.mxu1 %v36261_v12 }
 0xa00   :  { %27980 = vmatmul.mubr.f32.vlgmr.msra.gmra.mrb[24].mxu1 %v33920_v39 }
 0xa01   :  { %30555 = vmatpush3.bf16.msra.mxu1 %v33923_v34  ;;  %27990 = vmatprep.mubr.msk.f32.mxu1 %vm32104_vm6, %v36260_v14 }
 0xa02   :  { %30556 = vmatprep.subr.bf16.mxu1 %v36261_v12 }
 0xa05   :  { %30558 = vmatpush3.bf16.msra.mxu1 %v33956_v23 }
 0xa06   :  { %30559 = vmatprep.subr.bf16.mxu1 %v36261_v12 }
 0xa08   :  { %27991 = vmatmul.mubr.f32.vlgmr.msra.gmra.mrb[24].mxu1 %v33949_v63 }
 0xa09   :  { %30561 = vmatpush3.bf16.msra.mxu1 %v30560_v4  ;;  %28001 = vmatprep.mubr.msk.f32.mxu1 %vm32104_vm6, %v36260_v14 }
 0xa0a   :  { %30562 = vmatprep.subr.bf16.mxu1 %v36261_v12 }
 0xa0d   :  { %30564 = vmatpush3.bf16.msra.mxu1 %v30563_v0 }
 0xa0e   :  { %30565 = vmatprep.subr.bf16.mxu1 %v36261_v12 }
 0xa10   :  { %28002 = vmatmul.mubr.f32.vlgmr.msra.gmra.mrb[24].mxu1 %v33881_v58 }
 0xa11   :  { %30567 = vmatpush3.bf16.msra.mxu1 %v33923_v34  ;;  %28012 = vmatprep.mubr.msk.f32.mxu1 %vm32104_vm6, %v36260_v14 }
 0xa12   :  { %30568 = vmatprep.subr.bf16.mxu1 %v36261_v12 }
 0xa15   :  { %30570 = vmatpush3.bf16.msra.mxu1 %v33956_v23 }
 0xa16   :  { %30607 = vmatprep.subr.bf16.mxu1 %v36261_v12 }
 0xa18   :  { %28013 = vmatmul.mubr.f32.vlgmr.msra.gmra.mrb[24].mxu1 %v33881_v58 }
 0xa19   :  { %28089 = vmatprep.mubr.msk.f32.mxu1 %vm32104_vm6, %v36260_v14 }
 0xa3b   :  { %v27762_v22 = vpop.f32.mrb[20].mxu1 }
 0xa3c   :  { %v9564_v1 = vsub.f32 0.0, %v27762_v22  ;;  %v9553_v41 = vpop.f32.mrb[21].mxu1 }
 0xa3d   :  { %v9563_v9 = vsub.f32 0.0, %v9553_v41 }
 0xa3e   :  { %v9567_v40 = vmul.f32 1.442695, %v9564_v1 }
 0xa3f   :  { %v9565_v34 = vmul.f32 1.442695, %v9563_v9 }
 0xa40   :  { %32089 = vpow2.f32 %v9567_v40 }
 0xa41   :  { %32091 = vpow2.f32 %v9565_v34 }
 0xa4a   :  { %v32090_v61 = vpop.eup %32089 }
 0xa4b   :  { %v32092_v30 = vpop.eup %32091  ;;  %v9570_v27 = vadd.f32 1.0, %v32090_v61 }
 0xa4c   :  { %v9569_v5 = vadd.f32 1.0, %v32092_v30 }
 0xa4d   :  { %32093 = vrcp.f32 %v9570_v27 }
 0xa4e   :  { %32095 = vrcp.f32 %v9569_v5  ;;  %v24903_v5 = vld [vmem:[%s36178_s11 + $0xa8] sm:$0xff] }
 0xa57   :  { %v32094_v50 = vpop.eup %32093 }
 0xa58   :  { %v32096_v8 = vpop.eup %32095  ;;  %v9576_v11 = vmul.f32 %v32094_v50, %v27762_v22  ;;  %v16694_v23 = vsub.f32 1.0, %v32094_v50 }
 0xa59   :  { %v9575_v45 = vmul.f32 %v32096_v8, %v9553_v41  ;;  %v16693_v15 = vsub.f32 1.0, %v32096_v8 }
 0xa5a   :  { %v9581_v3 = vsel %vm671_vm2, %v9576_v11, 0  ;;  %v16696_v6 = vmul.f32 %v27762_v22, %v16694_v23  ;;  %v24905_v11 = vld [vmem:[%s36178_s11 + $0xb8] sm:$0xff] }
 0xa5b   :  { %v34070_v55 = vand.u32 4294901760, %v9581_v3  ;;  %v9578_v26 = vsel %vm671_vm2, %v9575_v45, 0  ;;  %v16695_v42 = vmul.f32 %v16693_v15, %v9553_v41 }
 0xa5c   :  { %v16698_v32 = vadd.f32 1.0, %v16696_v6  ;;  %v9656_v28 = vand.u32 4294901760, %v9578_v26 }
 0xa5d   :  { %v9667_v59 = vsub.f32 %v9581_v3, %v34070_v55  ;;  %v16697_v31 = vadd.f32 1.0, %v16695_v42 }
 0xa5e   :  { %v9657_v62 = vsub.f32 %v9578_v26, %v9656_v28  ;;  %v34074_v46 = vmul.f32 %v32094_v50, %v16698_v32  ;;  %v11607_v50 = vand.u32 4294901760, %v24903_v5 }
 0xa5f   :  { %v9668_v4 = vand.u32 4294901760, %v9667_v59  ;;  %v34076_v0 = vmul.f32 %v32096_v8, %v16697_v31  ;;  %v24904_v8 = vld [vmem:[%s36178_s11 + $0xb0] sm:$0xff] }
 0xa60   :  { %v9658_v35 = vand.u32 4294901760, %v9657_v62  ;;  %v11691_v45 = vsub.f32 %v24903_v5, %v11607_v50  ;;  %v11610_v15 = vand.u32 4294901760, %v24904_v8 }
 0xa61   :  { %v9669_v17 = vsub.f32 %v9667_v59, %v9668_v4 }
 0xa62   :  { %v9659_v1 = vsub.f32 %v9657_v62, %v9658_v35  ;;  %v11698_v3 = vsub.f32 %v24904_v8, %v11610_v15  ;;  %v11692_v26 = vand.u32 4294901760, %v11691_v45 }
 0xa63   :  { %v9670_v9 = vand.u32 4294901760, %v9669_v17 }
 0xa64   :  { %v9660_v22 = vand.u32 4294901760, %v9659_v1 }
 0xa66   :  { %27779 = vmatprep.mubr.f32.mxu0 %v9660_v22 }
 0xa67   :  { %27780 = vmatmul.mubr.f32.vlgmr.msra.gmra.mrb[18].mxu0 %v9670_v9 }
 0xa68   :  { %30440 = vmatpush3.bf16.msra.mxu0 %v33936_v54  ;;  %27798 = vmatprep.mubr.f32.mxu0 %v9656_v28 }
 0xa69   :  { %30442 = vmatprep.subr.bf16.mxu0 %v33967_v7 }
 0xa6c   :  { %30444 = vmatpush3.bf16.msra.mxu0 %v33967_v7 }
 0xa6d   :  { %30446 = vmatprep.subr.bf16.mxu0 %v33982_v13 }
 0xa70   :  { %30448 = vmatpush3.bf16.msra.mxu0 %v33982_v13 }
 0xa71   :  { %30450 = vmatprep.subr.bf16.mxu0 %v33992_v38 }
 0xa74   :  { %30452 = vmatpush3.bf16.msra.mxu0 %v33992_v38 }
 0xa75   :  { %30454 = vmatprep.subr.bf16.mxu0 %v33998_v18 }
 0xa77   :  { %27799 = vmatmul.mubr.f32.vlgmr.msra.gmra.mrb[18].mxu0 %v34070_v55 }
 0xa78   :  { %30456 = vmatpush3.bf16.msra.mxu0 %v33998_v18  ;;  %27817 = vmatprep.mubr.f32.mxu0 %v9657_v62 }
 0xa79   :  { %30458 = vmatprep.subr.bf16.mxu0 %v34004_v2 }
 0xa7c   :  { %30460 = vmatpush3.bf16.msra.mxu0 %v34004_v2 }
 0xa7d   :  { %30462 = vmatprep.subr.bf16.mxu0 %v34013_v16 }
 0xa80   :  { %30464 = vmatpush3.bf16.msra.mxu0 %v34013_v16 }
 0xa81   :  { %30466 = vmatprep.subr.bf16.mxu0 %v34018_v19 }
 0xa84   :  { %30468 = vmatpush3.bf16.msra.mxu0 %v34018_v19 }
 0xa85   :  { %30470 = vmatprep.subr.bf16.mxu0 %v33833_v57 }
 0xa87   :  { %27818 = vmatmul.mubr.f32.vlgmr.msra.gmra.mrb[18].mxu0 %v9667_v59  ;;  %v11699_v59 = vand.u32 4294901760, %v11698_v3 }
 0xa88   :  { %30472 = vmatpush3.bf16.msra.mxu0 %v33833_v57  ;;  %27836 = vmatprep.mubr.f32.mxu0 %v9658_v35 }
 0xa89   :  { %30474 = vmatprep.subr.bf16.mxu0 %v33849_v52  ;;  %v11700_v17 = vsub.f32 %v11698_v3, %v11699_v59 }
 0xa8b   :  { %v11701_v9 = vand.u32 4294901760, %v11700_v17 }
 0xa8c   :  { %30476 = vmatpush3.bf16.msra.mxu0 %v33849_v52 }
 0xa8d   :  { %30478 = vmatprep.subr.bf16.mxu0 %v33875_v36 }
 0xa90   :  { %30480 = vmatpush3.bf16.msra.mxu0 %v33875_v36 }
 0xa91   :  { %30482 = vmatprep.subr.bf16.mxu0 %v33903_v20 }
 0xa94   :  { %30484 = vmatpush3.bf16.msra.mxu0 %v33903_v20 }
 0xa95   :  { %30486 = vmatprep.subr.bf16.mxu0 %v34049_v60 }
 0xa97   :  { %27837 = vmatmul.mubr.f32.vlgmr.msra.gmra.mrb[18].mxu0 %v9668_v4 }
 0xa98   :  { %30488 = vmatpush3.bf16.msra.mxu0 %v34049_v60  ;;  %27855 = vmatprep.mubr.f32.mxu0 %v9656_v28 }
 0xa99   :  { %30490 = vmatprep.subr.bf16.mxu0 %v34057_v43 }
 0xa9c   :  { %30492 = vmatpush3.bf16.msra.mxu0 %v34057_v43 }
 0xa9d   :  { %30494 = vmatprep.subr.bf16.mxu0 %v34065_v49 }
 0xaa0   :  { %30496 = vmatpush3.bf16.msra.mxu0 %v34065_v49 }
 0xaa1   :  { %30498 = vmatprep.subr.bf16.mxu0 %v34067_v44 }
 0xaa4   :  { %30500 = vmatpush3.bf16.msra.mxu0 %v34067_v44 }
 0xaa5   :  { %30502 = vmatprep.subr.bf16.mxu0 %v33833_v57 }
 0xaa7   :  { %27856 = vmatmul.mubr.f32.vlgmr.msra.gmra.mrb[18].mxu0 %v34070_v55 }
 0xaa8   :  { %30504 = vmatpush3.bf16.msra.mxu0 %v33833_v57  ;;  %27874 = vmatprep.mubr.f32.mxu0 %v9656_v28  ;;  %v11693_v28 = vsub.f32 %v11691_v45, %v11692_v26 }
 0xaa9   :  { %30506 = vmatprep.subr.bf16.mxu0 %v33849_v52 }
 0xaaa   :  { %v11694_v35 = vand.u32 4294901760, %v11693_v28 }
 0xaac   :  { %30508 = vmatpush3.bf16.msra.mxu0 %v33849_v52 }
 0xaad   :  { %30510 = vmatprep.subr.bf16.mxu0 %v33875_v36 }
 0xab0   :  { %30512 = vmatpush3.bf16.msra.mxu0 %v33875_v36 }
 0xab1   :  { %30514 = vmatprep.subr.bf16.mxu0 %v33903_v20 }
 0xab4   :  { %30516 = vmatpush3.bf16.msra.mxu0 %v33903_v20 }
 0xab5   :  { %30517 = vmatprep.subr.bf16.mxu0 %v36261_v12 }
 0xab7   :  { %27875 = vmatmul.mubr.f32.vlgmr.msra.gmra.mrb[18].mxu0 %v34070_v55 }
 0xab8   :  { %27911 = vmatprep.mubr.msk.f32.mxu0 %vm32104_vm6, %v36260_v14 }
 0xabb   :  { %v34123_v57 = vpop.f32.mrb[22].mxu1 }
 0xabc   :  { %v34125_v54 = vpop.f32.mrb[23].mxu1 }
 0xaeb   :  { %v34127_v52 = vpop.f32.mrb[24].mxu1 }
 0xaec   :  { %v28014_v13 = vpop.f32.mrb[25].mxu1 }
 0xb8a   :  { %v34129_v7 = vpop.f32.mrb[18].mxu0 }
 0xb8b   :  { %v10653_v36 = vmul.f32 %v34123_v57, %v34129_v7  ;;  %v34133_v20 = vpop.f32.mrb[19].mxu0 }
 0xb8c   :  { %v10652_v38 = vmul.f32 %v34125_v54, %v34133_v20 }
 0xb8d   :  { %v10658_v18 = vand.u32 4294901760, %v10653_v36 }
 0xb8e   :  { %v10655_v2 = vand.u32 4294901760, %v10652_v38 }
 0xb8f   :  { %v10740_v16 = vsub.f32 %v10653_v36, %v10658_v18 }
 0xb90   :  { %v30518_v19 = vpack.c.bf16 %v10658_v18, %v10655_v2  ;;  %v10733_v60 = vsub.f32 %v10652_v38, %v10655_v2 }
 0xb91   :  { %v10741_v43 = vand.u32 4294901760, %v10740_v16 }
 0xb92   :  { %v10734_v49 = vand.u32 4294901760, %v10733_v60  ;;  %30519 = vmatpush3.bf16.msra.mxu0 %v30518_v19  ;;  %v30524_v44 = vpack.c.bf16 %v10740_v16, %v10733_v60 }
 0xb93   :  { %v10742_v41 = vsub.f32 %v10740_v16, %v10741_v43  ;;  %30520 = vmatprep.subr.bf16.mxu0 %v36261_v12 }
 0xb94   :  { %v10735_v40 = vsub.f32 %v10733_v60, %v10734_v49  ;;  %v30530_v34 = vpack.c.bf16 %v10741_v43, %v10734_v49  ;;  %v34225_v43 = vld [vmem:[%s36180_s10 + $0x50] sm:$0xff]  ;;  %v34230_v49 = vld [vmem:[%s36180_s10 + $0x58] sm:$0xff] }
 0xb95   :  { %v10743_v61 = vand.u32 4294901760, %v10742_v41  ;;  %27912 = vmatmul.mubr.f32.vlgmr.msra.gmra.mrb[20].mxu0 %v32783_v24  ;;  %v24902_v24 = vld [vmem:[%s36178_s11 + $0xa0] sm:$0xff]  ;;  %v12103_v41 = vand.u32 4294901760, %v34230_v49 }
 0xb96   :  { %v10736_v30 = vand.u32 4294901760, %v10735_v40  ;;  %27918 = vmatprep.mubr.msk.f32.mxu0 %vm32104_vm6, %v36260_v14 }
 0xb98   :  { %v30521_v27 = vpack.c.bf16 %v10743_v61, %v10736_v30 }
 0xb9a   :  { %30522 = vmatpush3.bf16.msra.mxu0 %v30521_v27  ;;  %v12195_v27 = vsub.f32 %v34230_v49, %v12103_v41 }
 0xb9b   :  { %30523 = vmatprep.subr.bf16.mxu0 %v36261_v12 }
 0xb9c   :  { %v12196_v8 = vand.u32 4294901760, %v12195_v27 }
 0xb9d   :  { %27919 = vmatmul.mubr.msk.f32.vlgmr.msra.gmra.mrb[20].mxu0 %vm2355_vm8, %v32770_v53 }
 0xb9e   :  { %30525 = vmatpush3.bf16.msra.mxu0 %v30524_v44  ;;  %27925 = vmatprep.mubr.msk.f32.mxu0 %vm32104_vm6, %v36260_v14  ;;  %v12100_v44 = vand.u32 4294901760, %v34225_v43 }
 0xb9f   :  { %30526 = vmatprep.subr.bf16.mxu0 %v36261_v12 }
 0xba0   :  { %v34236_v61 = vpack.c.bf16 %v12103_v41, %v12100_v44  ;;  %v12188_v30 = vsub.f32 %v34225_v43, %v12100_v44  ;;  %v34301_v41 = vld [vmem:[%s36181_s12 + $0x18] sm:$0xff] }
 0xba5   :  { %27926 = vmatmul.mubr.f32.vlgmr.msra.gmra.mrb[20].mxu0 %v32774_v48  ;;  %v11604_v48 = vand.u32 4294901760, %v24902_v24 }
 0xba6   :  { %30528 = vmatpush3.bf16.msra.mxu0 %v30518_v19  ;;  %27932 = vmatprep.mubr.msk.f32.mxu0 %vm32104_vm6, %v36260_v14 }
 0xba7   :  { %30529 = vmatprep.subr.bf16.mxu0 %v36261_v12  ;;  %v11684_v23 = vsub.f32 %v24902_v24, %v11604_v48  ;;  %v30572_v42 = vpack.c.bf16 %v11607_v50, %v11604_v48  ;;  %v12189_v50 = vand.u32 4294901760, %v12188_v30 }
 0xba9   :  { %v11685_v55 = vand.u32 4294901760, %v11684_v23  ;;  %v30584_v36 = vpack.c.bf16 %v11691_v45, %v11684_v23  ;;  %v12197_v45 = vsub.f32 %v12195_v27, %v12196_v8 }
 0xbab   :  { %v11686_v32 = vsub.f32 %v11684_v23, %v11685_v55  ;;  %v12190_v23 = vsub.f32 %v12188_v30, %v12189_v50 }
 0xbad   :  { %27933 = vmatmul.mubr.f32.vlgmr.msra.gmra.mrb[20].mxu0 %v32777_v21  ;;  %v11613_v21 = vand.u32 4294901760, %v24905_v11  ;;  %v11687_v4 = vand.u32 4294901760, %v11686_v32  ;;  %v30635_v32 = vpack.c.bf16 %v12196_v8, %v12189_v50 }
 0xbae   :  { %30531 = vmatpush3.bf16.msra.mxu0 %v30530_v34  ;;  %27939 = vmatprep.mubr.msk.f32.mxu0 %vm32104_vm6, %v36260_v14 }
 0xbaf   :  { %30532 = vmatprep.subr.bf16.mxu0 %v36261_v12  ;;  %v11705_v6 = vsub.f32 %v24905_v11, %v11613_v21  ;;  %v30575_v62 = vpack.c.bf16 %v11613_v21, %v11610_v15  ;;  %v30578_v22 = vpack.c.bf16 %v11694_v35, %v11687_v4  ;;  %v12191_v21 = vand.u32 4294901760, %v12190_v23 }
 0xbb1   :  { %v11706_v31 = vand.u32 4294901760, %v11705_v6  ;;  %v30587_v38 = vpack.c.bf16 %v11705_v6, %v11698_v3  ;;  %v12198_v3 = vand.u32 4294901760, %v12197_v45 }
 0xbb3   :  { %v11707_v1 = vsub.f32 %v11705_v6, %v11706_v31  ;;  %v30599_v18 = vpack.c.bf16 %v11706_v31, %v11699_v59  ;;  %v30617_v6 = vpack.c.bf16 %v12198_v3, %v12191_v21 }
 0xbb5   :  { %27940 = vmatmul.mubr.msk.f32.vlgmr.msra.gmra.mrb[20].mxu0 %vm2355_vm8, %v32770_v53  ;;  %v11708_v13 = vand.u32 4294901760, %v11707_v1 }
 0xbb6   :  { %30534 = vmatpush3.bf16.msra.mxu0 %v30518_v19  ;;  %27946 = vmatprep.mubr.msk.f32.mxu0 %vm32104_vm6, %v36260_v14 }
 0xbb7   :  { %30571 = vmatprep.subr.bf16.mxu0 %v36261_v12 }
 0xbbd   :  { %27947 = vmatmul.mubr.msk.f32.vlgmr.msra.gmra.mrb[20].mxu0 %vm2355_vm8, %v32770_v53  ;;  %v30581_v53 = vpack.c.bf16 %v11708_v13, %v11701_v9  ;;  %v34264_v9 = vld [vmem:[%s36181_s12] sm:$0xff]  ;;  %v34269_v13 = vld [vmem:[%s36181_s12 + $0x8] sm:$0xff] }
 0xbbe   :  { %30573 = vmatpush3.bf16.msra.mxu0 %v30572_v42  ;;  %28023 = vmatprep.mubr.msk.f32.mxu0 %vm32104_vm6, %v36260_v14 }
 0xbbf   :  { %30574 = vmatprep.subr.bf16.mxu0 %v36261_v12 }
 0xbc2   :  { %30576 = vmatpush3.bf16.msra.mxu0 %v30575_v62 }
 0xbc3   :  { %30577 = vmatprep.subr.bf16.mxu0 %v36261_v12 }
 0xbc5   :  { %28024 = vmatmul.mubr.f32.vlgmr.msra.gmra.mrb[22].mxu0 %v33984_v47  ;;  %v30596_v47 = vpack.c.bf16 %v11692_v26, %v11685_v55  ;;  %v30623_v26 = vpack.c.bf16 %v12195_v27, %v12188_v30 }
 0xbc6   :  { %30579 = vmatpush3.bf16.msra.mxu0 %v30578_v22  ;;  %28034 = vmatprep.mubr.msk.f32.mxu0 %vm32104_vm6, %v36260_v14 }
 0xbc7   :  { %30580 = vmatprep.subr.bf16.mxu0 %v36261_v12 }
 0xbca   :  { %30582 = vmatpush3.bf16.msra.mxu0 %v30581_v53 }
 0xbcb   :  { %30583 = vmatprep.subr.bf16.mxu0 %v36261_v12 }
 0xbcd   :  { %28035 = vmatmul.mubr.f32.vlgmr.msra.gmra.mrb[22].mxu0 %v33881_v58 }
 0xbce   :  { %30585 = vmatpush3.bf16.msra.mxu0 %v30584_v36  ;;  %28045 = vmatprep.mubr.msk.f32.mxu0 %vm32104_vm6, %v36260_v14  ;;  %v13089_v36 = vsel %vm2355_vm8, %v34264_v9, 0 }
 0xbcf   :  { %30586 = vmatprep.subr.bf16.mxu0 %v36261_v12 }
 0xbd2   :  { %30588 = vmatpush3.bf16.msra.mxu0 %v30587_v38  ;;  %v13092_v38 = vsel %vm2355_vm8, %v34269_v13, 0 }
 0xbd3   :  { %30589 = vmatprep.subr.bf16.mxu0 %v36261_v12 }
 0xbd5   :  { %28046 = vmatmul.mubr.f32.vlgmr.msra.gmra.mrb[22].mxu0 %v33920_v39  ;;  %v34209_v39 = vld [vmem:[%s36180_s10 + $0x40] sm:$0xff] }
 0xbd6   :  { %30591 = vmatpush3.bf16.msra.mxu0 %v30572_v42  ;;  %28056 = vmatprep.mubr.msk.f32.mxu0 %vm32104_vm6, %v36260_v14  ;;  %v12094_v2 = vand.u32 4294901760, %v34209_v39 }
 0xbd7   :  { %30592 = vmatprep.subr.bf16.mxu0 %v36261_v12 }
 0xbda   :  { %30594 = vmatpush3.bf16.msra.mxu0 %v30575_v62 }
 0xbdb   :  { %30595 = vmatprep.subr.bf16.mxu0 %v36261_v12 }
 0xbdd   :  { %28057 = vmatmul.mubr.f32.vlgmr.msra.gmra.mrb[22].mxu0 %v33949_v63  ;;  %v34214_v63 = vld [vmem:[%s36180_s10 + $0x48] sm:$0xff] }
 0xbde   :  { %30597 = vmatpush3.bf16.msra.mxu0 %v30596_v47  ;;  %28067 = vmatprep.mubr.msk.f32.mxu0 %vm32104_vm6, %v36260_v14  ;;  %v12097_v16 = vand.u32 4294901760, %v34214_v63  ;;  %v11602_v47 = vmul.f32 %v34127_v52, %v32438_v25  ;;  %v34296_v52 = vld [vmem:[%s36181_s12 + $0x10] sm:$0xff] }
 0xbdf   :  { %30598 = vmatprep.subr.bf16.mxu0 %v36261_v12  ;;  %v13095_v27 = vsel %vm2355_vm8, %v34296_v52, 0 }
 0xbe0   :  { %v34218_v19 = vpack.c.bf16 %v12097_v16, %v12094_v2  ;;  %v12181_v60 = vsub.f32 %v34214_v63, %v12097_v16  ;;  %v34285_v16 = vld [vmem:[%s36182_s13] sm:$0x1] }
 0xbe1   :  { %v13086_v44 = vsel %vm2355_vm8, %v34285_v16, 0 }
 0xbe2   :  { %30600 = vmatpush3.bf16.msra.mxu0 %v30599_v18  ;;  %30609 = vmatpush3.bf16.msra.mxu1 %v34218_v19  ;;  %v12182_v34 = vand.u32 4294901760, %v12181_v60 }
 0xbe3   :  { %30601 = vmatprep.subr.bf16.mxu0 %v36261_v12  ;;  %30610 = vmatprep.subr.bf16.mxu1 %v36261_v12 }
 0xbe4   :  { %v12183_v5 = vsub.f32 %v12181_v60, %v12182_v34 }
 0xbe5   :  { %28068 = vmatmul.mubr.f32.vlgmr.msra.gmra.mrb[22].mxu0 %v33881_v58 }
 0xbe6   :  { %30603 = vmatpush3.bf16.msra.mxu0 %v30572_v42  ;;  %28078 = vmatprep.mubr.msk.f32.mxu0 %vm32104_vm6, %v36260_v14  ;;  %v12184_v11 = vand.u32 4294901760, %v12183_v5  ;;  %v13107_v5 = vand.u32 4294901760, %v13095_v27 }
 0xbe7   :  { %30604 = vmatprep.subr.bf16.mxu0 %v36261_v12  ;;  %30612 = vmatpush3.bf16.msra.mxu1 %v34236_v61 }
 0xbe8   :  { %30613 = vmatprep.subr.bf16.mxu1 %v36261_v12 }
 0xbea   :  { %30606 = vmatpush3.bf16.msra.mxu0 %v30575_v62 }
 0xbeb   :  { %30643 = vmatprep.subr.bf16.mxu0 %v36261_v12 }
 0xbed   :  { %28079 = vmatmul.mubr.f32.vlgmr.msra.gmra.mrb[22].mxu0 %v33881_v58  ;;  %v12174_v58 = vsub.f32 %v34209_v39, %v12094_v2 }
 0xbee   :  { %28155 = vmatprep.mubr.msk.f32.mxu0 %vm32104_vm6, %v36260_v14 }
 0xbef   :  { %v12175_v40 = vand.u32 4294901760, %v12174_v58  ;;  %v30620_v55 = vpack.c.bf16 %v12181_v60, %v12174_v58 }
 0xbf1   :  { %v12176_v24 = vsub.f32 %v12174_v58, %v12175_v40  ;;  %v30632_v42 = vpack.c.bf16 %v12182_v34, %v12175_v40  ;;  %v13104_v58 = vand.u32 4294901760, %v13092_v38  ;;  %v34307_v34 = vand.u32 4294901760, %v13086_v44 }
 0xbf3   :  { %v12177_v48 = vand.u32 4294901760, %v12176_v24  ;;  %v13188_v30 = vsub.f32 %v13092_v38, %v13104_v58  ;;  %v13098_v24 = vsel %vm2355_vm8, %v34301_v41, 0  ;;  %v13170_v50 = vsub.f32 %v13086_v44, %v34307_v34 }
 0xbf5   :  { %v30614_v15 = vpack.c.bf16 %v12184_v11, %v12177_v48  ;;  %v13110_v48 = vand.u32 4294901760, %v13098_v24  ;;  %v13189_v11 = vand.u32 4294901760, %v13188_v30  ;;  %v13171_v45 = vand.u32 4294901760, %v13170_v50 }
 0xbf7   :  { %v30683_v23 = vpack.c.bf16 %v13110_v48, %v13107_v5  ;;  %v13202_v21 = vsub.f32 %v13098_v24, %v13110_v48 }
 0xc90   :  { %v11109_v28 = vpop.f32.mrb[20].mxu0 }
 0xc91   :  { %v11113_v59 = vmul.f32 0.2236068, %v11109_v28  ;;  %v27948_v31 = vpop.f32.mrb[21].mxu0  ;;  %v13203_v28 = vand.u32 4294901760, %v13202_v21 }
 0xc93   :  { %v12091_v62 = vsel %vm2819_vm5, %v11113_v59, 0 }
 0xc94   :  { %v12162_v4 = vand.u32 4294901760, %v12091_v62 }
 0xc96   :  { %v12163_v35 = vsub.f32 %v12091_v62, %v12162_v4 }
 0xc98   :  { %v12164_v17 = vand.u32 4294901760, %v12163_v35 }
 0xc9a   :  { %v12165_v1 = vsub.f32 %v12163_v35, %v12164_v17 }
 0xc9c   :  { %v12166_v22 = vand.u32 4294901760, %v12165_v1 }
 0xc9e   :  { %28090 = vmatmul.mubr.f32.vlgmr.msra.gmra.mrb[26].mxu1 %v12166_v22 }
 0xc9f   :  { %30615 = vmatpush3.bf16.msra.mxu1 %v30614_v15  ;;  %28100 = vmatprep.mubr.msk.f32.mxu1 %vm32104_vm6, %v36260_v14  ;;  %v13195_v15 = vsub.f32 %v13095_v27, %v13107_v5  ;;  %v12593_v27 = vand.u32 4294901760, %v34269_v13 }
 0xca0   :  { %30616 = vmatprep.subr.bf16.mxu1 %v36261_v12 }
 0xca1   :  { %v12677_v48 = vsub.f32 %v34269_v13, %v12593_v27 }
 0xca3   :  { %30618 = vmatpush3.bf16.msra.mxu1 %v30617_v6  ;;  %v13190_v6 = vsub.f32 %v13188_v30, %v13189_v11 }
 0xca4   :  { %30619 = vmatprep.subr.bf16.mxu1 %v36261_v12 }
 0xca6   :  { %28101 = vmatmul.mubr.f32.vlgmr.msra.gmra.mrb[26].mxu1 %v12162_v4 }
 0xca7   :  { %30621 = vmatpush3.bf16.msra.mxu1 %v30620_v55  ;;  %28111 = vmatprep.mubr.msk.f32.mxu1 %vm32104_vm6, %v36260_v14  ;;  %v13172_v55 = vsub.f32 %v13170_v50, %v13171_v45 }
 0xca8   :  { %30622 = vmatprep.subr.bf16.mxu1 %v36261_v12 }
 0xca9   :  { %v13173_v59 = vand.u32 4294901760, %v13172_v55 }
 0xcab   :  { %30624 = vmatpush3.bf16.msra.mxu1 %v30623_v26 }
 0xcac   :  { %30625 = vmatprep.subr.bf16.mxu1 %v36261_v12 }
 0xcae   :  { %28112 = vmatmul.mubr.f32.vlgmr.msra.gmra.mrb[26].mxu1 %v12163_v35 }
 0xcaf   :  { %30627 = vmatpush3.bf16.msra.mxu1 %v34218_v19  ;;  %28122 = vmatprep.mubr.msk.f32.mxu1 %vm32104_vm6, %v36260_v14 }
 0xcb0   :  { %30628 = vmatprep.subr.bf16.mxu1 %v36261_v12 }
 0xcb3   :  { %30630 = vmatpush3.bf16.msra.mxu1 %v34236_v61 }
 0xcb4   :  { %30631 = vmatprep.subr.bf16.mxu1 %v36261_v12 }
 0xcb6   :  { %28123 = vmatmul.mubr.f32.vlgmr.msra.gmra.mrb[26].mxu1 %v12164_v17 }
 0xcb7   :  { %30633 = vmatpush3.bf16.msra.mxu1 %v30632_v42  ;;  %28133 = vmatprep.mubr.msk.f32.mxu1 %vm32104_vm6, %v36260_v14  ;;  %v13191_v42 = vand.u32 4294901760, %v13190_v6 }
 0xcb8   :  { %30634 = vmatprep.subr.bf16.mxu1 %v36261_v12 }
 0xcbb   :  { %30636 = vmatpush3.bf16.msra.mxu1 %v30635_v32  ;;  %v13196_v32 = vand.u32 4294901760, %v13195_v15 }
 0xcbc   :  { %30637 = vmatprep.subr.bf16.mxu1 %v36261_v12 }
 0xcbd   :  { %v13197_v62 = vsub.f32 %v13195_v15, %v13196_v32  ;;  %v30707_v38 = vpack.c.bf16 %v13203_v28, %v13196_v32 }
 0xcbe   :  { %28134 = vmatmul.mubr.f32.vlgmr.msra.gmra.mrb[26].mxu1 %v12162_v4 }
 0xcbf   :  { %30639 = vmatpush3.bf16.msra.mxu1 %v34218_v19  ;;  %28144 = vmatprep.mubr.msk.f32.mxu1 %vm32104_vm6, %v36260_v14  ;;  %v13101_v19 = vand.u32 4294901760, %v13089_v36  ;;  %v13198_v35 = vand.u32 4294901760, %v13197_v62 }
 0xcc0   :  { %v12084_v53 = vpop.f32.mrb[22].mxu0  ;;  %30640 = vmatprep.subr.bf16.mxu1 %v36261_v12 }
 0xcc1   :  { %v12088_v18 = vmul.f32 %v12084_v53, %v32456_v37  ;;  %v28080_v2 = vpop.f32.mrb[23].mxu0  ;;  %v34303_v40 = vpack.c.bf16 %v13104_v58, %v13101_v19  ;;  %v30695_v53 = vpack.c.bf16 %v13202_v21, %v13195_v15 }
 0xcc3   :  { %30642 = vmatpush3.bf16.msra.mxu1 %v34236_v61  ;;  %v34288_v60 = vadd.f32 %v12088_v18, %v11602_v47  ;;  %v13181_v61 = vsub.f32 %v13089_v36, %v13101_v19  ;;  %v77_v47 = vpop.permute.xlu0 %76  ;;  %v36299_v18 = vld [vmem:[#allocation14_spill] sm:$0xff] }
 0xcc4   :  { %30679 = vmatprep.subr.bf16.mxu1 %v36261_v12  ;;  %vm81_vm9 = vcmp.eq.s32.totalorder %v36299_v18, %v77_v47 }
 0xcc5   :  { %v13182_v8 = vand.u32 4294901760, %v13181_v61  ;;  %v30692_v22 = vpack.c.bf16 %v13188_v30, %v13181_v61  ;;  %v34337_v2 = vsel %vm81_vm9, 1.0, %v36260_v14 }
 0xcc6   :  { %28145 = vmatmul.mubr.f32.vlgmr.msra.gmra.mrb[26].mxu1 %v12162_v4  ;;  %v13204_v4 = vsub.f32 %v13202_v21, %v13203_v28  ;;  %v14124_v19 = vsel %vm161_vm0, %v34337_v2, 0 }
 0xcc7   :  { %28221 = vmatprep.mubr.msk.f32.mxu1 %vm32104_vm6, %v36260_v14  ;;  %v13183_v3 = vsub.f32 %v13181_v61, %v13182_v8  ;;  %v30704_v36 = vpack.c.bf16 %v13189_v11, %v13182_v8  ;;  %v34346_v58 = vsub.f32 %v14124_v19, %v14124_v19  ;;  %v12599_v8 = vand.u32 4294901760, %v34301_v41 }
 0xcc8   :  { %v13205_v17 = vand.u32 4294901760, %v13204_v4 }
 0xcc9   :  { %v13184_v26 = vand.u32 4294901760, %v13183_v3  ;;  %v34349_v44 = vand.u32 4294901760, %v34346_v58  ;;  %v12691_v15 = vsub.f32 %v34301_v41, %v12599_v8 }
 0xcca   :  { %v30689_v1 = vpack.c.bf16 %v13205_v17, %v13198_v35 }
 0xccb   :  { %v30686_v31 = vpack.c.bf16 %v13191_v42, %v13184_v26  ;;  %v14198_v61 = vsub.f32 %v34346_v58, %v34349_v44  ;;  %v12692_v55 = vand.u32 4294901760, %v12691_v15 }
 0xccc   :  { %30681 = vmatpush3.bf16.xpose.msra.mxu1 %v34303_v40 }
 0xccd   :  { %30682 = vmatprep.subr.bf16.mxu1 %v36261_v12  ;;  %v34353_v30 = vand.u32 4294901760, %v14198_v61  ;;  %v12693_v42 = vsub.f32 %v12691_v15, %v12692_v55 }
 0xccf   :  { %v12694_v28 = vand.u32 4294901760, %v12693_v42 }
 0xcd4   :  { %30684 = vmatpush3.bf16.xpose.msra.mxu1 %v30683_v23 }
 0xcd5   :  { %30685 = vmatprep.subr.bf16.mxu1 %v36261_v12 }
 0xcdb   :  { %28222 = vmatmul.mubr.f32.vlgmr.msra.gmra.mrb[28].mxu1 %v13173_v59 }
 0xcdc   :  { %30687 = vmatpush3.bf16.xpose.msra.mxu1 %v30686_v31  ;;  %28232 = vmatprep.mubr.msk.f32.mxu1 %vm32104_vm6, %v36260_v14 }
 0xcdd   :  { %30688 = vmatprep.subr.bf16.mxu1 %v36261_v12 }
 0xce4   :  { %30690 = vmatpush3.bf16.xpose.msra.mxu1 %v30689_v1 }
 0xce5   :  { %30691 = vmatprep.subr.bf16.mxu1 %v36261_v12 }
 0xceb   :  { %28233 = vmatmul.mubr.f32.vlgmr.msra.gmra.mrb[28].mxu1 %v34307_v34 }
 0xcec   :  { %30693 = vmatpush3.bf16.xpose.msra.mxu1 %v30692_v22  ;;  %28243 = vmatprep.mubr.msk.f32.mxu1 %vm32104_vm6, %v36260_v14 }
 0xced   :  { %30694 = vmatprep.subr.bf16.mxu1 %v36261_v12 }
 0xcf4   :  { %30696 = vmatpush3.bf16.xpose.msra.mxu1 %v30695_v53 }
 0xcf5   :  { %30697 = vmatprep.subr.bf16.mxu1 %v36261_v12 }
 0xcfb   :  { %28244 = vmatmul.mubr.f32.vlgmr.msra.gmra.mrb[28].mxu1 %v13170_v50  ;;  %v12596_v50 = vand.u32 4294901760, %v34296_v52 }
 0xcfc   :  { %30699 = vmatpush3.bf16.xpose.msra.mxu1 %v34303_v40  ;;  %28254 = vmatprep.mubr.msk.f32.mxu1 %vm32104_vm6, %v36260_v14 }
 0xcfd   :  { %30700 = vmatprep.subr.bf16.mxu1 %v36261_v12 }
 0xd04   :  { %30702 = vmatpush3.bf16.xpose.msra.mxu1 %v30683_v23 }
 0xd05   :  { %30703 = vmatprep.subr.bf16.mxu1 %v36261_v12 }
 0xd0b   :  { %28255 = vmatmul.mubr.f32.vlgmr.msra.gmra.mrb[28].mxu1 %v13171_v45  ;;  %v34368_v45 = vpack.c.bf16 %v12599_v8, %v12596_v50 }
 0xd0c   :  { %30705 = vmatpush3.bf16.xpose.msra.mxu1 %v30704_v36  ;;  %28265 = vmatprep.mubr.msk.f32.mxu1 %vm32104_vm6, %v36260_v14 }
 0xd0d   :  { %30706 = vmatprep.subr.bf16.mxu1 %v36261_v12 }
 0xd14   :  { %30708 = vmatpush3.bf16.xpose.msra.mxu1 %v30707_v38 }
 0xd15   :  { %30709 = vmatprep.subr.bf16.mxu1 %v36261_v12 }
 0xd1b   :  { %28266 = vmatmul.mubr.f32.vlgmr.msra.gmra.mrb[28].mxu1 %v34307_v34 }
 0xd1c   :  { %30711 = vmatpush3.bf16.xpose.msra.mxu1 %v34303_v40  ;;  %28276 = vmatprep.mubr.msk.f32.mxu1 %vm32104_vm6, %v36260_v14  ;;  %v12590_v40 = vand.u32 4294901760, %v34264_v9 }
 0xd1d   :  { %30712 = vmatprep.subr.bf16.mxu1 %v36261_v12 }
 0xd1e   :  { %v34359_v24 = vpack.c.bf16 %v12593_v27, %v12590_v40  ;;  %v12670_v5 = vsub.f32 %v34264_v9, %v12590_v40 }
 0xd20   :  { %30645 = vmatpush3.bf16.msra.mxu0 %v34359_v24  ;;  %v12671_v11 = vand.u32 4294901760, %v12670_v5  ;;  %v30656_v31 = vpack.c.bf16 %v12677_v48, %v12670_v5 }
 0xd21   :  { %30646 = vmatprep.subr.bf16.mxu0 %v36261_v12 }
 0xd22   :  { %v12672_v21 = vsub.f32 %v12670_v5, %v12671_v11 }
 0xd24   :  { %30714 = vmatpush3.bf16.xpose.msra.mxu1 %v30683_v23  ;;  %v12678_v23 = vand.u32 4294901760, %v12677_v48  ;;  %30648 = vmatpush3.bf16.msra.mxu0 %v34368_v45  ;;  %v12673_v13 = vand.u32 4294901760, %v12672_v21 }
 0xd25   :  { %30649 = vmatprep.subr.bf16.mxu0 %v36261_v12 }
 0xd26   :  { %v12679_v9 = vsub.f32 %v12677_v48, %v12678_v23  ;;  %v30668_v4 = vpack.c.bf16 %v12678_v23, %v12671_v11 }
 0xd28   :  { %v12680_v3 = vand.u32 4294901760, %v12679_v9 }
 0xd2a   :  { %v30650_v26 = vpack.c.bf16 %v12680_v3, %v12673_v13  ;;  %v13633_v13 = vsel %vm2819_vm5, %v34225_v43, 0 }
 0xd2b   :  { %28277 = vmatmul.mubr.f32.vlgmr.msra.gmra.mrb[28].mxu1 %v34307_v34  ;;  %v12684_v34 = vsub.f32 %v34296_v52, %v12596_v50 }
 0xd2c   :  { %28347 = vmatprep.mubr.f32.mxu1 %v34353_v30 }
 0xd2d   :  { %v12685_v6 = vand.u32 4294901760, %v12684_v34  ;;  %v30659_v62 = vpack.c.bf16 %v12691_v15, %v12684_v34  ;;  %v13630_v15 = vsel %vm2819_vm5, %v34214_v63, 0  ;;  %v13645_v63 = vand.u32 4294901760, %v13633_v13 }
 0xd2e   :  { %v13642_v9 = vand.u32 4294901760, %v13630_v15 }
 0xd2f   :  { %v12686_v52 = vsub.f32 %v12684_v34, %v12685_v6  ;;  %v30671_v41 = vpack.c.bf16 %v12692_v55, %v12685_v6 }
 0xd30   :  { %v13726_v55 = vsub.f32 %v13630_v15, %v13642_v9 }
 0xd31   :  { %v12687_v32 = vand.u32 4294901760, %v12686_v52  ;;  %v36300_v52 = vld [vmem:[#allocation13_spill] sm:$0xff] }
 0xd33   :  { %v30653_v59 = vpack.c.bf16 %v12694_v28, %v12687_v32  ;;  %v13727_v28 = vand.u32 4294901760, %v13726_v55 }
 0xd99   :  { %v12574_v35 = vpop.f32.mrb[26].mxu1 }
 0xd9a   :  { %v31584_v17 = vadd.f32 %v12574_v35, %v34288_v60  ;;  %v28146_v1 = vpop.f32.mrb[27].mxu1 }
 0xd9c   :  { %v12578_v22 = vsub.f32 0.0, %v31584_v17 }
 0xd9e   :  { %v12579_v53 = vmul.f32 1.442695, %v12578_v22 }
 0xda0   :  { %32097 = vpow2.f32 %v12579_v53 }
 0xdaa   :  { %v32098_v36 = vpop.eup %32097 }
 0xdab   :  { %v12581_v38 = vadd.f32 1.0, %v32098_v36 }
 0xdad   :  { %32099 = vrcp.f32 %v12581_v38 }
 0xdb7   :  { %v32100_v47 = vpop.eup %32099 }
 0xdb8   :  { %v12584_v19 = vmul.f32 %v32100_v47, %v31584_v17  ;;  %v13618_v61 = vsub.f32 1.0, %v32100_v47 }
 0xdba   :  { %v12585_v40 = vadd.f32 %v12584_v19, %v33800_v56  ;;  %v13619_v27 = vmul.f32 %v31584_v17, %v13618_v61  ;;  %v13627_v56 = vsel %vm2819_vm5, %v34209_v39, 0  ;;  %v13636_v39 = vsel %vm2819_vm5, %v34230_v49, 0 }
 0xdbb   :  { %v13639_v21 = vand.u32 4294901760, %v13627_v56 }
 0xdbc   :  { %v12587_v5 = vsel %vm2819_vm5, %v12585_v40, 0  ;;  %v13620_v48 = vadd.f32 1.0, %v13619_v27 }
 0xdbd   :  { %v12658_v50 = vand.u32 4294901760, %v12587_v5  ;;  %v13719_v6 = vsub.f32 %v13627_v56, %v13639_v21 }
 0xdbe   :  { %v13621_v8 = vmul.f32 %v32100_v47, %v13620_v48 }
 0xdbf   :  { %v12659_v34 = vsub.f32 %v12587_v5, %v12658_v50  ;;  %v13720_v32 = vand.u32 4294901760, %v13719_v6 }
 0xdc1   :  { %v12660_v60 = vand.u32 4294901760, %v12659_v34 }
 0xdc3   :  { %v12661_v11 = vsub.f32 %v12659_v34, %v12660_v60 }
 0xdc5   :  { %v12662_v23 = vand.u32 4294901760, %v12661_v11 }
 0xdc7   :  { %28156 = vmatmul.mubr.f32.vlgmr.msra.gmra.mrb[24].mxu0 %v12662_v23  ;;  %v13078_v23 = vrot.slane %v34285_v16, %v36300_v52 }
 0xdc8   :  { %30651 = vmatpush3.bf16.msra.mxu0 %v30650_v26  ;;  %28166 = vmatprep.mubr.msk.f32.mxu0 %vm32104_vm6, %v36260_v14 }
 0xdc9   :  { %30652 = vmatprep.subr.bf16.mxu0 %v36261_v12 }
 0xdcc   :  { %30654 = vmatpush3.bf16.msra.mxu0 %v30653_v59  ;;  %v13733_v59 = vsub.f32 %v13633_v13, %v13645_v63 }
 0xdcd   :  { %30655 = vmatprep.subr.bf16.mxu0 %v36261_v12 }
 0xdce   :  { %v13734_v53 = vand.u32 4294901760, %v13733_v59 }
 0xdcf   :  { %28167 = vmatmul.mubr.f32.vlgmr.msra.gmra.mrb[24].mxu0 %v12658_v50 }
 0xdd0   :  { %30657 = vmatpush3.bf16.msra.mxu0 %v30656_v31  ;;  %28177 = vmatprep.mubr.msk.f32.mxu0 %vm32104_vm6, %v36260_v14  ;;  %v13735_v61 = vsub.f32 %v13733_v59, %v13734_v53 }
 0xdd1   :  { %30658 = vmatprep.subr.bf16.mxu0 %v36261_v12 }
 0xdd2   :  { %v13736_v5 = vand.u32 4294901760, %v13735_v61 }
 0xdd4   :  { %30660 = vmatpush3.bf16.msra.mxu0 %v30659_v62 }
 0xdd5   :  { %30661 = vmatprep.subr.bf16.mxu0 %v36261_v12 }
 0xdd7   :  { %28178 = vmatmul.mubr.f32.vlgmr.msra.gmra.mrb[24].mxu0 %v12659_v34 }
 0xdd8   :  { %30663 = vmatpush3.bf16.msra.mxu0 %v34359_v24  ;;  %28188 = vmatprep.mubr.msk.f32.mxu0 %vm32104_vm6, %v36260_v14 }
 0xdd9   :  { %30664 = vmatprep.subr.bf16.mxu0 %v36261_v12 }
 0xddc   :  { %30666 = vmatpush3.bf16.msra.mxu0 %v34368_v45 }
 0xddd   :  { %30667 = vmatprep.subr.bf16.mxu0 %v36261_v12 }
 0xddf   :  { %28189 = vmatmul.mubr.f32.vlgmr.msra.gmra.mrb[24].mxu0 %v12660_v60  ;;  %v30740_v60 = vpack.c.bf16 %v13727_v28, %v13720_v32 }
 0xde0   :  { %30669 = vmatpush3.bf16.msra.mxu0 %v30668_v4  ;;  %28199 = vmatprep.mubr.msk.f32.mxu0 %vm32104_vm6, %v36260_v14  ;;  %v13721_v4 = vsub.f32 %v13719_v6, %v13720_v32 }
 0xde1   :  { %30670 = vmatprep.subr.bf16.mxu0 %v36261_v12 }
 0xde2   :  { %v13722_v1 = vand.u32 4294901760, %v13721_v4 }
 0xde4   :  { %30672 = vmatpush3.bf16.msra.mxu0 %v30671_v41  ;;  %v13728_v41 = vsub.f32 %v13726_v55, %v13727_v28 }
 0xde5   :  { %30673 = vmatprep.subr.bf16.mxu0 %v36261_v12 }
 0xde6   :  { %v13729_v22 = vand.u32 4294901760, %v13728_v41 }
 0xde7   :  { %28200 = vmatmul.mubr.f32.vlgmr.msra.gmra.mrb[24].mxu0 %v12658_v50 }
 0xde8   :  { %30675 = vmatpush3.bf16.msra.mxu0 %v34359_v24  ;;  %28210 = vmatprep.mubr.msk.f32.mxu0 %vm32104_vm6, %v36260_v14  ;;  %v34406_v24 = vpack.c.bf16 %v13642_v9, %v13639_v21  ;;  %v30722_v19 = vpack.c.bf16 %v13729_v22, %v13722_v1 }
 0xde9   :  { %30676 = vmatprep.subr.bf16.mxu0 %v36261_v12 }
 0xdec   :  { %30678 = vmatpush3.bf16.msra.mxu0 %v34368_v45  ;;  %v13648_v45 = vand.u32 4294901760, %v13636_v39 }
 0xded   :  { %30715 = vmatprep.subr.bf16.mxu0 %v36261_v12 }
 0xdee   :  { %v30719_v3 = vpack.c.bf16 %v13648_v45, %v13645_v63  ;;  %v13740_v62 = vsub.f32 %v13636_v39, %v13648_v45 }
 0xdef   :  { %28211 = vmatmul.mubr.f32.vlgmr.msra.gmra.mrb[24].mxu0 %v12658_v50 }
 0xdf0   :  { %28287 = vmatprep.mubr.msk.f32.mxu0 %vm32104_vm6, %v36260_v14  ;;  %v13741_v36 = vand.u32 4294901760, %v13740_v62  ;;  %v30731_v34 = vpack.c.bf16 %v13740_v62, %v13733_v59  ;;  %v36301_v59 = vld [vmem:[#allocation12_spill] sm:$0xff] }
 0xdf2   :  { %v13742_v40 = vsub.f32 %v13740_v62, %v13741_v36  ;;  %v30743_v11 = vpack.c.bf16 %v13741_v36, %v13734_v53 }
 0xdf4   :  { %v13743_v48 = vand.u32 4294901760, %v13742_v40 }
 0xdf5   :  { %30717 = vmatpush3.bf16.xpose.msra.mxu0 %v34406_v24 }
 0xdf6   :  { %30718 = vmatprep.subr.bf16.mxu0 %v36261_v12  ;;  %v30725_v50 = vpack.c.bf16 %v13743_v48, %v13736_v5 }
 0xdfd   :  { %30720 = vmatpush3.bf16.xpose.msra.mxu0 %v30719_v3 }
 0xdfe   :  { %v13581_v26 = vpop.f32.mrb[28].mxu1  ;;  %30721 = vmatprep.subr.bf16.mxu0 %v36261_v12 }
 0xdff   :  { %v34416_v42 = vrot.slane %v13581_v26, %v36300_v52  ;;  %v28278_v43 = vpop.f32.mrb[29].mxu1 }
 0xe01   :  { %v13622_v49 = vmul.f32 %v13621_v8, %v34416_v42  ;;  %v30728_v8 = vpack.c.bf16 %v13726_v55, %v13719_v6 }
 0xe03   :  { %v13624_v31 = vsel %vm2819_vm5, %v13622_v49, 0  ;;  %v24824_v49 = vld [vmem:[%s36184_s2] ss:$0 sm:$0xff] }
 0xe04   :  { %v34420_v35 = vand.u32 4294901760, %v13624_v31  ;;  %vm100_vm12 = vcmp.eq.s32.totalorder %v36301_v59, %v24824_v49 }
 0xe06   :  { %v34423_v17 = vsub.f32 %v13624_v31, %v34420_v35  ;;  %v34508_v31 = vsel %vm100_vm12, 1.0, %v36260_v14 }
 0xe07   :  { %v14625_v62 = vsel %vm2355_vm8, %v34508_v31, 0 }
 0xe08   :  { %v34426_v38 = vand.u32 4294901760, %v34423_v17  ;;  %v34512_v4 = vsub.f32 %v14625_v62, %v14625_v62 }
 0xe0a   :  { %v13710_v47 = vsub.f32 %v34423_v17, %v34426_v38  ;;  %v34515_v53 = vand.u32 4294901760, %v34512_v4 }
 0xe0c   :  { %v34430_v27 = vand.u32 4294901760, %v13710_v47  ;;  %v14697_v48 = vsub.f32 %v34512_v4, %v34515_v53 }
 0xe0e   :  { %28288 = vmatmul.mubr.f32.vlgmr.msra.gmra.mrb[26].mxu0 %v34430_v27 }
 0xe0f   :  { %30723 = vmatpush3.bf16.xpose.msra.mxu0 %v30722_v19  ;;  %28298 = vmatprep.mubr.msk.f32.mxu0 %vm32104_vm6, %v36260_v14 }
 0xe10   :  { %30724 = vmatprep.subr.bf16.mxu0 %v36261_v12 }
 0xe17   :  { %30726 = vmatpush3.bf16.xpose.msra.mxu0 %v30725_v50 }
 0xe18   :  { %30727 = vmatprep.subr.bf16.mxu0 %v36261_v12 }
 0xe1e   :  { %28299 = vmatmul.mubr.f32.vlgmr.msra.gmra.mrb[26].mxu0 %v34420_v35 }
 0xe1f   :  { %30729 = vmatpush3.bf16.xpose.msra.mxu0 %v30728_v8  ;;  %28309 = vmatprep.mubr.msk.f32.mxu0 %vm32104_vm6, %v36260_v14 }
 0xe20   :  { %30730 = vmatprep.subr.bf16.mxu0 %v36261_v12 }
 0xe27   :  { %30732 = vmatpush3.bf16.xpose.msra.mxu0 %v30731_v34 }
 0xe28   :  { %30733 = vmatprep.subr.bf16.mxu0 %v36261_v12 }
 0xe2e   :  { %28310 = vmatmul.mubr.f32.vlgmr.msra.gmra.mrb[26].mxu0 %v34423_v17 }
 0xe2f   :  { %30735 = vmatpush3.bf16.xpose.msra.mxu0 %v34406_v24  ;;  %28320 = vmatprep.mubr.msk.f32.mxu0 %vm32104_vm6, %v36260_v14 }
 0xe30   :  { %30736 = vmatprep.subr.bf16.mxu0 %v36261_v12 }
 0xe37   :  { %30738 = vmatpush3.bf16.xpose.msra.mxu0 %v30719_v3 }
 0xe38   :  { %30739 = vmatprep.subr.bf16.mxu0 %v36261_v12 }
 0xe3e   :  { %28321 = vmatmul.mubr.f32.vlgmr.msra.gmra.mrb[26].mxu0 %v34426_v38 }
 0xe3f   :  { %30741 = vmatpush3.bf16.xpose.msra.mxu0 %v30740_v60  ;;  %28331 = vmatprep.mubr.msk.f32.mxu0 %vm32104_vm6, %v36260_v14 }
 0xe40   :  { %30742 = vmatprep.subr.bf16.mxu0 %v36261_v12 }
 0xe47   :  { %30744 = vmatpush3.bf16.xpose.msra.mxu0 %v30743_v11 }
 0xe48   :  { %30745 = vmatprep.subr.bf16.mxu0 %v36261_v12 }
 0xe4e   :  { %28332 = vmatmul.mubr.f32.vlgmr.msra.gmra.mrb[26].mxu0 %v34420_v35 }
 0xe4f   :  { %30747 = vmatpush3.bf16.xpose.msra.mxu0 %v34406_v24  ;;  %28342 = vmatprep.mubr.msk.f32.mxu0 %vm32104_vm6, %v36260_v14  ;;  %v80_v24 = vpop.permute.xlu1 %79 }
 0xe50   :  { %30748 = vmatprep.subr.bf16.mxu0 %v36261_v12  ;;  %vm82_vm10 = vcmp.eq.s32.totalorder %v36299_v18, %v80_v24 }
 0xe51   :  { %v34467_v13 = vsel %vm82_vm10, 1.0, %v36260_v14 }
 0xe52   :  { %v14127_v39 = vsel %vm161_vm0, %v34467_v13, 0 }
 0xe53   :  { %v34471_v63 = vsub.f32 %v14127_v39, %v14127_v39 }
 0xe55   :  { %v34474_v45 = vand.u32 4294901760, %v34471_v63 }
 0xe57   :  { %30750 = vmatpush3.bf16.xpose.msra.mxu0 %v30719_v3  ;;  %v14208_v16 = vsub.f32 %v34471_v63, %v34474_v45 }
 0xe58   :  { %30751 = vmatprep.subr.bf16.mxu0 %v36261_v12 }
 0xe59   :  { %v34478_v18 = vand.u32 4294901760, %v14208_v16 }
 0xe5e   :  { %28343 = vmatmul.mubr.f32.vlgmr.msra.gmra.mrb[26].mxu0 %v34420_v35 }
 0xe5f   :  { %28379 = vmatprep.mubr.msk.f32.mxu0 %vm32104_vm6, %v36260_v14 }
 0xec2   :  { %v13070_v56 = vpop.f32.mrb[24].mxu0 }
 0xec3   :  { %v13080_v15 = vmul.f32 %v13078_v23, %v13070_v56  ;;  %v28212_v21 = vpop.f32.mrb[25].mxu0  ;;  %v34527_v23 = vand.u32 4294901760, %v14697_v48 }
 0xec4   :  { %v24937_v21 = vld [vmem:[%s36178_s11 + $0x88] sm:$0xff] }
 0xec5   :  { %v13081_v9 = vsel %vm2355_vm8, %v13080_v15, 0.0  ;;  %v24936_v15 = vld [vmem:[%s36178_s11 + $0x80] sm:$0xff]  ;;  %v15090_v16 = vsel %vm2819_vm5, %v24937_v21, 0 }
 0xec6   :  { %13082 = vadd.xlane.f32.xlu0 %v13081_v9  ;;  %v15087_v39 = vsel %vm2819_vm5, %v24936_v15, 0 }
 0xf31   :  { %v14119_v3 = vpop.f32.mrb[26].mxu0 }
 0xf32   :  { %v14130_v6 = vand.u32 4294901760, %v14119_v3  ;;  %v28344_v55 = vpop.f32.mrb[27].mxu0 }
 0xf33   :  { %v15102_v55 = vand.u32 4294901760, %v15090_v16 }
 0xf34   :  { %v14217_v26 = vsub.f32 %v14119_v3, %v14130_v6  ;;  %28345 = vmatprep.subr.mxu1 %v14130_v6 }
 0xf35   :  { %28346 = vmatpush3.msra.mxu1 %v14130_v6  ;;  %v34565_v49 = vsub.f32 %v15090_v16, %v15102_v55 }
 0xf36   :  { %28348 = vmatmul.mubr.f32.vlgmr.msra.gmra.mrb[30].mxu1 %v34478_v18  ;;  %v14218_v52 = vand.u32 4294901760, %v14217_v26 }
 0xf37   :  { %28352 = vmatprep.mubr.msk.f32.mxu1 %vm161_vm0, %v34337_v2 }
 0xf38   :  { %v14219_v43 = vsub.f32 %v14217_v26, %v14218_v52 }
 0xf3a   :  { %v14220_v32 = vand.u32 4294901760, %v14219_v43  ;;  %v24940_v43 = vld [vmem:[%s36178_s11 + $0xa0] sm:$0xff] }
 0xf3c   :  { %28350 = vmatprep.subr.mxu1 %v14220_v32 }
 0xf3d   :  { %28351 = vmatpush3.msra.mxu1 %v14220_v32  ;;  %v24941_v32 = vld [vmem:[%s36178_s11 + $0xa8] sm:$0xff] }
 0xf3e   :  { %28353 = vmatmul.mubr.msk.f32.vlgmr.msra.gmra.mrb[30].mxu1 %vm161_vm0, %v34467_v13  ;;  %28355 = vmatprep.subr.mxu1 %v14217_v26 }
 0xf3f   :  { %28356 = vmatpush3.msra.mxu1 %v14217_v26  ;;  %28357 = vmatprep.mubr.f32.mxu1 %v34346_v58  ;;  %v24938_v26 = vld [vmem:[%s36178_s11 + $0x90] sm:$0xff] }
 0xf40   :  { %28360 = vmatprep.subr.mxu1 %v14130_v6  ;;  %v15093_v62 = vsel %vm2819_vm5, %v24938_v26, 0 }
 0xf46   :  { %28358 = vmatmul.mubr.f32.vlgmr.msra.gmra.mrb[30].mxu1 %v34471_v63 }
 0xf47   :  { %28361 = vmatpush3.msra.mxu1 %v14130_v6  ;;  %28362 = vmatprep.mubr.f32.mxu1 %v34349_v44 }
 0xf48   :  { %28365 = vmatprep.subr.mxu1 %v14218_v52 }
 0xf4e   :  { %28363 = vmatmul.mubr.f32.vlgmr.msra.gmra.mrb[30].mxu1 %v34474_v45 }
 0xf4f   :  { %28366 = vmatpush3.msra.mxu1 %v14218_v52  ;;  %28367 = vmatprep.mubr.msk.f32.mxu1 %vm161_vm0, %v34337_v2  ;;  %v24939_v52 = vld [vmem:[%s36178_s11 + $0x98] sm:$0xff] }
 0xf50   :  { %28370 = vmatprep.subr.mxu1 %v14130_v6 }
 0xf53   :  { %v13083_v28 = vpop.xlane.xlu0 %13082 }
 0xf54   :  { %13085 = vst.msk [vmem:[%s36183_s14] sm:$0xff] %vm13084_vm11, %v13083_v28 }
 0xf56   :  { %28368 = vmatmul.mubr.msk.f32.vlgmr.msra.gmra.mrb[30].mxu1 %vm161_vm0, %v34467_v13 }
 0xf57   :  { %28371 = vmatpush3.msra.mxu1 %v14130_v6  ;;  %28372 = vmatprep.mubr.msk.f32.mxu1 %vm161_vm0, %v34337_v2  ;;  %v15099_v6 = vand.u32 4294901760, %v15087_v39 }
 0xf58   :  { %30754 = vmatprep.subr.bf16.mxu1 %v36261_v12 }
 0xf59   :  { %v34563_v28 = vsub.f32 %v15087_v39, %v15099_v6  ;;  %v34569_v59 = vpack.c.bf16 %v15102_v55, %v15099_v6 }
 0xf5e   :  { %28373 = vmatmul.mubr.msk.f32.vlgmr.msra.gmra.mrb[30].mxu1 %vm161_vm0, %v34467_v13 }
 0xf5f   :  { %28386 = vmatprep.mubr.msk.f32.mxu1 %vm32104_vm6, %v36260_v14 }
0x1031   :  { %v28374_v41 = vpop.f32.mrb[30].mxu1 }
0x1032   :  { %v14619_v1 = vmul.f32 0.2236068, %v28374_v41  ;;  %v14608_v22 = vpop.f32.mrb[31].mxu1  ;;  %v15096_v41 = vsel %vm2819_vm5, %v24939_v52, 0 }
0x1033   :  { %v14618_v36 = vmul.f32 0.2236068, %v14608_v22  ;;  %v15588_v22 = vsel %vm2819_vm5, %v24941_v32, 0 }
0x1034   :  { %v14621_v47 = vmul.f32 %v34129_v7, %v14619_v1  ;;  %v34519_v19 = vmul.f32 %v34123_v57, %v14619_v1  ;;  %v15585_v1 = vsel %vm2819_vm5, %v24940_v43, 0 }
0x1035   :  { %v14620_v61 = vmul.f32 %v14618_v36, %v34133_v20  ;;  %v34523_v40 = vmul.f32 %v14618_v36, %v34125_v54  ;;  %v15180_v36 = vand.u32 4294901760, %v34563_v28  ;;  %v15597_v48 = vand.u32 4294901760, %v15585_v1 }
0x1036   :  { %v14631_v5 = vand.u32 4294901760, %v14621_v47 }
0x1037   :  { %v14628_v50 = vand.u32 4294901760, %v14620_v61 }
0x1038   :  { %v14713_v8 = vsub.f32 %v14621_v47, %v14631_v5  ;;  %v15187_v47 = vand.u32 4294901760, %v34565_v49 }
0x1039   :  { %v30752_v34 = vpack.c.bf16 %v14631_v5, %v14628_v50  ;;  %v14706_v60 = vsub.f32 %v14620_v61, %v14628_v50  ;;  %v15105_v61 = vand.u32 4294901760, %v15093_v62  ;;  %v15108_v5 = vand.u32 4294901760, %v15096_v41 }
0x103a   :  { %v14714_v11 = vand.u32 4294901760, %v14713_v8  ;;  %v15600_v50 = vand.u32 4294901760, %v15588_v22 }
0x103b   :  { %v14707_v7 = vand.u32 4294901760, %v14706_v60  ;;  %30753 = vmatpush3.bf16.msra.mxu0 %v30752_v34  ;;  %v30758_v57 = vpack.c.bf16 %v14713_v8, %v14706_v60 }
0x103c   :  { %v14715_v56 = vsub.f32 %v14713_v8, %v14714_v11  ;;  %30757 = vmatprep.subr.bf16.mxu0 %v36261_v12  ;;  %v24942_v8 = vld [vmem:[%s36178_s11 + $0xb0] sm:$0xff]  ;;  %v34612_v15 = vsub.f32 %v15588_v22, %v15600_v50 }
0x103d   :  { %v14708_v20 = vsub.f32 %v14706_v60, %v14707_v7  ;;  %v30764_v54 = vpack.c.bf16 %v14714_v11, %v14707_v7  ;;  %v15181_v60 = vsub.f32 %v34563_v28, %v15180_v36  ;;  %v15188_v11 = vsub.f32 %v34565_v49, %v15187_v47 }
0x103e   :  { %28380 = vmatmul.mubr.f32.vlgmr.msra.gmra.mrb[28].mxu0 %v34527_v23  ;;  %v14716_v9 = vand.u32 4294901760, %v14715_v56  ;;  %v34600_v7 = vpack.c.bf16 %v15108_v5, %v15105_v61  ;;  %v34604_v56 = vsub.f32 %v15096_v41, %v15108_v5  ;;  %v15591_v21 = vsel %vm2819_vm5, %v24942_v8, 0 }
0x103f   :  { %30759 = vmatpush3.bf16.msra.mxu0 %v30758_v57  ;;  %28393 = vmatprep.mubr.msk.f32.mxu0 %vm32104_vm6, %v36260_v14  ;;  %v14709_v24 = vand.u32 4294901760, %v14708_v20  ;;  %v34602_v57 = vsub.f32 %v15093_v62, %v15105_v61  ;;  %v34606_v20 = vpack.c.bf16 %v15600_v50, %v15597_v48  ;;  %v15189_v39 = vand.u32 4294901760, %v15188_v11 }
0x1040   :  { %30763 = vmatprep.subr.bf16.mxu0 %v36261_v12  ;;  %v15603_v16 = vand.u32 4294901760, %v15591_v21  ;;  %v15201_v55 = vand.u32 4294901760, %v34604_v56  ;;  %v15685_v52 = vand.u32 4294901760, %v34612_v15 }
0x1041   :  { %v30755_v3 = vpack.c.bf16 %v14716_v9, %v14709_v24  ;;  %v15182_v24 = vand.u32 4294901760, %v15181_v60  ;;  %v15194_v6 = vand.u32 4294901760, %v34602_v57 }
0x1042   :  { %28394 = vmatmul.mubr.f32.vlgmr.msra.gmra.mrb[30].mxu0 %v34512_v4  ;;  %v15202_v41 = vsub.f32 %v34604_v56, %v15201_v55  ;;  %v15686_v5 = vsub.f32 %v34612_v15, %v15685_v52 }
0x1043   :  { %30756 = vmatpush3.bf16.msra.mxu1 %v30755_v3  ;;  %30765 = vmatpush3.bf16.msra.mxu0 %v30764_v54  ;;  %v34610_v54 = vsub.f32 %v15585_v1, %v15597_v48  ;;  %v30776_v43 = vpack.c.bf16 %v15189_v39, %v15182_v24  ;;  %v15195_v62 = vsub.f32 %v34602_v57, %v15194_v6 }
0x1044   :  { %30760 = vmatprep.subr.bf16.mxu1 %v36261_v12  ;;  %28407 = vmatprep.mubr.msk.f32.mxu0 %vm32104_vm6, %v36260_v14  ;;  %v34632_v1 = vsub.f32 %v15591_v21, %v15603_v16  ;;  %v15203_v50 = vand.u32 4294901760, %v15202_v41 }
0x1045   :  { %30769 = vmatprep.subr.bf16.mxu0 %v36261_v12  ;;  %v15678_v26 = vand.u32 4294901760, %v34610_v54  ;;  %v15196_v48 = vand.u32 4294901760, %v15195_v62  ;;  %v30818_v41 = vpack.c.bf16 %v34612_v15, %v34610_v54 }
0x1046   :  { %28387 = vmatmul.mubr.msk.f32.vlgmr.msra.gmra.mrb[32].mxu1 %vm2355_vm8, %v34508_v31  ;;  %28408 = vmatmul.mubr.msk.f32.vlgmr.msra.gmra.mrb[32].mxu0 %vm2355_vm8, %v34508_v31  ;;  %v15692_v60 = vand.u32 4294901760, %v34632_v1 }
0x1047   :  { %30762 = vmatpush3.bf16.msra.mxu1 %v30752_v34  ;;  %28400 = vmatprep.mubr.msk.f32.mxu1 %vm32104_vm6, %v36260_v14  ;;  %v15679_v61 = vsub.f32 %v34610_v54, %v15678_v26  ;;  %v30779_v21 = vpack.c.bf16 %v15203_v50, %v15196_v48 }
0x1048   :  { %30766 = vmatprep.subr.bf16.mxu1 %v36261_v12  ;;  %28425 = vmatprep.mubr.msk.f32.mxu0 %vm32104_vm6, %v36260_v14  ;;  %v15693_v24 = vsub.f32 %v34632_v1, %v15692_v60 }
0x1049   :  { %v15680_v8 = vand.u32 4294901760, %v15679_v61 }
0x104a   :  { %28401 = vmatmul.mubr.f32.vlgmr.msra.gmra.mrb[34].mxu1 %v34515_v53 }
0x104b   :  { %30768 = vmatpush3.bf16.msra.mxu1 %v30752_v34  ;;  %28414 = vmatprep.mubr.msk.f32.mxu1 %vm32104_vm6, %v36260_v14  ;;  %v24943_v34 = vld [vmem:[%s36178_s11 + $0xb8] sm:$0xff] }
0x104c   :  { %30771 = vmatpush3.bf16.xpose.msra.mxu0 %v34569_v59  ;;  %30805 = vmatprep.subr.bf16.mxu1 %v36261_v12  ;;  %v15594_v9 = vsel %vm2819_vm5, %v24943_v34, 0  ;;  %v15687_v34 = vand.u32 4294901760, %v15686_v5  ;;  %v30794_v5 = vpack.c.bf16 %v15187_v47, %v15180_v36  ;;  %v24925_v36 = vld [vmem:[%s36176_s9 + $0x88] sm:$0xff] }
0x104d   :  { %30772 = vmatprep.subr.bf16.mxu0 %v36261_v12  ;;  %v15606_v3 = vand.u32 4294901760, %v15594_v9 }
0x104e   :  { %28415 = vmatmul.mubr.msk.f32.vlgmr.msra.gmra.mrb[36].mxu1 %vm2355_vm8, %v34508_v31 }
0x104f   :  { %28491 = vmatprep.mubr.msk.f32.mxu1 %vm32104_vm6, %v36260_v14  ;;  %v34624_v32 = vpack.c.bf16 %v15606_v3, %v15603_v16  ;;  %v34634_v22 = vsub.f32 %v15594_v9, %v15606_v3  ;;  %v30812_v9 = vpack.c.bf16 %v15687_v34, %v15680_v8  ;;  %v15694_v16 = vand.u32 4294901760, %v15693_v24  ;;  %v24928_v34 = vld [vmem:[%s36176_s9 + $0xa0] sm:$0xff] }
0x1051   :  { %v15699_v11 = vand.u32 4294901760, %v34634_v22  ;;  %v30821_v61 = vpack.c.bf16 %v34634_v22, %v34632_v1 }
0x1053   :  { %v15700_v39 = vsub.f32 %v34634_v22, %v15699_v11  ;;  %v30833_v47 = vpack.c.bf16 %v15699_v11, %v15692_v60  ;;  %v16102_v60 = vsel %vm2819_vm5, %v24928_v34, 0 }
0x1054   :  { %30774 = vmatpush3.bf16.xpose.msra.mxu0 %v34600_v7  ;;  %30807 = vmatpush3.bf16.xpose.msra.mxu1 %v34606_v20 }
0x1055   :  { %30775 = vmatprep.subr.bf16.mxu0 %v36261_v12  ;;  %30808 = vmatprep.subr.bf16.mxu1 %v36261_v12  ;;  %v15701_v3 = vand.u32 4294901760, %v15700_v39  ;;  %v24930_v39 = vld [vmem:[%s36176_s9 + $0xb0] sm:$0xff] }
0x1057   :  { %v30815_v62 = vpack.c.bf16 %v15701_v3, %v15694_v16  ;;  %v24931_v16 = vld [vmem:[%s36176_s9 + $0xb8] sm:$0xff] }
0x105b   :  { %28426 = vmatmul.mubr.f32.vlgmr.msra.gmra.mrb[34].mxu0 %v34430_v27 }
0x105c   :  { %30777 = vmatpush3.bf16.xpose.msra.mxu0 %v30776_v43  ;;  %30810 = vmatpush3.bf16.xpose.msra.mxu1 %v34624_v32  ;;  %v30782_v43 = vpack.c.bf16 %v34565_v49, %v34563_v28  ;;  %v30830_v28 = vpack.c.bf16 %v15685_v52, %v15678_v26  ;;  %v24924_v49 = vld [vmem:[%s36176_s9 + $0x80] sm:$0xff] }
0x105d   :  { %30778 = vmatprep.subr.bf16.mxu0 %v36261_v12  ;;  %30811 = vmatprep.subr.bf16.mxu1 %v36261_v12 }
0x105e   :  { %28436 = vmatprep.mubr.msk.f32.mxu0 %vm32104_vm6, %v36260_v14 }
0x1063   :  { %28492 = vmatmul.mubr.f32.vlgmr.msra.gmra.mrb[38].mxu1 %v34430_v27  ;;  %v30785_v27 = vpack.c.bf16 %v34604_v56, %v34602_v57  ;;  %v16090_v57 = vsel %vm2819_vm5, %v24924_v49, 0  ;;  %v16093_v56 = vsel %vm2819_vm5, %v24925_v36, 0 }
0x1064   :  { %30780 = vmatpush3.bf16.xpose.msra.mxu0 %v30779_v21  ;;  %30813 = vmatpush3.bf16.xpose.msra.mxu1 %v30812_v9  ;;  %v16117_v15 = vand.u32 4294901760, %v16093_v56  ;;  %v16126_v9 = vand.u32 4294901760, %v16102_v60 }
0x1065   :  { %30781 = vmatprep.subr.bf16.mxu0 %v36261_v12  ;;  %30814 = vmatprep.subr.bf16.mxu1 %v36261_v12 }
0x1066   :  { %28502 = vmatprep.mubr.msk.f32.mxu1 %vm32104_vm6, %v36260_v14 }
0x106b   :  { %28437 = vmatmul.mubr.f32.vlgmr.msra.gmra.mrb[34].mxu0 %v34420_v35 }
0x106c   :  { %30783 = vmatpush3.bf16.xpose.msra.mxu0 %v30782_v43  ;;  %30816 = vmatpush3.bf16.xpose.msra.mxu1 %v30815_v62  ;;  %v16108_v62 = vsel %vm2819_vm5, %v24930_v39, 0 }
0x106d   :  { %30784 = vmatprep.subr.bf16.mxu0 %v36261_v12  ;;  %30817 = vmatprep.subr.bf16.mxu1 %v36261_v12 }
0x106e   :  { %28447 = vmatprep.mubr.msk.f32.mxu0 %vm32104_vm6, %v36260_v14 }
0x1073   :  { %28503 = vmatmul.mubr.f32.vlgmr.msra.gmra.mrb[38].mxu1 %v34420_v35 }
0x1074   :  { %30786 = vmatpush3.bf16.xpose.msra.mxu0 %v30785_v27  ;;  %30819 = vmatpush3.bf16.xpose.msra.mxu1 %v30818_v41  ;;  %v16111_v27 = vsel %vm2819_vm5, %v24931_v16, 0  ;;  %v16087_v41 = vsel %vm2819_vm5, %v34519_v19, 0 }
0x1075   :  { %30787 = vmatprep.subr.bf16.mxu0 %v36261_v12  ;;  %30820 = vmatprep.subr.bf16.mxu1 %v36261_v12  ;;  %v34796_v49 = vand.u32 4294901760, %v16087_v41 }
0x1076   :  { %28513 = vmatprep.mubr.msk.f32.mxu1 %vm32104_vm6, %v36260_v14 }
0x107b   :  { %28448 = vmatmul.mubr.f32.vlgmr.msra.gmra.mrb[34].mxu0 %v34423_v17 }
0x107c   :  { %30789 = vmatpush3.bf16.xpose.msra.mxu0 %v34569_v59  ;;  %30822 = vmatpush3.bf16.xpose.msra.mxu1 %v30821_v61  ;;  %v16132_v61 = vand.u32 4294901760, %v16108_v62 }
0x107d   :  { %30790 = vmatprep.subr.bf16.mxu0 %v36261_v12  ;;  %30823 = vmatprep.subr.bf16.mxu1 %v36261_v12 }
0x107e   :  { %28458 = vmatprep.mubr.msk.f32.mxu0 %vm32104_vm6, %v36260_v14 }
0x1083   :  { %28514 = vmatmul.mubr.f32.vlgmr.msra.gmra.mrb[38].mxu1 %v34423_v17  ;;  %v30797_v17 = vpack.c.bf16 %v15201_v55, %v15194_v6  ;;  %v24926_v55 = vld [vmem:[%s36176_s9 + $0x90] sm:$0xff] }
0x1084   :  { %30792 = vmatpush3.bf16.xpose.msra.mxu0 %v34600_v7  ;;  %30825 = vmatpush3.bf16.xpose.msra.mxu1 %v34606_v20  ;;  %v16096_v52 = vsel %vm2819_vm5, %v24926_v55, 0 }
0x1085   :  { %30793 = vmatprep.subr.bf16.mxu0 %v36261_v12  ;;  %30826 = vmatprep.subr.bf16.mxu1 %v36261_v12  ;;  %v16120_v48 = vand.u32 4294901760, %v16096_v52 }
0x1086   :  { %28524 = vmatprep.mubr.msk.f32.mxu1 %vm32104_vm6, %v36260_v14 }
0x1087   :  { %v34798_v36 = vsub.f32 %v16096_v52, %v16120_v48 }
0x108b   :  { %28459 = vmatmul.mubr.f32.vlgmr.msra.gmra.mrb[34].mxu0 %v34426_v38 }
0x108c   :  { %30795 = vmatpush3.bf16.xpose.msra.mxu0 %v30794_v5  ;;  %30828 = vmatpush3.bf16.xpose.msra.mxu1 %v34624_v32  ;;  %v16135_v5 = vand.u32 4294901760, %v16111_v27 }
0x108d   :  { %30796 = vmatprep.subr.bf16.mxu0 %v36261_v12  ;;  %30829 = vmatprep.subr.bf16.mxu1 %v36261_v12 }
0x108e   :  { %28469 = vmatprep.mubr.msk.f32.mxu0 %vm32104_vm6, %v36260_v14 }
0x1093   :  { %28525 = vmatmul.mubr.f32.vlgmr.msra.gmra.mrb[38].mxu1 %v34426_v38  ;;  %v16084_v38 = vsel %vm2819_vm5, %v34523_v40, 0  ;;  %v16114_v40 = vand.u32 4294901760, %v16090_v57 }
0x1094   :  { %30798 = vmatpush3.bf16.xpose.msra.mxu0 %v30797_v17  ;;  %30831 = vmatpush3.bf16.xpose.msra.mxu1 %v30830_v28  ;;  %v34729_v54 = vand.u32 4294901760, %v16084_v38 }
0x1095   :  { %30799 = vmatprep.subr.bf16.mxu0 %v36261_v12  ;;  %30832 = vmatprep.subr.bf16.mxu1 %v36261_v12  ;;  %v34746_v26 = vpack.c.bf16 %v16117_v15, %v16114_v40  ;;  %v34783_v43 = vsub.f32 %v16090_v57, %v16114_v40  ;;  %v34811_v57 = vsub.f32 %v16087_v41, %v34796_v49 }
0x1096   :  { %28535 = vmatprep.mubr.msk.f32.mxu1 %vm32104_vm6, %v36260_v14  ;;  %v34738_v6 = vsub.f32 %v16084_v38, %v34729_v54 }
0x1097   :  { %v16209_v17 = vand.u32 4294901760, %v34783_v43 }
0x1098   :  { %v16188_v22 = vand.u32 4294901760, %v34738_v6 }
0x1099   :  { %v16210_v19 = vsub.f32 %v34783_v43, %v16209_v17 }
0x109a   :  { %v16189_v8 = vsub.f32 %v34738_v6, %v16188_v22 }
0x109b   :  { %28470 = vmatmul.mubr.f32.vlgmr.msra.gmra.mrb[34].mxu0 %v34420_v35 }
0x109c   :  { %30801 = vmatpush3.bf16.xpose.msra.mxu0 %v34569_v59  ;;  %30834 = vmatpush3.bf16.xpose.msra.mxu1 %v30833_v47  ;;  %v24927_v59 = vld [vmem:[%s36176_s9 + $0x98] sm:$0xff]  ;;  %v16190_v21 = vand.u32 4294901760, %v16189_v8 }
0x109d   :  { %30802 = vmatprep.subr.bf16.mxu0 %v36261_v12  ;;  %30835 = vmatprep.subr.bf16.mxu1 %v36261_v12  ;;  %v16099_v1 = vsel %vm2819_vm5, %v24927_v59, 0  ;;  %v16198_v59 = vand.u32 4294901760, %v34811_v57 }
0x109e   :  { %28480 = vmatprep.mubr.msk.f32.mxu0 %vm32104_vm6, %v36260_v14  ;;  %v16123_v50 = vand.u32 4294901760, %v16099_v1 }
0x109f   :  { %v16199_v34 = vsub.f32 %v34811_v57, %v16198_v59 }
0x10a0   :  { %v34800_v38 = vsub.f32 %v16099_v1, %v16123_v50 }
0x10a1   :  { %v16200_v41 = vand.u32 4294901760, %v16199_v34 }
0x10a2   :  { %v16230_v40 = vand.u32 4294901760, %v34800_v38 }
0x10a3   :  { %28536 = vmatmul.mubr.f32.vlgmr.msra.gmra.mrb[38].mxu1 %v34420_v35 }
0x10a4   :  { %30804 = vmatpush3.bf16.xpose.msra.mxu0 %v34600_v7  ;;  %30837 = vmatpush3.bf16.xpose.msra.mxu1 %v34606_v20  ;;  %v24929_v7 = vld [vmem:[%s36176_s9 + $0xa8] sm:$0xff]  ;;  %v34767_v20 = vpack.c.bf16 %v16123_v50, %v16120_v48  ;;  %v16231_v1 = vsub.f32 %v34800_v38, %v16230_v40  ;;  %v34824_v50 = vsub.f32 %v16102_v60, %v16126_v9 }
0x10a5   :  { %30838 = vmatprep.subr.bf16.mxu1 %v36261_v12  ;;  %30842 = vmatprep.subr.bf16.mxu0 %v34746_v26  ;;  %v16105_v11 = vsel %vm2819_vm5, %v24929_v7, 0 }
0x10a6   :  { %28546 = vmatprep.mubr.msk.f32.mxu1 %vm32104_vm6, %v36260_v14  ;;  %v16129_v24 = vand.u32 4294901760, %v16105_v11  ;;  %v16237_v39 = vand.u32 4294901760, %v34824_v50 }
0x10a8   :  { %v34781_v3 = vpack.c.bf16 %v16129_v24, %v16126_v9  ;;  %v34826_v8 = vsub.f32 %v16105_v11, %v16129_v24  ;;  %v16238_v60 = vsub.f32 %v34824_v50, %v16237_v39  ;;  %v34840_v9 = vsub.f32 %v16108_v62, %v16132_v61 }
0x10a9   :  { %v34842_v24 = vsub.f32 %v16111_v27, %v16135_v5 }
0x10aa   :  { %v16244_v16 = vand.u32 4294901760, %v34826_v8 }
0x10ab   :  { %28481 = vmatmul.mubr.f32.vlgmr.msra.gmra.mrb[34].mxu0 %v34420_v35 }
0x10ac   :  { %30840 = vmatpush3.bf16.xpose.msra.mxu1 %v34624_v32  ;;  %30844 = vmatpush3.bf16.xpose.msra.mxu0 %v34746_v26  ;;  %v34785_v32 = vsub.f32 %v16093_v56, %v16117_v15  ;;  %v16223_v56 = vand.u32 4294901760, %v34798_v36  ;;  %v16211_v15 = vand.u32 4294901760, %v16210_v19  ;;  %v16245_v11 = vsub.f32 %v34826_v8, %v16244_v16 }
0x10ad   :  { %28565 = vmatprep.mubr.f32.mxu0 %v16190_v21  ;;  %30846 = vmatprep.subr.bf16.mxu0 %v34767_v20  ;;  %v16232_v21 = vand.u32 4294901760, %v16231_v1 }
0x10ae   :  { %v16216_v28 = vand.u32 4294901760, %v34785_v32  ;;  %v16224_v52 = vsub.f32 %v34798_v36, %v16223_v56 }
0x10b0   :  { %v16217_v47 = vsub.f32 %v34785_v32, %v16216_v28  ;;  %v16225_v7 = vand.u32 4294901760, %v16224_v52  ;;  %v16258_v52 = vand.u32 4294901760, %v34842_v24 }
0x10b2   :  { %v16218_v55 = vand.u32 4294901760, %v16217_v47  ;;  %v30861_v19 = vpack.c.bf16 %v16232_v21, %v16225_v7  ;;  %v16239_v47 = vand.u32 4294901760, %v16238_v60  ;;  %v16259_v62 = vsub.f32 %v34842_v24, %v16258_v52 }
0x10b3   :  { %28547 = vmatmul.mubr.f32.vlgmr.msra.gmra.mrb[38].mxu1 %v34420_v35  ;;  %v34802_v35 = vpack.c.bf16 %v16135_v5, %v16132_v61  ;;  %v30877_v7 = vpack.c.bf16 %v34800_v38, %v34798_v36  ;;  %v30881_v21 = vpack.c.bf16 %v34826_v8, %v34824_v50  ;;  %v24973_v38 = vld [vmem:[%s36180_s10 + $0x38] sm:$0xff] }
0x10b4   :  { %30848 = vmatpush3.bf16.xpose.msra.mxu0 %v34767_v20  ;;  %v30857_v48 = vpack.c.bf16 %v16218_v55, %v16211_v15  ;;  %v16246_v15 = vand.u32 4294901760, %v16245_v11  ;;  %v16251_v55 = vand.u32 4294901760, %v34840_v9  ;;  %v16260_v61 = vand.u32 4294901760, %v16259_v62 }
0x10b5   :  { %30850 = vmatprep.subr.bf16.mxu0 %v34781_v3 }
0x10b6   :  { %v30865_v1 = vpack.c.bf16 %v16246_v15, %v16239_v47  ;;  %v16252_v34 = vsub.f32 %v34840_v9, %v16251_v55 }
0x10b8   :  { %v16253_v27 = vand.u32 4294901760, %v16252_v34 }
0x10ba   :  { %v30869_v5 = vpack.c.bf16 %v16260_v61, %v16253_v27 }
0x10bc   :  { %30852 = vmatpush3.bf16.xpose.msra.mxu0 %v34781_v3 }
0x10bd   :  { %30854 = vmatprep.subr.bf16.mxu0 %v34802_v35 }
0x10c4   :  { %30856 = vmatpush3.bf16.xpose.msra.mxu0 %v34802_v35 }
0x10c5   :  { %30858 = vmatprep.subr.bf16.mxu0 %v30857_v48 }
0x10cb   :  { %28566 = vmatmul.mubr.f32.vlgmr.msra.gmra.mrb[36].mxu0 %v16200_v41  ;;  %v30885_v41 = vpack.c.bf16 %v34842_v24, %v34840_v9 }
0x10cc   :  { %30860 = vmatpush3.bf16.xpose.msra.mxu0 %v30857_v48  ;;  %28584 = vmatprep.mubr.f32.mxu0 %v34729_v54  ;;  %v30873_v48 = vpack.c.bf16 %v34785_v32, %v34783_v43  ;;  %v30913_v43 = vpack.c.bf16 %v16244_v16, %v16237_v39  ;;  %v30917_v32 = vpack.c.bf16 %v16258_v52, %v16251_v55 }
0x10cd   :  { %30862 = vmatprep.subr.bf16.mxu0 %v30861_v19 }
0x10d4   :  { %30864 = vmatpush3.bf16.xpose.msra.mxu0 %v30861_v19 }
0x10d5   :  { %30866 = vmatprep.subr.bf16.mxu0 %v30865_v1 }
0x10dc   :  { %30868 = vmatpush3.bf16.xpose.msra.mxu0 %v30865_v1 }
0x10dd   :  { %30870 = vmatprep.subr.bf16.mxu0 %v30869_v5 }
0x10e4   :  { %30872 = vmatpush3.bf16.xpose.msra.mxu0 %v30869_v5 }
0x10e5   :  { %30874 = vmatprep.subr.bf16.mxu0 %v30873_v48 }
0x10eb   :  { %28585 = vmatmul.mubr.f32.vlgmr.msra.gmra.mrb[36].mxu0 %v34796_v49 }
0x10ec   :  { %30876 = vmatpush3.bf16.xpose.msra.mxu0 %v30873_v48  ;;  %28603 = vmatprep.mubr.f32.mxu0 %v34738_v6 }
0x10ed   :  { %30878 = vmatprep.subr.bf16.mxu0 %v30877_v7 }
0x10f4   :  { %30880 = vmatpush3.bf16.xpose.msra.mxu0 %v30877_v7 }
0x10f5   :  { %30882 = vmatprep.subr.bf16.mxu0 %v30881_v21 }
0x10fc   :  { %30884 = vmatpush3.bf16.xpose.msra.mxu0 %v30881_v21  ;;  %v30905_v21 = vpack.c.bf16 %v16216_v28, %v16209_v17  ;;  %v24970_v17 = vld [vmem:[%s36180_s10 + $0x20] sm:$0xff] }
0x10fd   :  { %30886 = vmatprep.subr.bf16.mxu0 %v30885_v41 }
0x1104   :  { %30888 = vmatpush3.bf16.xpose.msra.mxu0 %v30885_v41 }
0x1105   :  { %30890 = vmatprep.subr.bf16.mxu0 %v34746_v26 }
0x110b   :  { %28604 = vmatmul.mubr.f32.vlgmr.msra.gmra.mrb[36].mxu0 %v34811_v57 }
0x110c   :  { %30892 = vmatpush3.bf16.xpose.msra.mxu0 %v34746_v26  ;;  %28622 = vmatprep.mubr.f32.mxu0 %v16188_v22 }
0x110d   :  { %30894 = vmatprep.subr.bf16.mxu0 %v34767_v20 }
0x1111   :  { %v14700_v19 = vpop.f32.mrb[28].mxu0 }
0x1112   :  { %v28381_v60 = vpop.f32.mrb[29].mxu0 }
0x1114   :  { %30896 = vmatpush3.bf16.xpose.msra.mxu0 %v34767_v20 }
0x1115   :  { %v14857_v11 = vpop.f32.mrb[30].mxu0  ;;  %30898 = vmatprep.subr.bf16.mxu0 %v34781_v3 }
0x1116   :  { %v28395_v47 = vpop.f32.mrb[31].mxu0 }
0x1119   :  { %v14781_v15 = vpop.f32.mrb[32].mxu1  ;;  %v15009_v1 = vpop.f32.mrb[32].mxu0 }
0x111a   :  { %v14782_v34 = vadd.f32 %v14781_v15, %v14700_v19  ;;  %v28388_v62 = vpop.f32.mrb[33].mxu1  ;;  %v28409_v27 = vpop.f32.mrb[33].mxu0  ;;  %v30909_v19 = vpack.c.bf16 %v16230_v40, %v16223_v56  ;;  %v17372_v40 = vsel %vm2819_vm5, %v24973_v38, 0  ;;  %v24917_v38 = vld [vmem:[%s36172_s8 + $0x88] sm:$0xff] }
0x111c   :  { %v14858_v61 = vadd.f32 %v14857_v11, %v14782_v34  ;;  %30900 = vmatpush3.bf16.xpose.msra.mxu0 %v34781_v3 }
0x111d   :  { %v14932_v6 = vpop.f32.mrb[34].mxu1  ;;  %30902 = vmatprep.subr.bf16.mxu0 %v34802_v35 }
0x111e   :  { %v14933_v22 = vadd.f32 %v14932_v6, %v14858_v61  ;;  %v28402_v5 = vpop.f32.mrb[35].mxu1 }
0x1120   :  { %v15010_v48 = vadd.f32 %v15009_v1, %v14933_v22 }
0x1121   :  { %v15082_v7 = vpop.f32.mrb[36].mxu1 }
0x1122   :  { %v15083_v41 = vadd.f32 %v15082_v7, %v15010_v48  ;;  %v28416_v60 = vpop.f32.mrb[37].mxu1 }
0x1124   :  { %30904 = vmatpush3.bf16.xpose.msra.mxu0 %v34802_v35  ;;  %v17323_v11 = vadd.f32 %v15083_v41, %v34416_v42 }
0x1125   :  { %30906 = vmatprep.subr.bf16.mxu0 %v30905_v21 }
0x112b   :  { %28623 = vmatmul.mubr.f32.vlgmr.msra.gmra.mrb[36].mxu0 %v16198_v59  ;;  %v17384_v59 = vand.u32 4294901760, %v17372_v40 }
0x112c   :  { %30908 = vmatpush3.bf16.xpose.msra.mxu0 %v30905_v21  ;;  %28641 = vmatprep.mubr.f32.mxu0 %v34729_v54 }
0x112d   :  { %30910 = vmatprep.subr.bf16.mxu0 %v30909_v19  ;;  %v34947_v6 = vsub.f32 %v17372_v40, %v17384_v59  ;;  %v16713_v40 = vsel %vm671_vm2, %v24917_v38, 0 }
0x112f   :  { %v17477_v41 = vand.u32 4294901760, %v34947_v6 }
0x1134   :  { %30912 = vmatpush3.bf16.xpose.msra.mxu0 %v30909_v19 }
0x1135   :  { %30914 = vmatprep.subr.bf16.mxu0 %v30913_v43 }
0x113c   :  { %30916 = vmatpush3.bf16.xpose.msra.mxu0 %v30913_v43 }
0x113d   :  { %30918 = vmatprep.subr.bf16.mxu0 %v30917_v32 }
0x1144   :  { %30920 = vmatpush3.bf16.xpose.msra.mxu0 %v30917_v32 }
0x1145   :  { %30922 = vmatprep.subr.bf16.mxu0 %v34746_v26 }
0x114b   :  { %28642 = vmatmul.mubr.f32.vlgmr.msra.gmra.mrb[36].mxu0 %v34796_v49 }
0x114c   :  { %30924 = vmatpush3.bf16.xpose.msra.mxu0 %v34746_v26  ;;  %28660 = vmatprep.mubr.f32.mxu0 %v34729_v54  ;;  %v24971_v26 = vld [vmem:[%s36180_s10 + $0x28] sm:$0xff]  ;;  %v17363_v54 = vsel %vm2819_vm5, %v24970_v17, 0  ;;  %v17478_v17 = vsub.f32 %v34947_v6, %v17477_v41 }
0x114d   :  { %30926 = vmatprep.subr.bf16.mxu0 %v34767_v20  ;;  %v17366_v28 = vsel %vm2819_vm5, %v24971_v26, 0 }
0x114e   :  { %v17378_v36 = vand.u32 4294901760, %v17366_v28 }
0x1150   :  { %v34935_v52 = vsub.f32 %v17366_v28, %v17378_v36  ;;  %v17479_v28 = vand.u32 4294901760, %v17478_v17  ;;  %v24923_v17 = vld [vmem:[%s36172_s8 + $0xb8] sm:$0xff] }
0x1152   :  { %v17463_v34 = vand.u32 4294901760, %v34935_v52 }
0x1154   :  { %30928 = vmatpush3.bf16.xpose.msra.mxu0 %v34767_v20  ;;  %v17375_v20 = vand.u32 4294901760, %v17363_v54  ;;  %v17464_v22 = vsub.f32 %v34935_v52, %v17463_v34 }
0x1155   :  { %30930 = vmatprep.subr.bf16.mxu0 %v34781_v3 }
0x1156   :  { %v34918_v57 = vpack.c.bf16 %v17378_v36, %v17375_v20  ;;  %v34933_v55 = vsub.f32 %v17363_v54, %v17375_v20  ;;  %v17465_v7 = vand.u32 4294901760, %v17464_v22 }
0x1158   :  { %v17456_v1 = vand.u32 4294901760, %v34933_v55  ;;  %v31046_v36 = vpack.c.bf16 %v34935_v52, %v34933_v55 }
0x115a   :  { %v17457_v42 = vsub.f32 %v34933_v55, %v17456_v1 }
0x115c   :  { %30932 = vmatpush3.bf16.xpose.msra.mxu0 %v34781_v3  ;;  %v24972_v3 = vld [vmem:[%s36180_s10 + $0x30] sm:$0xff] }
0x115d   :  { %30934 = vmatprep.subr.bf16.mxu0 %v34802_v35  ;;  %v17369_v56 = vsel %vm2819_vm5, %v24972_v3, 0  ;;  %v24916_v3 = vld [vmem:[%s36172_s8 + $0x80] sm:$0xff] }
0x1164   :  { %30936 = vmatpush3.bf16.xpose.msra.mxu0 %v34802_v35  ;;  %v17381_v35 = vand.u32 4294901760, %v17369_v56 }
0x1165   :  { %31033 = vmatprep.subr.bf16.mxu0 %v36261_v12 }
0x1166   :  { %v34927_v50 = vpack.c.bf16 %v17384_v59, %v17381_v35  ;;  %v34944_v27 = vsub.f32 %v17369_v56, %v17381_v35  ;;  %v16710_v56 = vsel %vm671_vm2, %v24916_v3, 0  ;;  %v16737_v59 = vand.u32 4294901760, %v16713_v40 }
0x1167   :  { %v16734_v35 = vand.u32 4294901760, %v16710_v56 }
0x1168   :  { %v17470_v21 = vand.u32 4294901760, %v34944_v27 }
0x1169   :  { %v35042_v38 = vsub.f32 %v16710_v56, %v16734_v35 }
0x116a   :  { %v17471_v32 = vsub.f32 %v34944_v27, %v17470_v21 }
0x116b   :  { %28661 = vmatmul.mubr.f32.vlgmr.msra.gmra.mrb[36].mxu0 %v34796_v49 }
0x116c   :  { %31035 = vmatpush3.bf16.xpose.msra.mxu0 %v34918_v57  ;;  %28785 = vmatprep.mubr.msk.f32.mxu0 %vm32104_vm6, %v36260_v14  ;;  %v17472_v54 = vand.u32 4294901760, %v17471_v32  ;;  %v24922_v32 = vld [vmem:[%s36172_s8 + $0xb0] sm:$0xff] }
0x116d   :  { %31036 = vmatprep.subr.bf16.mxu0 %v36261_v12 }
0x116e   :  { %v31043_v20 = vpack.c.bf16 %v17479_v28, %v17472_v54  ;;  %v16728_v54 = vsel %vm671_vm2, %v24922_v32, 0  ;;  %v16731_v28 = vsel %vm671_vm2, %v24923_v17, 0 }
0x1174   :  { %31038 = vmatpush3.bf16.xpose.msra.mxu0 %v34927_v50 }
0x1175   :  { %31039 = vmatprep.subr.bf16.mxu0 %v36261_v12 }
0x117e   :  { %v15579_v8 = vpop.f32.mrb[34].mxu0 }
0x117f   :  { %v28482_v39 = vpop.f32.mrb[35].mxu0  ;;  %v15583_v49 = vmul.f32 %v15579_v8, %v32438_v25  ;;  %v34994_v8 = vpack.c.bf16 %v16737_v59, %v16734_v35 }
0x1180   :  { %v31049_v39 = vpack.c.bf16 %v34947_v6, %v34944_v27 }
0x1181   :  { %30938 = vmatprep.subr.bf16.mxu1 %v34994_v8 }
0x1182   :  { %30940 = vmatpush3.bf16.xpose.msra.mxu1 %v34994_v8 }
0x1186   :  { %v16077_v16 = vpop.f32.mrb[38].mxu1 }
0x1187   :  { %v16081_v9 = vmul.f32 %v16077_v16, %v32456_v37  ;;  %v28548_v24 = vpop.f32.mrb[39].mxu1  ;;  %v24918_v16 = vld [vmem:[%s36172_s8 + $0x90] sm:$0xff] }
0x1189   :  { %v16082_v47 = vadd.f32 %v16081_v9, %v15583_v49  ;;  %v24919_v49 = vld [vmem:[%s36172_s8 + $0x98] sm:$0xff]  ;;  %v16716_v9 = vsel %vm671_vm2, %v24918_v16, 0  ;;  %v31058_v16 = vpack.c.bf16 %v17463_v34, %v17456_v1 }
0x118a   :  { %v16719_v24 = vsel %vm671_vm2, %v24919_v49, 0  ;;  %v36237_v49 = vand.u32 4294901760, %v35042_v38 }
0x118b   :  { %v34938_v15 = vadd.f32 %v17323_v11, %v16082_v47  ;;  %v16740_v11 = vand.u32 4294901760, %v16716_v9  ;;  %v16743_v47 = vand.u32 4294901760, %v16719_v24 }
0x118c   :  { %v16830_v56 = vsub.f32 %v35042_v38, %v36237_v49 }
0x118d   :  { %36302 = vst [vmem:[#allocation8_spill] sm:$0xff] %v34938_v15  ;;  %v17358_v62 = vmul.f32 %v33805_v10, %v34938_v15  ;;  %v17458_v10 = vand.u32 4294901760, %v17457_v42  ;;  %v24921_v42 = vld [vmem:[%s36172_s8 + $0xa8] sm:$0xff]  ;;  %v35066_v34 = vsub.f32 %v16716_v9, %v16740_v11  ;;  %v35068_v35 = vsub.f32 %v16719_v24, %v16743_v47 }
0x118e   :  { %v16831_v55 = vand.u32 4294901760, %v16830_v56 }
0x118f   :  { %v17360_v61 = vsel %vm2819_vm5, %v17358_v62, 0  ;;  %v31040_v43 = vpack.c.bf16 %v17465_v7, %v17458_v10  ;;  %v35009_v62 = vpack.c.bf16 %v16743_v47, %v16740_v11  ;;  %v16725_v10 = vsel %vm671_vm2, %v24921_v42, 0 }
0x1190   :  { %v34955_v5 = vand.u32 4294901760, %v17360_v61  ;;  %v36235_v42 = vand.u32 4294901760, %v35066_v34  ;;  %v36234_v32 = vand.u32 4294901760, %v35068_v35 }
0x1191   :  { %30942 = vmatprep.subr.bf16.mxu1 %v35009_v62 }
0x1192   :  { %v34958_v48 = vsub.f32 %v17360_v61, %v34955_v5  ;;  %30944 = vmatpush3.bf16.xpose.msra.mxu1 %v35009_v62  ;;  %v24920_v61 = vld [vmem:[%s36172_s8 + $0xa0] sm:$0xff]  ;;  %v16844_v17 = vsub.f32 %v35066_v34, %v36235_v42  ;;  %v16851_v9 = vsub.f32 %v35068_v35, %v36234_v32 }
0x1193   :  { %v16722_v22 = vsel %vm671_vm2, %v24920_v61, 0 }
0x1194   :  { %v34963_v60 = vand.u32 4294901760, %v34958_v48  ;;  %v16746_v7 = vand.u32 4294901760, %v16722_v22  ;;  %v16845_v24 = vand.u32 4294901760, %v16844_v17  ;;  %v16852_v27 = vand.u32 4294901760, %v16851_v9 }
0x1196   :  { %v17446_v19 = vsub.f32 %v34958_v48, %v34963_v60  ;;  %v35084_v6 = vpack.c.bf16 %v16852_v27, %v16845_v24 }
0x1198   :  { %v34973_v26 = vand.u32 4294901760, %v17446_v19  ;;  %v16749_v19 = vand.u32 4294901760, %v16725_v10 }
0x119a   :  { %28786 = vmatmul.mubr.f32.vlgmr.msra.gmra.mrb[38].mxu0 %v34973_v26 }
0x119b   :  { %31041 = vmatpush3.bf16.xpose.msra.mxu0 %v31040_v43  ;;  %28796 = vmatprep.mubr.msk.f32.mxu0 %vm32104_vm6, %v36260_v14  ;;  %v35026_v43 = vpack.c.bf16 %v16749_v19, %v16746_v7 }
0x119c   :  { %31042 = vmatprep.subr.bf16.mxu0 %v36261_v12 }
0x119d   :  { %30946 = vmatprep.subr.bf16.mxu1 %v35026_v43 }
0x119e   :  { %30948 = vmatpush3.bf16.xpose.msra.mxu1 %v35026_v43 }
0x11a3   :  { %31044 = vmatpush3.bf16.xpose.msra.mxu0 %v31043_v20  ;;  %v16752_v20 = vand.u32 4294901760, %v16728_v54 }
0x11a4   :  { %31045 = vmatprep.subr.bf16.mxu0 %v36261_v12 }
0x11aa   :  { %28797 = vmatmul.mubr.f32.vlgmr.msra.gmra.mrb[38].mxu0 %v34955_v5 }
0x11ab   :  { %31047 = vmatpush3.bf16.xpose.msra.mxu0 %v31046_v36  ;;  %28807 = vmatprep.mubr.msk.f32.mxu0 %vm32104_vm6, %v36260_v14  ;;  %v16755_v36 = vand.u32 4294901760, %v16731_v28 }
0x11ac   :  { %31048 = vmatprep.subr.bf16.mxu0 %v36261_v12 }
0x11ad   :  { %v35040_v3 = vpack.c.bf16 %v16755_v36, %v16752_v20 }
0x11af   :  { %30950 = vmatprep.subr.bf16.mxu1 %v35040_v3 }
0x11b0   :  { %30952 = vmatpush3.bf16.xpose.msra.mxu1 %v35040_v3 }
0x11b3   :  { %31050 = vmatpush3.bf16.xpose.msra.mxu0 %v31049_v39  ;;  %v35044_v39 = vsub.f32 %v16713_v40, %v16737_v59  ;;  %v31061_v59 = vpack.c.bf16 %v17477_v41, %v17470_v21  ;;  %v35086_v21 = vsub.f32 %v16722_v22, %v16746_v7  ;;  %v35088_v41 = vsub.f32 %v16725_v10, %v16749_v19  ;;  %v24978_v7 = vld [vmem:[%s36178_s11 + $0x60] sm:$0xff]  ;;  %v24979_v19 = vld [vmem:[%s36178_s11 + $0x68] sm:$0xff] }
0x11b4   :  { %31051 = vmatprep.subr.bf16.mxu0 %v36261_v12 }
0x11b5   :  { %v36236_v61 = vand.u32 4294901760, %v35044_v39  ;;  %v36233_v11 = vand.u32 4294901760, %v35086_v21  ;;  %v36232_v47 = vand.u32 4294901760, %v35088_v41 }
0x11b7   :  { %v16837_v40 = vsub.f32 %v35044_v39, %v36236_v61  ;;  %v16865_v56 = vsub.f32 %v35088_v41, %v36232_v47 }
0x11b9   :  { %v16838_v52 = vand.u32 4294901760, %v16837_v40  ;;  %v16866_v10 = vand.u32 4294901760, %v16865_v56  ;;  %v24981_v56 = vld [vmem:[%s36178_s11 + $0x78] sm:$0xff] }
0x11ba   :  { %28808 = vmatmul.mubr.f32.vlgmr.msra.gmra.mrb[38].mxu0 %v34958_v48 }
0x11bb   :  { %31053 = vmatpush3.bf16.xpose.msra.mxu0 %v34918_v57  ;;  %28818 = vmatprep.mubr.msk.f32.mxu0 %vm32104_vm6, %v36260_v14  ;;  %v35064_v1 = vpack.c.bf16 %v16838_v52, %v16831_v55  ;;  %v35111_v55 = vsub.f32 %v16728_v54, %v16752_v20  ;;  %v19312_v52 = vsel %vm2819_vm5, %v24978_v7, 0 }
0x11bc   :  { %31054 = vmatprep.subr.bf16.mxu0 %v36261_v12  ;;  %v19324_v54 = vand.u32 4294901760, %v19312_v52 }
0x11bd   :  { %30954 = vmatprep.subr.bf16.mxu1 %v35064_v1  ;;  %v36231_v17 = vand.u32 4294901760, %v35111_v55 }
0x11be   :  { %v19404_v7 = vsub.f32 %v19312_v52, %v19324_v54  ;;  %v35143_v52 = vpack.c.bf16 %v35044_v39, %v35042_v38 }
0x11bf   :  { %v16872_v24 = vsub.f32 %v35111_v55, %v36231_v17 }
0x11c0   :  { %v19405_v17 = vand.u32 4294901760, %v19404_v7 }
0x11c3   :  { %31056 = vmatpush3.bf16.xpose.msra.mxu0 %v34927_v50 }
0x11c4   :  { %31057 = vmatprep.subr.bf16.mxu0 %v36261_v12 }
0x11ca   :  { %28819 = vmatmul.mubr.f32.vlgmr.msra.gmra.mrb[38].mxu0 %v34963_v60 }
0x11cb   :  { %31059 = vmatpush3.bf16.xpose.msra.mxu0 %v31058_v16  ;;  %28829 = vmatprep.mubr.msk.f32.mxu0 %vm32104_vm6, %v36260_v14  ;;  %v16858_v16 = vsub.f32 %v35086_v21, %v36233_v11 }
0x11cc   :  { %31060 = vmatprep.subr.bf16.mxu0 %v36261_v12 }
0x11cd   :  { %v16859_v22 = vand.u32 4294901760, %v16858_v16  ;;  %v24980_v16 = vld [vmem:[%s36178_s11 + $0x70] sm:$0xff] }
0x11cf   :  { %v35109_v40 = vpack.c.bf16 %v16866_v10, %v16859_v22 }
0x11d3   :  { %31062 = vmatpush3.bf16.xpose.msra.mxu0 %v31061_v59  ;;  %v19315_v59 = vsel %vm2819_vm5, %v24979_v19, 0 }
0x11d4   :  { %31063 = vmatprep.subr.bf16.mxu0 %v36261_v12  ;;  %v19327_v20 = vand.u32 4294901760, %v19315_v59 }
0x11d6   :  { %v31124_v10 = vpack.c.bf16 %v19327_v20, %v19324_v54  ;;  %v19411_v19 = vsub.f32 %v19315_v59, %v19327_v20 }
0x11d8   :  { %v19412_v47 = vand.u32 4294901760, %v19411_v19 }
0x11da   :  { %28830 = vmatmul.mubr.f32.vlgmr.msra.gmra.mrb[38].mxu0 %v34955_v5 }
0x11db   :  { %31065 = vmatpush3.bf16.xpose.msra.mxu0 %v34918_v57  ;;  %28840 = vmatprep.mubr.msk.f32.mxu0 %vm32104_vm6, %v36260_v14  ;;  %v35113_v57 = vsub.f32 %v16731_v28, %v16755_v36  ;;  %v16873_v28 = vand.u32 4294901760, %v16872_v24 }
0x11dc   :  { %31066 = vmatprep.subr.bf16.mxu0 %v36261_v12 }
0x11dd   :  { %v36230_v9 = vand.u32 4294901760, %v35113_v57 }
0x11df   :  { %v16879_v27 = vsub.f32 %v35113_v57, %v36230_v9  ;;  %v19318_v9 = vsel %vm2819_vm5, %v24980_v16, 0  ;;  %v35147_v16 = vpack.c.bf16 %v35068_v35, %v35066_v34 }
0x11e0   :  { %v19330_v24 = vand.u32 4294901760, %v19318_v9 }
0x11e1   :  { %v16880_v36 = vand.u32 4294901760, %v16879_v27 }
0x11e2   :  { %v19418_v54 = vsub.f32 %v19318_v9, %v19330_v24  ;;  %v35152_v9 = vpack.c.bf16 %v35088_v41, %v35086_v21 }
0x11e3   :  { %31068 = vmatpush3.bf16.xpose.msra.mxu0 %v34927_v50  ;;  %v35133_v22 = vpack.c.bf16 %v16880_v36, %v16873_v28  ;;  %v19321_v50 = vsel %vm2819_vm5, %v24981_v56, 0  ;;  %v19406_v28 = vsub.f32 %v19404_v7, %v19405_v17  ;;  %v19413_v36 = vsub.f32 %v19411_v19, %v19412_v47 }
0x11e4   :  { %31123 = vmatprep.subr.bf16.mxu0 %v36261_v12  ;;  %v19333_v27 = vand.u32 4294901760, %v19321_v50  ;;  %v19419_v32 = vand.u32 4294901760, %v19418_v54 }
0x11e5   :  { %v19407_v56 = vand.u32 4294901760, %v19406_v28  ;;  %v19414_v11 = vand.u32 4294901760, %v19413_v36  ;;  %v31136_v28 = vpack.c.bf16 %v19411_v19, %v19404_v7 }
0x11e6   :  { %v31127_v59 = vpack.c.bf16 %v19333_v27, %v19330_v24  ;;  %v19425_v20 = vsub.f32 %v19321_v50, %v19333_v27  ;;  %v19420_v49 = vsub.f32 %v19418_v54, %v19419_v32 }
0x11e7   :  { %v31130_v61 = vpack.c.bf16 %v19414_v11, %v19407_v56  ;;  %v35160_v11 = vpack.c.bf16 %v35113_v57, %v35111_v55 }
0x11e8   :  { %v19426_v42 = vand.u32 4294901760, %v19425_v20  ;;  %v19421_v50 = vand.u32 4294901760, %v19420_v49  ;;  %v31148_v49 = vpack.c.bf16 %v19412_v47, %v19405_v17 }
0x11ea   :  { %28841 = vmatmul.mubr.f32.vlgmr.msra.gmra.mrb[38].mxu0 %v34955_v5  ;;  %v19427_v15 = vsub.f32 %v19425_v20, %v19426_v42 }
0x11eb   :  { %31125 = vmatpush3.bf16.xpose.msra.mxu0 %v31124_v10  ;;  %28989 = vmatprep.mubr.msk.f32.mxu0 %vm32104_vm6, %v36260_v14 }
0x11ec   :  { %31126 = vmatprep.subr.bf16.mxu0 %v36261_v12  ;;  %v19428_v24 = vand.u32 4294901760, %v19427_v15  ;;  %v31139_v15 = vpack.c.bf16 %v19425_v20, %v19418_v54 }
0x11ee   :  { %v31133_v27 = vpack.c.bf16 %v19428_v24, %v19421_v50 }
0x11f3   :  { %31128 = vmatpush3.bf16.xpose.msra.mxu0 %v31127_v59 }
0x11f4   :  { %31129 = vmatprep.subr.bf16.mxu0 %v36261_v12 }
0x11fa   :  { %28990 = vmatmul.mubr.f32.vlgmr.msra.gmra.mrb[40].mxu0 %v34973_v26 }
0x11fb   :  { %31131 = vmatpush3.bf16.xpose.msra.mxu0 %v31130_v61  ;;  %29000 = vmatprep.mubr.msk.f32.mxu0 %vm32104_vm6, %v36260_v14  ;;  %v31151_v61 = vpack.c.bf16 %v19426_v42, %v19419_v32 }
0x11fc   :  { %31132 = vmatprep.subr.bf16.mxu0 %v36261_v12 }
0x1203   :  { %31134 = vmatpush3.bf16.xpose.msra.mxu0 %v31133_v27 }
0x1204   :  { %31135 = vmatprep.subr.bf16.mxu0 %v36261_v12 }
0x120a   :  { %29001 = vmatmul.mubr.f32.vlgmr.msra.gmra.mrb[40].mxu0 %v34955_v5 }
0x120b   :  { %31137 = vmatpush3.bf16.xpose.msra.mxu0 %v31136_v28  ;;  %29011 = vmatprep.mubr.msk.f32.mxu0 %vm32104_vm6, %v36260_v14 }
0x120c   :  { %31138 = vmatprep.subr.bf16.mxu0 %v36261_v12 }
0x1213   :  { %31140 = vmatpush3.bf16.xpose.msra.mxu0 %v31139_v15 }
0x1214   :  { %31141 = vmatprep.subr.bf16.mxu0 %v36261_v12 }
0x121a   :  { %29012 = vmatmul.mubr.f32.vlgmr.msra.gmra.mrb[40].mxu0 %v34958_v48 }
0x121b   :  { %31143 = vmatpush3.bf16.xpose.msra.mxu0 %v31124_v10  ;;  %29022 = vmatprep.mubr.msk.f32.mxu0 %vm32104_vm6, %v36260_v14 }
0x121c   :  { %31144 = vmatprep.subr.bf16.mxu0 %v36261_v12 }
0x1223   :  { %31146 = vmatpush3.bf16.xpose.msra.mxu0 %v31127_v59 }
0x1224   :  { %31147 = vmatprep.subr.bf16.mxu0 %v36261_v12 }
0x122a   :  { %29023 = vmatmul.mubr.f32.vlgmr.msra.gmra.mrb[40].mxu0 %v34963_v60 }
0x122b   :  { %31149 = vmatpush3.bf16.xpose.msra.mxu0 %v31148_v49  ;;  %29033 = vmatprep.mubr.msk.f32.mxu0 %vm32104_vm6, %v36260_v14 }
0x122c   :  { %31150 = vmatprep.subr.bf16.mxu0 %v36261_v12 }
0x1233   :  { %31152 = vmatpush3.bf16.xpose.msra.mxu0 %v31151_v61 }
0x1234   :  { %31153 = vmatprep.subr.bf16.mxu0 %v36261_v12 }
0x123a   :  { %29034 = vmatmul.mubr.f32.vlgmr.msra.gmra.mrb[40].mxu0 %v34955_v5 }
0x123b   :  { %31155 = vmatpush3.bf16.xpose.msra.mxu0 %v31124_v10  ;;  %29044 = vmatprep.mubr.msk.f32.mxu0 %vm32104_vm6, %v36260_v14 }
0x123c   :  { %31156 = vmatprep.subr.bf16.mxu0 %v36261_v12 }
0x123e   :  { %v28662_v47 = vpop.f32.mrb[36].mxu0 }
0x123f   :  { %v16702_v17 = vmul.f32 %v28662_v47, %v34074_v46  ;;  %v16683_v7 = vpop.f32.mrb[37].mxu0 }
0x1240   :  { %v16701_v19 = vmul.f32 %v34076_v0, %v16683_v7  ;;  %v36303_v0 = vand.u32 4294901760, %v35042_v38 }
0x1241   :  { %v16707_v54 = vsel %vm671_vm2, %v16702_v17, 0 }
0x1242   :  { %v35185_v42 = vand.u32 4294901760, %v16707_v54  ;;  %v16704_v32 = vsel %vm671_vm2, %v16701_v19, 0 }
0x1243   :  { %v16806_v20 = vand.u32 4294901760, %v16704_v32  ;;  %31158 = vmatpush3.bf16.xpose.msra.mxu0 %v31127_v59  ;;  %v36307_v59 = vand.u32 4294901760, %v35086_v21 }
0x1244   :  { %v16817_v10 = vsub.f32 %v16707_v54, %v35185_v42 }
0x1245   :  { %v16807_v36 = vsub.f32 %v16704_v32, %v16806_v20 }
0x1246   :  { %v16818_v56 = vand.u32 4294901760, %v16817_v10 }
0x1247   :  { %v16808_v50 = vand.u32 4294901760, %v16807_v36 }
0x1248   :  { %v16819_v24 = vsub.f32 %v16817_v10, %v16818_v56 }
0x1249   :  { %v16809_v27 = vsub.f32 %v16807_v36, %v16808_v50 }
0x124a   :  { %29045 = vmatmul.mubr.f32.vlgmr.msra.gmra.mrb[40].mxu0 %v34955_v5  ;;  %v16820_v28 = vand.u32 4294901760, %v16819_v24 }
0x124b   :  { %v16810_v46 = vand.u32 4294901760, %v16809_v27 }
0x124d   :  { %28679 = vmatprep.mubr.f32.mxu1 %v16810_v46 }
0x124e   :  { %28680 = vmatmul.mubr.f32.vlgmr.msra.gmra.mrb[40].mxu1 %v16820_v28 }
0x124f   :  { %30956 = vmatpush3.bf16.xpose.msra.mxu1 %v35064_v1  ;;  %28698 = vmatprep.mubr.f32.mxu1 %v16806_v20  ;;  %v36304_v1 = vand.u32 4294901760, %v35044_v39  ;;  %v36309_v39 = vand.u32 4294901760, %v35111_v55 }
0x1250   :  { %30958 = vmatprep.subr.bf16.mxu1 %v35084_v6 }
0x1257   :  { %30960 = vmatpush3.bf16.xpose.msra.mxu1 %v35084_v6  ;;  %v31001_v6 = vpack.c.bf16 %v36304_v1, %v36303_v0 }
0x1258   :  { %30962 = vmatprep.subr.bf16.mxu1 %v35109_v40 }
0x125f   :  { %30964 = vmatpush3.bf16.xpose.msra.mxu1 %v35109_v40  ;;  %v36305_v40 = vand.u32 4294901760, %v35066_v34 }
0x1260   :  { %30966 = vmatprep.subr.bf16.mxu1 %v35133_v22 }
0x1267   :  { %30968 = vmatpush3.bf16.xpose.msra.mxu1 %v35133_v22  ;;  %v36306_v22 = vand.u32 4294901760, %v35068_v35 }
0x1268   :  { %30970 = vmatprep.subr.bf16.mxu1 %v35143_v52 }
0x126e   :  { %28699 = vmatmul.mubr.f32.vlgmr.msra.gmra.mrb[40].mxu1 %v35185_v42 }
0x126f   :  { %30972 = vmatpush3.bf16.xpose.msra.mxu1 %v35143_v52  ;;  %28717 = vmatprep.mubr.f32.mxu1 %v16807_v36  ;;  %v31005_v52 = vpack.c.bf16 %v36306_v22, %v36305_v40  ;;  %v36313_v36 = vld [vmem:[#allocation25_spill] sm:$0xff] }
0x1270   :  { %30974 = vmatprep.subr.bf16.mxu1 %v35147_v16 }
0x1277   :  { %30976 = vmatpush3.bf16.xpose.msra.mxu1 %v35147_v16  ;;  %v36308_v16 = vand.u32 4294901760, %v35088_v41 }
0x1278   :  { %30978 = vmatprep.subr.bf16.mxu1 %v35152_v9 }
0x1279   :  { %v31009_v38 = vpack.c.bf16 %v36308_v16, %v36307_v59  ;;  %v24975_v59 = vld [vmem:[%s36178_s11 + $0x48] sm:$0xff] }
0x127a   :  { %v18817_v16 = vsel %vm2819_vm5, %v24975_v59, 0 }
0x127f   :  { %30980 = vmatpush3.bf16.xpose.msra.mxu1 %v35152_v9  ;;  %v36310_v9 = vand.u32 4294901760, %v35113_v57 }
0x1280   :  { %30982 = vmatprep.subr.bf16.mxu1 %v35160_v11 }
0x1287   :  { %30984 = vmatpush3.bf16.xpose.msra.mxu1 %v35160_v11  ;;  %v31013_v11 = vpack.c.bf16 %v36310_v9, %v36309_v39  ;;  %v18829_v39 = vand.u32 4294901760, %v18817_v16  ;;  %v24977_v9 = vld [vmem:[%s36178_s11 + $0x58] sm:$0xff] }
0x1288   :  { %30986 = vmatprep.subr.bf16.mxu1 %v34994_v8 }
0x128e   :  { %28718 = vmatmul.mubr.f32.vlgmr.msra.gmra.mrb[40].mxu1 %v16817_v10 }
0x128f   :  { %30988 = vmatpush3.bf16.xpose.msra.mxu1 %v34994_v8  ;;  %28736 = vmatprep.mubr.f32.mxu1 %v16808_v50 }
0x1290   :  { %30990 = vmatprep.subr.bf16.mxu1 %v35009_v62 }
0x1297   :  { %30992 = vmatpush3.bf16.xpose.msra.mxu1 %v35009_v62 }
0x1298   :  { %30994 = vmatprep.subr.bf16.mxu1 %v35026_v43 }
0x129f   :  { %30996 = vmatpush3.bf16.xpose.msra.mxu1 %v35026_v43 }
0x12a0   :  { %30998 = vmatprep.subr.bf16.mxu1 %v35040_v3 }
0x12a7   :  { %31000 = vmatpush3.bf16.xpose.msra.mxu1 %v35040_v3 }
0x12a8   :  { %31002 = vmatprep.subr.bf16.mxu1 %v31001_v6 }
0x12ae   :  { %28737 = vmatmul.mubr.f32.vlgmr.msra.gmra.mrb[40].mxu1 %v16818_v56 }
0x12af   :  { %31004 = vmatpush3.bf16.xpose.msra.mxu1 %v31001_v6  ;;  %28755 = vmatprep.mubr.f32.mxu1 %v16806_v20 }
0x12b0   :  { %31006 = vmatprep.subr.bf16.mxu1 %v31005_v52 }
0x12b7   :  { %31008 = vmatpush3.bf16.xpose.msra.mxu1 %v31005_v52 }
0x12b8   :  { %31010 = vmatprep.subr.bf16.mxu1 %v31009_v38 }
0x12bd   :  { %v17855_v34 = vpop.f32.mrb[38].mxu0 }
0x12be   :  { %v28842_v15 = vpop.f32.mrb[39].mxu0  ;;  %v17860_v35 = vand.u32 4294901760, %v17855_v34 }
0x12bf   :  { %31012 = vmatpush3.bf16.xpose.msra.mxu1 %v31009_v38  ;;  %v18913_v15 = vsub.f32 %v18817_v16, %v18829_v39 }
0x12c0   :  { %31014 = vmatprep.subr.bf16.mxu1 %v31013_v11  ;;  %v17947_v21 = vsub.f32 %v17855_v34, %v17860_v35 }
0x12c2   :  { %v17948_v41 = vand.u32 4294901760, %v17947_v21 }
0x12c4   :  { %v17949_v55 = vsub.f32 %v17947_v21, %v17948_v41 }
0x12c7   :  { %31016 = vmatpush3.bf16.xpose.msra.mxu1 %v31013_v11 }
0x12c8   :  { %31018 = vmatprep.subr.bf16.mxu1 %v34994_v8 }
0x12ce   :  { %28756 = vmatmul.mubr.f32.vlgmr.msra.gmra.mrb[40].mxu1 %v35185_v42 }
0x12cf   :  { %31020 = vmatpush3.bf16.xpose.msra.mxu1 %v34994_v8  ;;  %28774 = vmatprep.mubr.f32.mxu1 %v16806_v20  ;;  %v17950_v8 = vand.u32 4294901760, %v17949_v55  ;;  %v36312_v20 = vld [vmem:[#allocation26_spill] sm:$0xff] }
0x12d0   :  { %31022 = vmatprep.subr.bf16.mxu1 %v35009_v62 }
0x12d7   :  { %31024 = vmatpush3.bf16.xpose.msra.mxu1 %v35009_v62 }
0x12d8   :  { %31026 = vmatprep.subr.bf16.mxu1 %v35026_v43 }
0x12df   :  { %31028 = vmatpush3.bf16.xpose.msra.mxu1 %v35026_v43 }
0x12e0   :  { %31030 = vmatprep.subr.bf16.mxu1 %v35040_v3 }
0x12e7   :  { %31032 = vmatpush3.bf16.xpose.msra.mxu1 %v35040_v3 }
0x12e8   :  { %28843 = vmatprep.subr.mxu1 %v17860_v35 }
0x12ee   :  { %28775 = vmatmul.mubr.f32.vlgmr.msra.gmra.mrb[40].mxu1 %v35185_v42  ;;  %v36311_v42 = vld [vmem:[#allocation24_spill] sm:$0xff] }
0x12ef   :  { %28844 = vmatpush3.msra.mxu1 %v17860_v35  ;;  %28845 = vmatprep.mubr.f32.mxu1 %v34353_v30 }
0x12f0   :  { %28848 = vmatprep.subr.mxu1 %v17950_v8 }
0x12f2   :  { %28846 = vmatmul.mubr.f32.vlgmr.msra.gmra.mrb[42].mxu1 %v34478_v18 }
0x12f3   :  { %28849 = vmatpush3.msra.mxu1 %v17950_v8  ;;  %28850 = vmatprep.mubr.msk.f32.mxu1 %vm161_vm0, %v34337_v2 }
0x12f4   :  { %28853 = vmatprep.subr.mxu1 %v17947_v21 }
0x12fa   :  { %28851 = vmatmul.mubr.msk.f32.vlgmr.msra.gmra.mrb[42].mxu1 %vm161_vm0, %v34467_v13 }
0x12fb   :  { %28854 = vmatpush3.msra.mxu1 %v17947_v21  ;;  %28855 = vmatprep.mubr.f32.mxu1 %v34346_v58  ;;  %v18823_v21 = vsel %vm2819_vm5, %v24977_v9, 0  ;;  %v24966_v9 = vld [vmem:[%s36176_s9 + $0x60] sm:$0xff] }
0x12fc   :  { %28858 = vmatprep.subr.mxu1 %v17860_v35  ;;  %v18835_v55 = vand.u32 4294901760, %v18823_v21 }
0x1302   :  { %28856 = vmatmul.mubr.f32.vlgmr.msra.gmra.mrb[42].mxu1 %v34471_v63 }
0x1303   :  { %28859 = vmatpush3.msra.mxu1 %v17860_v35  ;;  %28860 = vmatprep.mubr.f32.mxu1 %v34349_v44 }
0x1304   :  { %28863 = vmatprep.subr.mxu1 %v17948_v41 }
0x130a   :  { %28861 = vmatmul.mubr.f32.vlgmr.msra.gmra.mrb[42].mxu1 %v34474_v45 }
0x130b   :  { %28864 = vmatpush3.msra.mxu1 %v17948_v41  ;;  %28865 = vmatprep.mubr.msk.f32.mxu1 %vm161_vm0, %v34337_v2 }
0x130c   :  { %28868 = vmatprep.subr.mxu1 %v17860_v35 }
0x1312   :  { %28866 = vmatmul.mubr.msk.f32.vlgmr.msra.gmra.mrb[42].mxu1 %vm161_vm0, %v34467_v13 }
0x1313   :  { %28869 = vmatpush3.msra.mxu1 %v17860_v35  ;;  %28870 = vmatprep.mubr.msk.f32.mxu1 %vm161_vm0, %v34337_v2 }
0x1314   :  { %31069 = vmatprep.subr.bf16.mxu1 %v36261_v12 }
0x131a   :  { %28871 = vmatmul.mubr.msk.f32.vlgmr.msra.gmra.mrb[42].mxu1 %vm161_vm0, %v34467_v13 }
0x131b   :  { %28877 = vmatprep.mubr.msk.f32.mxu1 %vm32104_vm6, %v36260_v14 }
0x131d   :  { %v35261_v62 = vpop.f32.mrb[40].mxu0 }
0x131e   :  { %v29046_v43 = vpop.f32.mrb[41].mxu0 }
0x131f   :  { %v18914_v43 = vand.u32 4294901760, %v18913_v15 }
0x13c1   :  { %v28776_v3 = vpop.f32.mrb[40].mxu1 }
0x13c2   :  { %v35264_v57 = vmul.f32 %v28776_v3, %v33751_v51  ;;  %v17303_v49 = vpop.f32.mrb[41].mxu1 }
0x13c3   :  { %v35267_v61 = vmul.f32 %v33753_v29, %v17303_v49  ;;  %v18927_v49 = vsub.f32 %v18823_v21, %v18835_v55 }
0x13ed   :  { %v28872_v47 = vpop.f32.mrb[42].mxu1 }
0x13ee   :  { %v18349_v17 = vmul.f32 0.2236068, %v28872_v47  ;;  %v18338_v7 = vpop.f32.mrb[43].mxu1 }
0x13ef   :  { %v18348_v19 = vmul.f32 0.2236068, %v18338_v7 }
0x13f0   :  { %v18351_v54 = vmul.f32 %v33453_v33, %v18349_v17  ;;  %v35271_v32 = vmul.f32 %v36311_v42, %v18349_v17  ;;  %v18915_v17 = vsub.f32 %v18913_v15, %v18914_v43  ;;  %v18928_v42 = vand.u32 4294901760, %v18927_v49 }
0x13f1   :  { %v18350_v10 = vmul.f32 %v18348_v19, %v36312_v20  ;;  %v35275_v56 = vmul.f32 %v18348_v19, %v36313_v36 }
0x13f2   :  { %v18358_v51 = vand.u32 4294901760, %v18351_v54  ;;  %v18916_v19 = vand.u32 4294901760, %v18915_v17  ;;  %v18929_v36 = vsub.f32 %v18927_v49, %v18928_v42  ;;  %v19814_v17 = vsel %vm2819_vm5, %v35271_v32, 0 }
0x13f3   :  { %v18355_v50 = vand.u32 4294901760, %v18350_v10 }
0x13f4   :  { %v18440_v24 = vsub.f32 %v18351_v54, %v18358_v51 }
0x13f5   :  { %v31070_v27 = vpack.c.bf16 %v18358_v51, %v18355_v50  ;;  %v18433_v29 = vsub.f32 %v18350_v10, %v18355_v50  ;;  %v18930_v50 = vand.u32 4294901760, %v18929_v36 }
0x13f6   :  { %v18441_v46 = vand.u32 4294901760, %v18440_v24 }
0x13f7   :  { %v18434_v28 = vand.u32 4294901760, %v18433_v29  ;;  %31071 = vmatpush3.bf16.msra.mxu1 %v31070_v27  ;;  %v31076_v0 = vpack.c.bf16 %v18440_v24, %v18433_v29 }
0x13f8   :  { %v18442_v1 = vsub.f32 %v18440_v24, %v18441_v46  ;;  %31072 = vmatprep.subr.bf16.mxu1 %v36261_v12 }
0x13f9   :  { %v18435_v33 = vsub.f32 %v18433_v29, %v18434_v28  ;;  %v31082_v6 = vpack.c.bf16 %v18441_v46, %v18434_v28  ;;  %v19811_v46 = vsel %vm2819_vm5, %v35275_v56, 0  ;;  %v24962_v28 = vld [vmem:[%s36176_s9 + $0x40] sm:$0xff] }
0x13fa   :  { %28878 = vmatmul.mubr.f32.vlgmr.msra.gmra.mrb[44].mxu1 %v34527_v23  ;;  %v18443_v40 = vand.u32 4294901760, %v18442_v1  ;;  %v24974_v23 = vld [vmem:[%s36178_s11 + $0x40] sm:$0xff]  ;;  %v19817_v1 = vsel %vm2819_vm5, %v24962_v28, 0 }
0x13fb   :  { %v18436_v22 = vand.u32 4294901760, %v18435_v33  ;;  %28884 = vmatprep.mubr.msk.f32.mxu1 %vm32104_vm6, %v36260_v14  ;;  %v19841_v56 = vand.u32 4294901760, %v19817_v1 }
0x13fd   :  { %v31073_v52 = vpack.c.bf16 %v18443_v40, %v18436_v22  ;;  %v24964_v22 = vld [vmem:[%s36176_s9 + $0x50] sm:$0xff] }
0x13ff   :  { %31074 = vmatpush3.bf16.msra.mxu1 %v31073_v52  ;;  %v24965_v52 = vld [vmem:[%s36176_s9 + $0x58] sm:$0xff] }
0x1400   :  { %31075 = vmatprep.subr.bf16.mxu1 %v36261_v12  ;;  %v19826_v16 = vsel %vm2819_vm5, %v24965_v52, 0 }
0x1402   :  { %28885 = vmatmul.mubr.msk.f32.vlgmr.msra.gmra.mrb[46].mxu1 %vm2355_vm8, %v34508_v31 }
0x1403   :  { %31077 = vmatpush3.bf16.msra.mxu1 %v31076_v0  ;;  %28891 = vmatprep.mubr.msk.f32.mxu1 %vm32104_vm6, %v36260_v14  ;;  %v35358_v0 = vand.u32 4294901760, %v19811_v46 }
0x1404   :  { %31078 = vmatprep.subr.bf16.mxu1 %v36261_v12 }
0x1405   :  { %v35368_v40 = vsub.f32 %v19811_v46, %v35358_v0 }
0x1406   :  { %28892 = vmatmul.mubr.f32.vlgmr.msra.gmra.mrb[48].mxu1 %v34512_v4  ;;  %v18814_v4 = vsel %vm2819_vm5, %v24974_v23, 0 }
0x1407   :  { %31080 = vmatpush3.bf16.msra.mxu1 %v31070_v27  ;;  %28898 = vmatprep.mubr.msk.f32.mxu1 %vm32104_vm6, %v36260_v14  ;;  %v18826_v38 = vand.u32 4294901760, %v18814_v4  ;;  %v19915_v59 = vand.u32 4294901760, %v35368_v40 }
0x1408   :  { %31081 = vmatprep.subr.bf16.mxu1 %v36261_v12 }
0x1409   :  { %v35316_v11 = vpack.c.bf16 %v18829_v39, %v18826_v38  ;;  %v18906_v34 = vsub.f32 %v18814_v4, %v18826_v38  ;;  %v19823_v4 = vsel %vm2819_vm5, %v24964_v22, 0  ;;  %v19850_v39 = vand.u32 4294901760, %v19826_v16 }
0x140a   :  { %28899 = vmatmul.mubr.f32.vlgmr.msra.gmra.mrb[50].mxu1 %v34515_v53  ;;  %v24976_v53 = vld [vmem:[%s36178_s11 + $0x50] sm:$0xff]  ;;  %v19847_v38 = vand.u32 4294901760, %v19823_v4 }
0x140b   :  { %31083 = vmatpush3.bf16.msra.mxu1 %v31082_v6  ;;  %28905 = vmatprep.mubr.msk.f32.mxu1 %vm32104_vm6, %v36260_v14  ;;  %v18820_v35 = vsel %vm2819_vm5, %v24976_v53, 0  ;;  %v18907_v8 = vand.u32 4294901760, %v18906_v34  ;;  %v19916_v53 = vsub.f32 %v35368_v40, %v19915_v59  ;;  %v35423_v36 = vsub.f32 %v19826_v16, %v19850_v39 }
0x140c   :  { %31084 = vmatprep.subr.bf16.mxu1 %v36261_v12  ;;  %v18832_v41 = vand.u32 4294901760, %v18820_v35 }
0x140d   :  { %v18908_v47 = vsub.f32 %v18906_v34, %v18907_v8  ;;  %v31112_v29 = vpack.c.bf16 %v18914_v43, %v18907_v8  ;;  %v24968_v8 = vld [vmem:[%s36176_s9 + $0x70] sm:$0xff]  ;;  %v24969_v43 = vld [vmem:[%s36176_s9 + $0x78] sm:$0xff] }
0x140e   :  { %28906 = vmatmul.mubr.msk.f32.vlgmr.msra.gmra.mrb[52].mxu1 %vm2355_vm8, %v34508_v31  ;;  %v18920_v3 = vsub.f32 %v18820_v35, %v18832_v41  ;;  %v19829_v35 = vsel %vm2819_vm5, %v24966_v9, 0 }
0x140f   :  { %31086 = vmatpush3.bf16.msra.mxu1 %v31070_v27  ;;  %28912 = vmatprep.mubr.msk.f32.mxu1 %vm32104_vm6, %v36260_v14  ;;  %v18909_v7 = vand.u32 4294901760, %v18908_v47  ;;  %v31100_v27 = vpack.c.bf16 %v18913_v15, %v18906_v34  ;;  %v35392_v34 = vpack.c.bf16 %v19850_v39, %v19847_v38  ;;  %v19917_v15 = vand.u32 4294901760, %v19916_v53 }
0x1410   :  { %31087 = vmatprep.subr.bf16.mxu1 %v36261_v12  ;;  %v18921_v54 = vand.u32 4294901760, %v18920_v3  ;;  %v19838_v47 = vsel %vm2819_vm5, %v24969_v43, 0 }
0x1411   :  { %v31094_v20 = vpack.c.bf16 %v18916_v19, %v18909_v7  ;;  %v19862_v19 = vand.u32 4294901760, %v19838_v47 }
0x1412   :  { %28913 = vmatmul.mubr.msk.f32.vlgmr.msra.gmra.mrb[54].mxu1 %vm2355_vm8, %v34508_v31  ;;  %v35324_v31 = vpack.c.bf16 %v18835_v55, %v18832_v41  ;;  %v18922_v10 = vsub.f32 %v18920_v3, %v18921_v54  ;;  %v19853_v41 = vand.u32 4294901760, %v19829_v35 }
0x1413   :  { %28923 = vmatprep.mubr.msk.f32.mxu1 %vm32104_vm6, %v36260_v14 }
0x1414   :  { %v18923_v51 = vand.u32 4294901760, %v18922_v10  ;;  %v35421_v10 = vsub.f32 %v19823_v4, %v19847_v38 }
0x1416   :  { %v31097_v24 = vpack.c.bf16 %v18930_v50, %v18923_v51 }
0x1418   :  { %31089 = vmatpush3.bf16.xpose.msra.mxu1 %v35316_v11 }
0x1419   :  { %31090 = vmatprep.subr.bf16.mxu1 %v36261_v12 }
0x1420   :  { %31092 = vmatpush3.bf16.xpose.msra.mxu1 %v35324_v31 }
0x1421   :  { %31093 = vmatprep.subr.bf16.mxu1 %v36261_v12 }
0x1427   :  { %28924 = vmatmul.mubr.f32.vlgmr.msra.gmra.mrb[56].mxu1 %v34973_v26  ;;  %v31103_v26 = vpack.c.bf16 %v18927_v49, %v18920_v3  ;;  %v35407_v3 = vsub.f32 %v19817_v1, %v19841_v56  ;;  %v19835_v49 = vsel %vm2819_vm5, %v24968_v8, 0 }
0x1428   :  { %31095 = vmatpush3.bf16.xpose.msra.mxu1 %v31094_v20  ;;  %28934 = vmatprep.mubr.msk.f32.mxu1 %vm32104_vm6, %v36260_v14  ;;  %v19859_v7 = vand.u32 4294901760, %v19835_v49  ;;  %v35419_v20 = vand.u32 4294901760, %v19814_v17 }
0x1429   :  { %31096 = vmatprep.subr.bf16.mxu1 %v36261_v12 }
0x142a   :  { %v35425_v51 = vpack.c.bf16 %v19862_v19, %v19859_v7 }
0x1430   :  { %31098 = vmatpush3.bf16.xpose.msra.mxu1 %v31097_v24  ;;  %v35434_v24 = vsub.f32 %v19814_v17, %v35419_v20 }
0x1431   :  { %31099 = vmatprep.subr.bf16.mxu1 %v36261_v12 }
0x1432   :  { %v19925_v46 = vand.u32 4294901760, %v35434_v24 }
0x1437   :  { %28935 = vmatmul.mubr.f32.vlgmr.msra.gmra.mrb[56].mxu1 %v34955_v5 }
0x1438   :  { %31101 = vmatpush3.bf16.xpose.msra.mxu1 %v31100_v27  ;;  %28945 = vmatprep.mubr.msk.f32.mxu1 %vm32104_vm6, %v36260_v14  ;;  %v19950_v27 = vand.u32 4294901760, %v35421_v10 }
0x1439   :  { %31102 = vmatprep.subr.bf16.mxu1 %v36261_v12 }
0x143a   :  { %v19951_v28 = vsub.f32 %v35421_v10, %v19950_v27 }
0x143c   :  { %v19952_v22 = vand.u32 4294901760, %v19951_v28 }
0x1440   :  { %31104 = vmatpush3.bf16.xpose.msra.mxu1 %v31103_v26  ;;  %v19957_v26 = vand.u32 4294901760, %v35423_v36 }
0x1441   :  { %31105 = vmatprep.subr.bf16.mxu1 %v36261_v12 }
0x1447   :  { %28946 = vmatmul.mubr.f32.vlgmr.msra.gmra.mrb[56].mxu1 %v34958_v48  ;;  %v31115_v48 = vpack.c.bf16 %v18928_v42, %v18921_v54  ;;  %v19936_v54 = vand.u32 4294901760, %v35407_v3 }
0x1448   :  { %31107 = vmatpush3.bf16.xpose.msra.mxu1 %v35316_v11  ;;  %28956 = vmatprep.mubr.msk.f32.mxu1 %vm32104_vm6, %v36260_v14 }
0x1449   :  { %31108 = vmatprep.subr.bf16.mxu1 %v36261_v12  ;;  %v19937_v32 = vsub.f32 %v35407_v3, %v19936_v54 }
0x1450   :  { %31110 = vmatpush3.bf16.xpose.msra.mxu1 %v35324_v31 }
0x1451   :  { %31111 = vmatprep.subr.bf16.mxu1 %v36261_v12 }
0x1457   :  { %28957 = vmatmul.mubr.f32.vlgmr.msra.gmra.mrb[56].mxu1 %v34963_v60  ;;  %v24963_v60 = vld [vmem:[%s36176_s9 + $0x48] sm:$0xff] }
0x1458   :  { %31113 = vmatpush3.bf16.xpose.msra.mxu1 %v31112_v29  ;;  %28967 = vmatprep.mubr.msk.f32.mxu1 %vm32104_vm6, %v36260_v14  ;;  %v19820_v33 = vsel %vm2819_vm5, %v24963_v60, 0  ;;  %v19938_v29 = vand.u32 4294901760, %v19937_v32  ;;  %v19958_v60 = vsub.f32 %v35423_v36, %v19957_v26  ;;  %v31195_v32 = vpack.c.bf16 %v35423_v36, %v35421_v10  ;;  %v36314_v10 = vld [vmem:[#allocation8_spill] sm:$0xff] }
0x1459   :  { %31114 = vmatprep.subr.bf16.mxu1 %v36261_v12  ;;  %v19844_v6 = vand.u32 4294901760, %v19820_v33 }
0x145a   :  { %v19959_v52 = vand.u32 4294901760, %v19958_v60 }
0x145b   :  { %v35376_v23 = vpack.c.bf16 %v19844_v6, %v19841_v56 }
0x145c   :  { %v31179_v39 = vpack.c.bf16 %v19959_v52, %v19952_v22  ;;  %v24954_v22 = vld [vmem:[%s36172_s8 + $0x40] sm:$0xff]  ;;  %v24955_v52 = vld [vmem:[%s36172_s8 + $0x48] sm:$0xff] }
0x1460   :  { %31116 = vmatpush3.bf16.xpose.msra.mxu1 %v31115_v48 }
0x1461   :  { %31117 = vmatprep.subr.bf16.mxu1 %v36261_v12 }
0x1467   :  { %28968 = vmatmul.mubr.f32.vlgmr.msra.gmra.mrb[56].mxu1 %v34955_v5 }
0x1468   :  { %31119 = vmatpush3.bf16.xpose.msra.mxu1 %v35316_v11  ;;  %28978 = vmatprep.mubr.msk.f32.mxu1 %vm32104_vm6, %v36260_v14  ;;  %v24967_v11 = vld [vmem:[%s36176_s9 + $0x68] sm:$0xff] }
0x1469   :  { %31120 = vmatprep.subr.bf16.mxu1 %v36261_v12  ;;  %v19832_v21 = vsel %vm2819_vm5, %v24967_v11, 0  ;;  %v35463_v11 = vsub.f32 %v19835_v49, %v19859_v7 }
0x146a   :  { %v19856_v55 = vand.u32 4294901760, %v19832_v21 }
0x146c   :  { %v35449_v56 = vsub.f32 %v19832_v21, %v19856_v55 }
0x146e   :  { %v19971_v16 = vand.u32 4294901760, %v35449_v56 }
0x1470   :  { %31122 = vmatpush3.bf16.xpose.msra.mxu1 %v35324_v31  ;;  %v35405_v31 = vpack.c.bf16 %v19856_v55, %v19853_v41  ;;  %v19972_v9 = vsub.f32 %v35449_v56, %v19971_v16 }
0x1471   :  { %31160 = vmatprep.subr.bf16.mxu1 %v35376_v23 }
0x1472   :  { %v19973_v21 = vand.u32 4294901760, %v19972_v9  ;;  %v24957_v9 = vld [vmem:[%s36172_s8 + $0x58] sm:$0xff] }
0x1477   :  { %28979 = vmatmul.mubr.f32.vlgmr.msra.gmra.mrb[56].mxu1 %v34955_v5  ;;  %v35409_v5 = vsub.f32 %v19820_v33, %v19844_v6  ;;  %v35447_v33 = vsub.f32 %v19829_v35, %v19853_v41  ;;  %v19926_v6 = vsub.f32 %v35434_v24, %v19925_v46  ;;  %v19978_v41 = vand.u32 4294901760, %v35463_v11 }
0x1478   :  { %31162 = vmatpush3.bf16.xpose.msra.mxu1 %v35376_v23  ;;  %29063 = vmatprep.mubr.f32.mxu1 %v19917_v15  ;;  %v35465_v15 = vsub.f32 %v19838_v47, %v19862_v19 }
0x1479   :  { %31164 = vmatprep.subr.bf16.mxu1 %v35392_v34  ;;  %v19943_v42 = vand.u32 4294901760, %v35409_v5  ;;  %v19964_v4 = vand.u32 4294901760, %v35447_v33  ;;  %v19927_v38 = vand.u32 4294901760, %v19926_v6  ;;  %v19979_v43 = vsub.f32 %v35463_v11, %v19978_v41 }
0x147a   :  { %v19985_v55 = vand.u32 4294901760, %v35465_v15  ;;  %v31191_v19 = vpack.c.bf16 %v35409_v5, %v35407_v3 }
0x147b   :  { %v19944_v50 = vsub.f32 %v35409_v5, %v19943_v42  ;;  %v19965_v53 = vsub.f32 %v35447_v33, %v19964_v4  ;;  %v19980_v47 = vand.u32 4294901760, %v19979_v43  ;;  %v35515_v43 = vsel %vm671_vm2, %v24957_v9, 0 }
0x147c   :  { %v19986_v49 = vsub.f32 %v35465_v15, %v19985_v55  ;;  %v31231_v3 = vpack.c.bf16 %v19971_v16, %v19964_v4  ;;  %v31235_v5 = vpack.c.bf16 %v19985_v55, %v19978_v41 }
0x147d   :  { %v19945_v48 = vand.u32 4294901760, %v19944_v50  ;;  %v19966_v35 = vand.u32 4294901760, %v19965_v53  ;;  %v31199_v50 = vpack.c.bf16 %v35449_v56, %v35447_v33  ;;  %v35501_v53 = vsel %vm671_vm2, %v24955_v52, 0 }
0x147e   :  { %v19987_v17 = vand.u32 4294901760, %v19986_v49 }
0x147f   :  { %v31175_v1 = vpack.c.bf16 %v19945_v48, %v19938_v29  ;;  %v31183_v8 = vpack.c.bf16 %v19973_v21, %v19966_v35  ;;  %v31203_v29 = vpack.c.bf16 %v35465_v15, %v35463_v11 }
0x1480   :  { %31166 = vmatpush3.bf16.xpose.msra.mxu1 %v35392_v34  ;;  %v31187_v7 = vpack.c.bf16 %v19987_v17, %v19980_v47  ;;  %v24958_v47 = vld [vmem:[%s36172_s8 + $0x60] sm:$0xff]  ;;  %v24959_v17 = vld [vmem:[%s36172_s8 + $0x68] sm:$0xff] }
0x1481   :  { %31168 = vmatprep.subr.bf16.mxu1 %v35405_v31 }
0x1488   :  { %31170 = vmatpush3.bf16.xpose.msra.mxu1 %v35405_v31 }
0x1489   :  { %31172 = vmatprep.subr.bf16.mxu1 %v35425_v51 }
0x1490   :  { %31174 = vmatpush3.bf16.xpose.msra.mxu1 %v35425_v51 }
0x1491   :  { %31176 = vmatprep.subr.bf16.mxu1 %v31175_v1 }
0x1497   :  { %29064 = vmatmul.mubr.f32.vlgmr.msra.gmra.mrb[58].mxu1 %v19927_v38  ;;  %v24956_v38 = vld [vmem:[%s36172_s8 + $0x50] sm:$0xff] }
0x1498   :  { %31178 = vmatpush3.bf16.xpose.msra.mxu1 %v31175_v1  ;;  %29082 = vmatprep.mubr.f32.mxu1 %v35358_v0  ;;  %v35507_v35 = vsel %vm671_vm2, %v24956_v38, 0 }
0x1499   :  { %31180 = vmatprep.subr.bf16.mxu1 %v31179_v39  ;;  %v20467_v49 = vand.u32 4294901760, %v35507_v35 }
0x14a0   :  { %31182 = vmatpush3.bf16.xpose.msra.mxu1 %v31179_v39  ;;  %v35498_v39 = vsel %vm671_vm2, %v24954_v22, 0 }
0x14a1   :  { %31184 = vmatprep.subr.bf16.mxu1 %v31183_v8  ;;  %v20461_v21 = vand.u32 4294901760, %v35498_v39 }
0x14a3   :  { %v35613_v33 = vsub.f32 %v35498_v39, %v20461_v21 }
0x14a5   :  { %v20556_v4 = vand.u32 4294901760, %v35613_v33 }
0x14a7   :  { %v20557_v11 = vsub.f32 %v35613_v33, %v20556_v4 }
0x14a8   :  { %31186 = vmatpush3.bf16.xpose.msra.mxu1 %v31183_v8  ;;  %v20464_v8 = vand.u32 4294901760, %v35501_v53 }
0x14a9   :  { %31188 = vmatprep.subr.bf16.mxu1 %v31187_v7  ;;  %v20558_v41 = vand.u32 4294901760, %v20557_v11 }
0x14aa   :  { %v35618_v56 = vsub.f32 %v35501_v53, %v20464_v8 }
0x14ac   :  { %v20563_v16 = vand.u32 4294901760, %v35618_v56 }
0x14ae   :  { %v20564_v15 = vsub.f32 %v35618_v56, %v20563_v16 }
0x14b0   :  { %31190 = vmatpush3.bf16.xpose.msra.mxu1 %v31187_v7  ;;  %v20565_v55 = vand.u32 4294901760, %v20564_v15 }
0x14b1   :  { %31192 = vmatprep.subr.bf16.mxu1 %v31191_v19 }
0x14b2   :  { %v31271_v39 = vpack.c.bf16 %v20565_v55, %v20558_v41 }
0x14b7   :  { %29083 = vmatmul.mubr.f32.vlgmr.msra.gmra.mrb[58].mxu1 %v35419_v20 }
0x14b8   :  { %31194 = vmatpush3.bf16.xpose.msra.mxu1 %v31191_v19  ;;  %29101 = vmatprep.mubr.f32.mxu1 %v35368_v40  ;;  %v20470_v40 = vand.u32 4294901760, %v35515_v43 }
0x14b9   :  { %31196 = vmatprep.subr.bf16.mxu1 %v31195_v32 }
0x14c0   :  { %31198 = vmatpush3.bf16.xpose.msra.mxu1 %v31195_v32  ;;  %v35530_v32 = vpack.c.bf16 %v20464_v8, %v20461_v21 }
0x14c1   :  { %31200 = vmatprep.subr.bf16.mxu1 %v31199_v50 }
0x14c2   :  { %31256 = vmatprep.subr.bf16.mxu0 %v35530_v32 }
0x14c3   :  { %31258 = vmatpush3.bf16.xpose.msra.mxu0 %v35530_v32 }
0x14c8   :  { %31202 = vmatpush3.bf16.xpose.msra.mxu1 %v31199_v50  ;;  %v35536_v50 = vpack.c.bf16 %v20470_v40, %v20467_v49 }
0x14c9   :  { %31204 = vmatprep.subr.bf16.mxu1 %v31203_v29 }
0x14ca   :  { %31260 = vmatprep.subr.bf16.mxu0 %v35536_v50 }
0x14cb   :  { %31262 = vmatpush3.bf16.xpose.msra.mxu0 %v35536_v50 }
0x14cd   :  { %v18427_v48 = vpop.f32.mrb[44].mxu1 }
0x14ce   :  { %v28879_v28 = vpop.f32.mrb[45].mxu1 }
0x14d0   :  { %31206 = vmatpush3.bf16.xpose.msra.mxu1 %v31203_v29  ;;  %v35539_v29 = vsel %vm671_vm2, %v24958_v47, 0 }
0x14d1   :  { %31208 = vmatprep.subr.bf16.mxu1 %v35376_v23 }
0x14d5   :  { %v18508_v60 = vpop.f32.mrb[46].mxu1 }
0x14d6   :  { %v18509_v1 = vadd.f32 %v18508_v60, %v18427_v48  ;;  %v28886_v6 = vpop.f32.mrb[47].mxu1  ;;  %v35542_v48 = vsel %vm671_vm2, %v24959_v17, 0 }
0x14d7   :  { %29102 = vmatmul.mubr.f32.vlgmr.msra.gmra.mrb[58].mxu1 %v35434_v24  ;;  %v20473_v6 = vand.u32 4294901760, %v35539_v29  ;;  %v20476_v22 = vand.u32 4294901760, %v35542_v48 }
0x14d8   :  { %31210 = vmatpush3.bf16.xpose.msra.mxu1 %v35376_v23  ;;  %29120 = vmatprep.mubr.f32.mxu1 %v19915_v59 }
0x14d9   :  { %v18584_v7 = vpop.f32.mrb[48].mxu1  ;;  %31212 = vmatprep.subr.bf16.mxu1 %v35392_v34  ;;  %v35555_v47 = vpack.c.bf16 %v20476_v22, %v20473_v6 }
0x14da   :  { %v18585_v59 = vadd.f32 %v18584_v7, %v18509_v1  ;;  %v28893_v19 = vpop.f32.mrb[49].mxu1 }
0x14db   :  { %31264 = vmatprep.subr.bf16.mxu0 %v35555_v47  ;;  %v31223_v19 = vpack.c.bf16 %v19943_v42, %v19936_v54 }
0x14dc   :  { %31266 = vmatpush3.bf16.xpose.msra.mxu0 %v35555_v47 }
0x14dd   :  { %v18659_v28 = vpop.f32.mrb[50].mxu1 }
0x14de   :  { %v18660_v60 = vadd.f32 %v18659_v28, %v18585_v59  ;;  %v28900_v1 = vpop.f32.mrb[51].mxu1  ;;  %v31227_v28 = vpack.c.bf16 %v19957_v26, %v19950_v27  ;;  %v36315_v27 = vld [vmem:[#allocation21_spill] sm:$0xff] }
0x14e0   :  { %31214 = vmatpush3.bf16.xpose.msra.mxu1 %v35392_v34 }
0x14e1   :  { %v18736_v52 = vpop.f32.mrb[52].mxu1  ;;  %31216 = vmatprep.subr.bf16.mxu1 %v35405_v31 }
0x14e2   :  { %v18737_v38 = vadd.f32 %v18736_v52, %v18660_v60  ;;  %v28907_v9 = vpop.f32.mrb[53].mxu1 }
0x14e5   :  { %v18809_v17 = vpop.f32.mrb[54].mxu1 }
0x14e6   :  { %v18810_v7 = vadd.f32 %v18809_v17, %v18737_v38  ;;  %v28914_v59 = vpop.f32.mrb[55].mxu1 }
0x14e8   :  { %31218 = vmatpush3.bf16.xpose.msra.mxu1 %v35405_v31  ;;  %v22046_v36 = vadd.f32 %v18810_v7, %v36314_v10  ;;  %v31287_v7 = vpack.c.bf16 %v35618_v56, %v35613_v33  ;;  %v22065_v56 = vld [vmem:[%s36180_s10] sm:$0xff] }
0x14e9   :  { %31220 = vmatprep.subr.bf16.mxu1 %v35425_v51 }
0x14f0   :  { %31222 = vmatpush3.bf16.xpose.msra.mxu1 %v35425_v51 }
0x14f1   :  { %31224 = vmatprep.subr.bf16.mxu1 %v31223_v19 }
0x14f7   :  { %29121 = vmatmul.mubr.f32.vlgmr.msra.gmra.mrb[58].mxu1 %v19925_v46 }
0x14f8   :  { %31226 = vmatpush3.bf16.xpose.msra.mxu1 %v31223_v19  ;;  %29139 = vmatprep.mubr.f32.mxu1 %v35358_v0  ;;  %v35649_v19 = vsub.f32 %v35507_v35, %v20467_v49 }
0x14f9   :  { %31228 = vmatprep.subr.bf16.mxu1 %v31227_v28 }
0x1500   :  { %31230 = vmatpush3.bf16.xpose.msra.mxu1 %v31227_v28  ;;  %v35654_v28 = vsub.f32 %v35515_v43, %v20470_v40 }
0x1501   :  { %31232 = vmatprep.subr.bf16.mxu1 %v31231_v3 }
0x1508   :  { %31234 = vmatpush3.bf16.xpose.msra.mxu1 %v31231_v3 }
0x1509   :  { %31236 = vmatprep.subr.bf16.mxu1 %v31235_v5 }
0x1510   :  { %31238 = vmatpush3.bf16.xpose.msra.mxu1 %v31235_v5  ;;  %v36316_v5 = vld [vmem:[#allocation22_spill] sm:$0xff] }
0x1511   :  { %31240 = vmatprep.subr.bf16.mxu1 %v35376_v23 }
0x1517   :  { %29140 = vmatmul.mubr.f32.vlgmr.msra.gmra.mrb[58].mxu1 %v35419_v20 }
0x1518   :  { %31242 = vmatpush3.bf16.xpose.msra.mxu1 %v35376_v23  ;;  %29158 = vmatprep.mubr.f32.mxu1 %v35358_v0  ;;  %v19808_v23 = vmul.f32 %v35261_v62, %v32456_v37 }
0x1519   :  { %31244 = vmatprep.subr.bf16.mxu1 %v35392_v34 }
0x1520   :  { %31246 = vmatpush3.bf16.xpose.msra.mxu1 %v35392_v34 }
0x1521   :  { %31248 = vmatprep.subr.bf16.mxu1 %v35405_v31 }
0x1528   :  { %31250 = vmatpush3.bf16.xpose.msra.mxu1 %v35405_v31  ;;  %v24960_v31 = vld [vmem:[%s36172_s8 + $0x70] sm:$0xff] }
0x1529   :  { %31252 = vmatprep.subr.bf16.mxu1 %v35425_v51  ;;  %v20455_v37 = vsel %vm671_vm2, %v24960_v31, 0  ;;  %v20583_v31 = vsub.f32 %v35539_v29, %v20473_v6 }
0x152a   :  { %v20479_v62 = vand.u32 4294901760, %v20455_v37 }
0x152b   :  { %v20584_v41 = vand.u32 4294901760, %v20583_v31 }
0x152c   :  { %v35630_v53 = vsub.f32 %v20455_v37, %v20479_v62 }
0x152e   :  { %v20598_v8 = vand.u32 4294901760, %v35630_v53 }
0x1530   :  { %31254 = vmatpush3.bf16.xpose.msra.mxu1 %v35425_v51  ;;  %v20599_v1 = vsub.f32 %v35630_v53, %v20598_v8 }
0x1532   :  { %v20600_v38 = vand.u32 4294901760, %v20599_v1 }
0x1537   :  { %29159 = vmatmul.mubr.f32.vlgmr.msra.gmra.mrb[58].mxu1 %v35419_v20  ;;  %v24961_v20 = vld [vmem:[%s36172_s8 + $0x78] sm:$0xff] }
0x154a   :  { %v19306_v54 = vpop.f32.mrb[56].mxu1 }
0x154b   :  { %v19310_v0 = vmul.f32 %v19306_v54, %v32438_v25  ;;  %v28980_v42 = vpop.f32.mrb[57].mxu1  ;;  %v20458_v25 = vsel %vm671_vm2, %v24961_v20, 0  ;;  %v20590_v20 = vsub.f32 %v35542_v48, %v20476_v22  ;;  %v31291_v22 = vpack.c.bf16 %v35654_v28, %v35649_v19 }
0x154c   :  { %v20482_v51 = vand.u32 4294901760, %v20458_v25  ;;  %v36317_v42 = vld [vmem:[#allocation23_spill] sm:$0xff] }
0x154d   :  { %v19809_v34 = vadd.f32 %v19808_v23, %v19310_v0  ;;  %v20570_v0 = vand.u32 4294901760, %v35649_v19  ;;  %v20591_v55 = vand.u32 4294901760, %v20590_v20 }
0x154e   :  { %v35608_v46 = vpack.c.bf16 %v20482_v51, %v20479_v62  ;;  %v35632_v21 = vsub.f32 %v20458_v25, %v20482_v51 }
0x154f   :  { %v22047_v24 = vadd.f32 %v22046_v36, %v19809_v34  ;;  %v20577_v36 = vand.u32 4294901760, %v35654_v28  ;;  %v20571_v43 = vsub.f32 %v35649_v19, %v20570_v0 }
0x1550   :  { %31268 = vmatprep.subr.bf16.mxu0 %v35608_v46  ;;  %v20605_v60 = vand.u32 4294901760, %v35632_v21  ;;  %v31299_v59 = vpack.c.bf16 %v35632_v21, %v35630_v53 }
0x1551   :  { %v35598_v26 = vmul.f32 %v36315_v27, %v22047_v24  ;;  %31270 = vmatpush3.bf16.xpose.msra.mxu0 %v35608_v46  ;;  %v20578_v27 = vsub.f32 %v35654_v28, %v20577_v36  ;;  %v20572_v51 = vand.u32 4294901760, %v20571_v43 }
0x1552   :  { %31272 = vmatprep.subr.bf16.mxu0 %v31271_v39  ;;  %v20606_v52 = vsub.f32 %v35632_v21, %v20605_v60  ;;  %v31331_v33 = vpack.c.bf16 %v20605_v60, %v20598_v8  ;;  %v22068_v21 = vld [vmem:[%s36180_s10 + $0x18] sm:$0xff] }
0x1553   :  { %v20579_v15 = vand.u32 4294901760, %v20578_v27  ;;  %v22075_v8 = vsel %vm2819_vm5, %v35598_v26, 0 }
0x1554   :  { %v20607_v9 = vand.u32 4294901760, %v20606_v52 }
0x1556   :  { %v31283_v17 = vpack.c.bf16 %v20607_v9, %v20600_v38  ;;  %v31275_v9 = vpack.c.bf16 %v20579_v15, %v20572_v51 }
0x160a   :  { %v29160_v3 = vpop.f32.mrb[58].mxu1 }
0x160b   :  { %v20429_v54 = vmul.f32 %v29160_v3, %v36316_v5  ;;  %v20410_v23 = vpop.f32.mrb[59].mxu1  ;;  %v20585_v3 = vsub.f32 %v20583_v31, %v20584_v41  ;;  %v20592_v5 = vsub.f32 %v20590_v20, %v20591_v55 }
0x160c   :  { %v20428_v10 = vmul.f32 %v36317_v42, %v20410_v23  ;;  %v35732_v23 = vand.u32 4294901760, %v22075_v8 }
0x160d   :  { %v20434_v34 = vsel %vm671_vm2, %v20429_v54, 0  ;;  %v20586_v29 = vand.u32 4294901760, %v20585_v3  ;;  %v20593_v48 = vand.u32 4294901760, %v20592_v5  ;;  %v24953_v5 = vld [vmem:[%s36170_s7 + $0x8] sm:$0xff] }
0x160e   :  { %v35661_v24 = vand.u32 4294901760, %v20434_v34  ;;  %v20431_v35 = vsel %vm671_vm2, %v20428_v10, 0 }
0x160f   :  { %v35664_v49 = vand.u32 4294901760, %v20431_v35  ;;  %v31279_v6 = vpack.c.bf16 %v20593_v48, %v20586_v29  ;;  %v21057_v29 = vsel %vm671_vm2, %v24953_v5, 0 }
0x1610   :  { %v20544_v40 = vsub.f32 %v20434_v34, %v35661_v24  ;;  %v21060_v48 = vand.u32 4294901760, %v21057_v29 }
0x1611   :  { %v20534_v37 = vsub.f32 %v20431_v35, %v35664_v49 }
0x1612   :  { %v20545_v25 = vand.u32 4294901760, %v20544_v40  ;;  %29275 = vmatprep.subr.mxu1 %v21060_v48 }
0x1613   :  { %v20535_v62 = vand.u32 4294901760, %v20534_v37  ;;  %29276 = vmatpush3.xpose.msra.mxu1 %v21060_v48 }
0x1614   :  { %v20546_v11 = vsub.f32 %v20544_v40, %v20545_v25 }
0x1615   :  { %v20536_v1 = vsub.f32 %v20534_v37, %v20535_v62 }
0x1616   :  { %v20547_v38 = vand.u32 4294901760, %v20546_v11 }
0x1617   :  { %v20537_v52 = vand.u32 4294901760, %v20536_v1 }
0x1619   :  { %29177 = vmatprep.mubr.f32.mxu0 %v20537_v52 }
0x161a   :  { %29178 = vmatmul.mubr.f32.vlgmr.msra.gmra.mrb[42].mxu0 %v20547_v38 }
0x161b   :  { %31274 = vmatpush3.bf16.xpose.msra.mxu0 %v31271_v39  ;;  %29196 = vmatprep.mubr.f32.mxu0 %v35664_v49  ;;  %v31295_v39 = vpack.c.bf16 %v20590_v20, %v20583_v31 }
0x161c   :  { %31276 = vmatprep.subr.bf16.mxu0 %v31275_v9 }
0x1623   :  { %31278 = vmatpush3.bf16.xpose.msra.mxu0 %v31275_v9 }
0x1624   :  { %31280 = vmatprep.subr.bf16.mxu0 %v31279_v6 }
0x162b   :  { %31282 = vmatpush3.bf16.xpose.msra.mxu0 %v31279_v6  ;;  %v21147_v6 = vsub.f32 %v21057_v29, %v21060_v48 }
0x162c   :  { %31284 = vmatprep.subr.bf16.mxu0 %v31283_v17 }
0x1633   :  { %31286 = vmatpush3.bf16.xpose.msra.mxu0 %v31283_v17  ;;  %v31319_v17 = vpack.c.bf16 %v20563_v16, %v20556_v4  ;;  %v22078_v4 = vsel %vm2819_vm5, %v22065_v56, 0 }
0x1634   :  { %31288 = vmatprep.subr.bf16.mxu0 %v31287_v7  ;;  %v22090_v53 = vand.u32 4294901760, %v22078_v4 }
0x1636   :  { %v22170_v19 = vsub.f32 %v22078_v4, %v22090_v53 }
0x1638   :  { %v22171_v26 = vand.u32 4294901760, %v22170_v19 }
0x163a   :  { %29197 = vmatmul.mubr.f32.vlgmr.msra.gmra.mrb[42].mxu0 %v35661_v24  ;;  %v22172_v43 = vsub.f32 %v22170_v19, %v22171_v26 }
0x163b   :  { %31290 = vmatpush3.bf16.xpose.msra.mxu0 %v31287_v7  ;;  %29215 = vmatprep.mubr.f32.mxu0 %v20534_v37  ;;  %v31323_v7 = vpack.c.bf16 %v20577_v36, %v20570_v0  ;;  %v22159_v36 = vsub.f32 %v22075_v8, %v35732_v23 }
0x163c   :  { %31292 = vmatprep.subr.bf16.mxu0 %v31291_v22 }
0x163d   :  { %v22160_v27 = vand.u32 4294901760, %v22159_v36 }
0x1643   :  { %31294 = vmatpush3.bf16.xpose.msra.mxu0 %v31291_v22  ;;  %v21148_v22 = vand.u32 4294901760, %v21147_v6 }
0x1644   :  { %31296 = vmatprep.subr.bf16.mxu0 %v31295_v39 }
0x164b   :  { %31298 = vmatpush3.bf16.xpose.msra.mxu0 %v31295_v39  ;;  %v21149_v39 = vsub.f32 %v21147_v6, %v21148_v22 }
0x164c   :  { %31300 = vmatprep.subr.bf16.mxu0 %v31299_v59 }
0x1653   :  { %31302 = vmatpush3.bf16.xpose.msra.mxu0 %v31299_v59  ;;  %v31327_v59 = vpack.c.bf16 %v20591_v55, %v20584_v41 }
0x1654   :  { %31304 = vmatprep.subr.bf16.mxu0 %v35530_v32 }
0x165a   :  { %29216 = vmatmul.mubr.f32.vlgmr.msra.gmra.mrb[42].mxu0 %v20544_v40 }
0x165b   :  { %31306 = vmatpush3.bf16.xpose.msra.mxu0 %v35530_v32  ;;  %29234 = vmatprep.mubr.f32.mxu0 %v20535_v62 }
0x165c   :  { %31308 = vmatprep.subr.bf16.mxu0 %v35536_v50 }
0x1663   :  { %31310 = vmatpush3.bf16.xpose.msra.mxu0 %v35536_v50 }
0x1664   :  { %31312 = vmatprep.subr.bf16.mxu0 %v35555_v47 }
0x166b   :  { %31314 = vmatpush3.bf16.xpose.msra.mxu0 %v35555_v47 }
0x166c   :  { %31316 = vmatprep.subr.bf16.mxu0 %v35608_v46 }
0x1673   :  { %31318 = vmatpush3.bf16.xpose.msra.mxu0 %v35608_v46 }
0x1674   :  { %31320 = vmatprep.subr.bf16.mxu0 %v31319_v17 }
0x167a   :  { %29235 = vmatmul.mubr.f32.vlgmr.msra.gmra.mrb[42].mxu0 %v20545_v25  ;;  %v22161_v25 = vsub.f32 %v22159_v36, %v22160_v27 }
0x167b   :  { %31322 = vmatpush3.bf16.xpose.msra.mxu0 %v31319_v17  ;;  %29253 = vmatprep.mubr.f32.mxu0 %v35664_v49  ;;  %v21150_v17 = vand.u32 4294901760, %v21149_v39 }
0x167c   :  { %31324 = vmatprep.subr.bf16.mxu0 %v31323_v7  ;;  %v22162_v15 = vand.u32 4294901760, %v22161_v25 }
0x167d   :  { %29280 = vmatprep.subr.mxu1 %v21150_v17 }
0x1683   :  { %31326 = vmatpush3.bf16.xpose.msra.mxu0 %v31323_v7  ;;  %v36318_v7 = vld [vmem:[#allocation19_spill] sm:$0xff] }
0x1684   :  { %31328 = vmatprep.subr.bf16.mxu0 %v31327_v59 }
0x168b   :  { %31330 = vmatpush3.bf16.xpose.msra.mxu0 %v31327_v59 }
0x168c   :  { %31332 = vmatprep.subr.bf16.mxu0 %v31331_v33 }
0x1693   :  { %31334 = vmatpush3.bf16.xpose.msra.mxu0 %v31331_v33  ;;  %v36319_v33 = vld [vmem:[#allocation20_spill] sm:$0xff] }
0x1694   :  { %31336 = vmatprep.subr.bf16.mxu0 %v35530_v32 }
0x169a   :  { %29254 = vmatmul.mubr.f32.vlgmr.msra.gmra.mrb[42].mxu0 %v35661_v24 }
0x169b   :  { %31338 = vmatpush3.bf16.xpose.msra.mxu0 %v35530_v32  ;;  %29272 = vmatprep.mubr.f32.mxu0 %v35664_v49  ;;  %v22066_v32 = vld [vmem:[%s36180_s10 + $0x8] sm:$0xff] }
0x169c   :  { %31340 = vmatprep.subr.bf16.mxu0 %v35536_v50  ;;  %v22081_v16 = vsel %vm2819_vm5, %v22066_v32, 0 }
0x16a3   :  { %31342 = vmatpush3.bf16.xpose.msra.mxu0 %v35536_v50  ;;  %v22093_v50 = vand.u32 4294901760, %v22081_v16 }
0x16a4   :  { %31344 = vmatprep.subr.bf16.mxu0 %v35555_v47 }
0x16a5   :  { %v35728_v60 = vpack.c.bf16 %v22093_v50, %v22090_v53  ;;  %v22177_v28 = vsub.f32 %v22081_v16, %v22093_v50 }
0x16a7   :  { %v22178_v10 = vand.u32 4294901760, %v22177_v28  ;;  %v31364_v52 = vpack.c.bf16 %v22177_v28, %v22170_v19 }
0x16a9   :  { %v22179_v40 = vsub.f32 %v22177_v28, %v22178_v10  ;;  %v31376_v9 = vpack.c.bf16 %v22178_v10, %v22171_v26 }
0x16ab   :  { %31346 = vmatpush3.bf16.xpose.msra.mxu0 %v35555_v47  ;;  %v22067_v47 = vld [vmem:[%s36180_s10 + $0x10] sm:$0xff]  ;;  %v22180_v31 = vand.u32 4294901760, %v22179_v40 }
0x16ac   :  { %31348 = vmatprep.subr.bf16.mxu0 %v35608_v46  ;;  %v22084_v54 = vsel %vm2819_vm5, %v22067_v47, 0 }
0x16ad   :  { %v22096_v0 = vand.u32 4294901760, %v22084_v54 }
0x16af   :  { %v22184_v35 = vsub.f32 %v22084_v54, %v22096_v0 }
0x16b1   :  { %v22185_v20 = vand.u32 4294901760, %v22184_v35 }
0x16b3   :  { %31350 = vmatpush3.bf16.xpose.msra.mxu0 %v35608_v46  ;;  %v22087_v46 = vsel %vm2819_vm5, %v22068_v21, 0  ;;  %v22186_v51 = vsub.f32 %v22184_v35, %v22185_v20 }
0x16b4   :  { %31351 = vmatprep.subr.bf16.mxu0 %v36261_v12  ;;  %v22099_v42 = vand.u32 4294901760, %v22087_v46 }
0x16b5   :  { %v22187_v41 = vand.u32 4294901760, %v22186_v51 }
0x16b6   :  { %v31355_v34 = vpack.c.bf16 %v22099_v42, %v22096_v0  ;;  %v22191_v49 = vsub.f32 %v22087_v46, %v22099_v42  ;;  %v24915_v46 = vld [vmem:[%s36170_s7 + $0x10] sm:$0xff]  ;;  %v21549_v0 = vsel %vm671_vm2, %v35267_v61, 0 }
0x16b7   :  { %v21623_v26 = vand.u32 4294901760, %v21549_v0 }
0x16b8   :  { %v22192_v37 = vand.u32 4294901760, %v22191_v49  ;;  %v31367_v38 = vpack.c.bf16 %v22191_v49, %v22184_v35 }
0x16ba   :  { %29273 = vmatmul.mubr.f32.vlgmr.msra.gmra.mrb[42].mxu0 %v35661_v24  ;;  %v22173_v24 = vand.u32 4294901760, %v22172_v43  ;;  %v22193_v11 = vsub.f32 %v22191_v49, %v22192_v37  ;;  %v31379_v3 = vpack.c.bf16 %v22192_v37, %v22185_v20 }
0x16bb   :  { %31353 = vmatpush3.bf16.xpose.msra.mxu0 %v35728_v60  ;;  %29343 = vmatprep.mubr.msk.f32.mxu0 %vm32104_vm6, %v36260_v14 }
0x16bc   :  { %31354 = vmatprep.subr.bf16.mxu0 %v36261_v12  ;;  %v31358_v62 = vpack.c.bf16 %v22180_v31, %v22173_v24  ;;  %v22194_v55 = vand.u32 4294901760, %v22193_v11 }
0x16be   :  { %v31361_v1 = vpack.c.bf16 %v22194_v55, %v22187_v41 }
0x16c3   :  { %31356 = vmatpush3.bf16.xpose.msra.mxu0 %v31355_v34 }
0x16c4   :  { %31357 = vmatprep.subr.bf16.mxu0 %v36261_v12 }
0x16ca   :  { %29344 = vmatmul.mubr.f32.vlgmr.msra.gmra.mrb[44].mxu0 %v22162_v15 }
0x16cb   :  { %31359 = vmatpush3.bf16.xpose.msra.mxu0 %v31358_v62  ;;  %29354 = vmatprep.mubr.msk.f32.mxu0 %vm32104_vm6, %v36260_v14 }
0x16cc   :  { %31360 = vmatprep.subr.bf16.mxu0 %v36261_v12 }
0x16d3   :  { %31362 = vmatpush3.bf16.xpose.msra.mxu0 %v31361_v1 }
0x16d4   :  { %31363 = vmatprep.subr.bf16.mxu0 %v36261_v12 }
0x16da   :  { %29355 = vmatmul.mubr.f32.vlgmr.msra.gmra.mrb[44].mxu0 %v35732_v23 }
0x16db   :  { %31365 = vmatpush3.bf16.xpose.msra.mxu0 %v31364_v52  ;;  %29365 = vmatprep.mubr.msk.f32.mxu0 %vm32104_vm6, %v36260_v14 }
0x16dc   :  { %31366 = vmatprep.subr.bf16.mxu0 %v36261_v12 }
0x16e3   :  { %31368 = vmatpush3.bf16.xpose.msra.mxu0 %v31367_v38  ;;  %v22060_v38 = vld [vmem:[%s36176_s9 + $0x18] sm:$0xff] }
0x16e4   :  { %31369 = vmatprep.subr.bf16.mxu0 %v36261_v12 }
0x16ea   :  { %29366 = vmatmul.mubr.f32.vlgmr.msra.gmra.mrb[44].mxu0 %v22159_v36  ;;  %v21552_v36 = vsel %vm671_vm2, %v35264_v57, 0 }
0x16eb   :  { %31371 = vmatpush3.bf16.xpose.msra.mxu0 %v35728_v60  ;;  %29376 = vmatprep.mubr.msk.f32.mxu0 %vm32104_vm6, %v36260_v14  ;;  %v21633_v35 = vand.u32 4294901760, %v21552_v36 }
0x16ec   :  { %31372 = vmatprep.subr.bf16.mxu0 %v36261_v12 }
0x16ed   :  { %v21634_v40 = vsub.f32 %v21552_v36, %v21633_v35 }
0x16ef   :  { %v21635_v24 = vand.u32 4294901760, %v21634_v40 }
0x16f1   :  { %v21636_v37 = vsub.f32 %v21634_v40, %v21635_v24 }
0x16f3   :  { %31374 = vmatpush3.bf16.xpose.msra.mxu0 %v31355_v34  ;;  %v21637_v57 = vand.u32 4294901760, %v21636_v37 }
0x16f4   :  { %31375 = vmatprep.subr.bf16.mxu0 %v36261_v12 }
0x16fa   :  { %29377 = vmatmul.mubr.f32.vlgmr.msra.gmra.mrb[44].mxu0 %v22160_v27 }
0x16fb   :  { %31377 = vmatpush3.bf16.xpose.msra.mxu0 %v31376_v9  ;;  %29387 = vmatprep.mubr.msk.f32.mxu0 %vm32104_vm6, %v36260_v14 }
0x16fc   :  { %31378 = vmatprep.subr.bf16.mxu0 %v36261_v12 }
0x1703   :  { %31380 = vmatpush3.bf16.xpose.msra.mxu0 %v31379_v3 }
0x1704   :  { %31381 = vmatprep.subr.bf16.mxu0 %v36261_v12 }
0x170a   :  { %29388 = vmatmul.mubr.f32.vlgmr.msra.gmra.mrb[44].mxu0 %v35732_v23 }
0x170b   :  { %31383 = vmatpush3.bf16.xpose.msra.mxu0 %v35728_v60  ;;  %29398 = vmatprep.mubr.msk.f32.mxu0 %vm32104_vm6, %v36260_v14 }
0x170c   :  { %31384 = vmatprep.subr.bf16.mxu0 %v36261_v12 }
0x1713   :  { %31386 = vmatpush3.bf16.xpose.msra.mxu0 %v31355_v34  ;;  %v21624_v34 = vsub.f32 %v21549_v0, %v21623_v26 }
0x1715   :  { %v21625_v43 = vand.u32 4294901760, %v21624_v34 }
0x1717   :  { %v21626_v27 = vsub.f32 %v21624_v34, %v21625_v43 }
0x1719   :  { %v21627_v20 = vand.u32 4294901760, %v21626_v27 }
0x171a   :  { %29399 = vmatmul.mubr.f32.vlgmr.msra.gmra.mrb[44].mxu0 %v35732_v23  ;;  %v21555_v23 = vsel %vm671_vm2, %v24915_v46, 0 }
0x171b   :  { %v21558_v42 = vand.u32 4294901760, %v21555_v23 }
0x171d   :  { %v21645_v10 = vsub.f32 %v21555_v23, %v21558_v42 }
0x171f   :  { %v21646_v49 = vand.u32 4294901760, %v21645_v10 }
0x1721   :  { %v21647_v61 = vsub.f32 %v21645_v10, %v21646_v49 }
0x1723   :  { %v21648_v31 = vand.u32 4294901760, %v21647_v61 }
0x178d   :  { %v29274_v14 = vpop.f32.mrb[42].mxu0 }
0x178e   :  { %v21049_v12 = vmul.f32 %v29274_v14, %v36318_v7  ;;  %v21030_v59 = vpop.f32.mrb[43].mxu0  ;;  %v22063_v7 = vld [vmem:[%s36176_s9 + $0x30] sm:$0xff] }
0x178f   :  { %v21048_v56 = vmul.f32 %v36319_v33, %v21030_v59  ;;  %v23092_v59 = vsel %vm2819_vm5, %v22063_v7, 0 }
0x1790   :  { %v21054_v32 = vsel %vm671_vm2, %v21049_v12, 0  ;;  %v22064_v12 = vld [vmem:[%s36176_s9 + $0x38] sm:$0xff] }
0x1791   :  { %v21135_v4 = vand.u32 4294901760, %v21054_v32  ;;  %v21051_v16 = vsel %vm671_vm2, %v21048_v56, 0  ;;  %v23095_v33 = vsel %vm2819_vm5, %v22064_v12, 0  ;;  %v23116_v56 = vand.u32 4294901760, %v23092_v59 }
0x1792   :  { %v21125_v53 = vand.u32 4294901760, %v21051_v16 }
0x1793   :  { %v21136_v50 = vsub.f32 %v21054_v32, %v21135_v4  ;;  %v23119_v32 = vand.u32 4294901760, %v23095_v33 }
0x1794   :  { %v21126_v47 = vsub.f32 %v21051_v16, %v21125_v53 }
0x1795   :  { %v21137_v21 = vand.u32 4294901760, %v21136_v50 }
0x1796   :  { %v21127_v8 = vand.u32 4294901760, %v21126_v47 }
0x1797   :  { %v21138_v60 = vsub.f32 %v21136_v50, %v21137_v21 }
0x1798   :  { %v21128_v19 = vsub.f32 %v21126_v47, %v21127_v8 }
0x1799   :  { %v21139_v54 = vand.u32 4294901760, %v21138_v60 }
0x179a   :  { %v21129_v28 = vand.u32 4294901760, %v21128_v19 }
0x179c   :  { %29277 = vmatprep.mubr.f32.mxu1 %v21129_v28 }
0x179d   :  { %29278 = vmatmul.mubr.f32.vlgmr.msra.gmra.mrb[60].mxu1 %v21139_v54 }
0x179e   :  { %29282 = vmatprep.mubr.f32.mxu1 %v21125_v53  ;;  %29281 = vmatpush3.xpose.msra.mxu1 %v21150_v17 }
0x179f   :  { %29285 = vmatprep.subr.mxu1 %v21147_v6 }
0x17a5   :  { %29283 = vmatmul.mubr.f32.vlgmr.msra.gmra.mrb[60].mxu1 %v21135_v4 }
0x17a6   :  { %29287 = vmatprep.mubr.f32.mxu1 %v21126_v47  ;;  %29286 = vmatpush3.xpose.msra.mxu1 %v21147_v6  ;;  %v22062_v6 = vld [vmem:[%s36176_s9 + $0x28] sm:$0xff] }
0x17a7   :  { %29290 = vmatprep.subr.mxu1 %v21060_v48  ;;  %v23089_v39 = vsel %vm2819_vm5, %v22062_v6, 0 }
0x17ad   :  { %29288 = vmatmul.mubr.f32.vlgmr.msra.gmra.mrb[60].mxu1 %v21136_v50 }
0x17ae   :  { %29292 = vmatprep.mubr.f32.mxu1 %v21127_v8  ;;  %29291 = vmatpush3.xpose.msra.mxu1 %v21060_v48 }
0x17af   :  { %29295 = vmatprep.subr.mxu1 %v21148_v22 }
0x17b5   :  { %29293 = vmatmul.mubr.f32.vlgmr.msra.gmra.mrb[60].mxu1 %v21137_v21 }
0x17b6   :  { %29297 = vmatprep.mubr.f32.mxu1 %v21125_v53  ;;  %29296 = vmatpush3.xpose.msra.mxu1 %v21148_v22 }
0x17b7   :  { %29300 = vmatprep.subr.mxu1 %v21060_v48 }
0x17bd   :  { %29298 = vmatmul.mubr.f32.vlgmr.msra.gmra.mrb[60].mxu1 %v21135_v4 }
0x17be   :  { %29302 = vmatprep.mubr.f32.mxu1 %v21125_v53  ;;  %29301 = vmatpush3.xpose.msra.mxu1 %v21060_v48 }
0x17bf   :  { %29305 = vmatprep.subr.mxu1 %v21558_v42 }
0x17c5   :  { %29303 = vmatmul.mubr.f32.vlgmr.msra.gmra.mrb[60].mxu1 %v21135_v4  ;;  %v35849_v4 = vpack.c.bf16 %v23119_v32, %v23116_v56 }
0x17c6   :  { %29307 = vmatprep.mubr.f32.mxu1 %v21627_v20  ;;  %29306 = vmatpush3.xpose.msra.mxu1 %v21558_v42 }
0x17c7   :  { %29310 = vmatprep.subr.mxu1 %v21648_v31 }
0x17cd   :  { %29308 = vmatmul.mubr.f32.vlgmr.msra.gmra.mrb[60].mxu1 %v21637_v57 }
0x17ce   :  { %29312 = vmatprep.mubr.f32.mxu1 %v21623_v26  ;;  %29311 = vmatpush3.xpose.msra.mxu1 %v21648_v31 }
0x17cf   :  { %29315 = vmatprep.subr.mxu1 %v21645_v10 }
0x17d5   :  { %29313 = vmatmul.mubr.f32.vlgmr.msra.gmra.mrb[60].mxu1 %v21633_v35 }
0x17d6   :  { %29317 = vmatprep.mubr.f32.mxu1 %v21624_v34  ;;  %29316 = vmatpush3.xpose.msra.mxu1 %v21645_v10 }
0x17d7   :  { %29320 = vmatprep.subr.mxu1 %v21558_v42 }
0x17dd   :  { %29318 = vmatmul.mubr.f32.vlgmr.msra.gmra.mrb[60].mxu1 %v21634_v40 }
0x17de   :  { %29322 = vmatprep.mubr.f32.mxu1 %v21625_v43  ;;  %29321 = vmatpush3.xpose.msra.mxu1 %v21558_v42 }
0x17df   :  { %29325 = vmatprep.subr.mxu1 %v21646_v49 }
0x17e5   :  { %29323 = vmatmul.mubr.f32.vlgmr.msra.gmra.mrb[60].mxu1 %v21635_v24 }
0x17e6   :  { %29327 = vmatprep.mubr.f32.mxu1 %v21623_v26  ;;  %29326 = vmatpush3.xpose.msra.mxu1 %v21646_v49  ;;  %v35879_v49 = vsub.f32 %v23095_v33, %v23119_v32 }
0x17e7   :  { %29330 = vmatprep.subr.mxu1 %v21558_v42 }
0x17e8   :  { %v23242_v40 = vand.u32 4294901760, %v35879_v49 }
0x17ea   :  { %v23243_v27 = vsub.f32 %v35879_v49, %v23242_v40 }
0x17ec   :  { %v23244_v31 = vand.u32 4294901760, %v23243_v27  ;;  %v22053_v27 = vld [vmem:[%s36172_s8 + $0x20] sm:$0xff] }
0x17ed   :  { %29328 = vmatmul.mubr.f32.vlgmr.msra.gmra.mrb[60].mxu1 %v21633_v35  ;;  %v22570_v25 = vpop.f32.mrb[44].mxu0 }
0x17ee   :  { %v22575_v62 = vand.u32 4294901760, %v22570_v25  ;;  %29332 = vmatprep.mubr.f32.mxu1 %v21623_v26  ;;  %v29400_v51 = vpop.f32.mrb[45].mxu0  ;;  %29331 = vmatpush3.xpose.msra.mxu1 %v21558_v42 }
0x17f0   :  { %v22662_v11 = vsub.f32 %v22570_v25, %v22575_v62  ;;  %29401 = vmatprep.subr.mxu1 %v22575_v62 }
0x17f2   :  { %v22663_v15 = vand.u32 4294901760, %v22662_v11 }
0x17f4   :  { %v22664_v41 = vsub.f32 %v22662_v11, %v22663_v15 }
0x17f5   :  { %29333 = vmatmul.mubr.f32.vlgmr.msra.gmra.mrb[60].mxu1 %v21633_v35  ;;  %v35877_v35 = vsub.f32 %v23092_v59, %v23116_v56 }
0x17f6   :  { %29402 = vmatpush3.msra.mxu1 %v22575_v62  ;;  %29403 = vmatprep.mubr.f32.mxu1 %v34353_v30  ;;  %v22665_v55 = vand.u32 4294901760, %v22664_v41  ;;  %v22057_v30 = vld [vmem:[%s36176_s9] sm:$0xff] }
0x17f7   :  { %v23074_v1 = vsel %vm2819_vm5, %v22057_v30, 0  ;;  %v23235_v43 = vand.u32 4294901760, %v35877_v35  ;;  %v35897_v25 = vpack.c.bf16 %v35879_v49, %v35877_v35  ;;  %v36320_v30 = vld [vmem:[#allocation17_spill] sm:$0xff] }
0x17f8   :  { %29406 = vmatprep.subr.mxu1 %v22665_v55 }
0x17f9   :  { %29404 = vmatmul.mubr.f32.vlgmr.msra.gmra.mrb[62].mxu1 %v34478_v18  ;;  %v22058_v18 = vld [vmem:[%s36176_s9 + $0x8] sm:$0xff]  ;;  %v23236_v61 = vsub.f32 %v35877_v35, %v23235_v43 }
0x17fa   :  { %29407 = vmatpush3.msra.mxu1 %v22665_v55  ;;  %29408 = vmatprep.mubr.msk.f32.mxu1 %vm161_vm0, %v34337_v2  ;;  %v23077_v52 = vsel %vm2819_vm5, %v22058_v18, 0 }
0x17fb   :  { %29411 = vmatprep.subr.mxu1 %v22662_v11  ;;  %v23237_v24 = vand.u32 4294901760, %v23236_v61 }
0x17fd   :  { %v31415_v20 = vpack.c.bf16 %v23244_v31, %v23237_v24  ;;  %v22054_v24 = vld [vmem:[%s36172_s8 + $0x28] sm:$0xff] }
0x1801   :  { %29409 = vmatmul.mubr.msk.f32.vlgmr.msra.gmra.mrb[62].mxu1 %vm161_vm0, %v34467_v13 }
0x1802   :  { %29412 = vmatpush3.msra.mxu1 %v22662_v11  ;;  %29413 = vmatprep.mubr.f32.mxu1 %v34346_v58  ;;  %v23098_v58 = vand.u32 4294901760, %v23074_v1 }
0x1803   :  { %29416 = vmatprep.subr.mxu1 %v22575_v62 }
0x1804   :  { %v35851_v16 = vsub.f32 %v23074_v1, %v23098_v58  ;;  %v36321_v1 = vld [vmem:[#allocation18_spill] sm:$0xff] }
0x1806   :  { %v23193_v50 = vand.u32 4294901760, %v35851_v16 }
0x1808   :  { %v23194_v21 = vsub.f32 %v35851_v16, %v23193_v50 }
0x1809   :  { %29414 = vmatmul.mubr.f32.vlgmr.msra.gmra.mrb[62].mxu1 %v34471_v63  ;;  %v22059_v63 = vld [vmem:[%s36176_s9 + $0x10] sm:$0xff] }
0x180a   :  { %29417 = vmatpush3.msra.mxu1 %v22575_v62  ;;  %29418 = vmatprep.mubr.f32.mxu1 %v34349_v44  ;;  %v23101_v44 = vand.u32 4294901760, %v23077_v52  ;;  %v35810_v3 = vsel %vm2819_vm5, %v22059_v63, 0  ;;  %v23195_v60 = vand.u32 4294901760, %v23194_v21  ;;  %v22049_v21 = vld [vmem:[%s36172_s8] sm:$0xff] }
0x180b   :  { %29421 = vmatprep.subr.mxu1 %v22663_v15  ;;  %v23104_v5 = vand.u32 4294901760, %v35810_v3 }
0x180c   :  { %v35807_v9 = vpack.c.bf16 %v23101_v44, %v23098_v58  ;;  %v35853_v53 = vsub.f32 %v23077_v52, %v23101_v44 }
0x180d   :  { %v35900_v51 = vsub.f32 %v35810_v3, %v23104_v5 }
0x180e   :  { %v23200_v47 = vand.u32 4294901760, %v35853_v53  ;;  %v31419_v37 = vpack.c.bf16 %v35853_v53, %v35851_v16 }
0x180f   :  { %v23207_v58 = vand.u32 4294901760, %v35900_v51 }
0x1810   :  { %v23201_v8 = vsub.f32 %v35853_v53, %v23200_v47  ;;  %v31463_v53 = vpack.c.bf16 %v23242_v40, %v23235_v43 }
0x1811   :  { %29419 = vmatmul.mubr.f32.vlgmr.msra.gmra.mrb[62].mxu1 %v34474_v45  ;;  %v35813_v45 = vsel %vm2819_vm5, %v22060_v38, 0 }
0x1812   :  { %29422 = vmatpush3.msra.mxu1 %v22663_v15  ;;  %29423 = vmatprep.mubr.msk.f32.mxu1 %vm161_vm0, %v34337_v2  ;;  %v23107_v29 = vand.u32 4294901760, %v35813_v45  ;;  %v23202_v19 = vand.u32 4294901760, %v23201_v8  ;;  %v22050_v8 = vld [vmem:[%s36172_s8 + $0x8] sm:$0xff] }
0x1813   :  { %29426 = vmatprep.subr.mxu1 %v22575_v62 }
0x1814   :  { %v35822_v48 = vpack.c.bf16 %v23107_v29, %v23104_v5  ;;  %v31403_v28 = vpack.c.bf16 %v23202_v19, %v23195_v60  ;;  %v35903_v11 = vsub.f32 %v35813_v45, %v23107_v29  ;;  %v23208_v29 = vsub.f32 %v35900_v51, %v23207_v58  ;;  %v22051_v60 = vld [vmem:[%s36172_s8 + $0x10] sm:$0xff] }
0x1815   :  { %v35943_v19 = vsel %vm671_vm2, %v22049_v21, 0 }
0x1816   :  { %v23214_v44 = vand.u32 4294901760, %v35903_v11  ;;  %v31423_v32 = vpack.c.bf16 %v35903_v11, %v35900_v51 }
0x1819   :  { %29424 = vmatmul.mubr.msk.f32.vlgmr.msra.gmra.mrb[62].mxu1 %vm161_vm0, %v34467_v13 }
0x181a   :  { %29427 = vmatpush3.msra.mxu1 %v22575_v62  ;;  %29428 = vmatprep.mubr.msk.f32.mxu1 %vm161_vm0, %v34337_v2  ;;  %v22061_v2 = vld [vmem:[%s36176_s9 + $0x20] sm:$0xff] }
0x181b   :  { %31388 = vmatprep.subr.bf16.mxu1 %v35807_v9  ;;  %v23086_v22 = vsel %vm2819_vm5, %v22061_v2, 0  ;;  %v23215_v2 = vsub.f32 %v35903_v11, %v23214_v44 }
0x181c   :  { %v23110_v17 = vand.u32 4294901760, %v23086_v22 }
0x181d   :  { %v23216_v7 = vand.u32 4294901760, %v23215_v2 }
0x181e   :  { %v35865_v54 = vsub.f32 %v23086_v22, %v23110_v17 }
0x1820   :  { %v23221_v23 = vand.u32 4294901760, %v35865_v54 }
0x1821   :  { %29429 = vmatmul.mubr.msk.f32.vlgmr.msra.gmra.mrb[62].mxu1 %vm161_vm0, %v34467_v13  ;;  %v23113_v13 = vand.u32 4294901760, %v23089_v39 }
0x1822   :  { %31390 = vmatpush3.bf16.xpose.msra.mxu1 %v35807_v9  ;;  %v23222_v42 = vsub.f32 %v35865_v54, %v23221_v23 }
0x1823   :  { %31392 = vmatprep.subr.bf16.mxu1 %v35822_v48  ;;  %v35837_v14 = vpack.c.bf16 %v23113_v13, %v23110_v17  ;;  %v35867_v46 = vsub.f32 %v23089_v39, %v23113_v13  ;;  %v23209_v13 = vand.u32 4294901760, %v23208_v29 }
0x1824   :  { %v23223_v10 = vand.u32 4294901760, %v23222_v42  ;;  %v22052_v42 = vld [vmem:[%s36172_s8 + $0x18] sm:$0xff] }
0x1825   :  { %v23228_v0 = vand.u32 4294901760, %v35867_v46  ;;  %v35893_v57 = vpack.c.bf16 %v35867_v46, %v35865_v54  ;;  %v31407_v56 = vpack.c.bf16 %v23216_v7, %v23209_v13 }
0x1827   :  { %v23229_v26 = vsub.f32 %v35867_v46, %v23228_v0  ;;  %v31459_v16 = vpack.c.bf16 %v23228_v0, %v23221_v23 }
0x1829   :  { %v23230_v36 = vand.u32 4294901760, %v23229_v26  ;;  %v35952_v26 = vsel %vm671_vm2, %v22051_v60, 0 }
0x182a   :  { %31394 = vmatpush3.bf16.xpose.msra.mxu1 %v35822_v48  ;;  %v23724_v61 = vand.u32 4294901760, %v35952_v26 }
0x182b   :  { %31396 = vmatprep.subr.bf16.mxu1 %v35837_v14  ;;  %v31411_v34 = vpack.c.bf16 %v23230_v36, %v23223_v10  ;;  %v23718_v10 = vand.u32 4294901760, %v35943_v19 }
0x182c   :  { %v36091_v2 = vsub.f32 %v35952_v26, %v23724_v61 }
0x182e   :  { %v23827_v7 = vand.u32 4294901760, %v36091_v2 }
0x1830   :  { %v23828_v60 = vsub.f32 %v36091_v2, %v23827_v7 }
0x1832   :  { %31398 = vmatpush3.bf16.xpose.msra.mxu1 %v35837_v14 }
0x1833   :  { %31400 = vmatprep.subr.bf16.mxu1 %v35849_v4 }
0x183a   :  { %31402 = vmatpush3.bf16.xpose.msra.mxu1 %v35849_v4 }
0x183b   :  { %31404 = vmatprep.subr.bf16.mxu1 %v31403_v28 }
0x18f4   :  { %v29430_v62 = vpop.f32.mrb[62].mxu1 }
0x18f5   :  { %v23064_v15 = vmul.f32 0.2236068, %v29430_v62  ;;  %v23053_v41 = vpop.f32.mrb[63].mxu1  ;;  %v35980_v62 = vsel %vm671_vm2, %v22053_v27, 0 }
0x18f6   :  { %v23063_v55 = vmul.f32 0.2236068, %v23053_v41  ;;  %v23730_v41 = vand.u32 4294901760, %v35980_v62 }
0x18f7   :  { %v23066_v18 = vmul.f32 %v36320_v30, %v23064_v15  ;;  %v35983_v15 = vsel %vm671_vm2, %v22054_v24, 0 }
0x18f8   :  { %v23065_v52 = vmul.f32 %v23063_v55, %v36321_v1  ;;  %v23733_v55 = vand.u32 4294901760, %v35983_v15 }
0x18f9   :  { %v23071_v63 = vsel %vm2819_vm5, %v23066_v18, 0 }
0x18fa   :  { %v35910_v38 = vand.u32 4294901760, %v23071_v63  ;;  %v23068_v3 = vsel %vm2819_vm5, %v23065_v52, 0  ;;  %v35995_v30 = vpack.c.bf16 %v23733_v55, %v23730_v41  ;;  %v23847_v26 = vsub.f32 %v35983_v15, %v23733_v55 }
0x18fb   :  { %v35913_v5 = vand.u32 4294901760, %v23068_v3 }
0x18fc   :  { %v35916_v45 = vsub.f32 %v23071_v63, %v35910_v38 }
0x18fd   :  { %v23171_v6 = vsub.f32 %v23068_v3, %v35913_v5 }
0x18fe   :  { %v23182_v22 = vand.u32 4294901760, %v35916_v45 }
0x18ff   :  { %v23172_v39 = vand.u32 4294901760, %v23171_v6 }
0x1900   :  { %v23183_v17 = vsub.f32 %v35916_v45, %v23182_v22 }
0x1901   :  { %v23173_v12 = vsub.f32 %v23171_v6, %v23172_v39 }
0x1902   :  { %v23184_v33 = vand.u32 4294901760, %v23183_v17 }
0x1903   :  { %v23174_v59 = vand.u32 4294901760, %v23173_v12  ;;  %v36323_v12 = vld [vmem:[#allocation16_spill] sm:$0xff] }
0x1905   :  { %29447 = vmatprep.mubr.f32.mxu1 %v23174_v59 }
0x1906   :  { %29448 = vmatmul.mubr.f32.vlgmr.msra.gmra.mrb[64].mxu1 %v23184_v33 }
0x1907   :  { %31406 = vmatpush3.bf16.xpose.msra.mxu1 %v31403_v28  ;;  %29466 = vmatprep.mubr.f32.mxu1 %v35913_v5  ;;  %v35946_v28 = vsel %vm671_vm2, %v22050_v8, 0 }
0x1908   :  { %31408 = vmatprep.subr.bf16.mxu1 %v31407_v56  ;;  %v23721_v36 = vand.u32 4294901760, %v35946_v28 }
0x190a   :  { %v36060_v23 = vsub.f32 %v35946_v28, %v23721_v36 }
0x190c   :  { %v23820_v35 = vand.u32 4294901760, %v36060_v23 }
0x190e   :  { %v23821_v43 = vsub.f32 %v36060_v23, %v23820_v35 }
0x190f   :  { %31410 = vmatpush3.bf16.xpose.msra.mxu1 %v31407_v56 }
0x1910   :  { %31412 = vmatprep.subr.bf16.mxu1 %v31411_v34  ;;  %v23822_v51 = vand.u32 4294901760, %v23821_v43 }
0x1917   :  { %31414 = vmatpush3.bf16.xpose.msra.mxu1 %v31411_v34  ;;  %v35957_v34 = vsel %vm671_vm2, %v22052_v42, 0  ;;  %v23840_v42 = vsub.f32 %v35980_v62, %v23730_v41 }
0x1918   :  { %31416 = vmatprep.subr.bf16.mxu1 %v31415_v20  ;;  %v23727_v31 = vand.u32 4294901760, %v35957_v34 }
0x191f   :  { %31418 = vmatpush3.bf16.xpose.msra.mxu1 %v31415_v20  ;;  %v35971_v20 = vpack.c.bf16 %v23721_v36, %v23718_v10 }
0x1920   :  { %31420 = vmatprep.subr.bf16.mxu1 %v31419_v37 }
0x1921   :  { %31484 = vmatprep.subr.bf16.mxu0 %v35971_v20 }
0x1922   :  { %31486 = vmatpush3.bf16.xpose.msra.mxu0 %v35971_v20 }
0x1926   :  { %29467 = vmatmul.mubr.f32.vlgmr.msra.gmra.mrb[64].mxu1 %v35910_v38 }
0x1927   :  { %31422 = vmatpush3.bf16.xpose.msra.mxu1 %v31419_v37  ;;  %29485 = vmatprep.mubr.f32.mxu1 %v23171_v6  ;;  %v35977_v37 = vpack.c.bf16 %v23727_v31, %v23724_v61  ;;  %v36096_v6 = vsub.f32 %v35957_v34, %v23727_v31  ;;  %v23829_v61 = vand.u32 4294901760, %v23828_v60  ;;  %v23841_v31 = vand.u32 4294901760, %v23840_v42 }
0x1928   :  { %31424 = vmatprep.subr.bf16.mxu1 %v31423_v32 }
0x1929   :  { %31488 = vmatprep.subr.bf16.mxu0 %v35977_v37  ;;  %v23834_v33 = vand.u32 4294901760, %v36096_v6  ;;  %v31519_v55 = vpack.c.bf16 %v36096_v6, %v36091_v2 }
0x192a   :  { %31490 = vmatpush3.bf16.xpose.msra.mxu0 %v35977_v37 }
0x192b   :  { %31492 = vmatprep.subr.bf16.mxu0 %v35995_v30  ;;  %v23835_v28 = vsub.f32 %v36096_v6, %v23834_v33 }
0x192d   :  { %v23836_v24 = vand.u32 4294901760, %v23835_v28 }
0x192f   :  { %31426 = vmatpush3.bf16.xpose.msra.mxu1 %v31423_v32 }
0x1930   :  { %31428 = vmatprep.subr.bf16.mxu1 %v35893_v57 }
0x1932   :  { %31494 = vmatpush3.bf16.xpose.msra.mxu0 %v35995_v30 }
0x1937   :  { %31430 = vmatpush3.bf16.xpose.msra.mxu1 %v35893_v57  ;;  %v31451_v57 = vpack.c.bf16 %v23200_v47, %v23193_v50  ;;  %v22056_v50 = vld [vmem:[%s36172_s8 + $0x38] sm:$0xff] }
0x1938   :  { %31432 = vmatprep.subr.bf16.mxu1 %v35897_v25  ;;  %v23715_v47 = vsel %vm671_vm2, %v22056_v50, 0  ;;  %v23842_v50 = vsub.f32 %v23840_v42, %v23841_v31 }
0x193a   :  { %v23843_v62 = vand.u32 4294901760, %v23842_v50 }
0x193f   :  { %31434 = vmatpush3.bf16.xpose.msra.mxu1 %v35897_v25  ;;  %v31455_v25 = vpack.c.bf16 %v23214_v44, %v23207_v58 }
0x1940   :  { %31436 = vmatprep.subr.bf16.mxu1 %v35807_v9 }
0x1946   :  { %29486 = vmatmul.mubr.f32.vlgmr.msra.gmra.mrb[64].mxu1 %v35916_v45 }
0x1947   :  { %31438 = vmatpush3.bf16.xpose.msra.mxu1 %v35807_v9  ;;  %29504 = vmatprep.mubr.f32.mxu1 %v23172_v39  ;;  %v36322_v39 = vld [vmem:[#allocation15_spill] sm:$0xff] }
0x1948   :  { %31440 = vmatprep.subr.bf16.mxu1 %v35822_v48 }
0x194f   :  { %31442 = vmatpush3.bf16.xpose.msra.mxu1 %v35822_v48 }
0x1950   :  { %31444 = vmatprep.subr.bf16.mxu1 %v35837_v14 }
0x1957   :  { %31446 = vmatpush3.bf16.xpose.msra.mxu1 %v35837_v14 }
0x1958   :  { %31448 = vmatprep.subr.bf16.mxu1 %v35849_v4 }
0x195f   :  { %31450 = vmatpush3.bf16.xpose.msra.mxu1 %v35849_v4 }
0x1960   :  { %31452 = vmatprep.subr.bf16.mxu1 %v31451_v57 }
0x1966   :  { %29505 = vmatmul.mubr.f32.vlgmr.msra.gmra.mrb[64].mxu1 %v23182_v22 }
0x1967   :  { %31454 = vmatpush3.bf16.xpose.msra.mxu1 %v31451_v57  ;;  %29523 = vmatprep.mubr.f32.mxu1 %v35913_v5  ;;  %v23848_v57 = vand.u32 4294901760, %v23847_v26 }
0x1968   :  { %31456 = vmatprep.subr.bf16.mxu1 %v31455_v25 }
0x196f   :  { %31458 = vmatpush3.bf16.xpose.msra.mxu1 %v31455_v25 }
0x1970   :  { %31460 = vmatprep.subr.bf16.mxu1 %v31459_v16 }
0x1977   :  { %31462 = vmatpush3.bf16.xpose.msra.mxu1 %v31459_v16 }
0x1978   :  { %31464 = vmatprep.subr.bf16.mxu1 %v31463_v53 }
0x197f   :  { %31466 = vmatpush3.bf16.xpose.msra.mxu1 %v31463_v53 }
0x1980   :  { %31468 = vmatprep.subr.bf16.mxu1 %v35807_v9 }
0x1986   :  { %29524 = vmatmul.mubr.f32.vlgmr.msra.gmra.mrb[64].mxu1 %v35910_v38 }
0x1987   :  { %31470 = vmatpush3.bf16.xpose.msra.mxu1 %v35807_v9  ;;  %29542 = vmatprep.mubr.f32.mxu1 %v35913_v5  ;;  %v22055_v9 = vld [vmem:[%s36172_s8 + $0x30] sm:$0xff] }
0x1988   :  { %31472 = vmatprep.subr.bf16.mxu1 %v35822_v48 }
0x198f   :  { %31474 = vmatpush3.bf16.xpose.msra.mxu1 %v35822_v48  ;;  %v23712_v48 = vsel %vm671_vm2, %v22055_v9, 0  ;;  %v31503_v9 = vpack.c.bf16 %v23836_v24, %v23829_v61 }
0x1990   :  { %31476 = vmatprep.subr.bf16.mxu1 %v35837_v14  ;;  %v23736_v54 = vand.u32 4294901760, %v23712_v48 }
0x1992   :  { %v36072_v18 = vsub.f32 %v23712_v48, %v23736_v54  ;;  %v23849_v48 = vsub.f32 %v23847_v26, %v23848_v57 }
0x1994   :  { %v23855_v52 = vand.u32 4294901760, %v36072_v18  ;;  %v23850_v15 = vand.u32 4294901760, %v23849_v48 }
0x1996   :  { %v23856_v44 = vsub.f32 %v36072_v18, %v23855_v52  ;;  %v31507_v41 = vpack.c.bf16 %v23850_v15, %v23843_v62 }
0x1997   :  { %31478 = vmatpush3.bf16.xpose.msra.mxu1 %v35837_v14  ;;  %v23739_v14 = vand.u32 4294901760, %v23715_v47 }
0x1998   :  { %31480 = vmatprep.subr.bf16.mxu1 %v35849_v4 }
0x1999   :  { %v36050_v46 = vpack.c.bf16 %v23739_v14, %v23736_v54  ;;  %v36074_v1 = vsub.f32 %v23715_v47, %v23739_v14  ;;  %v31523_v47 = vpack.c.bf16 %v23847_v26, %v23840_v42  ;;  %v31551_v14 = vpack.c.bf16 %v23834_v33, %v23827_v7 }
0x199b   :  { %31496 = vmatprep.subr.bf16.mxu0 %v36050_v46  ;;  %v23862_v58 = vand.u32 4294901760, %v36074_v1  ;;  %v31527_v29 = vpack.c.bf16 %v36074_v1, %v36072_v18  ;;  %v36325_v18 = vld [vmem:[#allocation11_spill] sm:$0xff] }
0x199c   :  { %31498 = vmatpush3.bf16.xpose.msra.mxu0 %v36050_v46 }
0x199d   :  { %v23863_v63 = vsub.f32 %v36074_v1, %v23862_v58 }
0x199f   :  { %31482 = vmatpush3.bf16.xpose.msra.mxu1 %v35849_v4  ;;  %v36055_v4 = vsub.f32 %v35943_v19, %v23718_v10  ;;  %v23864_v3 = vand.u32 4294901760, %v23863_v63 }
0x19a1   :  { %v23813_v0 = vand.u32 4294901760, %v36055_v4  ;;  %v31515_v45 = vpack.c.bf16 %v36060_v23, %v36055_v4 }
0x19a3   :  { %v23814_v49 = vsub.f32 %v36055_v4, %v23813_v0  ;;  %v31547_v54 = vpack.c.bf16 %v23820_v35, %v23813_v0  ;;  %v31559_v4 = vpack.c.bf16 %v23862_v58, %v23855_v52 }
0x19a5   :  { %v23815_v40 = vand.u32 4294901760, %v23814_v49  ;;  %v31555_v49 = vpack.c.bf16 %v23848_v57, %v23841_v31 }
0x19a6   :  { %29543 = vmatmul.mubr.f32.vlgmr.msra.gmra.mrb[64].mxu1 %v35910_v38  ;;  %v23857_v38 = vand.u32 4294901760, %v23856_v44 }
0x19a7   :  { %v31499_v11 = vpack.c.bf16 %v23822_v51, %v23815_v40  ;;  %v36324_v51 = vld [vmem:[#allocation10_spill] sm:$0xff] }
0x19a8   :  { %v31511_v5 = vpack.c.bf16 %v23864_v3, %v23857_v38 }
0x19a9   :  { %31500 = vmatprep.subr.bf16.mxu0 %v31499_v11 }
0x1a79   :  { %v29544_v22 = vpop.f32.mrb[64].mxu1 }
0x1a7a   :  { %v23686_v17 = vmul.f32 %v29544_v22, %v36322_v39  ;;  %v23667_v13 = vpop.f32.mrb[65].mxu1 }
0x1a7b   :  { %v23685_v59 = vmul.f32 %v36323_v12, %v23667_v13 }
0x1a7c   :  { %v23691_v56 = vsel %vm671_vm2, %v23686_v17, 0 }
0x1a7d   :  { %v36103_v32 = vand.u32 4294901760, %v23691_v56  ;;  %v23688_v21 = vsel %vm671_vm2, %v23685_v59, 0 }
0x1a7e   :  { %v36106_v8 = vand.u32 4294901760, %v23688_v21 }
0x1a7f   :  { %v23801_v19 = vsub.f32 %v23691_v56, %v36103_v32 }
0x1a80   :  { %v23791_v10 = vsub.f32 %v23688_v21, %v36106_v8 }
0x1a81   :  { %v23802_v36 = vand.u32 4294901760, %v23801_v19 }
0x1a82   :  { %v23792_v34 = vand.u32 4294901760, %v23791_v10 }
0x1a83   :  { %v23803_v27 = vsub.f32 %v23801_v19, %v23802_v36 }
0x1a84   :  { %v23793_v25 = vsub.f32 %v23791_v10, %v23792_v34 }
0x1a85   :  { %v23804_v53 = vand.u32 4294901760, %v23803_v27 }
0x1a86   :  { %v23794_v16 = vand.u32 4294901760, %v23793_v25 }
0x1a88   :  { %29561 = vmatprep.mubr.f32.mxu0 %v23794_v16 }
0x1a89   :  { %29562 = vmatmul.mubr.f32.vlgmr.msra.gmra.mrb[46].mxu0 %v23804_v53 }
0x1a8a   :  { %31502 = vmatpush3.bf16.xpose.msra.mxu0 %v31499_v11  ;;  %29580 = vmatprep.mubr.f32.mxu0 %v36106_v8 }
0x1a8b   :  { %31504 = vmatprep.subr.bf16.mxu0 %v31503_v9 }
0x1a92   :  { %31506 = vmatpush3.bf16.xpose.msra.mxu0 %v31503_v9 }
0x1a93   :  { %31508 = vmatprep.subr.bf16.mxu0 %v31507_v41 }
0x1a9a   :  { %31510 = vmatpush3.bf16.xpose.msra.mxu0 %v31507_v41 }
0x1a9b   :  { %31512 = vmatprep.subr.bf16.mxu0 %v31511_v5 }
0x1aa2   :  { %31514 = vmatpush3.bf16.xpose.msra.mxu0 %v31511_v5 }
0x1aa3   :  { %31516 = vmatprep.subr.bf16.mxu0 %v31515_v45 }
0x1aa9   :  { %29581 = vmatmul.mubr.f32.vlgmr.msra.gmra.mrb[46].mxu0 %v36103_v32 }
0x1aaa   :  { %31518 = vmatpush3.bf16.xpose.msra.mxu0 %v31515_v45  ;;  %29599 = vmatprep.mubr.f32.mxu0 %v23791_v10 }
0x1aab   :  { %31520 = vmatprep.subr.bf16.mxu0 %v31519_v55 }
0x1ab2   :  { %31522 = vmatpush3.bf16.xpose.msra.mxu0 %v31519_v55 }
0x1ab3   :  { %31524 = vmatprep.subr.bf16.mxu0 %v31523_v47 }
0x1aba   :  { %31526 = vmatpush3.bf16.xpose.msra.mxu0 %v31523_v47 }
0x1abb   :  { %31528 = vmatprep.subr.bf16.mxu0 %v31527_v29 }
0x1ac2   :  { %31530 = vmatpush3.bf16.xpose.msra.mxu0 %v31527_v29 }
0x1ac3   :  { %31532 = vmatprep.subr.bf16.mxu0 %v35971_v20 }
0x1ac9   :  { %29600 = vmatmul.mubr.f32.vlgmr.msra.gmra.mrb[46].mxu0 %v23801_v19 }
0x1aca   :  { %31534 = vmatpush3.bf16.xpose.msra.mxu0 %v35971_v20  ;;  %29618 = vmatprep.mubr.f32.mxu0 %v23792_v34 }
0x1acb   :  { %31536 = vmatprep.subr.bf16.mxu0 %v35977_v37 }
0x1ad2   :  { %31538 = vmatpush3.bf16.xpose.msra.mxu0 %v35977_v37 }
0x1ad3   :  { %31540 = vmatprep.subr.bf16.mxu0 %v35995_v30 }
0x1ada   :  { %31542 = vmatpush3.bf16.xpose.msra.mxu0 %v35995_v30 }
0x1adb   :  { %31544 = vmatprep.subr.bf16.mxu0 %v36050_v46 }
0x1ae2   :  { %31546 = vmatpush3.bf16.xpose.msra.mxu0 %v36050_v46 }
0x1ae3   :  { %31548 = vmatprep.subr.bf16.mxu0 %v31547_v54 }
0x1ae9   :  { %29619 = vmatmul.mubr.f32.vlgmr.msra.gmra.mrb[46].mxu0 %v23802_v36 }
0x1aea   :  { %31550 = vmatpush3.bf16.xpose.msra.mxu0 %v31547_v54  ;;  %29637 = vmatprep.mubr.f32.mxu0 %v36106_v8 }
0x1aeb   :  { %31552 = vmatprep.subr.bf16.mxu0 %v31551_v14 }
0x1af2   :  { %31554 = vmatpush3.bf16.xpose.msra.mxu0 %v31551_v14 }
0x1af3   :  { %31556 = vmatprep.subr.bf16.mxu0 %v31555_v49 }
0x1afa   :  { %31558 = vmatpush3.bf16.xpose.msra.mxu0 %v31555_v49 }
0x1afb   :  { %31560 = vmatprep.subr.bf16.mxu0 %v31559_v4 }
0x1b02   :  { %31562 = vmatpush3.bf16.xpose.msra.mxu0 %v31559_v4 }
0x1b03   :  { %31564 = vmatprep.subr.bf16.mxu0 %v35971_v20 }
0x1b09   :  { %29638 = vmatmul.mubr.f32.vlgmr.msra.gmra.mrb[46].mxu0 %v36103_v32 }
0x1b0a   :  { %31566 = vmatpush3.bf16.xpose.msra.mxu0 %v35971_v20  ;;  %29656 = vmatprep.mubr.f32.mxu0 %v36106_v8  ;;  %v22048_v20 = vld [vmem:[%s36170_s7] sm:$0xff] }
0x1b0b   :  { %31568 = vmatprep.subr.bf16.mxu0 %v35977_v37  ;;  %v24314_v23 = vsel %vm671_vm2, %v22048_v20, 0 }
0x1b0c   :  { %v24317_v0 = vand.u32 4294901760, %v24314_v23 }
0x1b0e   :  { %29659 = vmatprep.subr.mxu1 %v24317_v0  ;;  %v24404_v35 = vsub.f32 %v24314_v23, %v24317_v0 }
0x1b0f   :  { %29660 = vmatpush3.xpose.msra.mxu1 %v24317_v0 }
0x1b12   :  { %31570 = vmatpush3.bf16.xpose.msra.mxu0 %v35977_v37  ;;  %v24405_v37 = vand.u32 4294901760, %v24404_v35 }
0x1b13   :  { %31572 = vmatprep.subr.bf16.mxu0 %v35995_v30 }
0x1b14   :  { %v24406_v43 = vsub.f32 %v24404_v35, %v24405_v37 }
0x1b16   :  { %v24407_v40 = vand.u32 4294901760, %v24406_v43 }
0x1b18   :  { %29664 = vmatprep.subr.mxu1 %v24407_v40 }
0x1b1a   :  { %31574 = vmatpush3.bf16.xpose.msra.mxu0 %v35995_v30 }
0x1b1b   :  { %31576 = vmatprep.subr.bf16.mxu0 %v36050_v46 }
0x1b22   :  { %31578 = vmatpush3.bf16.xpose.msra.mxu0 %v36050_v46 }
0x1b29   :  { %29657 = vmatmul.mubr.f32.vlgmr.msra.gmra.mrb[46].mxu0 %v36103_v32 }
0x1bfc   :  { %v29658_v30 = vpop.f32.mrb[46].mxu0 }
0x1bfd   :  { %v24306_v11 = vmul.f32 %v29658_v30, %v36324_v51  ;;  %v24287_v46 = vpop.f32.mrb[47].mxu0 }
0x1bfe   :  { %v24305_v1 = vmul.f32 %v36325_v18, %v24287_v46 }
0x1bff   :  { %v24311_v52 = vsel %vm671_vm2, %v24306_v11, 0 }
0x1c00   :  { %v24392_v58 = vand.u32 4294901760, %v24311_v52  ;;  %v24308_v44 = vsel %vm671_vm2, %v24305_v1, 0 }
0x1c01   :  { %v24382_v63 = vand.u32 4294901760, %v24308_v44 }
0x1c02   :  { %v24393_v38 = vsub.f32 %v24311_v52, %v24392_v58 }
0x1c03   :  { %v24383_v3 = vsub.f32 %v24308_v44, %v24382_v63 }
0x1c04   :  { %v24394_v5 = vand.u32 4294901760, %v24393_v38 }
0x1c05   :  { %v24384_v45 = vand.u32 4294901760, %v24383_v3 }
0x1c06   :  { %v24395_v29 = vsub.f32 %v24393_v38, %v24394_v5 }
0x1c07   :  { %v24385_v2 = vsub.f32 %v24383_v3, %v24384_v45 }
0x1c08   :  { %v24396_v22 = vand.u32 4294901760, %v24395_v29 }
0x1c09   :  { %v24386_v6 = vand.u32 4294901760, %v24385_v2 }
0x1c0b   :  { %29661 = vmatprep.mubr.f32.mxu1 %v24386_v6 }
0x1c0c   :  { %29662 = vmatmul.mubr.f32.vlgmr.msra.gmra.mrb[60].mxu1 %v24396_v22 }
0x1c0d   :  { %29666 = vmatprep.mubr.f32.mxu1 %v24382_v63  ;;  %29665 = vmatpush3.xpose.msra.mxu1 %v24407_v40 }
0x1c0e   :  { %29669 = vmatprep.subr.mxu1 %v24404_v35 }
0x1c14   :  { %29667 = vmatmul.mubr.f32.vlgmr.msra.gmra.mrb[60].mxu1 %v24392_v58 }
0x1c15   :  { %29671 = vmatprep.mubr.f32.mxu1 %v24383_v3  ;;  %29670 = vmatpush3.xpose.msra.mxu1 %v24404_v35 }
0x1c16   :  { %29674 = vmatprep.subr.mxu1 %v24317_v0 }
0x1c1c   :  { %29672 = vmatmul.mubr.f32.vlgmr.msra.gmra.mrb[60].mxu1 %v24393_v38 }
0x1c1d   :  { %29676 = vmatprep.mubr.f32.mxu1 %v24384_v45  ;;  %29675 = vmatpush3.xpose.msra.mxu1 %v24317_v0 }
0x1c1e   :  { %29679 = vmatprep.subr.mxu1 %v24405_v37 }
0x1c24   :  { %29677 = vmatmul.mubr.f32.vlgmr.msra.gmra.mrb[60].mxu1 %v24394_v5 }
0x1c25   :  { %29681 = vmatprep.mubr.f32.mxu1 %v24382_v63  ;;  %29680 = vmatpush3.xpose.msra.mxu1 %v24405_v37 }
0x1c26   :  { %29684 = vmatprep.subr.mxu1 %v24317_v0 }
0x1c2c   :  { %29682 = vmatmul.mubr.f32.vlgmr.msra.gmra.mrb[60].mxu1 %v24392_v58 }
0x1c2d   :  { %29686 = vmatprep.mubr.f32.mxu1 %v24382_v63  ;;  %29685 = vmatpush3.xpose.msra.mxu1 %v24317_v0 }
0x1c34   :  { %29687 = vmatmul.mubr.f32.vlgmr.msra.gmra.mrb[60].mxu1 %v24392_v58 }
0x1d07   :  { %v29688_v39 = vpop.f32.mrb[60].mxu1 }
0x1d08   :  { %24808 = vst.msk [vmem:[%s36185_s15 + $0x8] sm:$0xff] %vm161_vm0, %v29688_v39  ;;  %v24795_v17 = vpop.f32.mrb[61].mxu1 }
0x1d09   :  { %24807 = vst.msk [vmem:[%s36185_s15] sm:$0xff] %vm161_vm0, %v24795_v17 }

</bundles_post_ra>
